<compile_context>
chip_gen: v7x
topology: tpu7x:2x2x1
jax: 0.10.0
libtpu: 0.0.40
codegen_flags: <defaults>
</compile_context>

<pallas_src>
import jax
import jax.numpy as jnp
from jax.experimental import pallas as pl
from jax.experimental.pallas import tpu as pltpu

IN_FEATURES = 84 * 84      # 7056
HIDDEN = 512
OUT = 1


def _round_up(x, m):
    return (x + m - 1) // m * m


def _disc_kernel(x_ref, w1_ref, b1_ref, w2_ref, b2_ref, o_ref):
    # x_ref:  (TM, 7056) bf16     w1_ref: (7056, 512) bf16 (VMEM-resident)
    # b1_ref: (1, 512) f32        w2_ref: (1, 512) f32 (layer-2 weight as a row)
    # b2_ref: (1, 1) f32          o_ref:  (TM, 1) f32
    # Layer 1: single full-K MXU matmul with f32 accumulation.
    h = jnp.dot(x_ref[...], w1_ref[...], preferred_element_type=jnp.float32)
    h = jnp.maximum(h + b1_ref[...], 0.0)                       # bias + ReLU (f32)
    # Layer 2 (N=1): VPU multiply + lane reduction instead of an MXU matmul.
    z = jnp.sum(h * w2_ref[...], axis=-1, keepdims=True) + b2_ref[...]
    # sigmoid(z) = 1 / (1 + exp(-z)); reciprocal goes to the EUP slot.
    o_ref[...] = pl.reciprocal(1.0 + jnp.exp(-z), approx=True).astype(o_ref.dtype)


def prepare_params(w1, b1, w2, b2):
    """One-time conversion to the kernel layout. Do this at init, NOT per call:
    the bf16 cast of the ~14 MiB W1 is as expensive as the kernel itself."""
    return (
        w1.astype(jnp.bfloat16),                     # (7056, 512) streamed bf16
        b1.reshape(1, HIDDEN).astype(jnp.float32),   # (1, 512)
        w2.reshape(1, HIDDEN).astype(jnp.float32),   # (512, 1) -> row (1, 512)
        b2.reshape(1, OUT).astype(jnp.float32),      # (1, 1)
    )


@jax.jit
def discriminator_forward(x, params):
    """x: (B, 84, 84) or (B, 1, 84, 84) float32 -> (B, 1) float32 in (0, 1)."""
    w1_bf16, b1_2d, w2_row, b2_2d = params
    B = x.shape[0]
    x_flat = x.reshape(B, IN_FEATURES).astype(jnp.bfloat16)    # single cast

    # Batch tiling: multiple of 8 sublanes, at most 128 rows per tile.
    tm = min(128, _round_up(B, 8))
    bp = _round_up(B, tm)
    if bp != B:
        x_flat = jnp.pad(x_flat, ((0, bp - B), (0, 0)))

    out = pl.pallas_call(
        _disc_kernel,
        out_shape=jax.ShapeDtypeStruct((bp, OUT), jnp.float32),
        grid=(bp // tm,),
        in_specs=[
            pl.BlockSpec((tm, IN_FEATURES), lambda m: (m, 0)),      # x tile
            pl.BlockSpec((IN_FEATURES, HIDDEN), lambda m: (0, 0)),  # W1, resident
            pl.BlockSpec((1, HIDDEN), lambda m: (0, 0)),            # b1
            pl.BlockSpec((1, HIDDEN), lambda m: (0, 0)),            # w2 row
            pl.BlockSpec((1, OUT), lambda m: (0, 0)),               # b2
        ],
        out_specs=pl.BlockSpec((tm, OUT), lambda m: (m, 0)),
        compiler_params=pltpu.CompilerParams(
            dimension_semantics=("parallel",),
            vmem_limit_bytes=32 * 1024 * 1024,   # needed for v5e's 16 MiB default
        ),
    )(x_flat, w1_bf16, b1_2d, w2_row, b2_2d)
    return out[:B]


def init_params(key):
    """PyTorch nn.Linear default init: U(-1/sqrt(fan_in), 1/sqrt(fan_in))."""
    k1, k2, k3, k4 = jax.random.split(key, 4)
    bound1 = 1.0 / (IN_FEATURES ** 0.5)
    bound2 = 1.0 / (HIDDEN ** 0.5)
    w1 = jax.random.uniform(k1, (IN_FEATURES, HIDDEN), jnp.float32, -bound1, bound1)
    b1 = jax.random.uniform(k2, (HIDDEN,), jnp.float32, -bound1, bound1)
    w2 = jax.random.uniform(k3, (HIDDEN, OUT), jnp.float32, -bound2, bound2)
    b2 = jax.random.uniform(k4, (OUT,), jnp.float32, -bound2, bound2)
    return w1, b1, w2, b2


if __name__ == "__main__":
    key = jax.random.PRNGKey(0)
    k_params, k_x = jax.random.split(key)

    w1, b1, w2, b2 = init_params(k_params)
    params = prepare_params(w1, b1, w2, b2)      # one-time layout/bf16 conversion

    # Small batch of 84x84 "frames" as the module's forward implies.
    B = 2
    x = jax.random.normal(k_x, (B, 84, 84), dtype=jnp.float32)

    out = discriminator_forward(x, params)
    out = jax.block_until_ready(out)

    # Plain-JAX f32 reference (tolerance loosened for the bf16 x/W1 stream and
    # the approximate EUP reciprocal in the sigmoid).
    x_flat = x.reshape(B, -1)
    ref = jax.nn.sigmoid(jnp.maximum(x_flat @ w1 + b1, 0.0) @ w2 + b2)
    assert out.shape == (B, 1)
    assert jnp.allclose(out, ref, atol=2e-2, rtol=2e-2), (out, ref)

    print("KERNEL_OK")
</pallas_src>

<mosaic_0001>
module attributes {stable_mosaic.version = 11 : i64} {
  func.func @_disc_kernel(%arg0: i32, %arg1: memref<8x7056xbf16, #tpu.memory_space<vmem>>, %arg2: memref<7056x512xbf16, #tpu.memory_space<vmem>>, %arg3: memref<1x512xf32, #tpu.memory_space<vmem>>, %arg4: memref<1x512xf32, #tpu.memory_space<vmem>>, %arg5: memref<1x1xf32, #tpu.memory_space<vmem>>, %arg6: memref<8x1xf32, #tpu.memory_space<vmem>>) attributes {dimension_semantics = [#tpu.dimension_semantics<parallel>], iteration_bounds = array<i64: 1>, scalar_prefetch = 0 : i64, scratch_operands = 0 : i64, tpu.core_type = #tpu.core_type<tc>, window_params = [{transform_indices = @transform_0, window_bounds = array<i64: 8, 7056>}, {pipeline_mode = #tpu.pipeline_mode<synchronous>, transform_indices = @transform_1, window_bounds = array<i64: 7056, 512>}, {pipeline_mode = #tpu.pipeline_mode<synchronous>, transform_indices = @transform_2, window_bounds = array<i64: 1, 512>}, {pipeline_mode = #tpu.pipeline_mode<synchronous>, transform_indices = @transform_3, window_bounds = array<i64: 1, 512>}, {pipeline_mode = #tpu.pipeline_mode<synchronous>, transform_indices = @transform_4, window_bounds = array<i64: 1, 1>}, {transform_indices = @transform_5, window_bounds = array<i64: 8, 1>}]} {
    %c0 = arith.constant 0 : index
    %c0_0 = arith.constant 0 : index
    %0 = vector.load %arg1[%c0, %c0_0] : memref<8x7056xbf16, #tpu.memory_space<vmem>>, vector<8x7056xbf16>
    %c0_1 = arith.constant 0 : index
    %c0_2 = arith.constant 0 : index
    %1 = vector.load %arg2[%c0_1, %c0_2] : memref<7056x512xbf16, #tpu.memory_space<vmem>>, vector<7056x512xbf16>
    %cst = arith.constant dense<0.000000e+00> : vector<8x512xf32>
    %2 = tpu.matmul %0, %1, %cst {dimension_numbers = #tpu.dot_dimension_numbers<[1], [0], [0], [1], [0, 0, 1, 1], [], []>} : vector<8x7056xbf16>, vector<7056x512xbf16>, vector<8x512xf32> -> vector<8x512xf32>
    %c0_3 = arith.constant 0 : index
    %c0_4 = arith.constant 0 : index
    %3 = vector.load %arg3[%c0_3, %c0_4] : memref<1x512xf32, #tpu.memory_space<vmem>>, vector<1x512xf32>
    %4 = vector.broadcast %3 : vector<1x512xf32> to vector<8x512xf32>
    %5 = arith.addf %2, %4 : vector<8x512xf32>
    %cst_5 = arith.constant 0.000000e+00 : f32
    %6 = vector.broadcast %cst_5 : f32 to vector<8x512xf32>
    %7 = arith.maximumf %5, %6 : vector<8x512xf32>
    %c0_6 = arith.constant 0 : index
    %c0_7 = arith.constant 0 : index
    %8 = vector.load %arg4[%c0_6, %c0_7] : memref<1x512xf32, #tpu.memory_space<vmem>>, vector<1x512xf32>
    %9 = vector.broadcast %8 : vector<1x512xf32> to vector<8x512xf32>
    %10 = arith.mulf %7, %9 : vector<8x512xf32>
    %cst_8 = arith.constant dense<0.000000e+00> : vector<8xf32>
    %11 = vector.multi_reduction <add>, %10, %cst_8 [1] : vector<8x512xf32> to vector<8xf32>
    %12 = vector.shape_cast %11 : vector<8xf32> to vector<8x1xf32>
    %c0_9 = arith.constant 0 : index
    %c0_10 = arith.constant 0 : index
    %13 = vector.load %arg5[%c0_9, %c0_10] : memref<1x1xf32, #tpu.memory_space<vmem>>, vector<1x1xf32>
    %14 = vector.broadcast %13 : vector<1x1xf32> to vector<8x1xf32>
    %15 = arith.addf %12, %14 : vector<8x1xf32>
    %cst_11 = arith.constant 0.000000e+00 : f32
    %16 = vector.broadcast %cst_11 : f32 to vector<8x1xf32>
    %17 = arith.subf %16, %15 : vector<8x1xf32>
    %18 = math.exp %17 : vector<8x1xf32>
    %cst_12 = arith.constant 1.000000e+00 : f32
    %19 = vector.broadcast %cst_12 : f32 to vector<8x1xf32>
    %20 = arith.addf %19, %18 : vector<8x1xf32>
    %21 = tpu.reciprocal %20 {approx = true} : vector<8x1xf32> -> vector<8x1xf32>
    %c0_13 = arith.constant 0 : index
    %c0_14 = arith.constant 0 : index
    %22 = vector.load %arg6[%c0_13, %c0_14] : memref<8x1xf32, #tpu.memory_space<vmem>>, vector<8x1xf32>
    tpu.vector_store %arg6[%c0_13, %c0_14], %21 {strides = array<i32>} : memref<8x1xf32, #tpu.memory_space<vmem>>, vector<8x1xf32>,
    return
  }
  func.func @transform_0(%arg0: i32) -> (i32, i32) {
    %c0_i32 = arith.constant 0 : i32
    %c0_i32_0 = arith.constant 0 : i32
    return %arg0, %c0_i32 : i32, i32
  }
  func.func @transform_1(%arg0: i32) -> (i32, i32) {
    %c0_i32 = arith.constant 0 : i32
    %c0_i32_0 = arith.constant 0 : i32
    %c0_i32_1 = arith.constant 0 : i32
    return %c0_i32, %c0_i32_0 : i32, i32
  }
  func.func @transform_2(%arg0: i32) -> (i32, i32) {
    %c0_i32 = arith.constant 0 : i32
    %c0_i32_0 = arith.constant 0 : i32
    %c0_i32_1 = arith.constant 0 : i32
    return %c0_i32, %c0_i32_0 : i32, i32
  }
  func.func @transform_3(%arg0: i32) -> (i32, i32) {
    %c0_i32 = arith.constant 0 : i32
    %c0_i32_0 = arith.constant 0 : i32
    %c0_i32_1 = arith.constant 0 : i32
    return %c0_i32, %c0_i32_0 : i32, i32
  }
  func.func @transform_4(%arg0: i32) -> (i32, i32) {
    %c0_i32 = arith.constant 0 : i32
    %c0_i32_0 = arith.constant 0 : i32
    %c0_i32_1 = arith.constant 0 : i32
    return %c0_i32, %c0_i32_0 : i32, i32
  }
  func.func @transform_5(%arg0: i32) -> (i32, i32) {
    %c0_i32 = arith.constant 0 : i32
    %c0_i32_0 = arith.constant 0 : i32
    return %arg0, %c0_i32 : i32, i32
  }
}

</mosaic_0001>

<bundles_post_ra>
// kernel: discriminator_forward.1
= control target key start
LH: loop header
LB: loop body
LE: loop exit
PB: predicated region body
PF: predicated region fallthrough
CT: control target
= control target key end

     0   :  { %s18399_s0 = inlined_call_operand.vmem [shape: bf16[8,7056], index: 0, kind: input, shape index: {}]   ;;  %s18400_s1 = inlined_call_operand.hbm [shape: bf16[7056,512], index: 1, kind: input, shape index: {}]   ;;  %s18401_s2 = inlined_call_operand.hbm [shape: f32[1,512], index: 2, kind: input, shape index: {}]   ;;  %s18402_s3 = inlined_call_operand.hbm [shape: f32[1,512], index: 3, kind: input, shape index: {}]   ;;  %s18403_s4 = inlined_call_operand.<no memory space> [shape: f32[1,1], index: 4, kind: input, shape index: {}]   ;;  %s18404_s5 = inlined_call_operand.vmem [shape: f32[8,1], index: 5, kind: output, shape index: {}]  }
   0x1   :  { %v10_v0 = vstv %s18403_s4 }
   0x2   :  { %11 = vst [vmem:[#allocation2] sm:$0x1] %v10_v0 }
   0x3   :  { %12 = vsyncpa [#allocation4], 0 }
   0x4   :  { %13 = vsyncpa [#allocation6], 0  ;;  %s18069_s20 = smov [#allocation5]   ;;  %s18070_s22 = smov [#allocation3]  }
   0x5   :  { %s34_s21 = sshll.u32 %s18069_s20, 4  ;;  %s21_s23 = sshll.u32 %s18070_s22, 4  ;;  %s35_s21 = int_to_ptr.vmem [resolvable:$true] %s34_s21  ;;  %s18107_s23 = int_to_ptr.vmem [resolvable:$true] %s21_s23 }
   0x6   :  { %s17999_s26 = scalar_lea.hbm %s18401_s2, 64 }
   0x7   :  { %p18000_p0 = scmp.ne.s32.totalorder %s18401_s2, %s17999_s26  ;;  %p18003_p1 = scmp.lt.u32.totalorder %s17999_s26, %s18401_s2 }
   0x9   :  { %p18005_p2 = pnand %p18003_p1, %p18000_p0 }
   0xb   :  { %18008 = shalt.err (!%p18005_p2)
}
   0xc   :  { %s18009_s30 = scalar_lea.vmem %s35_s21, 64  ;;  %p18014_p4 = scmp.lt.s32.totalorder %s35_s21, %s35_s21 }
   0xd   :  { %p18010_p3 = scmp.ne.s32.totalorder %s35_s21, %s18009_s30  ;;  %p18015_p5 = scmp.lt.s32.totalorder %s18009_s30, %s18009_s30 }
   0xf   :  { %p18016_p6 = por %p18015_p5, %p18014_p4 }
  0x11   :  { %p18017_p7 = pnand %p18016_p6, %p18010_p3 }
  0x13   :  { %18020 = shalt.err (!%p18017_p7)
}
  0x14   :  { %37 = dma.hbm_to_vmem [thread:$0]  %s18401_s2, 64, %s35_s21, [#allocation6]  }
  0x15   :  { %s18021_s10 = scalar_lea.hbm %s18400_s1, 225792 }
  0x16   :  { %p18022_p8 = scmp.ne.s32.totalorder %s18400_s1, %s18021_s10  ;;  %p18025_p9 = scmp.lt.u32.totalorder %s18021_s10, %s18400_s1 }
  0x18   :  { %p18027_p10 = pnand %p18025_p9, %p18022_p8 }
  0x1a   :  { %18030 = shalt.err (!%p18027_p10)
}
  0x1b   :  { %s18031_s15 = scalar_lea.vmem %s18107_s23, 225792  ;;  %p18036_p12 = scmp.lt.s32.totalorder %s18107_s23, %s18107_s23 }
  0x1c   :  { %p18032_p11 = scmp.ne.s32.totalorder %s18107_s23, %s18031_s15  ;;  %p18037_p13 = scmp.lt.s32.totalorder %s18031_s15, %s18031_s15 }
  0x1e   :  { %p18038_p0 = por %p18037_p13, %p18036_p12 }
  0x20   :  { %p18039_p1 = pnand %p18038_p0, %p18032_p11 }
  0x22   :  { %18042 = shalt.err (!%p18039_p1)
}
  0x23   :  { %s18071_s2 = smov 256   ;;  %s18072_s16 = smov 16  }
  0x24   :  { %27 = dma.hbm_to_vmem [thread:$0]  %s18400_s1, 225792, %s18107_s23, [#allocation4], %s18071_s2, %s18071_s2, %s18072_s16  }
  0x25   :  { %s18073_s19 = smov [#allocation7]   ;;  %s18043_s24 = scalar_lea.hbm %s18402_s3, 64 }
  0x26   :  { %s44_s20 = sshll.u32 %s18073_s19, 4  ;;  %p18044_p2 = scmp.ne.s32.totalorder %s18402_s3, %s18043_s24  ;;  %s45_s20 = int_to_ptr.vmem [resolvable:$true] %s44_s20 }
  0x27   :  { %p18047_p3 = scmp.lt.u32.totalorder %s18043_s24, %s18402_s3 }
  0x29   :  { %p18049_p4 = pnand %p18047_p3, %p18044_p2 }
  0x2b   :  { %18052 = shalt.err (!%p18049_p4)
}
  0x2c   :  { %s18053_s29 = scalar_lea.vmem %s45_s20, 64  ;;  %p18058_p6 = scmp.lt.s32.totalorder %s45_s20, %s45_s20 }
  0x2d   :  { %p18054_p5 = scmp.ne.s32.totalorder %s45_s20, %s18053_s29  ;;  %p18059_p7 = scmp.lt.s32.totalorder %s18053_s29, %s18053_s29 }
  0x2f   :  { %p18060_p8 = por %p18059_p7, %p18058_p6 }
  0x31   :  { %p18061_p9 = pnand %p18060_p8, %p18054_p5 }
  0x33   :  { %18064 = shalt.err (!%p18061_p9)
}
  0x34   :  { %47 = dma.hbm_to_vmem [thread:$0]  %s18402_s3, 64, %s45_s20, [#allocation6]  }
  0x35   :  { %18065 = dma.done.wait [#allocation4], 225792  }
  0x36   :  { %18066 = vsyncadd [#allocation4], 4294741504 }
  0x37   :  { %18067 = dma.done.wait [#allocation6], 128  }
  0x38   :  { %18068 = vsyncadd [#allocation6], 4294967168  ;;  %v15293_v1 = vld [vmem:[#allocation3 + $0x4] ss:$16 sps:$4 sm:$0xff]   ;;  %v15295_v2 = vld [vmem:[#allocation3 + $0xc] ss:$16 sps:$4 sm:$0xff]  }
  0x39   :  { %10893 = vmatprep.subr.bf16.mxu0 %v15293_v1  ;;  %v15297_v3 = vld [vmem:[#allocation3] ss:$16 sps:$4 sm:$0xff]   ;;  %v15298_v4 = vld [vmem:[#allocation3 + $0x8] ss:$16 sps:$4 sm:$0xff]   ;;  %12041 = vmatprep.subr.bf16.mxu1 %v15295_v2  ;;  %v15299_v5 = vld [vmem:[#allocation3 + $0x24] ss:$16 sps:$4 sm:$0xff]  }
  0x3a   :  { %10894 = vmatpush1.bf16.msra.mxu0 %v15297_v3  ;;  %12042 = vmatpush1.bf16.msra.mxu1 %v15298_v4  ;;  %v15301_v6 = vld [vmem:[#allocation3 + $0x2c] ss:$16 sps:$4 sm:$0xff]   ;;  %v15303_v7 = vld [vmem:[#allocation3 + $0x20] ss:$16 sps:$4 sm:$0xff]   ;;  %v15304_v8 = vld [vmem:[#allocation3 + $0x28] ss:$16 sps:$4 sm:$0xff]  }
  0x3b   :  { %10895 = vmatprep.subr.bf16.mxu0 %v15299_v5  ;;  %12043 = vmatprep.subr.bf16.mxu1 %v15301_v6  ;;  %v15305_v9 = vld [vmem:[#allocation3 + $0x44] ss:$16 sps:$4 sm:$0xff]   ;;  %v15307_v10 = vld [vmem:[#allocation3 + $0x4c] ss:$16 sps:$4 sm:$0xff]   ;;  %v15309_v11 = vld [vmem:[#allocation3 + $0x40] ss:$16 sps:$4 sm:$0xff]  }
  0x3c   :  { %v15310_v12 = vld [vmem:[#allocation3 + $0x48] ss:$16 sps:$4 sm:$0xff]   ;;  %v15311_v13 = vld [vmem:[#allocation3 + $0x64] ss:$16 sps:$4 sm:$0xff]   ;;  %v15313_v14 = vld [vmem:[#allocation3 + $0x6c] ss:$16 sps:$4 sm:$0xff]  }
  0x3d   :  { %v15315_v15 = vld [vmem:[#allocation3 + $0x60] ss:$16 sps:$4 sm:$0xff]   ;;  %v15316_v16 = vld [vmem:[#allocation3 + $0x68] ss:$16 sps:$4 sm:$0xff]   ;;  %v15317_v17 = vld [vmem:[#allocation3 + $0x84] ss:$16 sps:$4 sm:$0xff]  }
  0x3e   :  { %10896 = vmatpush1.bf16.msra.mxu0 %v15303_v7  ;;  %12044 = vmatpush1.bf16.msra.mxu1 %v15304_v8  ;;  %v15319_v18 = vld [vmem:[#allocation3 + $0x8c] ss:$16 sps:$4 sm:$0xff]   ;;  %v15321_v19 = vld [vmem:[#allocation3 + $0x80] ss:$16 sps:$4 sm:$0xff]   ;;  %v15322_v20 = vld [vmem:[#allocation3 + $0x88] ss:$16 sps:$4 sm:$0xff]  }
  0x3f   :  { %10897 = vmatprep.subr.bf16.mxu0 %v15305_v9  ;;  %12045 = vmatprep.subr.bf16.mxu1 %v15307_v10  ;;  %v15323_v21 = vld [vmem:[#allocation3 + $0xa4] ss:$16 sps:$4 sm:$0xff]   ;;  %v15325_v22 = vld [vmem:[#allocation3 + $0xac] ss:$16 sps:$4 sm:$0xff]   ;;  %v15327_v23 = vld [vmem:[#allocation3 + $0xa0] ss:$16 sps:$4 sm:$0xff]  }
  0x40   :  { %v15328_v24 = vld [vmem:[#allocation3 + $0xa8] ss:$16 sps:$4 sm:$0xff]   ;;  %v15329_v25 = vld [vmem:[#allocation3 + $0xc4] ss:$16 sps:$4 sm:$0xff]   ;;  %v15331_v26 = vld [vmem:[#allocation3 + $0xcc] ss:$16 sps:$4 sm:$0xff]  }
  0x41   :  { %v15333_v27 = vld [vmem:[#allocation3 + $0xc0] ss:$16 sps:$4 sm:$0xff]   ;;  %v15334_v28 = vld [vmem:[#allocation3 + $0xc8] ss:$16 sps:$4 sm:$0xff]   ;;  %v15335_v29 = vld [vmem:[#allocation3 + $0xe4] ss:$16 sps:$4 sm:$0xff]  }
  0x42   :  { %10898 = vmatpush1.bf16.msra.mxu0 %v15309_v11  ;;  %12046 = vmatpush1.bf16.msra.mxu1 %v15310_v12  ;;  %v15337_v30 = vld [vmem:[#allocation3 + $0xec] ss:$16 sps:$4 sm:$0xff]   ;;  %v15339_v31 = vld [vmem:[#allocation3 + $0xe0] ss:$16 sps:$4 sm:$0xff]   ;;  %v15340_v32 = vld [vmem:[#allocation3 + $0xe8] ss:$16 sps:$4 sm:$0xff]  }
  0x43   :  { %10899 = vmatprep.subr.bf16.mxu0 %v15311_v13  ;;  %12047 = vmatprep.subr.bf16.mxu1 %v15313_v14  ;;  %v15341_v33 = vld [vmem:[#allocation3 + $0x104] ss:$16 sps:$4 sm:$0xff]   ;;  %v15343_v34 = vld [vmem:[#allocation3 + $0x10c] ss:$16 sps:$4 sm:$0xff]   ;;  %v15345_v35 = vld [vmem:[#allocation3 + $0x100] ss:$16 sps:$4 sm:$0xff]  }
  0x44   :  { %v15346_v36 = vld [vmem:[#allocation3 + $0x108] ss:$16 sps:$4 sm:$0xff]   ;;  %v15347_v37 = vld [vmem:[#allocation3 + $0x124] ss:$16 sps:$4 sm:$0xff]   ;;  %v15349_v38 = vld [vmem:[#allocation3 + $0x12c] ss:$16 sps:$4 sm:$0xff]  }
  0x45   :  { %v15351_v39 = vld [vmem:[#allocation3 + $0x120] ss:$16 sps:$4 sm:$0xff]   ;;  %v15352_v40 = vld [vmem:[#allocation3 + $0x128] ss:$16 sps:$4 sm:$0xff]   ;;  %v15353_v41 = vld [vmem:[#allocation3 + $0x144] ss:$16 sps:$4 sm:$0xff]  }
  0x46   :  { %10900 = vmatpush1.bf16.msra.mxu0 %v15315_v15  ;;  %12048 = vmatpush1.bf16.msra.mxu1 %v15316_v16  ;;  %v15355_v42 = vld [vmem:[#allocation3 + $0x14c] ss:$16 sps:$4 sm:$0xff]   ;;  %v15357_v43 = vld [vmem:[#allocation3 + $0x140] ss:$16 sps:$4 sm:$0xff]   ;;  %v15358_v44 = vld [vmem:[#allocation3 + $0x148] ss:$16 sps:$4 sm:$0xff]  }
  0x47   :  { %10901 = vmatprep.subr.bf16.mxu0 %v15317_v17  ;;  %12049 = vmatprep.subr.bf16.mxu1 %v15319_v18  ;;  %v15359_v45 = vld [vmem:[#allocation3 + $0x164] ss:$16 sps:$4 sm:$0xff]   ;;  %v15361_v46 = vld [vmem:[#allocation3 + $0x16c] ss:$16 sps:$4 sm:$0xff]   ;;  %v15363_v48 = vld [vmem:[#allocation3 + $0x160] ss:$16 sps:$4 sm:$0xff]  }
  0x48   :  { %v60_v47 = vld [vmem:[%s18399_s0] sm:$0xff]  ;;  %v15364_v50 = vld [vmem:[#allocation3 + $0x168] ss:$16 sps:$4 sm:$0xff]   ;;  %vm10889_vm0 = vcmask 130048   ;;  %vm13237_vm1 = vcmask 7168  }
  0x49   :  { %v13246_v49 = vcombine.high %v60_v47, %v60_v47  ;;  %v15365_v51 = vld [vmem:[#allocation3 + $0x184] ss:$16 sps:$4 sm:$0xff]   ;;  %v15367_v52 = vld [vmem:[#allocation3 + $0x18c] ss:$16 sps:$4 sm:$0xff]   ;;  %v15369_v53 = vld [vmem:[#allocation3 + $0x180] ss:$16 sps:$4 sm:$0xff]   ;;  %v13245_v5 = vcombine.low %v60_v47, %v60_v47 }
  0x4a   :  { %10902 = vmatpush1.bf16.msra.mxu0 %v15321_v19  ;;  %12050 = vmatpush1.bf16.msra.mxu1 %v15322_v20  ;;  %v15370_v54 = vld [vmem:[#allocation3 + $0x188] ss:$16 sps:$4 sm:$0xff]   ;;  %v15371_v55 = vld [vmem:[#allocation3 + $0x1a4] ss:$16 sps:$4 sm:$0xff]   ;;  %v15373_v56 = vld [vmem:[#allocation3 + $0x1ac] ss:$16 sps:$4 sm:$0xff]  }
  0x4b   :  { %10903 = vmatprep.subr.bf16.mxu0 %v15323_v21  ;;  %12051 = vmatprep.subr.bf16.mxu1 %v15325_v22  ;;  %v15375_v57 = vld [vmem:[#allocation3 + $0x1a0] ss:$16 sps:$4 sm:$0xff]   ;;  %v15376_v58 = vld [vmem:[#allocation3 + $0x1a8] ss:$16 sps:$4 sm:$0xff]   ;;  %v15377_v59 = vld [vmem:[#allocation3 + $0x1c4] ss:$16 sps:$4 sm:$0xff]  }
  0x4c   :  { %10925 = vmatprep.mubr.bf16.mxu0 %v13246_v49  ;;  %12073 = vmatprep.mubr.bf16.mxu1 %v13246_v49  ;;  %v15379_v60 = vld [vmem:[#allocation3 + $0x1cc] ss:$16 sps:$4 sm:$0xff]   ;;  %v15381_v61 = vld [vmem:[#allocation3 + $0x1c0] ss:$16 sps:$4 sm:$0xff]   ;;  %v15382_v62 = vld [vmem:[#allocation3 + $0x1c8] ss:$16 sps:$4 sm:$0xff]  }
  0x4d   :  { %v15383_v63 = vld [vmem:[#allocation3 + $0x1e4] ss:$16 sps:$4 sm:$0xff]   ;;  %v15385_v0 = vld [vmem:[#allocation3 + $0x1ec] ss:$16 sps:$4 sm:$0xff]   ;;  %v15387_v1 = vld [vmem:[#allocation3 + $0x1e0] ss:$16 sps:$4 sm:$0xff]  }
  0x4e   :  { %10904 = vmatpush1.bf16.msra.mxu0 %v15327_v23  ;;  %12052 = vmatpush1.bf16.msra.mxu1 %v15328_v24  ;;  %v15388_v2 = vld [vmem:[#allocation3 + $0x1e8] ss:$16 sps:$4 sm:$0xff]   ;;  %v15393_v3 = vld [vmem:[#allocation3 + $0x204] ss:$16 sps:$4 sm:$0xff]   ;;  %v15396_v4 = vld [vmem:[#allocation3 + $0x20c] ss:$16 sps:$4 sm:$0xff]  }
  0x4f   :  { %10905 = vmatprep.subr.bf16.mxu0 %v15329_v25  ;;  %12053 = vmatprep.subr.bf16.mxu1 %v15331_v26  ;;  %v15391_v6 = vld [vmem:[#allocation3 + $0x200] ss:$16 sps:$4 sm:$0xff]   ;;  %v15394_v7 = vld [vmem:[#allocation3 + $0x208] ss:$16 sps:$4 sm:$0xff]   ;;  %v15399_v8 = vld [vmem:[#allocation3 + $0x224] ss:$16 sps:$4 sm:$0xff]  }
  0x50   :  { %v15402_v9 = vld [vmem:[#allocation3 + $0x22c] ss:$16 sps:$4 sm:$0xff]   ;;  %v15397_v10 = vld [vmem:[#allocation3 + $0x220] ss:$16 sps:$4 sm:$0xff]   ;;  %v15400_v11 = vld [vmem:[#allocation3 + $0x228] ss:$16 sps:$4 sm:$0xff]  }
  0x51   :  { %v15405_v12 = vld [vmem:[#allocation3 + $0x244] ss:$16 sps:$4 sm:$0xff]   ;;  %v15408_v13 = vld [vmem:[#allocation3 + $0x24c] ss:$16 sps:$4 sm:$0xff]   ;;  %v15403_v14 = vld [vmem:[#allocation3 + $0x240] ss:$16 sps:$4 sm:$0xff]  }
  0x52   :  { %10906 = vmatpush1.bf16.msra.mxu0 %v15333_v27  ;;  %12054 = vmatpush1.bf16.msra.mxu1 %v15334_v28  ;;  %v15406_v15 = vld [vmem:[#allocation3 + $0x248] ss:$16 sps:$4 sm:$0xff]   ;;  %v15411_v16 = vld [vmem:[#allocation3 + $0x264] ss:$16 sps:$4 sm:$0xff]   ;;  %v15414_v17 = vld [vmem:[#allocation3 + $0x26c] ss:$16 sps:$4 sm:$0xff]  }
  0x53   :  { %10907 = vmatprep.subr.bf16.mxu0 %v15335_v29  ;;  %12055 = vmatprep.subr.bf16.mxu1 %v15337_v30  ;;  %v15409_v18 = vld [vmem:[#allocation3 + $0x260] ss:$16 sps:$4 sm:$0xff]   ;;  %v15412_v19 = vld [vmem:[#allocation3 + $0x268] ss:$16 sps:$4 sm:$0xff]   ;;  %v15417_v20 = vld [vmem:[#allocation3 + $0x284] ss:$16 sps:$4 sm:$0xff]  }
  0x54   :  { %v15420_v21 = vld [vmem:[#allocation3 + $0x28c] ss:$16 sps:$4 sm:$0xff]   ;;  %v15415_v22 = vld [vmem:[#allocation3 + $0x280] ss:$16 sps:$4 sm:$0xff]   ;;  %v15418_v23 = vld [vmem:[#allocation3 + $0x288] ss:$16 sps:$4 sm:$0xff]  }
  0x55   :  { %v15423_v24 = vld [vmem:[#allocation3 + $0x2a4] ss:$16 sps:$4 sm:$0xff]   ;;  %v15426_v25 = vld [vmem:[#allocation3 + $0x2ac] ss:$16 sps:$4 sm:$0xff]   ;;  %v15421_v26 = vld [vmem:[#allocation3 + $0x2a0] ss:$16 sps:$4 sm:$0xff]  }
  0x56   :  { %10908 = vmatpush1.bf16.msra.mxu0 %v15339_v31  ;;  %12056 = vmatpush1.bf16.msra.mxu1 %v15340_v32  ;;  %v15424_v27 = vld [vmem:[#allocation3 + $0x2a8] ss:$16 sps:$4 sm:$0xff]   ;;  %v15429_v28 = vld [vmem:[#allocation3 + $0x2c4] ss:$16 sps:$4 sm:$0xff]   ;;  %v15432_v29 = vld [vmem:[#allocation3 + $0x2cc] ss:$16 sps:$4 sm:$0xff]  }
  0x57   :  { %10909 = vmatprep.subr.bf16.mxu0 %v15341_v33  ;;  %12057 = vmatprep.subr.bf16.mxu1 %v15343_v34  ;;  %v18156_v30 = vld [vmem:[%s18399_s0 + $0x8] sm:$0xff]  ;;  %v15427_v32 = vld [vmem:[#allocation3 + $0x2c0] ss:$16 sps:$4 sm:$0xff]  }
  0x58   :  { %v13248_v31 = vcombine.high %v18156_v30, %v18156_v30  ;;  %v15430_v33 = vld [vmem:[#allocation3 + $0x2c8] ss:$16 sps:$4 sm:$0xff]   ;;  %v15435_v34 = vld [vmem:[#allocation3 + $0x2e4] ss:$16 sps:$4 sm:$0xff]   ;;  %v15456_v47 = vld [vmem:[#allocation3 + $0x34c] ss:$16 sps:$4 sm:$0xff]  }
  0x59   :  { %v15454_v49 = vld [vmem:[#allocation3 + $0x348] ss:$16 sps:$4 sm:$0xff]  }
  0x5a   :  { %10910 = vmatpush1.bf16.msra.mxu0 %v15345_v35  ;;  %12058 = vmatpush1.bf16.msra.mxu1 %v15346_v36  ;;  %v15438_v35 = vld [vmem:[#allocation3 + $0x2ec] ss:$16 sps:$4 sm:$0xff]   ;;  %v15433_v36 = vld [vmem:[#allocation3 + $0x2e0] ss:$16 sps:$4 sm:$0xff]  }
  0x5b   :  { %10911 = vmatprep.subr.bf16.mxu0 %v15347_v37  ;;  %12059 = vmatprep.subr.bf16.mxu1 %v15349_v38  ;;  %v15436_v37 = vld [vmem:[#allocation3 + $0x2e8] ss:$16 sps:$4 sm:$0xff]   ;;  %v15441_v38 = vld [vmem:[#allocation3 + $0x304] ss:$16 sps:$4 sm:$0xff]  }
  0x5e   :  { %10912 = vmatpush1.bf16.msra.mxu0 %v15351_v39  ;;  %12060 = vmatpush1.bf16.msra.mxu1 %v15352_v40  ;;  %v15444_v39 = vld [vmem:[#allocation3 + $0x30c] ss:$16 sps:$4 sm:$0xff]   ;;  %v15439_v40 = vld [vmem:[#allocation3 + $0x300] ss:$16 sps:$4 sm:$0xff]  }
  0x5f   :  { %10913 = vmatprep.subr.bf16.mxu0 %v15353_v41  ;;  %12061 = vmatprep.subr.bf16.mxu1 %v15355_v42  ;;  %v15442_v41 = vld [vmem:[#allocation3 + $0x308] ss:$16 sps:$4 sm:$0xff]   ;;  %v15447_v42 = vld [vmem:[#allocation3 + $0x324] ss:$16 sps:$4 sm:$0xff]  }
  0x62   :  { %10914 = vmatpush1.bf16.msra.mxu0 %v15357_v43  ;;  %12062 = vmatpush1.bf16.msra.mxu1 %v15358_v44  ;;  %v15450_v43 = vld [vmem:[#allocation3 + $0x32c] ss:$16 sps:$4 sm:$0xff]   ;;  %v15445_v44 = vld [vmem:[#allocation3 + $0x320] ss:$16 sps:$4 sm:$0xff]  }
  0x63   :  { %10915 = vmatprep.subr.bf16.mxu0 %v15359_v45  ;;  %12063 = vmatprep.subr.bf16.mxu1 %v15361_v46  ;;  %v15448_v45 = vld [vmem:[#allocation3 + $0x328] ss:$16 sps:$4 sm:$0xff]   ;;  %v15453_v46 = vld [vmem:[#allocation3 + $0x344] ss:$16 sps:$4 sm:$0xff]  }
  0x66   :  { %10916 = vmatpush1.bf16.msra.mxu0 %v15363_v48  ;;  %12064 = vmatpush1.bf16.msra.mxu1 %v15364_v50  ;;  %v15451_v48 = vld [vmem:[#allocation3 + $0x340] ss:$16 sps:$4 sm:$0xff]   ;;  %v15459_v50 = vld [vmem:[#allocation3 + $0x364] ss:$16 sps:$4 sm:$0xff]  }
  0x67   :  { %10917 = vmatprep.subr.bf16.mxu0 %v15365_v51  ;;  %12065 = vmatprep.subr.bf16.mxu1 %v15367_v52  ;;  %v15462_v51 = vld [vmem:[#allocation3 + $0x36c] ss:$16 sps:$4 sm:$0xff]   ;;  %v15457_v52 = vld [vmem:[#allocation3 + $0x360] ss:$16 sps:$4 sm:$0xff]  }
  0x6a   :  { %10918 = vmatpush1.bf16.msra.mxu0 %v15369_v53  ;;  %12066 = vmatpush1.bf16.msra.mxu1 %v15370_v54  ;;  %v15460_v53 = vld [vmem:[#allocation3 + $0x368] ss:$16 sps:$4 sm:$0xff]   ;;  %v15465_v54 = vld [vmem:[#allocation3 + $0x384] ss:$16 sps:$4 sm:$0xff]  }
  0x6b   :  { %10919 = vmatprep.subr.bf16.mxu0 %v15371_v55  ;;  %12067 = vmatprep.subr.bf16.mxu1 %v15373_v56  ;;  %v15468_v55 = vld [vmem:[#allocation3 + $0x38c] ss:$16 sps:$4 sm:$0xff]   ;;  %v15463_v56 = vld [vmem:[#allocation3 + $0x380] ss:$16 sps:$4 sm:$0xff]  }
  0x6e   :  { %10920 = vmatpush1.bf16.msra.mxu0 %v15375_v57  ;;  %12068 = vmatpush1.bf16.msra.mxu1 %v15376_v58  ;;  %v15466_v57 = vld [vmem:[#allocation3 + $0x388] ss:$16 sps:$4 sm:$0xff]   ;;  %v15471_v58 = vld [vmem:[#allocation3 + $0x3a4] ss:$16 sps:$4 sm:$0xff]  }
  0x6f   :  { %10921 = vmatprep.subr.bf16.mxu0 %v15377_v59  ;;  %12069 = vmatprep.subr.bf16.mxu1 %v15379_v60  ;;  %v15474_v59 = vld [vmem:[#allocation3 + $0x3ac] ss:$16 sps:$4 sm:$0xff]   ;;  %v15469_v60 = vld [vmem:[#allocation3 + $0x3a0] ss:$16 sps:$4 sm:$0xff]  }
  0x72   :  { %10922 = vmatpush1.bf16.msra.mxu0 %v15381_v61  ;;  %12070 = vmatpush1.bf16.msra.mxu1 %v15382_v62  ;;  %v15472_v61 = vld [vmem:[#allocation3 + $0x3a8] ss:$16 sps:$4 sm:$0xff]   ;;  %v15477_v62 = vld [vmem:[#allocation3 + $0x3c4] ss:$16 sps:$4 sm:$0xff]  }
  0x73   :  { %10923 = vmatprep.subr.bf16.mxu0 %v15383_v63  ;;  %12071 = vmatprep.subr.bf16.mxu1 %v15385_v0  ;;  %v15480_v63 = vld [vmem:[#allocation3 + $0x3cc] ss:$16 sps:$4 sm:$0xff]   ;;  %v15475_v0 = vld [vmem:[#allocation3 + $0x3c0] ss:$16 sps:$4 sm:$0xff]  }
  0x76   :  { %10924 = vmatpush1.bf16.msra.mxu0 %v15387_v1  ;;  %12072 = vmatpush1.bf16.msra.mxu1 %v15388_v2  ;;  %v15478_v1 = vld [vmem:[#allocation3 + $0x3c8] ss:$16 sps:$4 sm:$0xff]   ;;  %v15483_v2 = vld [vmem:[#allocation3 + $0x3e4] ss:$16 sps:$4 sm:$0xff]  }
  0x77   :  { %10934 = vmatprep.subr.bf16.mxu0 %v15393_v3  ;;  %12082 = vmatprep.subr.bf16.mxu1 %v15396_v4  ;;  %v15486_v3 = vld [vmem:[#allocation3 + $0x3ec] ss:$16 sps:$4 sm:$0xff]   ;;  %v15481_v4 = vld [vmem:[#allocation3 + $0x3e0] ss:$16 sps:$4 sm:$0xff]  }
  0x79   :  { %10926 = vmatmul.mubr.bf16.vlgmr.msra.gmra.mrb[0].mxu0 %v13245_v5  ;;  %12074 = vmatmul.mubr.bf16.vlgmr.msra.gmra.mrb[0].mxu1 %v13245_v5  ;;  %v15484_v5 = vld [vmem:[#allocation3 + $0x3e8] ss:$16 sps:$4 sm:$0xff]  }
  0x7a   :  { %10935 = vmatpush1.bf16.msra.mxu0 %v15391_v6  ;;  %12083 = vmatpush1.bf16.msra.mxu1 %v15394_v7  ;;  %v15491_v6 = vld [vmem:[#allocation3 + $0x404] ss:$16 sps:$4 sm:$0xff]   ;;  %v15494_v7 = vld [vmem:[#allocation3 + $0x40c] ss:$16 sps:$4 sm:$0xff]  }
  0x7b   :  { %10936 = vmatprep.subr.bf16.mxu0 %v15399_v8  ;;  %12084 = vmatprep.subr.bf16.mxu1 %v15402_v9  ;;  %v13247_v8 = vcombine.low %v18156_v30, %v18156_v30  ;;  %v15489_v9 = vld [vmem:[#allocation3 + $0x400] ss:$16 sps:$4 sm:$0xff]   ;;  %v15524_v30 = vld [vmem:[#allocation3 + $0x4ac] ss:$16 sps:$4 sm:$0xff]  }
  0x7c   :  { %10966 = vmatprep.mubr.bf16.mxu0 %v13248_v31  ;;  %12114 = vmatprep.mubr.bf16.mxu1 %v13248_v31  ;;  %v15519_v31 = vld [vmem:[#allocation3 + $0x4a0] ss:$16 sps:$4 sm:$0xff]  }
  0x7e   :  { %10937 = vmatpush1.bf16.msra.mxu0 %v15397_v10  ;;  %12085 = vmatpush1.bf16.msra.mxu1 %v15400_v11  ;;  %v15492_v10 = vld [vmem:[#allocation3 + $0x408] ss:$16 sps:$4 sm:$0xff]   ;;  %v15497_v11 = vld [vmem:[#allocation3 + $0x424] ss:$16 sps:$4 sm:$0xff]  }
  0x7f   :  { %10938 = vmatprep.subr.bf16.mxu0 %v15405_v12  ;;  %12086 = vmatprep.subr.bf16.mxu1 %v15408_v13  ;;  %v18165_v12 = vld [vmem:[%s18399_s0 + $0x10] sm:$0xff] }
  0x80   :  { %v15500_v13 = vld [vmem:[#allocation3 + $0x42c] ss:$16 sps:$4 sm:$0xff]  }
  0x82   :  { %10939 = vmatpush1.bf16.msra.mxu0 %v15403_v14  ;;  %12087 = vmatpush1.bf16.msra.mxu1 %v15406_v15  ;;  %v13250_v14 = vcombine.high %v18165_v12, %v18165_v12  ;;  %v15495_v15 = vld [vmem:[#allocation3 + $0x420] ss:$16 sps:$4 sm:$0xff]  }
  0x83   :  { %10940 = vmatprep.subr.bf16.mxu0 %v15411_v16  ;;  %12088 = vmatprep.subr.bf16.mxu1 %v15414_v17  ;;  %v15498_v16 = vld [vmem:[#allocation3 + $0x428] ss:$16 sps:$4 sm:$0xff]   ;;  %v15503_v17 = vld [vmem:[#allocation3 + $0x444] ss:$16 sps:$4 sm:$0xff]  }
  0x86   :  { %10941 = vmatpush1.bf16.msra.mxu0 %v15409_v18  ;;  %12089 = vmatpush1.bf16.msra.mxu1 %v15412_v19  ;;  %v15506_v18 = vld [vmem:[#allocation3 + $0x44c] ss:$16 sps:$4 sm:$0xff]   ;;  %v15501_v19 = vld [vmem:[#allocation3 + $0x440] ss:$16 sps:$4 sm:$0xff]  }
  0x87   :  { %10942 = vmatprep.subr.bf16.mxu0 %v15417_v20  ;;  %12090 = vmatprep.subr.bf16.mxu1 %v15420_v21  ;;  %v15504_v20 = vld [vmem:[#allocation3 + $0x448] ss:$16 sps:$4 sm:$0xff]   ;;  %v15509_v21 = vld [vmem:[#allocation3 + $0x464] ss:$16 sps:$4 sm:$0xff]  }
  0x8a   :  { %10943 = vmatpush1.bf16.msra.mxu0 %v15415_v22  ;;  %12091 = vmatpush1.bf16.msra.mxu1 %v15418_v23  ;;  %v15512_v22 = vld [vmem:[#allocation3 + $0x46c] ss:$16 sps:$4 sm:$0xff]   ;;  %v15507_v23 = vld [vmem:[#allocation3 + $0x460] ss:$16 sps:$4 sm:$0xff]  }
  0x8b   :  { %10944 = vmatprep.subr.bf16.mxu0 %v15423_v24  ;;  %12092 = vmatprep.subr.bf16.mxu1 %v15426_v25  ;;  %v15510_v24 = vld [vmem:[#allocation3 + $0x468] ss:$16 sps:$4 sm:$0xff]   ;;  %v15515_v25 = vld [vmem:[#allocation3 + $0x484] ss:$16 sps:$4 sm:$0xff]  }
  0x8e   :  { %10945 = vmatpush1.bf16.msra.mxu0 %v15421_v26  ;;  %12093 = vmatpush1.bf16.msra.mxu1 %v15424_v27  ;;  %v15518_v26 = vld [vmem:[#allocation3 + $0x48c] ss:$16 sps:$4 sm:$0xff]   ;;  %v15513_v27 = vld [vmem:[#allocation3 + $0x480] ss:$16 sps:$4 sm:$0xff]  }
  0x8f   :  { %10946 = vmatprep.subr.bf16.mxu0 %v15429_v28  ;;  %12094 = vmatprep.subr.bf16.mxu1 %v15432_v29  ;;  %v15516_v28 = vld [vmem:[#allocation3 + $0x488] ss:$16 sps:$4 sm:$0xff]   ;;  %v15521_v29 = vld [vmem:[#allocation3 + $0x4a4] ss:$16 sps:$4 sm:$0xff]  }
  0x92   :  { %10947 = vmatpush1.bf16.msra.mxu0 %v15427_v32  ;;  %12095 = vmatpush1.bf16.msra.mxu1 %v15430_v33  ;;  %v15522_v32 = vld [vmem:[#allocation3 + $0x4a8] ss:$16 sps:$4 sm:$0xff]   ;;  %v15527_v33 = vld [vmem:[#allocation3 + $0x4c4] ss:$16 sps:$4 sm:$0xff]  }
  0x93   :  { %10948 = vmatprep.subr.bf16.mxu0 %v15435_v34  ;;  %12096 = vmatprep.subr.bf16.mxu1 %v15438_v35  ;;  %v15530_v34 = vld [vmem:[#allocation3 + $0x4cc] ss:$16 sps:$4 sm:$0xff]   ;;  %v15525_v35 = vld [vmem:[#allocation3 + $0x4c0] ss:$16 sps:$4 sm:$0xff]  }
  0x96   :  { %10949 = vmatpush1.bf16.msra.mxu0 %v15433_v36  ;;  %12097 = vmatpush1.bf16.msra.mxu1 %v15436_v37  ;;  %v15528_v36 = vld [vmem:[#allocation3 + $0x4c8] ss:$16 sps:$4 sm:$0xff]   ;;  %v15533_v37 = vld [vmem:[#allocation3 + $0x4e4] ss:$16 sps:$4 sm:$0xff]  }
  0x97   :  { %10950 = vmatprep.subr.bf16.mxu0 %v15441_v38  ;;  %12098 = vmatprep.subr.bf16.mxu1 %v15444_v39  ;;  %v15536_v38 = vld [vmem:[#allocation3 + $0x4ec] ss:$16 sps:$4 sm:$0xff]   ;;  %v15531_v39 = vld [vmem:[#allocation3 + $0x4e0] ss:$16 sps:$4 sm:$0xff]  }
  0x9a   :  { %10951 = vmatpush1.bf16.msra.mxu0 %v15439_v40  ;;  %12099 = vmatpush1.bf16.msra.mxu1 %v15442_v41  ;;  %v15534_v40 = vld [vmem:[#allocation3 + $0x4e8] ss:$16 sps:$4 sm:$0xff]   ;;  %v15539_v41 = vld [vmem:[#allocation3 + $0x504] ss:$16 sps:$4 sm:$0xff]  }
  0x9b   :  { %10952 = vmatprep.subr.bf16.mxu0 %v15447_v42  ;;  %12100 = vmatprep.subr.bf16.mxu1 %v15450_v43  ;;  %v15542_v42 = vld [vmem:[#allocation3 + $0x50c] ss:$16 sps:$4 sm:$0xff]   ;;  %v15537_v43 = vld [vmem:[#allocation3 + $0x500] ss:$16 sps:$4 sm:$0xff]  }
  0x9e   :  { %10953 = vmatpush1.bf16.msra.mxu0 %v15445_v44  ;;  %12101 = vmatpush1.bf16.msra.mxu1 %v15448_v45  ;;  %v15540_v44 = vld [vmem:[#allocation3 + $0x508] ss:$16 sps:$4 sm:$0xff]   ;;  %v15545_v45 = vld [vmem:[#allocation3 + $0x524] ss:$16 sps:$4 sm:$0xff]  }
  0x9f   :  { %10954 = vmatprep.subr.bf16.mxu0 %v15453_v46  ;;  %12102 = vmatprep.subr.bf16.mxu1 %v15456_v47  ;;  %v15548_v46 = vld [vmem:[#allocation3 + $0x52c] ss:$16 sps:$4 sm:$0xff]   ;;  %v15543_v47 = vld [vmem:[#allocation3 + $0x520] ss:$16 sps:$4 sm:$0xff]  }
  0xa2   :  { %10955 = vmatpush1.bf16.msra.mxu0 %v15451_v48  ;;  %12103 = vmatpush1.bf16.msra.mxu1 %v15454_v49  ;;  %v15546_v48 = vld [vmem:[#allocation3 + $0x528] ss:$16 sps:$4 sm:$0xff]   ;;  %v15551_v49 = vld [vmem:[#allocation3 + $0x544] ss:$16 sps:$4 sm:$0xff]  }
  0xa3   :  { %10956 = vmatprep.subr.bf16.mxu0 %v15459_v50  ;;  %12104 = vmatprep.subr.bf16.mxu1 %v15462_v51  ;;  %v15554_v50 = vld [vmem:[#allocation3 + $0x54c] ss:$16 sps:$4 sm:$0xff]   ;;  %v15549_v51 = vld [vmem:[#allocation3 + $0x540] ss:$16 sps:$4 sm:$0xff]  }
  0xa6   :  { %10957 = vmatpush1.bf16.msra.mxu0 %v15457_v52  ;;  %12105 = vmatpush1.bf16.msra.mxu1 %v15460_v53  ;;  %v15552_v52 = vld [vmem:[#allocation3 + $0x548] ss:$16 sps:$4 sm:$0xff]   ;;  %v15557_v53 = vld [vmem:[#allocation3 + $0x564] ss:$16 sps:$4 sm:$0xff]  }
  0xa7   :  { %10958 = vmatprep.subr.bf16.mxu0 %v15465_v54  ;;  %12106 = vmatprep.subr.bf16.mxu1 %v15468_v55  ;;  %v15560_v54 = vld [vmem:[#allocation3 + $0x56c] ss:$16 sps:$4 sm:$0xff]   ;;  %v15555_v55 = vld [vmem:[#allocation3 + $0x560] ss:$16 sps:$4 sm:$0xff]  }
  0xaa   :  { %10959 = vmatpush1.bf16.msra.mxu0 %v15463_v56  ;;  %12107 = vmatpush1.bf16.msra.mxu1 %v15466_v57  ;;  %v15558_v56 = vld [vmem:[#allocation3 + $0x568] ss:$16 sps:$4 sm:$0xff]   ;;  %v15563_v57 = vld [vmem:[#allocation3 + $0x584] ss:$16 sps:$4 sm:$0xff]  }
  0xab   :  { %10960 = vmatprep.subr.bf16.mxu0 %v15471_v58  ;;  %12108 = vmatprep.subr.bf16.mxu1 %v15474_v59  ;;  %v15566_v58 = vld [vmem:[#allocation3 + $0x58c] ss:$16 sps:$4 sm:$0xff]   ;;  %v15561_v59 = vld [vmem:[#allocation3 + $0x580] ss:$16 sps:$4 sm:$0xff]  }
  0xae   :  { %10961 = vmatpush1.bf16.msra.mxu0 %v15469_v60  ;;  %12109 = vmatpush1.bf16.msra.mxu1 %v15472_v61  ;;  %v15564_v60 = vld [vmem:[#allocation3 + $0x588] ss:$16 sps:$4 sm:$0xff]   ;;  %v15569_v61 = vld [vmem:[#allocation3 + $0x5a4] ss:$16 sps:$4 sm:$0xff]  }
  0xaf   :  { %10962 = vmatprep.subr.bf16.mxu0 %v15477_v62  ;;  %12110 = vmatprep.subr.bf16.mxu1 %v15480_v63  ;;  %v15572_v62 = vld [vmem:[#allocation3 + $0x5ac] ss:$16 sps:$4 sm:$0xff]   ;;  %v15567_v63 = vld [vmem:[#allocation3 + $0x5a0] ss:$16 sps:$4 sm:$0xff]  }
  0xb2   :  { %10963 = vmatpush1.bf16.msra.mxu0 %v15475_v0  ;;  %12111 = vmatpush1.bf16.msra.mxu1 %v15478_v1  ;;  %v15570_v0 = vld [vmem:[#allocation3 + $0x5a8] ss:$16 sps:$4 sm:$0xff]   ;;  %v15575_v1 = vld [vmem:[#allocation3 + $0x5c4] ss:$16 sps:$4 sm:$0xff]  }
  0xb3   :  { %10964 = vmatprep.subr.bf16.mxu0 %v15483_v2  ;;  %12112 = vmatprep.subr.bf16.mxu1 %v15486_v3  ;;  %v15578_v2 = vld [vmem:[#allocation3 + $0x5cc] ss:$16 sps:$4 sm:$0xff]   ;;  %v15573_v3 = vld [vmem:[#allocation3 + $0x5c0] ss:$16 sps:$4 sm:$0xff]  }
  0xb6   :  { %10965 = vmatpush1.bf16.msra.mxu0 %v15481_v4  ;;  %12113 = vmatpush1.bf16.msra.mxu1 %v15484_v5  ;;  %v15576_v4 = vld [vmem:[#allocation3 + $0x5c8] ss:$16 sps:$4 sm:$0xff]   ;;  %v15581_v5 = vld [vmem:[#allocation3 + $0x5e4] ss:$16 sps:$4 sm:$0xff]  }
  0xb7   :  { %10975 = vmatprep.subr.bf16.mxu0 %v15491_v6  ;;  %12123 = vmatprep.subr.bf16.mxu1 %v15494_v7  ;;  %v15584_v6 = vld [vmem:[#allocation3 + $0x5ec] ss:$16 sps:$4 sm:$0xff]   ;;  %v15579_v7 = vld [vmem:[#allocation3 + $0x5e0] ss:$16 sps:$4 sm:$0xff]  }
  0xb9   :  { %10967 = vmatmul.mubr.bf16.vlgmr.msra.gmra.mrb[0].mxu0 %v13247_v8  ;;  %12115 = vmatmul.mubr.bf16.vlgmr.msra.gmra.mrb[0].mxu1 %v13247_v8  ;;  %v15582_v8 = vld [vmem:[#allocation3 + $0x5e8] ss:$16 sps:$4 sm:$0xff]  }
  0xba   :  { %10976 = vmatpush1.bf16.msra.mxu0 %v15489_v9  ;;  %12124 = vmatpush1.bf16.msra.mxu1 %v15492_v10  ;;  %v15589_v9 = vld [vmem:[#allocation3 + $0x604] ss:$16 sps:$4 sm:$0xff]   ;;  %v15592_v10 = vld [vmem:[#allocation3 + $0x60c] ss:$16 sps:$4 sm:$0xff]  }
  0xbb   :  { %10977 = vmatprep.subr.bf16.mxu0 %v15497_v11  ;;  %12125 = vmatprep.subr.bf16.mxu1 %v15500_v13  ;;  %v15587_v11 = vld [vmem:[#allocation3 + $0x600] ss:$16 sps:$4 sm:$0xff]   ;;  %v13249_v13 = vcombine.low %v18165_v12, %v18165_v12  ;;  %v15601_v12 = vld [vmem:[#allocation3 + $0x644] ss:$16 sps:$4 sm:$0xff]  }
  0xbc   :  { %11007 = vmatprep.mubr.bf16.mxu0 %v13250_v14  ;;  %12155 = vmatprep.mubr.bf16.mxu1 %v13250_v14  ;;  %v15590_v14 = vld [vmem:[#allocation3 + $0x608] ss:$16 sps:$4 sm:$0xff]  }
  0xbe   :  { %10978 = vmatpush1.bf16.msra.mxu0 %v15495_v15  ;;  %12126 = vmatpush1.bf16.msra.mxu1 %v15498_v16  ;;  %v18174_v15 = vld [vmem:[%s18399_s0 + $0x18] sm:$0xff] }
  0xbf   :  { %10979 = vmatprep.subr.bf16.mxu0 %v15503_v17  ;;  %12127 = vmatprep.subr.bf16.mxu1 %v15506_v18  ;;  %v15595_v16 = vld [vmem:[#allocation3 + $0x624] ss:$16 sps:$4 sm:$0xff]   ;;  %v15598_v17 = vld [vmem:[#allocation3 + $0x62c] ss:$16 sps:$4 sm:$0xff]   ;;  %v13252_v18 = vcombine.high %v18174_v15, %v18174_v15 }
  0xc2   :  { %10980 = vmatpush1.bf16.msra.mxu0 %v15501_v19  ;;  %12128 = vmatpush1.bf16.msra.mxu1 %v15504_v20  ;;  %v15593_v19 = vld [vmem:[#allocation3 + $0x620] ss:$16 sps:$4 sm:$0xff]   ;;  %v15596_v20 = vld [vmem:[#allocation3 + $0x628] ss:$16 sps:$4 sm:$0xff]  }
  0xc3   :  { %10981 = vmatprep.subr.bf16.mxu0 %v15509_v21  ;;  %12129 = vmatprep.subr.bf16.mxu1 %v15512_v22  ;;  %v15604_v21 = vld [vmem:[#allocation3 + $0x64c] ss:$16 sps:$4 sm:$0xff]   ;;  %v15599_v22 = vld [vmem:[#allocation3 + $0x640] ss:$16 sps:$4 sm:$0xff]  }
  0xc6   :  { %10982 = vmatpush1.bf16.msra.mxu0 %v15507_v23  ;;  %12130 = vmatpush1.bf16.msra.mxu1 %v15510_v24  ;;  %v15602_v23 = vld [vmem:[#allocation3 + $0x648] ss:$16 sps:$4 sm:$0xff]   ;;  %v15607_v24 = vld [vmem:[#allocation3 + $0x664] ss:$16 sps:$4 sm:$0xff]  }
  0xc7   :  { %10983 = vmatprep.subr.bf16.mxu0 %v15515_v25  ;;  %12131 = vmatprep.subr.bf16.mxu1 %v15518_v26  ;;  %v15610_v25 = vld [vmem:[#allocation3 + $0x66c] ss:$16 sps:$4 sm:$0xff]   ;;  %v15605_v26 = vld [vmem:[#allocation3 + $0x660] ss:$16 sps:$4 sm:$0xff]  }
  0xca   :  { %10984 = vmatpush1.bf16.msra.mxu0 %v15513_v27  ;;  %12132 = vmatpush1.bf16.msra.mxu1 %v15516_v28  ;;  %v15608_v27 = vld [vmem:[#allocation3 + $0x668] ss:$16 sps:$4 sm:$0xff]   ;;  %v15613_v28 = vld [vmem:[#allocation3 + $0x684] ss:$16 sps:$4 sm:$0xff]  }
  0xcb   :  { %10985 = vmatprep.subr.bf16.mxu0 %v15521_v29  ;;  %12133 = vmatprep.subr.bf16.mxu1 %v15524_v30  ;;  %v15616_v29 = vld [vmem:[#allocation3 + $0x68c] ss:$16 sps:$4 sm:$0xff]   ;;  %v15611_v30 = vld [vmem:[#allocation3 + $0x680] ss:$16 sps:$4 sm:$0xff]  }
  0xce   :  { %10986 = vmatpush1.bf16.msra.mxu0 %v15519_v31  ;;  %12134 = vmatpush1.bf16.msra.mxu1 %v15522_v32  ;;  %v15614_v31 = vld [vmem:[#allocation3 + $0x688] ss:$16 sps:$4 sm:$0xff]   ;;  %v15619_v32 = vld [vmem:[#allocation3 + $0x6a4] ss:$16 sps:$4 sm:$0xff]  }
  0xcf   :  { %10987 = vmatprep.subr.bf16.mxu0 %v15527_v33  ;;  %12135 = vmatprep.subr.bf16.mxu1 %v15530_v34  ;;  %v15622_v33 = vld [vmem:[#allocation3 + $0x6ac] ss:$16 sps:$4 sm:$0xff]   ;;  %v15617_v34 = vld [vmem:[#allocation3 + $0x6a0] ss:$16 sps:$4 sm:$0xff]  }
  0xd2   :  { %10988 = vmatpush1.bf16.msra.mxu0 %v15525_v35  ;;  %12136 = vmatpush1.bf16.msra.mxu1 %v15528_v36  ;;  %v15620_v35 = vld [vmem:[#allocation3 + $0x6a8] ss:$16 sps:$4 sm:$0xff]   ;;  %v15625_v36 = vld [vmem:[#allocation3 + $0x6c4] ss:$16 sps:$4 sm:$0xff]  }
  0xd3   :  { %10989 = vmatprep.subr.bf16.mxu0 %v15533_v37  ;;  %12137 = vmatprep.subr.bf16.mxu1 %v15536_v38  ;;  %v15628_v37 = vld [vmem:[#allocation3 + $0x6cc] ss:$16 sps:$4 sm:$0xff]   ;;  %v15623_v38 = vld [vmem:[#allocation3 + $0x6c0] ss:$16 sps:$4 sm:$0xff]  }
  0xd6   :  { %10990 = vmatpush1.bf16.msra.mxu0 %v15531_v39  ;;  %12138 = vmatpush1.bf16.msra.mxu1 %v15534_v40  ;;  %v15626_v39 = vld [vmem:[#allocation3 + $0x6c8] ss:$16 sps:$4 sm:$0xff]   ;;  %v15631_v40 = vld [vmem:[#allocation3 + $0x6e4] ss:$16 sps:$4 sm:$0xff]  }
  0xd7   :  { %10991 = vmatprep.subr.bf16.mxu0 %v15539_v41  ;;  %12139 = vmatprep.subr.bf16.mxu1 %v15542_v42  ;;  %v15634_v41 = vld [vmem:[#allocation3 + $0x6ec] ss:$16 sps:$4 sm:$0xff]   ;;  %v15629_v42 = vld [vmem:[#allocation3 + $0x6e0] ss:$16 sps:$4 sm:$0xff]  }
  0xda   :  { %10992 = vmatpush1.bf16.msra.mxu0 %v15537_v43  ;;  %12140 = vmatpush1.bf16.msra.mxu1 %v15540_v44  ;;  %v15632_v43 = vld [vmem:[#allocation3 + $0x6e8] ss:$16 sps:$4 sm:$0xff]   ;;  %v15637_v44 = vld [vmem:[#allocation3 + $0x704] ss:$16 sps:$4 sm:$0xff]  }
  0xdb   :  { %10993 = vmatprep.subr.bf16.mxu0 %v15545_v45  ;;  %12141 = vmatprep.subr.bf16.mxu1 %v15548_v46  ;;  %v15640_v45 = vld [vmem:[#allocation3 + $0x70c] ss:$16 sps:$4 sm:$0xff]   ;;  %v15635_v46 = vld [vmem:[#allocation3 + $0x700] ss:$16 sps:$4 sm:$0xff]  }
  0xde   :  { %10994 = vmatpush1.bf16.msra.mxu0 %v15543_v47  ;;  %12142 = vmatpush1.bf16.msra.mxu1 %v15546_v48  ;;  %v15638_v47 = vld [vmem:[#allocation3 + $0x708] ss:$16 sps:$4 sm:$0xff]   ;;  %v15643_v48 = vld [vmem:[#allocation3 + $0x724] ss:$16 sps:$4 sm:$0xff]  }
  0xdf   :  { %10995 = vmatprep.subr.bf16.mxu0 %v15551_v49  ;;  %12143 = vmatprep.subr.bf16.mxu1 %v15554_v50  ;;  %v15646_v49 = vld [vmem:[#allocation3 + $0x72c] ss:$16 sps:$4 sm:$0xff]   ;;  %v15641_v50 = vld [vmem:[#allocation3 + $0x720] ss:$16 sps:$4 sm:$0xff]  }
  0xe2   :  { %10996 = vmatpush1.bf16.msra.mxu0 %v15549_v51  ;;  %12144 = vmatpush1.bf16.msra.mxu1 %v15552_v52  ;;  %v15644_v51 = vld [vmem:[#allocation3 + $0x728] ss:$16 sps:$4 sm:$0xff]   ;;  %v15649_v52 = vld [vmem:[#allocation3 + $0x744] ss:$16 sps:$4 sm:$0xff]  }
  0xe3   :  { %10997 = vmatprep.subr.bf16.mxu0 %v15557_v53  ;;  %12145 = vmatprep.subr.bf16.mxu1 %v15560_v54  ;;  %v15652_v53 = vld [vmem:[#allocation3 + $0x74c] ss:$16 sps:$4 sm:$0xff]   ;;  %v15647_v54 = vld [vmem:[#allocation3 + $0x740] ss:$16 sps:$4 sm:$0xff]  }
  0xe6   :  { %10998 = vmatpush1.bf16.msra.mxu0 %v15555_v55  ;;  %12146 = vmatpush1.bf16.msra.mxu1 %v15558_v56  ;;  %v15650_v55 = vld [vmem:[#allocation3 + $0x748] ss:$16 sps:$4 sm:$0xff]   ;;  %v15655_v56 = vld [vmem:[#allocation3 + $0x764] ss:$16 sps:$4 sm:$0xff]  }
  0xe7   :  { %10999 = vmatprep.subr.bf16.mxu0 %v15563_v57  ;;  %12147 = vmatprep.subr.bf16.mxu1 %v15566_v58  ;;  %v15658_v57 = vld [vmem:[#allocation3 + $0x76c] ss:$16 sps:$4 sm:$0xff]   ;;  %v15653_v58 = vld [vmem:[#allocation3 + $0x760] ss:$16 sps:$4 sm:$0xff]  }
  0xea   :  { %11000 = vmatpush1.bf16.msra.mxu0 %v15561_v59  ;;  %12148 = vmatpush1.bf16.msra.mxu1 %v15564_v60  ;;  %v15656_v59 = vld [vmem:[#allocation3 + $0x768] ss:$16 sps:$4 sm:$0xff]   ;;  %v15661_v60 = vld [vmem:[#allocation3 + $0x784] ss:$16 sps:$4 sm:$0xff]  }
  0xeb   :  { %11001 = vmatprep.subr.bf16.mxu0 %v15569_v61  ;;  %12149 = vmatprep.subr.bf16.mxu1 %v15572_v62  ;;  %v15664_v61 = vld [vmem:[#allocation3 + $0x78c] ss:$16 sps:$4 sm:$0xff]   ;;  %v15659_v62 = vld [vmem:[#allocation3 + $0x780] ss:$16 sps:$4 sm:$0xff]  }
  0xee   :  { %11002 = vmatpush1.bf16.msra.mxu0 %v15567_v63  ;;  %12150 = vmatpush1.bf16.msra.mxu1 %v15570_v0  ;;  %v15662_v63 = vld [vmem:[#allocation3 + $0x788] ss:$16 sps:$4 sm:$0xff]   ;;  %v15667_v0 = vld [vmem:[#allocation3 + $0x7a4] ss:$16 sps:$4 sm:$0xff]  }
  0xef   :  { %11003 = vmatprep.subr.bf16.mxu0 %v15575_v1  ;;  %12151 = vmatprep.subr.bf16.mxu1 %v15578_v2  ;;  %v15670_v1 = vld [vmem:[#allocation3 + $0x7ac] ss:$16 sps:$4 sm:$0xff]   ;;  %v15665_v2 = vld [vmem:[#allocation3 + $0x7a0] ss:$16 sps:$4 sm:$0xff]  }
  0xf2   :  { %11004 = vmatpush1.bf16.msra.mxu0 %v15573_v3  ;;  %12152 = vmatpush1.bf16.msra.mxu1 %v15576_v4  ;;  %v15668_v3 = vld [vmem:[#allocation3 + $0x7a8] ss:$16 sps:$4 sm:$0xff]   ;;  %v15673_v4 = vld [vmem:[#allocation3 + $0x7c4] ss:$16 sps:$4 sm:$0xff]  }
  0xf3   :  { %11005 = vmatprep.subr.bf16.mxu0 %v15581_v5  ;;  %12153 = vmatprep.subr.bf16.mxu1 %v15584_v6  ;;  %v15676_v5 = vld [vmem:[#allocation3 + $0x7cc] ss:$16 sps:$4 sm:$0xff]   ;;  %v15671_v6 = vld [vmem:[#allocation3 + $0x7c0] ss:$16 sps:$4 sm:$0xff]  }
  0xf6   :  { %11006 = vmatpush1.bf16.msra.mxu0 %v15579_v7  ;;  %12154 = vmatpush1.bf16.msra.mxu1 %v15582_v8  ;;  %v15674_v7 = vld [vmem:[#allocation3 + $0x7c8] ss:$16 sps:$4 sm:$0xff]   ;;  %v15679_v8 = vld [vmem:[#allocation3 + $0x7e4] ss:$16 sps:$4 sm:$0xff]  }
  0xf7   :  { %11016 = vmatprep.subr.bf16.mxu0 %v15589_v9  ;;  %12164 = vmatprep.subr.bf16.mxu1 %v15592_v10  ;;  %v15682_v9 = vld [vmem:[#allocation3 + $0x7ec] ss:$16 sps:$4 sm:$0xff]   ;;  %v15677_v10 = vld [vmem:[#allocation3 + $0x7e0] ss:$16 sps:$4 sm:$0xff]  }
  0xf9   :  { %11008 = vmatmul.mubr.bf16.vlgmr.msra.gmra.mrb[0].mxu0 %v13249_v13  ;;  %12156 = vmatmul.mubr.bf16.vlgmr.msra.gmra.mrb[0].mxu1 %v13249_v13  ;;  %v15687_v13 = vld [vmem:[#allocation3 + $0x804] ss:$16 sps:$4 sm:$0xff]  }
  0xfa   :  { %11017 = vmatpush1.bf16.msra.mxu0 %v15587_v11  ;;  %12165 = vmatpush1.bf16.msra.mxu1 %v15590_v14  ;;  %v15680_v11 = vld [vmem:[#allocation3 + $0x7e8] ss:$16 sps:$4 sm:$0xff]   ;;  %v15690_v14 = vld [vmem:[#allocation3 + $0x80c] ss:$16 sps:$4 sm:$0xff]  }
  0xfb   :  { %11018 = vmatprep.subr.bf16.mxu0 %v15595_v16  ;;  %12166 = vmatprep.subr.bf16.mxu1 %v15598_v17  ;;  %v15685_v16 = vld [vmem:[#allocation3 + $0x800] ss:$16 sps:$4 sm:$0xff]   ;;  %v13251_v17 = vcombine.low %v18174_v15, %v18174_v15 }
  0xfc   :  { %11048 = vmatprep.mubr.bf16.mxu0 %v13252_v18  ;;  %12196 = vmatprep.mubr.bf16.mxu1 %v13252_v18  ;;  %v18183_v18 = vld [vmem:[%s18399_s0 + $0x20] sm:$0xff] }
  0xfd   :  { %v15691_v15 = vld [vmem:[#allocation3 + $0x820] ss:$16 sps:$4 sm:$0xff]  }
  0xfe   :  { %11019 = vmatpush1.bf16.msra.mxu0 %v15593_v19  ;;  %12167 = vmatpush1.bf16.msra.mxu1 %v15596_v20  ;;  %v15688_v19 = vld [vmem:[#allocation3 + $0x808] ss:$16 sps:$4 sm:$0xff]   ;;  %v15693_v20 = vld [vmem:[#allocation3 + $0x824] ss:$16 sps:$4 sm:$0xff]  }
  0xff   :  { %11020 = vmatprep.subr.bf16.mxu0 %v15601_v12  ;;  %12168 = vmatprep.subr.bf16.mxu1 %v15604_v21  ;;  %v15696_v12 = vld [vmem:[#allocation3 + $0x82c] ss:$16 sps:$4 sm:$0xff]   ;;  %v13254_v21 = vcombine.high %v18183_v18, %v18183_v18 }
 0x102   :  { %11021 = vmatpush1.bf16.msra.mxu0 %v15599_v22  ;;  %12169 = vmatpush1.bf16.msra.mxu1 %v15602_v23  ;;  %v15694_v22 = vld [vmem:[#allocation3 + $0x828] ss:$16 sps:$4 sm:$0xff]   ;;  %v15699_v23 = vld [vmem:[#allocation3 + $0x844] ss:$16 sps:$4 sm:$0xff]  }
 0x103   :  { %11022 = vmatprep.subr.bf16.mxu0 %v15607_v24  ;;  %12170 = vmatprep.subr.bf16.mxu1 %v15610_v25  ;;  %v15702_v24 = vld [vmem:[#allocation3 + $0x84c] ss:$16 sps:$4 sm:$0xff]   ;;  %v15697_v25 = vld [vmem:[#allocation3 + $0x840] ss:$16 sps:$4 sm:$0xff]  }
 0x106   :  { %11023 = vmatpush1.bf16.msra.mxu0 %v15605_v26  ;;  %12171 = vmatpush1.bf16.msra.mxu1 %v15608_v27  ;;  %v15700_v26 = vld [vmem:[#allocation3 + $0x848] ss:$16 sps:$4 sm:$0xff]   ;;  %v15705_v27 = vld [vmem:[#allocation3 + $0x864] ss:$16 sps:$4 sm:$0xff]  }
 0x107   :  { %11024 = vmatprep.subr.bf16.mxu0 %v15613_v28  ;;  %12172 = vmatprep.subr.bf16.mxu1 %v15616_v29  ;;  %v15708_v28 = vld [vmem:[#allocation3 + $0x86c] ss:$16 sps:$4 sm:$0xff]   ;;  %v15703_v29 = vld [vmem:[#allocation3 + $0x860] ss:$16 sps:$4 sm:$0xff]  }
 0x10a   :  { %11025 = vmatpush1.bf16.msra.mxu0 %v15611_v30  ;;  %12173 = vmatpush1.bf16.msra.mxu1 %v15614_v31  ;;  %v15706_v30 = vld [vmem:[#allocation3 + $0x868] ss:$16 sps:$4 sm:$0xff]   ;;  %v15711_v31 = vld [vmem:[#allocation3 + $0x884] ss:$16 sps:$4 sm:$0xff]  }
 0x10b   :  { %11026 = vmatprep.subr.bf16.mxu0 %v15619_v32  ;;  %12174 = vmatprep.subr.bf16.mxu1 %v15622_v33  ;;  %v15714_v32 = vld [vmem:[#allocation3 + $0x88c] ss:$16 sps:$4 sm:$0xff]   ;;  %v15709_v33 = vld [vmem:[#allocation3 + $0x880] ss:$16 sps:$4 sm:$0xff]  }
 0x10e   :  { %11027 = vmatpush1.bf16.msra.mxu0 %v15617_v34  ;;  %12175 = vmatpush1.bf16.msra.mxu1 %v15620_v35  ;;  %v15712_v34 = vld [vmem:[#allocation3 + $0x888] ss:$16 sps:$4 sm:$0xff]   ;;  %v15717_v35 = vld [vmem:[#allocation3 + $0x8a4] ss:$16 sps:$4 sm:$0xff]  }
 0x10f   :  { %11028 = vmatprep.subr.bf16.mxu0 %v15625_v36  ;;  %12176 = vmatprep.subr.bf16.mxu1 %v15628_v37  ;;  %v15720_v36 = vld [vmem:[#allocation3 + $0x8ac] ss:$16 sps:$4 sm:$0xff]   ;;  %v15715_v37 = vld [vmem:[#allocation3 + $0x8a0] ss:$16 sps:$4 sm:$0xff]  }
 0x112   :  { %11029 = vmatpush1.bf16.msra.mxu0 %v15623_v38  ;;  %12177 = vmatpush1.bf16.msra.mxu1 %v15626_v39  ;;  %v15718_v38 = vld [vmem:[#allocation3 + $0x8a8] ss:$16 sps:$4 sm:$0xff]   ;;  %v15723_v39 = vld [vmem:[#allocation3 + $0x8c4] ss:$16 sps:$4 sm:$0xff]  }
 0x113   :  { %11030 = vmatprep.subr.bf16.mxu0 %v15631_v40  ;;  %12178 = vmatprep.subr.bf16.mxu1 %v15634_v41  ;;  %v15726_v40 = vld [vmem:[#allocation3 + $0x8cc] ss:$16 sps:$4 sm:$0xff]   ;;  %v15721_v41 = vld [vmem:[#allocation3 + $0x8c0] ss:$16 sps:$4 sm:$0xff]  }
 0x116   :  { %11031 = vmatpush1.bf16.msra.mxu0 %v15629_v42  ;;  %12179 = vmatpush1.bf16.msra.mxu1 %v15632_v43  ;;  %v15724_v42 = vld [vmem:[#allocation3 + $0x8c8] ss:$16 sps:$4 sm:$0xff]   ;;  %v15729_v43 = vld [vmem:[#allocation3 + $0x8e4] ss:$16 sps:$4 sm:$0xff]  }
 0x117   :  { %11032 = vmatprep.subr.bf16.mxu0 %v15637_v44  ;;  %12180 = vmatprep.subr.bf16.mxu1 %v15640_v45  ;;  %v15732_v44 = vld [vmem:[#allocation3 + $0x8ec] ss:$16 sps:$4 sm:$0xff]   ;;  %v15727_v45 = vld [vmem:[#allocation3 + $0x8e0] ss:$16 sps:$4 sm:$0xff]  }
 0x11a   :  { %11033 = vmatpush1.bf16.msra.mxu0 %v15635_v46  ;;  %12181 = vmatpush1.bf16.msra.mxu1 %v15638_v47  ;;  %v15730_v46 = vld [vmem:[#allocation3 + $0x8e8] ss:$16 sps:$4 sm:$0xff]   ;;  %v15735_v47 = vld [vmem:[#allocation3 + $0x904] ss:$16 sps:$4 sm:$0xff]  }
 0x11b   :  { %11034 = vmatprep.subr.bf16.mxu0 %v15643_v48  ;;  %12182 = vmatprep.subr.bf16.mxu1 %v15646_v49  ;;  %v15738_v48 = vld [vmem:[#allocation3 + $0x90c] ss:$16 sps:$4 sm:$0xff]   ;;  %v15733_v49 = vld [vmem:[#allocation3 + $0x900] ss:$16 sps:$4 sm:$0xff]  }
 0x11e   :  { %11035 = vmatpush1.bf16.msra.mxu0 %v15641_v50  ;;  %12183 = vmatpush1.bf16.msra.mxu1 %v15644_v51  ;;  %v15736_v50 = vld [vmem:[#allocation3 + $0x908] ss:$16 sps:$4 sm:$0xff]   ;;  %v15741_v51 = vld [vmem:[#allocation3 + $0x924] ss:$16 sps:$4 sm:$0xff]  }
 0x11f   :  { %11036 = vmatprep.subr.bf16.mxu0 %v15649_v52  ;;  %12184 = vmatprep.subr.bf16.mxu1 %v15652_v53  ;;  %v15744_v52 = vld [vmem:[#allocation3 + $0x92c] ss:$16 sps:$4 sm:$0xff]   ;;  %v15739_v53 = vld [vmem:[#allocation3 + $0x920] ss:$16 sps:$4 sm:$0xff]  }
 0x122   :  { %11037 = vmatpush1.bf16.msra.mxu0 %v15647_v54  ;;  %12185 = vmatpush1.bf16.msra.mxu1 %v15650_v55  ;;  %v15742_v54 = vld [vmem:[#allocation3 + $0x928] ss:$16 sps:$4 sm:$0xff]   ;;  %v15747_v55 = vld [vmem:[#allocation3 + $0x944] ss:$16 sps:$4 sm:$0xff]  }
 0x123   :  { %11038 = vmatprep.subr.bf16.mxu0 %v15655_v56  ;;  %12186 = vmatprep.subr.bf16.mxu1 %v15658_v57  ;;  %v15750_v56 = vld [vmem:[#allocation3 + $0x94c] ss:$16 sps:$4 sm:$0xff]   ;;  %v15745_v57 = vld [vmem:[#allocation3 + $0x940] ss:$16 sps:$4 sm:$0xff]  }
 0x126   :  { %11039 = vmatpush1.bf16.msra.mxu0 %v15653_v58  ;;  %12187 = vmatpush1.bf16.msra.mxu1 %v15656_v59  ;;  %v15748_v58 = vld [vmem:[#allocation3 + $0x948] ss:$16 sps:$4 sm:$0xff]   ;;  %v15753_v59 = vld [vmem:[#allocation3 + $0x964] ss:$16 sps:$4 sm:$0xff]  }
 0x127   :  { %11040 = vmatprep.subr.bf16.mxu0 %v15661_v60  ;;  %12188 = vmatprep.subr.bf16.mxu1 %v15664_v61  ;;  %v15756_v60 = vld [vmem:[#allocation3 + $0x96c] ss:$16 sps:$4 sm:$0xff]   ;;  %v15751_v61 = vld [vmem:[#allocation3 + $0x960] ss:$16 sps:$4 sm:$0xff]  }
 0x12a   :  { %11041 = vmatpush1.bf16.msra.mxu0 %v15659_v62  ;;  %12189 = vmatpush1.bf16.msra.mxu1 %v15662_v63  ;;  %v15754_v62 = vld [vmem:[#allocation3 + $0x968] ss:$16 sps:$4 sm:$0xff]   ;;  %v15759_v63 = vld [vmem:[#allocation3 + $0x984] ss:$16 sps:$4 sm:$0xff]  }
 0x12b   :  { %11042 = vmatprep.subr.bf16.mxu0 %v15667_v0  ;;  %12190 = vmatprep.subr.bf16.mxu1 %v15670_v1  ;;  %v15762_v0 = vld [vmem:[#allocation3 + $0x98c] ss:$16 sps:$4 sm:$0xff]   ;;  %v15757_v1 = vld [vmem:[#allocation3 + $0x980] ss:$16 sps:$4 sm:$0xff]  }
 0x12e   :  { %11043 = vmatpush1.bf16.msra.mxu0 %v15665_v2  ;;  %12191 = vmatpush1.bf16.msra.mxu1 %v15668_v3  ;;  %v15760_v2 = vld [vmem:[#allocation3 + $0x988] ss:$16 sps:$4 sm:$0xff]   ;;  %v15765_v3 = vld [vmem:[#allocation3 + $0x9a4] ss:$16 sps:$4 sm:$0xff]  }
 0x12f   :  { %11044 = vmatprep.subr.bf16.mxu0 %v15673_v4  ;;  %12192 = vmatprep.subr.bf16.mxu1 %v15676_v5  ;;  %v15768_v4 = vld [vmem:[#allocation3 + $0x9ac] ss:$16 sps:$4 sm:$0xff]   ;;  %v15763_v5 = vld [vmem:[#allocation3 + $0x9a0] ss:$16 sps:$4 sm:$0xff]  }
 0x132   :  { %11045 = vmatpush1.bf16.msra.mxu0 %v15671_v6  ;;  %12193 = vmatpush1.bf16.msra.mxu1 %v15674_v7  ;;  %v15766_v6 = vld [vmem:[#allocation3 + $0x9a8] ss:$16 sps:$4 sm:$0xff]   ;;  %v15771_v7 = vld [vmem:[#allocation3 + $0x9c4] ss:$16 sps:$4 sm:$0xff]  }
 0x133   :  { %11046 = vmatprep.subr.bf16.mxu0 %v15679_v8  ;;  %12194 = vmatprep.subr.bf16.mxu1 %v15682_v9  ;;  %v15774_v8 = vld [vmem:[#allocation3 + $0x9cc] ss:$16 sps:$4 sm:$0xff]   ;;  %v15769_v9 = vld [vmem:[#allocation3 + $0x9c0] ss:$16 sps:$4 sm:$0xff]  }
 0x136   :  { %11047 = vmatpush1.bf16.msra.mxu0 %v15677_v10  ;;  %12195 = vmatpush1.bf16.msra.mxu1 %v15680_v11  ;;  %v15772_v10 = vld [vmem:[#allocation3 + $0x9c8] ss:$16 sps:$4 sm:$0xff]   ;;  %v15777_v11 = vld [vmem:[#allocation3 + $0x9e4] ss:$16 sps:$4 sm:$0xff]  }
 0x137   :  { %11057 = vmatprep.subr.bf16.mxu0 %v15687_v13  ;;  %12205 = vmatprep.subr.bf16.mxu1 %v15690_v14  ;;  %v15780_v13 = vld [vmem:[#allocation3 + $0x9ec] ss:$16 sps:$4 sm:$0xff]   ;;  %v15775_v14 = vld [vmem:[#allocation3 + $0x9e0] ss:$16 sps:$4 sm:$0xff]  }
 0x139   :  { %11049 = vmatmul.mubr.bf16.vlgmr.msra.gmra.mrb[0].mxu0 %v13251_v17  ;;  %12197 = vmatmul.mubr.bf16.vlgmr.msra.gmra.mrb[0].mxu1 %v13251_v17  ;;  %v15785_v17 = vld [vmem:[#allocation3 + $0xa04] ss:$16 sps:$4 sm:$0xff]  }
 0x13a   :  { %11058 = vmatpush1.bf16.msra.mxu0 %v15685_v16  ;;  %12206 = vmatpush1.bf16.msra.mxu1 %v15688_v19  ;;  %v15778_v16 = vld [vmem:[#allocation3 + $0x9e8] ss:$16 sps:$4 sm:$0xff]   ;;  %v15788_v19 = vld [vmem:[#allocation3 + $0xa0c] ss:$16 sps:$4 sm:$0xff]  }
 0x13b   :  { %11059 = vmatprep.subr.bf16.mxu0 %v15693_v20  ;;  %12207 = vmatprep.subr.bf16.mxu1 %v15696_v12  ;;  %v18190_v20 = vld [vmem:[%s18399_s0 + $0x28] sm:$0xff]  ;;  %v13253_v12 = vcombine.low %v18183_v18, %v18183_v18 }
 0x13c   :  { %11089 = vmatprep.mubr.bf16.mxu0 %v13254_v21  ;;  %12237 = vmatprep.mubr.bf16.mxu1 %v13254_v21  ;;  %v15783_v21 = vld [vmem:[#allocation3 + $0xa00] ss:$16 sps:$4 sm:$0xff]   ;;  %v15797_v18 = vld [vmem:[#allocation3 + $0xa44] ss:$16 sps:$4 sm:$0xff]  }
 0x13e   :  { %11060 = vmatpush1.bf16.msra.mxu0 %v15691_v15  ;;  %12208 = vmatpush1.bf16.msra.mxu1 %v15694_v22  ;;  %v15786_v15 = vld [vmem:[#allocation3 + $0xa08] ss:$16 sps:$4 sm:$0xff]   ;;  %v15791_v22 = vld [vmem:[#allocation3 + $0xa24] ss:$16 sps:$4 sm:$0xff]  }
 0x13f   :  { %11061 = vmatprep.subr.bf16.mxu0 %v15699_v23  ;;  %12209 = vmatprep.subr.bf16.mxu1 %v15702_v24  ;;  %v15794_v23 = vld [vmem:[#allocation3 + $0xa2c] ss:$16 sps:$4 sm:$0xff]   ;;  %v13256_v24 = vcombine.high %v18190_v20, %v18190_v20 }
 0x142   :  { %11062 = vmatpush1.bf16.msra.mxu0 %v15697_v25  ;;  %12210 = vmatpush1.bf16.msra.mxu1 %v15700_v26  ;;  %v15789_v25 = vld [vmem:[#allocation3 + $0xa20] ss:$16 sps:$4 sm:$0xff]   ;;  %v15792_v26 = vld [vmem:[#allocation3 + $0xa28] ss:$16 sps:$4 sm:$0xff]  }
 0x143   :  { %11063 = vmatprep.subr.bf16.mxu0 %v15705_v27  ;;  %12211 = vmatprep.subr.bf16.mxu1 %v15708_v28  ;;  %v15800_v27 = vld [vmem:[#allocation3 + $0xa4c] ss:$16 sps:$4 sm:$0xff]   ;;  %v15795_v28 = vld [vmem:[#allocation3 + $0xa40] ss:$16 sps:$4 sm:$0xff]  }
 0x146   :  { %11064 = vmatpush1.bf16.msra.mxu0 %v15703_v29  ;;  %12212 = vmatpush1.bf16.msra.mxu1 %v15706_v30  ;;  %v15798_v29 = vld [vmem:[#allocation3 + $0xa48] ss:$16 sps:$4 sm:$0xff]   ;;  %v15803_v30 = vld [vmem:[#allocation3 + $0xa64] ss:$16 sps:$4 sm:$0xff]  }
 0x147   :  { %11065 = vmatprep.subr.bf16.mxu0 %v15711_v31  ;;  %12213 = vmatprep.subr.bf16.mxu1 %v15714_v32  ;;  %v15806_v31 = vld [vmem:[#allocation3 + $0xa6c] ss:$16 sps:$4 sm:$0xff]   ;;  %v15801_v32 = vld [vmem:[#allocation3 + $0xa60] ss:$16 sps:$4 sm:$0xff]  }
 0x14a   :  { %11066 = vmatpush1.bf16.msra.mxu0 %v15709_v33  ;;  %12214 = vmatpush1.bf16.msra.mxu1 %v15712_v34  ;;  %v15804_v33 = vld [vmem:[#allocation3 + $0xa68] ss:$16 sps:$4 sm:$0xff]   ;;  %v15809_v34 = vld [vmem:[#allocation3 + $0xa84] ss:$16 sps:$4 sm:$0xff]  }
 0x14b   :  { %11067 = vmatprep.subr.bf16.mxu0 %v15717_v35  ;;  %12215 = vmatprep.subr.bf16.mxu1 %v15720_v36  ;;  %v15812_v35 = vld [vmem:[#allocation3 + $0xa8c] ss:$16 sps:$4 sm:$0xff]   ;;  %v15807_v36 = vld [vmem:[#allocation3 + $0xa80] ss:$16 sps:$4 sm:$0xff]  }
 0x14e   :  { %11068 = vmatpush1.bf16.msra.mxu0 %v15715_v37  ;;  %12216 = vmatpush1.bf16.msra.mxu1 %v15718_v38  ;;  %v15810_v37 = vld [vmem:[#allocation3 + $0xa88] ss:$16 sps:$4 sm:$0xff]   ;;  %v15815_v38 = vld [vmem:[#allocation3 + $0xaa4] ss:$16 sps:$4 sm:$0xff]  }
 0x14f   :  { %11069 = vmatprep.subr.bf16.mxu0 %v15723_v39  ;;  %12217 = vmatprep.subr.bf16.mxu1 %v15726_v40  ;;  %v15818_v39 = vld [vmem:[#allocation3 + $0xaac] ss:$16 sps:$4 sm:$0xff]   ;;  %v15813_v40 = vld [vmem:[#allocation3 + $0xaa0] ss:$16 sps:$4 sm:$0xff]  }
 0x152   :  { %11070 = vmatpush1.bf16.msra.mxu0 %v15721_v41  ;;  %12218 = vmatpush1.bf16.msra.mxu1 %v15724_v42  ;;  %v15816_v41 = vld [vmem:[#allocation3 + $0xaa8] ss:$16 sps:$4 sm:$0xff]   ;;  %v15821_v42 = vld [vmem:[#allocation3 + $0xac4] ss:$16 sps:$4 sm:$0xff]  }
 0x153   :  { %11071 = vmatprep.subr.bf16.mxu0 %v15729_v43  ;;  %12219 = vmatprep.subr.bf16.mxu1 %v15732_v44  ;;  %v15824_v43 = vld [vmem:[#allocation3 + $0xacc] ss:$16 sps:$4 sm:$0xff]   ;;  %v15819_v44 = vld [vmem:[#allocation3 + $0xac0] ss:$16 sps:$4 sm:$0xff]  }
 0x156   :  { %11072 = vmatpush1.bf16.msra.mxu0 %v15727_v45  ;;  %12220 = vmatpush1.bf16.msra.mxu1 %v15730_v46  ;;  %v15822_v45 = vld [vmem:[#allocation3 + $0xac8] ss:$16 sps:$4 sm:$0xff]   ;;  %v15827_v46 = vld [vmem:[#allocation3 + $0xae4] ss:$16 sps:$4 sm:$0xff]  }
 0x157   :  { %11073 = vmatprep.subr.bf16.mxu0 %v15735_v47  ;;  %12221 = vmatprep.subr.bf16.mxu1 %v15738_v48  ;;  %v15830_v47 = vld [vmem:[#allocation3 + $0xaec] ss:$16 sps:$4 sm:$0xff]   ;;  %v15825_v48 = vld [vmem:[#allocation3 + $0xae0] ss:$16 sps:$4 sm:$0xff]  }
 0x15a   :  { %11074 = vmatpush1.bf16.msra.mxu0 %v15733_v49  ;;  %12222 = vmatpush1.bf16.msra.mxu1 %v15736_v50  ;;  %v15828_v49 = vld [vmem:[#allocation3 + $0xae8] ss:$16 sps:$4 sm:$0xff]   ;;  %v15833_v50 = vld [vmem:[#allocation3 + $0xb04] ss:$16 sps:$4 sm:$0xff]  }
 0x15b   :  { %11075 = vmatprep.subr.bf16.mxu0 %v15741_v51  ;;  %12223 = vmatprep.subr.bf16.mxu1 %v15744_v52  ;;  %v15836_v51 = vld [vmem:[#allocation3 + $0xb0c] ss:$16 sps:$4 sm:$0xff]   ;;  %v15831_v52 = vld [vmem:[#allocation3 + $0xb00] ss:$16 sps:$4 sm:$0xff]  }
 0x15e   :  { %11076 = vmatpush1.bf16.msra.mxu0 %v15739_v53  ;;  %12224 = vmatpush1.bf16.msra.mxu1 %v15742_v54  ;;  %v15834_v53 = vld [vmem:[#allocation3 + $0xb08] ss:$16 sps:$4 sm:$0xff]   ;;  %v15839_v54 = vld [vmem:[#allocation3 + $0xb24] ss:$16 sps:$4 sm:$0xff]  }
 0x15f   :  { %11077 = vmatprep.subr.bf16.mxu0 %v15747_v55  ;;  %12225 = vmatprep.subr.bf16.mxu1 %v15750_v56  ;;  %v15842_v55 = vld [vmem:[#allocation3 + $0xb2c] ss:$16 sps:$4 sm:$0xff]   ;;  %v15837_v56 = vld [vmem:[#allocation3 + $0xb20] ss:$16 sps:$4 sm:$0xff]  }
 0x162   :  { %11078 = vmatpush1.bf16.msra.mxu0 %v15745_v57  ;;  %12226 = vmatpush1.bf16.msra.mxu1 %v15748_v58  ;;  %v15840_v57 = vld [vmem:[#allocation3 + $0xb28] ss:$16 sps:$4 sm:$0xff]   ;;  %v15845_v58 = vld [vmem:[#allocation3 + $0xb44] ss:$16 sps:$4 sm:$0xff]  }
 0x163   :  { %11079 = vmatprep.subr.bf16.mxu0 %v15753_v59  ;;  %12227 = vmatprep.subr.bf16.mxu1 %v15756_v60  ;;  %v15848_v59 = vld [vmem:[#allocation3 + $0xb4c] ss:$16 sps:$4 sm:$0xff]   ;;  %v15843_v60 = vld [vmem:[#allocation3 + $0xb40] ss:$16 sps:$4 sm:$0xff]  }
 0x166   :  { %11080 = vmatpush1.bf16.msra.mxu0 %v15751_v61  ;;  %12228 = vmatpush1.bf16.msra.mxu1 %v15754_v62  ;;  %v15846_v61 = vld [vmem:[#allocation3 + $0xb48] ss:$16 sps:$4 sm:$0xff]   ;;  %v15851_v62 = vld [vmem:[#allocation3 + $0xb64] ss:$16 sps:$4 sm:$0xff]  }
 0x167   :  { %11081 = vmatprep.subr.bf16.mxu0 %v15759_v63  ;;  %12229 = vmatprep.subr.bf16.mxu1 %v15762_v0  ;;  %v15854_v63 = vld [vmem:[#allocation3 + $0xb6c] ss:$16 sps:$4 sm:$0xff]   ;;  %v15849_v0 = vld [vmem:[#allocation3 + $0xb60] ss:$16 sps:$4 sm:$0xff]  }
 0x16a   :  { %11082 = vmatpush1.bf16.msra.mxu0 %v15757_v1  ;;  %12230 = vmatpush1.bf16.msra.mxu1 %v15760_v2  ;;  %v15852_v1 = vld [vmem:[#allocation3 + $0xb68] ss:$16 sps:$4 sm:$0xff]   ;;  %v15857_v2 = vld [vmem:[#allocation3 + $0xb84] ss:$16 sps:$4 sm:$0xff]  }
 0x16b   :  { %11083 = vmatprep.subr.bf16.mxu0 %v15765_v3  ;;  %12231 = vmatprep.subr.bf16.mxu1 %v15768_v4  ;;  %v15860_v3 = vld [vmem:[#allocation3 + $0xb8c] ss:$16 sps:$4 sm:$0xff]   ;;  %v15855_v4 = vld [vmem:[#allocation3 + $0xb80] ss:$16 sps:$4 sm:$0xff]  }
 0x16e   :  { %11084 = vmatpush1.bf16.msra.mxu0 %v15763_v5  ;;  %12232 = vmatpush1.bf16.msra.mxu1 %v15766_v6  ;;  %v15858_v5 = vld [vmem:[#allocation3 + $0xb88] ss:$16 sps:$4 sm:$0xff]   ;;  %v15863_v6 = vld [vmem:[#allocation3 + $0xba4] ss:$16 sps:$4 sm:$0xff]  }
 0x16f   :  { %11085 = vmatprep.subr.bf16.mxu0 %v15771_v7  ;;  %12233 = vmatprep.subr.bf16.mxu1 %v15774_v8  ;;  %v15866_v7 = vld [vmem:[#allocation3 + $0xbac] ss:$16 sps:$4 sm:$0xff]   ;;  %v15861_v8 = vld [vmem:[#allocation3 + $0xba0] ss:$16 sps:$4 sm:$0xff]  }
 0x172   :  { %11086 = vmatpush1.bf16.msra.mxu0 %v15769_v9  ;;  %12234 = vmatpush1.bf16.msra.mxu1 %v15772_v10  ;;  %v15864_v9 = vld [vmem:[#allocation3 + $0xba8] ss:$16 sps:$4 sm:$0xff]   ;;  %v15869_v10 = vld [vmem:[#allocation3 + $0xbc4] ss:$16 sps:$4 sm:$0xff]  }
 0x173   :  { %11087 = vmatprep.subr.bf16.mxu0 %v15777_v11  ;;  %12235 = vmatprep.subr.bf16.mxu1 %v15780_v13  ;;  %v15872_v11 = vld [vmem:[#allocation3 + $0xbcc] ss:$16 sps:$4 sm:$0xff]   ;;  %v15867_v13 = vld [vmem:[#allocation3 + $0xbc0] ss:$16 sps:$4 sm:$0xff]  }
 0x176   :  { %11088 = vmatpush1.bf16.msra.mxu0 %v15775_v14  ;;  %12236 = vmatpush1.bf16.msra.mxu1 %v15778_v16  ;;  %v15870_v14 = vld [vmem:[#allocation3 + $0xbc8] ss:$16 sps:$4 sm:$0xff]   ;;  %v15875_v16 = vld [vmem:[#allocation3 + $0xbe4] ss:$16 sps:$4 sm:$0xff]  }
 0x177   :  { %11098 = vmatprep.subr.bf16.mxu0 %v15785_v17  ;;  %12246 = vmatprep.subr.bf16.mxu1 %v15788_v19  ;;  %v15878_v17 = vld [vmem:[#allocation3 + $0xbec] ss:$16 sps:$4 sm:$0xff]   ;;  %v15873_v19 = vld [vmem:[#allocation3 + $0xbe0] ss:$16 sps:$4 sm:$0xff]  }
 0x179   :  { %11090 = vmatmul.mubr.bf16.vlgmr.msra.gmra.mrb[0].mxu0 %v13253_v12  ;;  %12238 = vmatmul.mubr.bf16.vlgmr.msra.gmra.mrb[0].mxu1 %v13253_v12  ;;  %v15876_v12 = vld [vmem:[#allocation3 + $0xbe8] ss:$16 sps:$4 sm:$0xff]  }
 0x17a   :  { %11099 = vmatpush1.bf16.msra.mxu0 %v15783_v21  ;;  %12247 = vmatpush1.bf16.msra.mxu1 %v15786_v15  ;;  %v15883_v21 = vld [vmem:[#allocation3 + $0xc04] ss:$16 sps:$4 sm:$0xff]   ;;  %v15886_v15 = vld [vmem:[#allocation3 + $0xc0c] ss:$16 sps:$4 sm:$0xff]  }
 0x17b   :  { %11100 = vmatprep.subr.bf16.mxu0 %v15791_v22  ;;  %12248 = vmatprep.subr.bf16.mxu1 %v15794_v23  ;;  %v18199_v22 = vld [vmem:[%s18399_s0 + $0x30] sm:$0xff]  ;;  %v13255_v23 = vcombine.low %v18190_v20, %v18190_v20 }
 0x17c   :  { %11130 = vmatprep.mubr.bf16.mxu0 %v13256_v24  ;;  %12278 = vmatprep.mubr.bf16.mxu1 %v13256_v24  ;;  %v15881_v24 = vld [vmem:[#allocation3 + $0xc00] ss:$16 sps:$4 sm:$0xff]   ;;  %v15895_v20 = vld [vmem:[#allocation3 + $0xc44] ss:$16 sps:$4 sm:$0xff]  }
 0x17e   :  { %11101 = vmatpush1.bf16.msra.mxu0 %v15789_v25  ;;  %12249 = vmatpush1.bf16.msra.mxu1 %v15792_v26  ;;  %v15884_v25 = vld [vmem:[#allocation3 + $0xc08] ss:$16 sps:$4 sm:$0xff]   ;;  %v15889_v26 = vld [vmem:[#allocation3 + $0xc24] ss:$16 sps:$4 sm:$0xff]  }
 0x17f   :  { %11102 = vmatprep.subr.bf16.mxu0 %v15797_v18  ;;  %12250 = vmatprep.subr.bf16.mxu1 %v15800_v27  ;;  %v15892_v18 = vld [vmem:[#allocation3 + $0xc2c] ss:$16 sps:$4 sm:$0xff]   ;;  %v13258_v27 = vcombine.high %v18199_v22, %v18199_v22 }
 0x182   :  { %11103 = vmatpush1.bf16.msra.mxu0 %v15795_v28  ;;  %12251 = vmatpush1.bf16.msra.mxu1 %v15798_v29  ;;  %v15887_v28 = vld [vmem:[#allocation3 + $0xc20] ss:$16 sps:$4 sm:$0xff]   ;;  %v15890_v29 = vld [vmem:[#allocation3 + $0xc28] ss:$16 sps:$4 sm:$0xff]  }
 0x183   :  { %11104 = vmatprep.subr.bf16.mxu0 %v15803_v30  ;;  %12252 = vmatprep.subr.bf16.mxu1 %v15806_v31  ;;  %v15898_v30 = vld [vmem:[#allocation3 + $0xc4c] ss:$16 sps:$4 sm:$0xff]   ;;  %v15893_v31 = vld [vmem:[#allocation3 + $0xc40] ss:$16 sps:$4 sm:$0xff]  }
 0x186   :  { %11105 = vmatpush1.bf16.msra.mxu0 %v15801_v32  ;;  %12253 = vmatpush1.bf16.msra.mxu1 %v15804_v33  ;;  %v15896_v32 = vld [vmem:[#allocation3 + $0xc48] ss:$16 sps:$4 sm:$0xff]   ;;  %v15901_v33 = vld [vmem:[#allocation3 + $0xc64] ss:$16 sps:$4 sm:$0xff]  }
 0x187   :  { %11106 = vmatprep.subr.bf16.mxu0 %v15809_v34  ;;  %12254 = vmatprep.subr.bf16.mxu1 %v15812_v35  ;;  %v15904_v34 = vld [vmem:[#allocation3 + $0xc6c] ss:$16 sps:$4 sm:$0xff]   ;;  %v15899_v35 = vld [vmem:[#allocation3 + $0xc60] ss:$16 sps:$4 sm:$0xff]  }
 0x18a   :  { %11107 = vmatpush1.bf16.msra.mxu0 %v15807_v36  ;;  %12255 = vmatpush1.bf16.msra.mxu1 %v15810_v37  ;;  %v15902_v36 = vld [vmem:[#allocation3 + $0xc68] ss:$16 sps:$4 sm:$0xff]   ;;  %v15907_v37 = vld [vmem:[#allocation3 + $0xc84] ss:$16 sps:$4 sm:$0xff]  }
 0x18b   :  { %11108 = vmatprep.subr.bf16.mxu0 %v15815_v38  ;;  %12256 = vmatprep.subr.bf16.mxu1 %v15818_v39  ;;  %v15910_v38 = vld [vmem:[#allocation3 + $0xc8c] ss:$16 sps:$4 sm:$0xff]   ;;  %v15905_v39 = vld [vmem:[#allocation3 + $0xc80] ss:$16 sps:$4 sm:$0xff]  }
 0x18e   :  { %11109 = vmatpush1.bf16.msra.mxu0 %v15813_v40  ;;  %12257 = vmatpush1.bf16.msra.mxu1 %v15816_v41  ;;  %v15908_v40 = vld [vmem:[#allocation3 + $0xc88] ss:$16 sps:$4 sm:$0xff]   ;;  %v15913_v41 = vld [vmem:[#allocation3 + $0xca4] ss:$16 sps:$4 sm:$0xff]  }
 0x18f   :  { %11110 = vmatprep.subr.bf16.mxu0 %v15821_v42  ;;  %12258 = vmatprep.subr.bf16.mxu1 %v15824_v43  ;;  %v15916_v42 = vld [vmem:[#allocation3 + $0xcac] ss:$16 sps:$4 sm:$0xff]   ;;  %v15911_v43 = vld [vmem:[#allocation3 + $0xca0] ss:$16 sps:$4 sm:$0xff]  }
 0x192   :  { %11111 = vmatpush1.bf16.msra.mxu0 %v15819_v44  ;;  %12259 = vmatpush1.bf16.msra.mxu1 %v15822_v45  ;;  %v15914_v44 = vld [vmem:[#allocation3 + $0xca8] ss:$16 sps:$4 sm:$0xff]   ;;  %v15919_v45 = vld [vmem:[#allocation3 + $0xcc4] ss:$16 sps:$4 sm:$0xff]  }
 0x193   :  { %11112 = vmatprep.subr.bf16.mxu0 %v15827_v46  ;;  %12260 = vmatprep.subr.bf16.mxu1 %v15830_v47  ;;  %v15922_v46 = vld [vmem:[#allocation3 + $0xccc] ss:$16 sps:$4 sm:$0xff]   ;;  %v15917_v47 = vld [vmem:[#allocation3 + $0xcc0] ss:$16 sps:$4 sm:$0xff]  }
 0x196   :  { %11113 = vmatpush1.bf16.msra.mxu0 %v15825_v48  ;;  %12261 = vmatpush1.bf16.msra.mxu1 %v15828_v49  ;;  %v15920_v48 = vld [vmem:[#allocation3 + $0xcc8] ss:$16 sps:$4 sm:$0xff]   ;;  %v15925_v49 = vld [vmem:[#allocation3 + $0xce4] ss:$16 sps:$4 sm:$0xff]  }
 0x197   :  { %11114 = vmatprep.subr.bf16.mxu0 %v15833_v50  ;;  %12262 = vmatprep.subr.bf16.mxu1 %v15836_v51  ;;  %v15928_v50 = vld [vmem:[#allocation3 + $0xcec] ss:$16 sps:$4 sm:$0xff]   ;;  %v15923_v51 = vld [vmem:[#allocation3 + $0xce0] ss:$16 sps:$4 sm:$0xff]  }
 0x19a   :  { %11115 = vmatpush1.bf16.msra.mxu0 %v15831_v52  ;;  %12263 = vmatpush1.bf16.msra.mxu1 %v15834_v53  ;;  %v15926_v52 = vld [vmem:[#allocation3 + $0xce8] ss:$16 sps:$4 sm:$0xff]   ;;  %v15931_v53 = vld [vmem:[#allocation3 + $0xd04] ss:$16 sps:$4 sm:$0xff]  }
 0x19b   :  { %11116 = vmatprep.subr.bf16.mxu0 %v15839_v54  ;;  %12264 = vmatprep.subr.bf16.mxu1 %v15842_v55  ;;  %v15934_v54 = vld [vmem:[#allocation3 + $0xd0c] ss:$16 sps:$4 sm:$0xff]   ;;  %v15929_v55 = vld [vmem:[#allocation3 + $0xd00] ss:$16 sps:$4 sm:$0xff]  }
 0x19e   :  { %11117 = vmatpush1.bf16.msra.mxu0 %v15837_v56  ;;  %12265 = vmatpush1.bf16.msra.mxu1 %v15840_v57  ;;  %v15932_v56 = vld [vmem:[#allocation3 + $0xd08] ss:$16 sps:$4 sm:$0xff]   ;;  %v15937_v57 = vld [vmem:[#allocation3 + $0xd24] ss:$16 sps:$4 sm:$0xff]  }
 0x19f   :  { %11118 = vmatprep.subr.bf16.mxu0 %v15845_v58  ;;  %12266 = vmatprep.subr.bf16.mxu1 %v15848_v59  ;;  %v15940_v58 = vld [vmem:[#allocation3 + $0xd2c] ss:$16 sps:$4 sm:$0xff]   ;;  %v15935_v59 = vld [vmem:[#allocation3 + $0xd20] ss:$16 sps:$4 sm:$0xff]  }
 0x1a2   :  { %11119 = vmatpush1.bf16.msra.mxu0 %v15843_v60  ;;  %12267 = vmatpush1.bf16.msra.mxu1 %v15846_v61  ;;  %v15938_v60 = vld [vmem:[#allocation3 + $0xd28] ss:$16 sps:$4 sm:$0xff]   ;;  %v15943_v61 = vld [vmem:[#allocation3 + $0xd44] ss:$16 sps:$4 sm:$0xff]  }
 0x1a3   :  { %11120 = vmatprep.subr.bf16.mxu0 %v15851_v62  ;;  %12268 = vmatprep.subr.bf16.mxu1 %v15854_v63  ;;  %v15946_v62 = vld [vmem:[#allocation3 + $0xd4c] ss:$16 sps:$4 sm:$0xff]   ;;  %v15941_v63 = vld [vmem:[#allocation3 + $0xd40] ss:$16 sps:$4 sm:$0xff]  }
 0x1a6   :  { %11121 = vmatpush1.bf16.msra.mxu0 %v15849_v0  ;;  %12269 = vmatpush1.bf16.msra.mxu1 %v15852_v1  ;;  %v15944_v0 = vld [vmem:[#allocation3 + $0xd48] ss:$16 sps:$4 sm:$0xff]   ;;  %v15949_v1 = vld [vmem:[#allocation3 + $0xd64] ss:$16 sps:$4 sm:$0xff]  }
 0x1a7   :  { %11122 = vmatprep.subr.bf16.mxu0 %v15857_v2  ;;  %12270 = vmatprep.subr.bf16.mxu1 %v15860_v3  ;;  %v15952_v2 = vld [vmem:[#allocation3 + $0xd6c] ss:$16 sps:$4 sm:$0xff]   ;;  %v15947_v3 = vld [vmem:[#allocation3 + $0xd60] ss:$16 sps:$4 sm:$0xff]  }
 0x1aa   :  { %11123 = vmatpush1.bf16.msra.mxu0 %v15855_v4  ;;  %12271 = vmatpush1.bf16.msra.mxu1 %v15858_v5  ;;  %v15950_v4 = vld [vmem:[#allocation3 + $0xd68] ss:$16 sps:$4 sm:$0xff]   ;;  %v15955_v5 = vld [vmem:[#allocation3 + $0xd84] ss:$16 sps:$4 sm:$0xff]  }
 0x1ab   :  { %11124 = vmatprep.subr.bf16.mxu0 %v15863_v6  ;;  %12272 = vmatprep.subr.bf16.mxu1 %v15866_v7  ;;  %v15958_v6 = vld [vmem:[#allocation3 + $0xd8c] ss:$16 sps:$4 sm:$0xff]   ;;  %v15953_v7 = vld [vmem:[#allocation3 + $0xd80] ss:$16 sps:$4 sm:$0xff]  }
 0x1ae   :  { %11125 = vmatpush1.bf16.msra.mxu0 %v15861_v8  ;;  %12273 = vmatpush1.bf16.msra.mxu1 %v15864_v9  ;;  %v15956_v8 = vld [vmem:[#allocation3 + $0xd88] ss:$16 sps:$4 sm:$0xff]   ;;  %v15961_v9 = vld [vmem:[#allocation3 + $0xda4] ss:$16 sps:$4 sm:$0xff]  }
 0x1af   :  { %11126 = vmatprep.subr.bf16.mxu0 %v15869_v10  ;;  %12274 = vmatprep.subr.bf16.mxu1 %v15872_v11  ;;  %v15964_v10 = vld [vmem:[#allocation3 + $0xdac] ss:$16 sps:$4 sm:$0xff]   ;;  %v15959_v11 = vld [vmem:[#allocation3 + $0xda0] ss:$16 sps:$4 sm:$0xff]  }
 0x1b2   :  { %11127 = vmatpush1.bf16.msra.mxu0 %v15867_v13  ;;  %12275 = vmatpush1.bf16.msra.mxu1 %v15870_v14  ;;  %v15962_v13 = vld [vmem:[#allocation3 + $0xda8] ss:$16 sps:$4 sm:$0xff]   ;;  %v15967_v14 = vld [vmem:[#allocation3 + $0xdc4] ss:$16 sps:$4 sm:$0xff]  }
 0x1b3   :  { %11128 = vmatprep.subr.bf16.mxu0 %v15875_v16  ;;  %12276 = vmatprep.subr.bf16.mxu1 %v15878_v17  ;;  %v15970_v16 = vld [vmem:[#allocation3 + $0xdcc] ss:$16 sps:$4 sm:$0xff]   ;;  %v15965_v17 = vld [vmem:[#allocation3 + $0xdc0] ss:$16 sps:$4 sm:$0xff]  }
 0x1b6   :  { %11129 = vmatpush1.bf16.msra.mxu0 %v15873_v19  ;;  %12277 = vmatpush1.bf16.msra.mxu1 %v15876_v12  ;;  %v15968_v19 = vld [vmem:[#allocation3 + $0xdc8] ss:$16 sps:$4 sm:$0xff]   ;;  %v15973_v12 = vld [vmem:[#allocation3 + $0xde4] ss:$16 sps:$4 sm:$0xff]  }
 0x1b7   :  { %11139 = vmatprep.subr.bf16.mxu0 %v15883_v21  ;;  %12287 = vmatprep.subr.bf16.mxu1 %v15886_v15  ;;  %v15976_v21 = vld [vmem:[#allocation3 + $0xdec] ss:$16 sps:$4 sm:$0xff]   ;;  %v15971_v15 = vld [vmem:[#allocation3 + $0xde0] ss:$16 sps:$4 sm:$0xff]  }
 0x1b9   :  { %11131 = vmatmul.mubr.bf16.vlgmr.msra.gmra.mrb[0].mxu0 %v13255_v23  ;;  %12279 = vmatmul.mubr.bf16.vlgmr.msra.gmra.mrb[0].mxu1 %v13255_v23  ;;  %v15974_v23 = vld [vmem:[#allocation3 + $0xde8] ss:$16 sps:$4 sm:$0xff]  }
 0x1ba   :  { %11140 = vmatpush1.bf16.msra.mxu0 %v15881_v24  ;;  %12288 = vmatpush1.bf16.msra.mxu1 %v15884_v25  ;;  %v15981_v24 = vld [vmem:[#allocation3 + $0xe04] ss:$16 sps:$4 sm:$0xff]   ;;  %v15984_v25 = vld [vmem:[#allocation3 + $0xe0c] ss:$16 sps:$4 sm:$0xff]  }
 0x1bb   :  { %11141 = vmatprep.subr.bf16.mxu0 %v15889_v26  ;;  %12289 = vmatprep.subr.bf16.mxu1 %v15892_v18  ;;  %v18208_v26 = vld [vmem:[%s18399_s0 + $0x38] sm:$0xff]  ;;  %v13257_v18 = vcombine.low %v18199_v22, %v18199_v22 }
 0x1bc   :  { %11171 = vmatprep.mubr.bf16.mxu0 %v13258_v27  ;;  %12319 = vmatprep.mubr.bf16.mxu1 %v13258_v27  ;;  %v15979_v27 = vld [vmem:[#allocation3 + $0xe00] ss:$16 sps:$4 sm:$0xff]   ;;  %v15993_v22 = vld [vmem:[#allocation3 + $0xe44] ss:$16 sps:$4 sm:$0xff]  }
 0x1be   :  { %11142 = vmatpush1.bf16.msra.mxu0 %v15887_v28  ;;  %12290 = vmatpush1.bf16.msra.mxu1 %v15890_v29  ;;  %v15982_v28 = vld [vmem:[#allocation3 + $0xe08] ss:$16 sps:$4 sm:$0xff]   ;;  %v15987_v29 = vld [vmem:[#allocation3 + $0xe24] ss:$16 sps:$4 sm:$0xff]  }
 0x1bf   :  { %11143 = vmatprep.subr.bf16.mxu0 %v15895_v20  ;;  %12291 = vmatprep.subr.bf16.mxu1 %v15898_v30  ;;  %v15990_v20 = vld [vmem:[#allocation3 + $0xe2c] ss:$16 sps:$4 sm:$0xff]   ;;  %v13260_v30 = vcombine.high %v18208_v26, %v18208_v26 }
 0x1c2   :  { %11144 = vmatpush1.bf16.msra.mxu0 %v15893_v31  ;;  %12292 = vmatpush1.bf16.msra.mxu1 %v15896_v32  ;;  %v15985_v31 = vld [vmem:[#allocation3 + $0xe20] ss:$16 sps:$4 sm:$0xff]   ;;  %v15988_v32 = vld [vmem:[#allocation3 + $0xe28] ss:$16 sps:$4 sm:$0xff]  }
 0x1c3   :  { %11145 = vmatprep.subr.bf16.mxu0 %v15901_v33  ;;  %12293 = vmatprep.subr.bf16.mxu1 %v15904_v34  ;;  %v15996_v33 = vld [vmem:[#allocation3 + $0xe4c] ss:$16 sps:$4 sm:$0xff]   ;;  %v15991_v34 = vld [vmem:[#allocation3 + $0xe40] ss:$16 sps:$4 sm:$0xff]  }
 0x1c6   :  { %11146 = vmatpush1.bf16.msra.mxu0 %v15899_v35  ;;  %12294 = vmatpush1.bf16.msra.mxu1 %v15902_v36  ;;  %v15994_v35 = vld [vmem:[#allocation3 + $0xe48] ss:$16 sps:$4 sm:$0xff]   ;;  %v15999_v36 = vld [vmem:[#allocation3 + $0xe64] ss:$16 sps:$4 sm:$0xff]  }
 0x1c7   :  { %11147 = vmatprep.subr.bf16.mxu0 %v15907_v37  ;;  %12295 = vmatprep.subr.bf16.mxu1 %v15910_v38  ;;  %v16002_v37 = vld [vmem:[#allocation3 + $0xe6c] ss:$16 sps:$4 sm:$0xff]   ;;  %v15997_v38 = vld [vmem:[#allocation3 + $0xe60] ss:$16 sps:$4 sm:$0xff]  }
 0x1ca   :  { %11148 = vmatpush1.bf16.msra.mxu0 %v15905_v39  ;;  %12296 = vmatpush1.bf16.msra.mxu1 %v15908_v40  ;;  %v16000_v39 = vld [vmem:[#allocation3 + $0xe68] ss:$16 sps:$4 sm:$0xff]   ;;  %v16005_v40 = vld [vmem:[#allocation3 + $0xe84] ss:$16 sps:$4 sm:$0xff]  }
 0x1cb   :  { %11149 = vmatprep.subr.bf16.mxu0 %v15913_v41  ;;  %12297 = vmatprep.subr.bf16.mxu1 %v15916_v42  ;;  %v16008_v41 = vld [vmem:[#allocation3 + $0xe8c] ss:$16 sps:$4 sm:$0xff]   ;;  %v16003_v42 = vld [vmem:[#allocation3 + $0xe80] ss:$16 sps:$4 sm:$0xff]  }
 0x1ce   :  { %11150 = vmatpush1.bf16.msra.mxu0 %v15911_v43  ;;  %12298 = vmatpush1.bf16.msra.mxu1 %v15914_v44  ;;  %v16006_v43 = vld [vmem:[#allocation3 + $0xe88] ss:$16 sps:$4 sm:$0xff]   ;;  %v16011_v44 = vld [vmem:[#allocation3 + $0xea4] ss:$16 sps:$4 sm:$0xff]  }
 0x1cf   :  { %11151 = vmatprep.subr.bf16.mxu0 %v15919_v45  ;;  %12299 = vmatprep.subr.bf16.mxu1 %v15922_v46  ;;  %v16014_v45 = vld [vmem:[#allocation3 + $0xeac] ss:$16 sps:$4 sm:$0xff]   ;;  %v16009_v46 = vld [vmem:[#allocation3 + $0xea0] ss:$16 sps:$4 sm:$0xff]  }
 0x1d2   :  { %11152 = vmatpush1.bf16.msra.mxu0 %v15917_v47  ;;  %12300 = vmatpush1.bf16.msra.mxu1 %v15920_v48  ;;  %v16012_v47 = vld [vmem:[#allocation3 + $0xea8] ss:$16 sps:$4 sm:$0xff]   ;;  %v16017_v48 = vld [vmem:[#allocation3 + $0xec4] ss:$16 sps:$4 sm:$0xff]  }
 0x1d3   :  { %11153 = vmatprep.subr.bf16.mxu0 %v15925_v49  ;;  %12301 = vmatprep.subr.bf16.mxu1 %v15928_v50  ;;  %v16020_v49 = vld [vmem:[#allocation3 + $0xecc] ss:$16 sps:$4 sm:$0xff]   ;;  %v16015_v50 = vld [vmem:[#allocation3 + $0xec0] ss:$16 sps:$4 sm:$0xff]  }
 0x1d6   :  { %11154 = vmatpush1.bf16.msra.mxu0 %v15923_v51  ;;  %12302 = vmatpush1.bf16.msra.mxu1 %v15926_v52  ;;  %v16018_v51 = vld [vmem:[#allocation3 + $0xec8] ss:$16 sps:$4 sm:$0xff]   ;;  %v16023_v52 = vld [vmem:[#allocation3 + $0xee4] ss:$16 sps:$4 sm:$0xff]  }
 0x1d7   :  { %11155 = vmatprep.subr.bf16.mxu0 %v15931_v53  ;;  %12303 = vmatprep.subr.bf16.mxu1 %v15934_v54  ;;  %v16026_v53 = vld [vmem:[#allocation3 + $0xeec] ss:$16 sps:$4 sm:$0xff]   ;;  %v16021_v54 = vld [vmem:[#allocation3 + $0xee0] ss:$16 sps:$4 sm:$0xff]  }
 0x1da   :  { %11156 = vmatpush1.bf16.msra.mxu0 %v15929_v55  ;;  %12304 = vmatpush1.bf16.msra.mxu1 %v15932_v56  ;;  %v16024_v55 = vld [vmem:[#allocation3 + $0xee8] ss:$16 sps:$4 sm:$0xff]   ;;  %v16029_v56 = vld [vmem:[#allocation3 + $0xf04] ss:$16 sps:$4 sm:$0xff]  }
 0x1db   :  { %11157 = vmatprep.subr.bf16.mxu0 %v15937_v57  ;;  %12305 = vmatprep.subr.bf16.mxu1 %v15940_v58  ;;  %v16032_v57 = vld [vmem:[#allocation3 + $0xf0c] ss:$16 sps:$4 sm:$0xff]   ;;  %v16027_v58 = vld [vmem:[#allocation3 + $0xf00] ss:$16 sps:$4 sm:$0xff]  }
 0x1de   :  { %11158 = vmatpush1.bf16.msra.mxu0 %v15935_v59  ;;  %12306 = vmatpush1.bf16.msra.mxu1 %v15938_v60  ;;  %v16030_v59 = vld [vmem:[#allocation3 + $0xf08] ss:$16 sps:$4 sm:$0xff]   ;;  %v16035_v60 = vld [vmem:[#allocation3 + $0xf24] ss:$16 sps:$4 sm:$0xff]  }
 0x1df   :  { %11159 = vmatprep.subr.bf16.mxu0 %v15943_v61  ;;  %12307 = vmatprep.subr.bf16.mxu1 %v15946_v62  ;;  %v16038_v61 = vld [vmem:[#allocation3 + $0xf2c] ss:$16 sps:$4 sm:$0xff]   ;;  %v16033_v62 = vld [vmem:[#allocation3 + $0xf20] ss:$16 sps:$4 sm:$0xff]  }
 0x1e2   :  { %11160 = vmatpush1.bf16.msra.mxu0 %v15941_v63  ;;  %12308 = vmatpush1.bf16.msra.mxu1 %v15944_v0  ;;  %v16036_v63 = vld [vmem:[#allocation3 + $0xf28] ss:$16 sps:$4 sm:$0xff]   ;;  %v16041_v0 = vld [vmem:[#allocation3 + $0xf44] ss:$16 sps:$4 sm:$0xff]  }
 0x1e3   :  { %11161 = vmatprep.subr.bf16.mxu0 %v15949_v1  ;;  %12309 = vmatprep.subr.bf16.mxu1 %v15952_v2  ;;  %v16044_v1 = vld [vmem:[#allocation3 + $0xf4c] ss:$16 sps:$4 sm:$0xff]   ;;  %v16039_v2 = vld [vmem:[#allocation3 + $0xf40] ss:$16 sps:$4 sm:$0xff]  }
 0x1e6   :  { %11162 = vmatpush1.bf16.msra.mxu0 %v15947_v3  ;;  %12310 = vmatpush1.bf16.msra.mxu1 %v15950_v4  ;;  %v16042_v3 = vld [vmem:[#allocation3 + $0xf48] ss:$16 sps:$4 sm:$0xff]   ;;  %v16047_v4 = vld [vmem:[#allocation3 + $0xf64] ss:$16 sps:$4 sm:$0xff]  }
 0x1e7   :  { %11163 = vmatprep.subr.bf16.mxu0 %v15955_v5  ;;  %12311 = vmatprep.subr.bf16.mxu1 %v15958_v6  ;;  %v16050_v5 = vld [vmem:[#allocation3 + $0xf6c] ss:$16 sps:$4 sm:$0xff]   ;;  %v16045_v6 = vld [vmem:[#allocation3 + $0xf60] ss:$16 sps:$4 sm:$0xff]  }
 0x1ea   :  { %11164 = vmatpush1.bf16.msra.mxu0 %v15953_v7  ;;  %12312 = vmatpush1.bf16.msra.mxu1 %v15956_v8  ;;  %v16048_v7 = vld [vmem:[#allocation3 + $0xf68] ss:$16 sps:$4 sm:$0xff]   ;;  %v16053_v8 = vld [vmem:[#allocation3 + $0xf84] ss:$16 sps:$4 sm:$0xff]  }
 0x1eb   :  { %11165 = vmatprep.subr.bf16.mxu0 %v15961_v9  ;;  %12313 = vmatprep.subr.bf16.mxu1 %v15964_v10  ;;  %v16056_v9 = vld [vmem:[#allocation3 + $0xf8c] ss:$16 sps:$4 sm:$0xff]   ;;  %v16051_v10 = vld [vmem:[#allocation3 + $0xf80] ss:$16 sps:$4 sm:$0xff]  }
 0x1ee   :  { %11166 = vmatpush1.bf16.msra.mxu0 %v15959_v11  ;;  %12314 = vmatpush1.bf16.msra.mxu1 %v15962_v13  ;;  %v16054_v11 = vld [vmem:[#allocation3 + $0xf88] ss:$16 sps:$4 sm:$0xff]   ;;  %v16059_v13 = vld [vmem:[#allocation3 + $0xfa4] ss:$16 sps:$4 sm:$0xff]  }
 0x1ef   :  { %11167 = vmatprep.subr.bf16.mxu0 %v15967_v14  ;;  %12315 = vmatprep.subr.bf16.mxu1 %v15970_v16  ;;  %v16062_v14 = vld [vmem:[#allocation3 + $0xfac] ss:$16 sps:$4 sm:$0xff]   ;;  %v16057_v16 = vld [vmem:[#allocation3 + $0xfa0] ss:$16 sps:$4 sm:$0xff]  }
 0x1f2   :  { %11168 = vmatpush1.bf16.msra.mxu0 %v15965_v17  ;;  %12316 = vmatpush1.bf16.msra.mxu1 %v15968_v19  ;;  %v16060_v17 = vld [vmem:[#allocation3 + $0xfa8] ss:$16 sps:$4 sm:$0xff]   ;;  %v16065_v19 = vld [vmem:[#allocation3 + $0xfc4] ss:$16 sps:$4 sm:$0xff]  }
 0x1f3   :  { %11169 = vmatprep.subr.bf16.mxu0 %v15973_v12  ;;  %12317 = vmatprep.subr.bf16.mxu1 %v15976_v21  ;;  %v16068_v12 = vld [vmem:[#allocation3 + $0xfcc] ss:$16 sps:$4 sm:$0xff]   ;;  %v16063_v21 = vld [vmem:[#allocation3 + $0xfc0] ss:$16 sps:$4 sm:$0xff]  }
 0x1f6   :  { %11170 = vmatpush1.bf16.msra.mxu0 %v15971_v15  ;;  %12318 = vmatpush1.bf16.msra.mxu1 %v15974_v23  ;;  %v16066_v15 = vld [vmem:[#allocation3 + $0xfc8] ss:$16 sps:$4 sm:$0xff]   ;;  %v16071_v23 = vld [vmem:[#allocation3 + $0xfe4] ss:$16 sps:$4 sm:$0xff]  }
 0x1f7   :  { %11180 = vmatprep.subr.bf16.mxu0 %v15981_v24  ;;  %12328 = vmatprep.subr.bf16.mxu1 %v15984_v25  ;;  %v16074_v24 = vld [vmem:[#allocation3 + $0xfec] ss:$16 sps:$4 sm:$0xff]   ;;  %v16069_v25 = vld [vmem:[#allocation3 + $0xfe0] ss:$16 sps:$4 sm:$0xff]  }
 0x1f9   :  { %11172 = vmatmul.mubr.bf16.vlgmr.msra.gmra.mrb[0].mxu0 %v13257_v18  ;;  %12320 = vmatmul.mubr.bf16.vlgmr.msra.gmra.mrb[0].mxu1 %v13257_v18  ;;  %v16072_v18 = vld [vmem:[#allocation3 + $0xfe8] ss:$16 sps:$4 sm:$0xff]  }
 0x1fa   :  { %11181 = vmatpush1.bf16.msra.mxu0 %v15979_v27  ;;  %12329 = vmatpush1.bf16.msra.mxu1 %v15982_v28  ;;  %v16079_v27 = vld [vmem:[#allocation3 + $0x1004] ss:$16 sps:$4 sm:$0xff]   ;;  %v16082_v28 = vld [vmem:[#allocation3 + $0x100c] ss:$16 sps:$4 sm:$0xff]  }
 0x1fb   :  { %11182 = vmatprep.subr.bf16.mxu0 %v15987_v29  ;;  %12330 = vmatprep.subr.bf16.mxu1 %v15990_v20  ;;  %v18217_v29 = vld [vmem:[%s18399_s0 + $0x40] sm:$0xff]  ;;  %v13259_v20 = vcombine.low %v18208_v26, %v18208_v26 }
 0x1fc   :  { %11212 = vmatprep.mubr.bf16.mxu0 %v13260_v30  ;;  %12360 = vmatprep.mubr.bf16.mxu1 %v13260_v30  ;;  %v16077_v30 = vld [vmem:[#allocation3 + $0x1000] ss:$16 sps:$4 sm:$0xff]   ;;  %v16091_v26 = vld [vmem:[#allocation3 + $0x1044] ss:$16 sps:$4 sm:$0xff]  }
 0x1fe   :  { %11183 = vmatpush1.bf16.msra.mxu0 %v15985_v31  ;;  %12331 = vmatpush1.bf16.msra.mxu1 %v15988_v32  ;;  %v16080_v31 = vld [vmem:[#allocation3 + $0x1008] ss:$16 sps:$4 sm:$0xff]   ;;  %v16085_v32 = vld [vmem:[#allocation3 + $0x1024] ss:$16 sps:$4 sm:$0xff]  }
 0x1ff   :  { %11184 = vmatprep.subr.bf16.mxu0 %v15993_v22  ;;  %12332 = vmatprep.subr.bf16.mxu1 %v15996_v33  ;;  %v16088_v22 = vld [vmem:[#allocation3 + $0x102c] ss:$16 sps:$4 sm:$0xff]   ;;  %v13262_v33 = vcombine.high %v18217_v29, %v18217_v29 }
 0x202   :  { %11185 = vmatpush1.bf16.msra.mxu0 %v15991_v34  ;;  %12333 = vmatpush1.bf16.msra.mxu1 %v15994_v35  ;;  %v16083_v34 = vld [vmem:[#allocation3 + $0x1020] ss:$16 sps:$4 sm:$0xff]   ;;  %v16086_v35 = vld [vmem:[#allocation3 + $0x1028] ss:$16 sps:$4 sm:$0xff]  }
 0x203   :  { %11186 = vmatprep.subr.bf16.mxu0 %v15999_v36  ;;  %12334 = vmatprep.subr.bf16.mxu1 %v16002_v37  ;;  %v16094_v36 = vld [vmem:[#allocation3 + $0x104c] ss:$16 sps:$4 sm:$0xff]   ;;  %v16089_v37 = vld [vmem:[#allocation3 + $0x1040] ss:$16 sps:$4 sm:$0xff]  }
 0x206   :  { %11187 = vmatpush1.bf16.msra.mxu0 %v15997_v38  ;;  %12335 = vmatpush1.bf16.msra.mxu1 %v16000_v39  ;;  %v16092_v38 = vld [vmem:[#allocation3 + $0x1048] ss:$16 sps:$4 sm:$0xff]   ;;  %v16097_v39 = vld [vmem:[#allocation3 + $0x1064] ss:$16 sps:$4 sm:$0xff]  }
 0x207   :  { %11188 = vmatprep.subr.bf16.mxu0 %v16005_v40  ;;  %12336 = vmatprep.subr.bf16.mxu1 %v16008_v41  ;;  %v16100_v40 = vld [vmem:[#allocation3 + $0x106c] ss:$16 sps:$4 sm:$0xff]   ;;  %v16095_v41 = vld [vmem:[#allocation3 + $0x1060] ss:$16 sps:$4 sm:$0xff]  }
 0x20a   :  { %11189 = vmatpush1.bf16.msra.mxu0 %v16003_v42  ;;  %12337 = vmatpush1.bf16.msra.mxu1 %v16006_v43  ;;  %v16098_v42 = vld [vmem:[#allocation3 + $0x1068] ss:$16 sps:$4 sm:$0xff]   ;;  %v16103_v43 = vld [vmem:[#allocation3 + $0x1084] ss:$16 sps:$4 sm:$0xff]  }
 0x20b   :  { %11190 = vmatprep.subr.bf16.mxu0 %v16011_v44  ;;  %12338 = vmatprep.subr.bf16.mxu1 %v16014_v45  ;;  %v16106_v44 = vld [vmem:[#allocation3 + $0x108c] ss:$16 sps:$4 sm:$0xff]   ;;  %v16101_v45 = vld [vmem:[#allocation3 + $0x1080] ss:$16 sps:$4 sm:$0xff]  }
 0x20e   :  { %11191 = vmatpush1.bf16.msra.mxu0 %v16009_v46  ;;  %12339 = vmatpush1.bf16.msra.mxu1 %v16012_v47  ;;  %v16104_v46 = vld [vmem:[#allocation3 + $0x1088] ss:$16 sps:$4 sm:$0xff]   ;;  %v16109_v47 = vld [vmem:[#allocation3 + $0x10a4] ss:$16 sps:$4 sm:$0xff]  }
 0x20f   :  { %11192 = vmatprep.subr.bf16.mxu0 %v16017_v48  ;;  %12340 = vmatprep.subr.bf16.mxu1 %v16020_v49  ;;  %v16112_v48 = vld [vmem:[#allocation3 + $0x10ac] ss:$16 sps:$4 sm:$0xff]   ;;  %v16107_v49 = vld [vmem:[#allocation3 + $0x10a0] ss:$16 sps:$4 sm:$0xff]  }
 0x212   :  { %11193 = vmatpush1.bf16.msra.mxu0 %v16015_v50  ;;  %12341 = vmatpush1.bf16.msra.mxu1 %v16018_v51  ;;  %v16110_v50 = vld [vmem:[#allocation3 + $0x10a8] ss:$16 sps:$4 sm:$0xff]   ;;  %v16115_v51 = vld [vmem:[#allocation3 + $0x10c4] ss:$16 sps:$4 sm:$0xff]  }
 0x213   :  { %11194 = vmatprep.subr.bf16.mxu0 %v16023_v52  ;;  %12342 = vmatprep.subr.bf16.mxu1 %v16026_v53  ;;  %v16118_v52 = vld [vmem:[#allocation3 + $0x10cc] ss:$16 sps:$4 sm:$0xff]   ;;  %v16113_v53 = vld [vmem:[#allocation3 + $0x10c0] ss:$16 sps:$4 sm:$0xff]  }
 0x216   :  { %11195 = vmatpush1.bf16.msra.mxu0 %v16021_v54  ;;  %12343 = vmatpush1.bf16.msra.mxu1 %v16024_v55  ;;  %v16116_v54 = vld [vmem:[#allocation3 + $0x10c8] ss:$16 sps:$4 sm:$0xff]   ;;  %v16121_v55 = vld [vmem:[#allocation3 + $0x10e4] ss:$16 sps:$4 sm:$0xff]  }
 0x217   :  { %11196 = vmatprep.subr.bf16.mxu0 %v16029_v56  ;;  %12344 = vmatprep.subr.bf16.mxu1 %v16032_v57  ;;  %v16124_v56 = vld [vmem:[#allocation3 + $0x10ec] ss:$16 sps:$4 sm:$0xff]   ;;  %v16119_v57 = vld [vmem:[#allocation3 + $0x10e0] ss:$16 sps:$4 sm:$0xff]  }
 0x21a   :  { %11197 = vmatpush1.bf16.msra.mxu0 %v16027_v58  ;;  %12345 = vmatpush1.bf16.msra.mxu1 %v16030_v59  ;;  %v16122_v58 = vld [vmem:[#allocation3 + $0x10e8] ss:$16 sps:$4 sm:$0xff]   ;;  %v16127_v59 = vld [vmem:[#allocation3 + $0x1104] ss:$16 sps:$4 sm:$0xff]  }
 0x21b   :  { %11198 = vmatprep.subr.bf16.mxu0 %v16035_v60  ;;  %12346 = vmatprep.subr.bf16.mxu1 %v16038_v61  ;;  %v16130_v60 = vld [vmem:[#allocation3 + $0x110c] ss:$16 sps:$4 sm:$0xff]   ;;  %v16125_v61 = vld [vmem:[#allocation3 + $0x1100] ss:$16 sps:$4 sm:$0xff]  }
 0x21e   :  { %11199 = vmatpush1.bf16.msra.mxu0 %v16033_v62  ;;  %12347 = vmatpush1.bf16.msra.mxu1 %v16036_v63  ;;  %v16128_v62 = vld [vmem:[#allocation3 + $0x1108] ss:$16 sps:$4 sm:$0xff]   ;;  %v16133_v63 = vld [vmem:[#allocation3 + $0x1124] ss:$16 sps:$4 sm:$0xff]  }
 0x21f   :  { %11200 = vmatprep.subr.bf16.mxu0 %v16041_v0  ;;  %12348 = vmatprep.subr.bf16.mxu1 %v16044_v1  ;;  %v16136_v0 = vld [vmem:[#allocation3 + $0x112c] ss:$16 sps:$4 sm:$0xff]   ;;  %v16131_v1 = vld [vmem:[#allocation3 + $0x1120] ss:$16 sps:$4 sm:$0xff]  }
 0x222   :  { %11201 = vmatpush1.bf16.msra.mxu0 %v16039_v2  ;;  %12349 = vmatpush1.bf16.msra.mxu1 %v16042_v3  ;;  %v16134_v2 = vld [vmem:[#allocation3 + $0x1128] ss:$16 sps:$4 sm:$0xff]   ;;  %v16139_v3 = vld [vmem:[#allocation3 + $0x1144] ss:$16 sps:$4 sm:$0xff]  }
 0x223   :  { %11202 = vmatprep.subr.bf16.mxu0 %v16047_v4  ;;  %12350 = vmatprep.subr.bf16.mxu1 %v16050_v5  ;;  %v16142_v4 = vld [vmem:[#allocation3 + $0x114c] ss:$16 sps:$4 sm:$0xff]   ;;  %v16137_v5 = vld [vmem:[#allocation3 + $0x1140] ss:$16 sps:$4 sm:$0xff]  }
 0x226   :  { %11203 = vmatpush1.bf16.msra.mxu0 %v16045_v6  ;;  %12351 = vmatpush1.bf16.msra.mxu1 %v16048_v7  ;;  %v16140_v6 = vld [vmem:[#allocation3 + $0x1148] ss:$16 sps:$4 sm:$0xff]   ;;  %v16145_v7 = vld [vmem:[#allocation3 + $0x1164] ss:$16 sps:$4 sm:$0xff]  }
 0x227   :  { %11204 = vmatprep.subr.bf16.mxu0 %v16053_v8  ;;  %12352 = vmatprep.subr.bf16.mxu1 %v16056_v9  ;;  %v16148_v8 = vld [vmem:[#allocation3 + $0x116c] ss:$16 sps:$4 sm:$0xff]   ;;  %v16143_v9 = vld [vmem:[#allocation3 + $0x1160] ss:$16 sps:$4 sm:$0xff]  }
 0x22a   :  { %11205 = vmatpush1.bf16.msra.mxu0 %v16051_v10  ;;  %12353 = vmatpush1.bf16.msra.mxu1 %v16054_v11  ;;  %v16146_v10 = vld [vmem:[#allocation3 + $0x1168] ss:$16 sps:$4 sm:$0xff]   ;;  %v16151_v11 = vld [vmem:[#allocation3 + $0x1184] ss:$16 sps:$4 sm:$0xff]  }
 0x22b   :  { %11206 = vmatprep.subr.bf16.mxu0 %v16059_v13  ;;  %12354 = vmatprep.subr.bf16.mxu1 %v16062_v14  ;;  %v16154_v13 = vld [vmem:[#allocation3 + $0x118c] ss:$16 sps:$4 sm:$0xff]   ;;  %v16149_v14 = vld [vmem:[#allocation3 + $0x1180] ss:$16 sps:$4 sm:$0xff]  }
 0x22e   :  { %11207 = vmatpush1.bf16.msra.mxu0 %v16057_v16  ;;  %12355 = vmatpush1.bf16.msra.mxu1 %v16060_v17  ;;  %v16152_v16 = vld [vmem:[#allocation3 + $0x1188] ss:$16 sps:$4 sm:$0xff]   ;;  %v16157_v17 = vld [vmem:[#allocation3 + $0x11a4] ss:$16 sps:$4 sm:$0xff]  }
 0x22f   :  { %11208 = vmatprep.subr.bf16.mxu0 %v16065_v19  ;;  %12356 = vmatprep.subr.bf16.mxu1 %v16068_v12  ;;  %v16160_v19 = vld [vmem:[#allocation3 + $0x11ac] ss:$16 sps:$4 sm:$0xff]   ;;  %v16155_v12 = vld [vmem:[#allocation3 + $0x11a0] ss:$16 sps:$4 sm:$0xff]  }
 0x232   :  { %11209 = vmatpush1.bf16.msra.mxu0 %v16063_v21  ;;  %12357 = vmatpush1.bf16.msra.mxu1 %v16066_v15  ;;  %v16158_v21 = vld [vmem:[#allocation3 + $0x11a8] ss:$16 sps:$4 sm:$0xff]   ;;  %v16163_v15 = vld [vmem:[#allocation3 + $0x11c4] ss:$16 sps:$4 sm:$0xff]  }
 0x233   :  { %11210 = vmatprep.subr.bf16.mxu0 %v16071_v23  ;;  %12358 = vmatprep.subr.bf16.mxu1 %v16074_v24  ;;  %v16166_v23 = vld [vmem:[#allocation3 + $0x11cc] ss:$16 sps:$4 sm:$0xff]   ;;  %v16161_v24 = vld [vmem:[#allocation3 + $0x11c0] ss:$16 sps:$4 sm:$0xff]  }
 0x236   :  { %11211 = vmatpush1.bf16.msra.mxu0 %v16069_v25  ;;  %12359 = vmatpush1.bf16.msra.mxu1 %v16072_v18  ;;  %v16164_v25 = vld [vmem:[#allocation3 + $0x11c8] ss:$16 sps:$4 sm:$0xff]   ;;  %v16169_v18 = vld [vmem:[#allocation3 + $0x11e4] ss:$16 sps:$4 sm:$0xff]  }
 0x237   :  { %11221 = vmatprep.subr.bf16.mxu0 %v16079_v27  ;;  %12369 = vmatprep.subr.bf16.mxu1 %v16082_v28  ;;  %v16172_v27 = vld [vmem:[#allocation3 + $0x11ec] ss:$16 sps:$4 sm:$0xff]   ;;  %v16167_v28 = vld [vmem:[#allocation3 + $0x11e0] ss:$16 sps:$4 sm:$0xff]  }
 0x239   :  { %11213 = vmatmul.mubr.bf16.vlgmr.msra.gmra.mrb[0].mxu0 %v13259_v20  ;;  %12361 = vmatmul.mubr.bf16.vlgmr.msra.gmra.mrb[0].mxu1 %v13259_v20  ;;  %v16170_v20 = vld [vmem:[#allocation3 + $0x11e8] ss:$16 sps:$4 sm:$0xff]  }
 0x23a   :  { %11222 = vmatpush1.bf16.msra.mxu0 %v16077_v30  ;;  %12370 = vmatpush1.bf16.msra.mxu1 %v16080_v31  ;;  %v16177_v30 = vld [vmem:[#allocation3 + $0x1204] ss:$16 sps:$4 sm:$0xff]   ;;  %v16180_v31 = vld [vmem:[#allocation3 + $0x120c] ss:$16 sps:$4 sm:$0xff]  }
 0x23b   :  { %11223 = vmatprep.subr.bf16.mxu0 %v16085_v32  ;;  %12371 = vmatprep.subr.bf16.mxu1 %v16088_v22  ;;  %v18226_v32 = vld [vmem:[%s18399_s0 + $0x48] sm:$0xff]  ;;  %v13261_v22 = vcombine.low %v18217_v29, %v18217_v29 }
 0x23c   :  { %11253 = vmatprep.mubr.bf16.mxu0 %v13262_v33  ;;  %12401 = vmatprep.mubr.bf16.mxu1 %v13262_v33  ;;  %v16175_v33 = vld [vmem:[#allocation3 + $0x1200] ss:$16 sps:$4 sm:$0xff]   ;;  %v16189_v29 = vld [vmem:[#allocation3 + $0x1244] ss:$16 sps:$4 sm:$0xff]  }
 0x23e   :  { %11224 = vmatpush1.bf16.msra.mxu0 %v16083_v34  ;;  %12372 = vmatpush1.bf16.msra.mxu1 %v16086_v35  ;;  %v16178_v34 = vld [vmem:[#allocation3 + $0x1208] ss:$16 sps:$4 sm:$0xff]   ;;  %v16183_v35 = vld [vmem:[#allocation3 + $0x1224] ss:$16 sps:$4 sm:$0xff]  }
 0x23f   :  { %11225 = vmatprep.subr.bf16.mxu0 %v16091_v26  ;;  %12373 = vmatprep.subr.bf16.mxu1 %v16094_v36  ;;  %v16186_v26 = vld [vmem:[#allocation3 + $0x122c] ss:$16 sps:$4 sm:$0xff]   ;;  %v13264_v36 = vcombine.high %v18226_v32, %v18226_v32 }
 0x242   :  { %11226 = vmatpush1.bf16.msra.mxu0 %v16089_v37  ;;  %12374 = vmatpush1.bf16.msra.mxu1 %v16092_v38  ;;  %v16181_v37 = vld [vmem:[#allocation3 + $0x1220] ss:$16 sps:$4 sm:$0xff]   ;;  %v16184_v38 = vld [vmem:[#allocation3 + $0x1228] ss:$16 sps:$4 sm:$0xff]  }
 0x243   :  { %11227 = vmatprep.subr.bf16.mxu0 %v16097_v39  ;;  %12375 = vmatprep.subr.bf16.mxu1 %v16100_v40  ;;  %v16192_v39 = vld [vmem:[#allocation3 + $0x124c] ss:$16 sps:$4 sm:$0xff]   ;;  %v16187_v40 = vld [vmem:[#allocation3 + $0x1240] ss:$16 sps:$4 sm:$0xff]  }
 0x246   :  { %11228 = vmatpush1.bf16.msra.mxu0 %v16095_v41  ;;  %12376 = vmatpush1.bf16.msra.mxu1 %v16098_v42  ;;  %v16190_v41 = vld [vmem:[#allocation3 + $0x1248] ss:$16 sps:$4 sm:$0xff]   ;;  %v16195_v42 = vld [vmem:[#allocation3 + $0x1264] ss:$16 sps:$4 sm:$0xff]  }
 0x247   :  { %11229 = vmatprep.subr.bf16.mxu0 %v16103_v43  ;;  %12377 = vmatprep.subr.bf16.mxu1 %v16106_v44  ;;  %v16198_v43 = vld [vmem:[#allocation3 + $0x126c] ss:$16 sps:$4 sm:$0xff]   ;;  %v16193_v44 = vld [vmem:[#allocation3 + $0x1260] ss:$16 sps:$4 sm:$0xff]  }
 0x24a   :  { %11230 = vmatpush1.bf16.msra.mxu0 %v16101_v45  ;;  %12378 = vmatpush1.bf16.msra.mxu1 %v16104_v46  ;;  %v16196_v45 = vld [vmem:[#allocation3 + $0x1268] ss:$16 sps:$4 sm:$0xff]   ;;  %v16201_v46 = vld [vmem:[#allocation3 + $0x1284] ss:$16 sps:$4 sm:$0xff]  }
 0x24b   :  { %11231 = vmatprep.subr.bf16.mxu0 %v16109_v47  ;;  %12379 = vmatprep.subr.bf16.mxu1 %v16112_v48  ;;  %v16204_v47 = vld [vmem:[#allocation3 + $0x128c] ss:$16 sps:$4 sm:$0xff]   ;;  %v16199_v48 = vld [vmem:[#allocation3 + $0x1280] ss:$16 sps:$4 sm:$0xff]  }
 0x24e   :  { %11232 = vmatpush1.bf16.msra.mxu0 %v16107_v49  ;;  %12380 = vmatpush1.bf16.msra.mxu1 %v16110_v50  ;;  %v16202_v49 = vld [vmem:[#allocation3 + $0x1288] ss:$16 sps:$4 sm:$0xff]   ;;  %v16207_v50 = vld [vmem:[#allocation3 + $0x12a4] ss:$16 sps:$4 sm:$0xff]  }
 0x24f   :  { %11233 = vmatprep.subr.bf16.mxu0 %v16115_v51  ;;  %12381 = vmatprep.subr.bf16.mxu1 %v16118_v52  ;;  %v16210_v51 = vld [vmem:[#allocation3 + $0x12ac] ss:$16 sps:$4 sm:$0xff]   ;;  %v16205_v52 = vld [vmem:[#allocation3 + $0x12a0] ss:$16 sps:$4 sm:$0xff]  }
 0x252   :  { %11234 = vmatpush1.bf16.msra.mxu0 %v16113_v53  ;;  %12382 = vmatpush1.bf16.msra.mxu1 %v16116_v54  ;;  %v16208_v53 = vld [vmem:[#allocation3 + $0x12a8] ss:$16 sps:$4 sm:$0xff]   ;;  %v16213_v54 = vld [vmem:[#allocation3 + $0x12c4] ss:$16 sps:$4 sm:$0xff]  }
 0x253   :  { %11235 = vmatprep.subr.bf16.mxu0 %v16121_v55  ;;  %12383 = vmatprep.subr.bf16.mxu1 %v16124_v56  ;;  %v16216_v55 = vld [vmem:[#allocation3 + $0x12cc] ss:$16 sps:$4 sm:$0xff]   ;;  %v16211_v56 = vld [vmem:[#allocation3 + $0x12c0] ss:$16 sps:$4 sm:$0xff]  }
 0x256   :  { %11236 = vmatpush1.bf16.msra.mxu0 %v16119_v57  ;;  %12384 = vmatpush1.bf16.msra.mxu1 %v16122_v58  ;;  %v16214_v57 = vld [vmem:[#allocation3 + $0x12c8] ss:$16 sps:$4 sm:$0xff]   ;;  %v16219_v58 = vld [vmem:[#allocation3 + $0x12e4] ss:$16 sps:$4 sm:$0xff]  }
 0x257   :  { %11237 = vmatprep.subr.bf16.mxu0 %v16127_v59  ;;  %12385 = vmatprep.subr.bf16.mxu1 %v16130_v60  ;;  %v16222_v59 = vld [vmem:[#allocation3 + $0x12ec] ss:$16 sps:$4 sm:$0xff]   ;;  %v16217_v60 = vld [vmem:[#allocation3 + $0x12e0] ss:$16 sps:$4 sm:$0xff]  }
 0x25a   :  { %11238 = vmatpush1.bf16.msra.mxu0 %v16125_v61  ;;  %12386 = vmatpush1.bf16.msra.mxu1 %v16128_v62  ;;  %v16220_v61 = vld [vmem:[#allocation3 + $0x12e8] ss:$16 sps:$4 sm:$0xff]   ;;  %v16225_v62 = vld [vmem:[#allocation3 + $0x1304] ss:$16 sps:$4 sm:$0xff]  }
 0x25b   :  { %11239 = vmatprep.subr.bf16.mxu0 %v16133_v63  ;;  %12387 = vmatprep.subr.bf16.mxu1 %v16136_v0  ;;  %v16228_v63 = vld [vmem:[#allocation3 + $0x130c] ss:$16 sps:$4 sm:$0xff]   ;;  %v16223_v0 = vld [vmem:[#allocation3 + $0x1300] ss:$16 sps:$4 sm:$0xff]  }
 0x25e   :  { %11240 = vmatpush1.bf16.msra.mxu0 %v16131_v1  ;;  %12388 = vmatpush1.bf16.msra.mxu1 %v16134_v2  ;;  %v16226_v1 = vld [vmem:[#allocation3 + $0x1308] ss:$16 sps:$4 sm:$0xff]   ;;  %v16231_v2 = vld [vmem:[#allocation3 + $0x1324] ss:$16 sps:$4 sm:$0xff]  }
 0x25f   :  { %11241 = vmatprep.subr.bf16.mxu0 %v16139_v3  ;;  %12389 = vmatprep.subr.bf16.mxu1 %v16142_v4  ;;  %v16234_v3 = vld [vmem:[#allocation3 + $0x132c] ss:$16 sps:$4 sm:$0xff]   ;;  %v16229_v4 = vld [vmem:[#allocation3 + $0x1320] ss:$16 sps:$4 sm:$0xff]  }
 0x262   :  { %11242 = vmatpush1.bf16.msra.mxu0 %v16137_v5  ;;  %12390 = vmatpush1.bf16.msra.mxu1 %v16140_v6  ;;  %v16232_v5 = vld [vmem:[#allocation3 + $0x1328] ss:$16 sps:$4 sm:$0xff]   ;;  %v16237_v6 = vld [vmem:[#allocation3 + $0x1344] ss:$16 sps:$4 sm:$0xff]  }
 0x263   :  { %11243 = vmatprep.subr.bf16.mxu0 %v16145_v7  ;;  %12391 = vmatprep.subr.bf16.mxu1 %v16148_v8  ;;  %v16240_v7 = vld [vmem:[#allocation3 + $0x134c] ss:$16 sps:$4 sm:$0xff]   ;;  %v16235_v8 = vld [vmem:[#allocation3 + $0x1340] ss:$16 sps:$4 sm:$0xff]  }
 0x266   :  { %11244 = vmatpush1.bf16.msra.mxu0 %v16143_v9  ;;  %12392 = vmatpush1.bf16.msra.mxu1 %v16146_v10  ;;  %v16238_v9 = vld [vmem:[#allocation3 + $0x1348] ss:$16 sps:$4 sm:$0xff]   ;;  %v16243_v10 = vld [vmem:[#allocation3 + $0x1364] ss:$16 sps:$4 sm:$0xff]  }
 0x267   :  { %11245 = vmatprep.subr.bf16.mxu0 %v16151_v11  ;;  %12393 = vmatprep.subr.bf16.mxu1 %v16154_v13  ;;  %v16246_v11 = vld [vmem:[#allocation3 + $0x136c] ss:$16 sps:$4 sm:$0xff]   ;;  %v16241_v13 = vld [vmem:[#allocation3 + $0x1360] ss:$16 sps:$4 sm:$0xff]  }
 0x26a   :  { %11246 = vmatpush1.bf16.msra.mxu0 %v16149_v14  ;;  %12394 = vmatpush1.bf16.msra.mxu1 %v16152_v16  ;;  %v16244_v14 = vld [vmem:[#allocation3 + $0x1368] ss:$16 sps:$4 sm:$0xff]   ;;  %v16249_v16 = vld [vmem:[#allocation3 + $0x1384] ss:$16 sps:$4 sm:$0xff]  }
 0x26b   :  { %11247 = vmatprep.subr.bf16.mxu0 %v16157_v17  ;;  %12395 = vmatprep.subr.bf16.mxu1 %v16160_v19  ;;  %v16252_v17 = vld [vmem:[#allocation3 + $0x138c] ss:$16 sps:$4 sm:$0xff]   ;;  %v16247_v19 = vld [vmem:[#allocation3 + $0x1380] ss:$16 sps:$4 sm:$0xff]  }
 0x26e   :  { %11248 = vmatpush1.bf16.msra.mxu0 %v16155_v12  ;;  %12396 = vmatpush1.bf16.msra.mxu1 %v16158_v21  ;;  %v16250_v12 = vld [vmem:[#allocation3 + $0x1388] ss:$16 sps:$4 sm:$0xff]   ;;  %v16255_v21 = vld [vmem:[#allocation3 + $0x13a4] ss:$16 sps:$4 sm:$0xff]  }
 0x26f   :  { %11249 = vmatprep.subr.bf16.mxu0 %v16163_v15  ;;  %12397 = vmatprep.subr.bf16.mxu1 %v16166_v23  ;;  %v16258_v15 = vld [vmem:[#allocation3 + $0x13ac] ss:$16 sps:$4 sm:$0xff]   ;;  %v16253_v23 = vld [vmem:[#allocation3 + $0x13a0] ss:$16 sps:$4 sm:$0xff]  }
 0x272   :  { %11250 = vmatpush1.bf16.msra.mxu0 %v16161_v24  ;;  %12398 = vmatpush1.bf16.msra.mxu1 %v16164_v25  ;;  %v16256_v24 = vld [vmem:[#allocation3 + $0x13a8] ss:$16 sps:$4 sm:$0xff]   ;;  %v16261_v25 = vld [vmem:[#allocation3 + $0x13c4] ss:$16 sps:$4 sm:$0xff]  }
 0x273   :  { %11251 = vmatprep.subr.bf16.mxu0 %v16169_v18  ;;  %12399 = vmatprep.subr.bf16.mxu1 %v16172_v27  ;;  %v16264_v18 = vld [vmem:[#allocation3 + $0x13cc] ss:$16 sps:$4 sm:$0xff]   ;;  %v16259_v27 = vld [vmem:[#allocation3 + $0x13c0] ss:$16 sps:$4 sm:$0xff]  }
 0x276   :  { %11252 = vmatpush1.bf16.msra.mxu0 %v16167_v28  ;;  %12400 = vmatpush1.bf16.msra.mxu1 %v16170_v20  ;;  %v16262_v28 = vld [vmem:[#allocation3 + $0x13c8] ss:$16 sps:$4 sm:$0xff]   ;;  %v16267_v20 = vld [vmem:[#allocation3 + $0x13e4] ss:$16 sps:$4 sm:$0xff]  }
 0x277   :  { %11262 = vmatprep.subr.bf16.mxu0 %v16177_v30  ;;  %12410 = vmatprep.subr.bf16.mxu1 %v16180_v31  ;;  %v16270_v30 = vld [vmem:[#allocation3 + $0x13ec] ss:$16 sps:$4 sm:$0xff]   ;;  %v16265_v31 = vld [vmem:[#allocation3 + $0x13e0] ss:$16 sps:$4 sm:$0xff]  }
 0x279   :  { %11254 = vmatmul.mubr.bf16.vlgmr.msra.gmra.mrb[0].mxu0 %v13261_v22  ;;  %12402 = vmatmul.mubr.bf16.vlgmr.msra.gmra.mrb[0].mxu1 %v13261_v22  ;;  %v16268_v22 = vld [vmem:[#allocation3 + $0x13e8] ss:$16 sps:$4 sm:$0xff]  }
 0x27a   :  { %11263 = vmatpush1.bf16.msra.mxu0 %v16175_v33  ;;  %12411 = vmatpush1.bf16.msra.mxu1 %v16178_v34  ;;  %v16275_v33 = vld [vmem:[#allocation3 + $0x1404] ss:$16 sps:$4 sm:$0xff]   ;;  %v16278_v34 = vld [vmem:[#allocation3 + $0x140c] ss:$16 sps:$4 sm:$0xff]  }
 0x27b   :  { %11264 = vmatprep.subr.bf16.mxu0 %v16183_v35  ;;  %12412 = vmatprep.subr.bf16.mxu1 %v16186_v26  ;;  %v18235_v35 = vld [vmem:[%s18399_s0 + $0x50] sm:$0xff]  ;;  %v13263_v26 = vcombine.low %v18226_v32, %v18226_v32 }
 0x27c   :  { %11294 = vmatprep.mubr.bf16.mxu0 %v13264_v36  ;;  %12442 = vmatprep.mubr.bf16.mxu1 %v13264_v36  ;;  %v16273_v36 = vld [vmem:[#allocation3 + $0x1400] ss:$16 sps:$4 sm:$0xff]   ;;  %v16287_v32 = vld [vmem:[#allocation3 + $0x1444] ss:$16 sps:$4 sm:$0xff]  }
 0x27e   :  { %11265 = vmatpush1.bf16.msra.mxu0 %v16181_v37  ;;  %12413 = vmatpush1.bf16.msra.mxu1 %v16184_v38  ;;  %v16276_v37 = vld [vmem:[#allocation3 + $0x1408] ss:$16 sps:$4 sm:$0xff]   ;;  %v16281_v38 = vld [vmem:[#allocation3 + $0x1424] ss:$16 sps:$4 sm:$0xff]  }
 0x27f   :  { %11266 = vmatprep.subr.bf16.mxu0 %v16189_v29  ;;  %12414 = vmatprep.subr.bf16.mxu1 %v16192_v39  ;;  %v16284_v29 = vld [vmem:[#allocation3 + $0x142c] ss:$16 sps:$4 sm:$0xff]   ;;  %v13266_v39 = vcombine.high %v18235_v35, %v18235_v35 }
 0x282   :  { %11267 = vmatpush1.bf16.msra.mxu0 %v16187_v40  ;;  %12415 = vmatpush1.bf16.msra.mxu1 %v16190_v41  ;;  %v16279_v40 = vld [vmem:[#allocation3 + $0x1420] ss:$16 sps:$4 sm:$0xff]   ;;  %v16282_v41 = vld [vmem:[#allocation3 + $0x1428] ss:$16 sps:$4 sm:$0xff]  }
 0x283   :  { %11268 = vmatprep.subr.bf16.mxu0 %v16195_v42  ;;  %12416 = vmatprep.subr.bf16.mxu1 %v16198_v43  ;;  %v16290_v42 = vld [vmem:[#allocation3 + $0x144c] ss:$16 sps:$4 sm:$0xff]   ;;  %v16285_v43 = vld [vmem:[#allocation3 + $0x1440] ss:$16 sps:$4 sm:$0xff]  }
 0x286   :  { %11269 = vmatpush1.bf16.msra.mxu0 %v16193_v44  ;;  %12417 = vmatpush1.bf16.msra.mxu1 %v16196_v45  ;;  %v16288_v44 = vld [vmem:[#allocation3 + $0x1448] ss:$16 sps:$4 sm:$0xff]   ;;  %v16293_v45 = vld [vmem:[#allocation3 + $0x1464] ss:$16 sps:$4 sm:$0xff]  }
 0x287   :  { %11270 = vmatprep.subr.bf16.mxu0 %v16201_v46  ;;  %12418 = vmatprep.subr.bf16.mxu1 %v16204_v47  ;;  %v16296_v46 = vld [vmem:[#allocation3 + $0x146c] ss:$16 sps:$4 sm:$0xff]   ;;  %v16291_v47 = vld [vmem:[#allocation3 + $0x1460] ss:$16 sps:$4 sm:$0xff]  }
 0x28a   :  { %11271 = vmatpush1.bf16.msra.mxu0 %v16199_v48  ;;  %12419 = vmatpush1.bf16.msra.mxu1 %v16202_v49  ;;  %v16294_v48 = vld [vmem:[#allocation3 + $0x1468] ss:$16 sps:$4 sm:$0xff]   ;;  %v16299_v49 = vld [vmem:[#allocation3 + $0x1484] ss:$16 sps:$4 sm:$0xff]  }
 0x28b   :  { %11272 = vmatprep.subr.bf16.mxu0 %v16207_v50  ;;  %12420 = vmatprep.subr.bf16.mxu1 %v16210_v51  ;;  %v16302_v50 = vld [vmem:[#allocation3 + $0x148c] ss:$16 sps:$4 sm:$0xff]   ;;  %v16297_v51 = vld [vmem:[#allocation3 + $0x1480] ss:$16 sps:$4 sm:$0xff]  }
 0x28e   :  { %11273 = vmatpush1.bf16.msra.mxu0 %v16205_v52  ;;  %12421 = vmatpush1.bf16.msra.mxu1 %v16208_v53  ;;  %v16300_v52 = vld [vmem:[#allocation3 + $0x1488] ss:$16 sps:$4 sm:$0xff]   ;;  %v16305_v53 = vld [vmem:[#allocation3 + $0x14a4] ss:$16 sps:$4 sm:$0xff]  }
 0x28f   :  { %11274 = vmatprep.subr.bf16.mxu0 %v16213_v54  ;;  %12422 = vmatprep.subr.bf16.mxu1 %v16216_v55  ;;  %v16308_v54 = vld [vmem:[#allocation3 + $0x14ac] ss:$16 sps:$4 sm:$0xff]   ;;  %v16303_v55 = vld [vmem:[#allocation3 + $0x14a0] ss:$16 sps:$4 sm:$0xff]  }
 0x292   :  { %11275 = vmatpush1.bf16.msra.mxu0 %v16211_v56  ;;  %12423 = vmatpush1.bf16.msra.mxu1 %v16214_v57  ;;  %v16306_v56 = vld [vmem:[#allocation3 + $0x14a8] ss:$16 sps:$4 sm:$0xff]   ;;  %v16311_v57 = vld [vmem:[#allocation3 + $0x14c4] ss:$16 sps:$4 sm:$0xff]  }
 0x293   :  { %11276 = vmatprep.subr.bf16.mxu0 %v16219_v58  ;;  %12424 = vmatprep.subr.bf16.mxu1 %v16222_v59  ;;  %v16314_v58 = vld [vmem:[#allocation3 + $0x14cc] ss:$16 sps:$4 sm:$0xff]   ;;  %v16309_v59 = vld [vmem:[#allocation3 + $0x14c0] ss:$16 sps:$4 sm:$0xff]  }
 0x296   :  { %11277 = vmatpush1.bf16.msra.mxu0 %v16217_v60  ;;  %12425 = vmatpush1.bf16.msra.mxu1 %v16220_v61  ;;  %v16312_v60 = vld [vmem:[#allocation3 + $0x14c8] ss:$16 sps:$4 sm:$0xff]   ;;  %v16317_v61 = vld [vmem:[#allocation3 + $0x14e4] ss:$16 sps:$4 sm:$0xff]  }
 0x297   :  { %11278 = vmatprep.subr.bf16.mxu0 %v16225_v62  ;;  %12426 = vmatprep.subr.bf16.mxu1 %v16228_v63  ;;  %v16320_v62 = vld [vmem:[#allocation3 + $0x14ec] ss:$16 sps:$4 sm:$0xff]   ;;  %v16315_v63 = vld [vmem:[#allocation3 + $0x14e0] ss:$16 sps:$4 sm:$0xff]  }
 0x29a   :  { %11279 = vmatpush1.bf16.msra.mxu0 %v16223_v0  ;;  %12427 = vmatpush1.bf16.msra.mxu1 %v16226_v1  ;;  %v16318_v0 = vld [vmem:[#allocation3 + $0x14e8] ss:$16 sps:$4 sm:$0xff]   ;;  %v16323_v1 = vld [vmem:[#allocation3 + $0x1504] ss:$16 sps:$4 sm:$0xff]  }
 0x29b   :  { %11280 = vmatprep.subr.bf16.mxu0 %v16231_v2  ;;  %12428 = vmatprep.subr.bf16.mxu1 %v16234_v3  ;;  %v16326_v2 = vld [vmem:[#allocation3 + $0x150c] ss:$16 sps:$4 sm:$0xff]   ;;  %v16321_v3 = vld [vmem:[#allocation3 + $0x1500] ss:$16 sps:$4 sm:$0xff]  }
 0x29e   :  { %11281 = vmatpush1.bf16.msra.mxu0 %v16229_v4  ;;  %12429 = vmatpush1.bf16.msra.mxu1 %v16232_v5  ;;  %v16324_v4 = vld [vmem:[#allocation3 + $0x1508] ss:$16 sps:$4 sm:$0xff]   ;;  %v16329_v5 = vld [vmem:[#allocation3 + $0x1524] ss:$16 sps:$4 sm:$0xff]  }
 0x29f   :  { %11282 = vmatprep.subr.bf16.mxu0 %v16237_v6  ;;  %12430 = vmatprep.subr.bf16.mxu1 %v16240_v7  ;;  %v16332_v6 = vld [vmem:[#allocation3 + $0x152c] ss:$16 sps:$4 sm:$0xff]   ;;  %v16327_v7 = vld [vmem:[#allocation3 + $0x1520] ss:$16 sps:$4 sm:$0xff]  }
 0x2a2   :  { %11283 = vmatpush1.bf16.msra.mxu0 %v16235_v8  ;;  %12431 = vmatpush1.bf16.msra.mxu1 %v16238_v9  ;;  %v16330_v8 = vld [vmem:[#allocation3 + $0x1528] ss:$16 sps:$4 sm:$0xff]   ;;  %v16335_v9 = vld [vmem:[#allocation3 + $0x1544] ss:$16 sps:$4 sm:$0xff]  }
 0x2a3   :  { %11284 = vmatprep.subr.bf16.mxu0 %v16243_v10  ;;  %12432 = vmatprep.subr.bf16.mxu1 %v16246_v11  ;;  %v16338_v10 = vld [vmem:[#allocation3 + $0x154c] ss:$16 sps:$4 sm:$0xff]   ;;  %v16333_v11 = vld [vmem:[#allocation3 + $0x1540] ss:$16 sps:$4 sm:$0xff]  }
 0x2a6   :  { %11285 = vmatpush1.bf16.msra.mxu0 %v16241_v13  ;;  %12433 = vmatpush1.bf16.msra.mxu1 %v16244_v14  ;;  %v16336_v13 = vld [vmem:[#allocation3 + $0x1548] ss:$16 sps:$4 sm:$0xff]   ;;  %v16341_v14 = vld [vmem:[#allocation3 + $0x1564] ss:$16 sps:$4 sm:$0xff]  }
 0x2a7   :  { %11286 = vmatprep.subr.bf16.mxu0 %v16249_v16  ;;  %12434 = vmatprep.subr.bf16.mxu1 %v16252_v17  ;;  %v16344_v16 = vld [vmem:[#allocation3 + $0x156c] ss:$16 sps:$4 sm:$0xff]   ;;  %v16339_v17 = vld [vmem:[#allocation3 + $0x1560] ss:$16 sps:$4 sm:$0xff]  }
 0x2aa   :  { %11287 = vmatpush1.bf16.msra.mxu0 %v16247_v19  ;;  %12435 = vmatpush1.bf16.msra.mxu1 %v16250_v12  ;;  %v16342_v19 = vld [vmem:[#allocation3 + $0x1568] ss:$16 sps:$4 sm:$0xff]   ;;  %v16347_v12 = vld [vmem:[#allocation3 + $0x1584] ss:$16 sps:$4 sm:$0xff]  }
 0x2ab   :  { %11288 = vmatprep.subr.bf16.mxu0 %v16255_v21  ;;  %12436 = vmatprep.subr.bf16.mxu1 %v16258_v15  ;;  %v16350_v21 = vld [vmem:[#allocation3 + $0x158c] ss:$16 sps:$4 sm:$0xff]   ;;  %v16345_v15 = vld [vmem:[#allocation3 + $0x1580] ss:$16 sps:$4 sm:$0xff]  }
 0x2ae   :  { %11289 = vmatpush1.bf16.msra.mxu0 %v16253_v23  ;;  %12437 = vmatpush1.bf16.msra.mxu1 %v16256_v24  ;;  %v16348_v23 = vld [vmem:[#allocation3 + $0x1588] ss:$16 sps:$4 sm:$0xff]   ;;  %v16353_v24 = vld [vmem:[#allocation3 + $0x15a4] ss:$16 sps:$4 sm:$0xff]  }
 0x2af   :  { %11290 = vmatprep.subr.bf16.mxu0 %v16261_v25  ;;  %12438 = vmatprep.subr.bf16.mxu1 %v16264_v18  ;;  %v16356_v25 = vld [vmem:[#allocation3 + $0x15ac] ss:$16 sps:$4 sm:$0xff]   ;;  %v16351_v18 = vld [vmem:[#allocation3 + $0x15a0] ss:$16 sps:$4 sm:$0xff]  }
 0x2b2   :  { %11291 = vmatpush1.bf16.msra.mxu0 %v16259_v27  ;;  %12439 = vmatpush1.bf16.msra.mxu1 %v16262_v28  ;;  %v16354_v27 = vld [vmem:[#allocation3 + $0x15a8] ss:$16 sps:$4 sm:$0xff]   ;;  %v16359_v28 = vld [vmem:[#allocation3 + $0x15c4] ss:$16 sps:$4 sm:$0xff]  }
 0x2b3   :  { %11292 = vmatprep.subr.bf16.mxu0 %v16267_v20  ;;  %12440 = vmatprep.subr.bf16.mxu1 %v16270_v30  ;;  %v16362_v20 = vld [vmem:[#allocation3 + $0x15cc] ss:$16 sps:$4 sm:$0xff]   ;;  %v16357_v30 = vld [vmem:[#allocation3 + $0x15c0] ss:$16 sps:$4 sm:$0xff]  }
 0x2b6   :  { %11293 = vmatpush1.bf16.msra.mxu0 %v16265_v31  ;;  %12441 = vmatpush1.bf16.msra.mxu1 %v16268_v22  ;;  %v16360_v31 = vld [vmem:[#allocation3 + $0x15c8] ss:$16 sps:$4 sm:$0xff]   ;;  %v16365_v22 = vld [vmem:[#allocation3 + $0x15e4] ss:$16 sps:$4 sm:$0xff]  }
 0x2b7   :  { %11303 = vmatprep.subr.bf16.mxu0 %v16275_v33  ;;  %12451 = vmatprep.subr.bf16.mxu1 %v16278_v34  ;;  %v16368_v33 = vld [vmem:[#allocation3 + $0x15ec] ss:$16 sps:$4 sm:$0xff]   ;;  %v16363_v34 = vld [vmem:[#allocation3 + $0x15e0] ss:$16 sps:$4 sm:$0xff]  }
 0x2b9   :  { %11295 = vmatmul.mubr.bf16.vlgmr.msra.gmra.mrb[0].mxu0 %v13263_v26  ;;  %12443 = vmatmul.mubr.bf16.vlgmr.msra.gmra.mrb[0].mxu1 %v13263_v26  ;;  %v16366_v26 = vld [vmem:[#allocation3 + $0x15e8] ss:$16 sps:$4 sm:$0xff]  }
 0x2ba   :  { %11304 = vmatpush1.bf16.msra.mxu0 %v16273_v36  ;;  %12452 = vmatpush1.bf16.msra.mxu1 %v16276_v37  ;;  %v16373_v36 = vld [vmem:[#allocation3 + $0x1604] ss:$16 sps:$4 sm:$0xff]   ;;  %v16376_v37 = vld [vmem:[#allocation3 + $0x160c] ss:$16 sps:$4 sm:$0xff]  }
 0x2bb   :  { %11305 = vmatprep.subr.bf16.mxu0 %v16281_v38  ;;  %12453 = vmatprep.subr.bf16.mxu1 %v16284_v29  ;;  %v18244_v38 = vld [vmem:[%s18399_s0 + $0x58] sm:$0xff]  ;;  %v13265_v29 = vcombine.low %v18235_v35, %v18235_v35 }
 0x2bc   :  { %11335 = vmatprep.mubr.bf16.mxu0 %v13266_v39  ;;  %12483 = vmatprep.mubr.bf16.mxu1 %v13266_v39  ;;  %v16371_v39 = vld [vmem:[#allocation3 + $0x1600] ss:$16 sps:$4 sm:$0xff]   ;;  %v16385_v35 = vld [vmem:[#allocation3 + $0x1644] ss:$16 sps:$4 sm:$0xff]  }
 0x2be   :  { %11306 = vmatpush1.bf16.msra.mxu0 %v16279_v40  ;;  %12454 = vmatpush1.bf16.msra.mxu1 %v16282_v41  ;;  %v16374_v40 = vld [vmem:[#allocation3 + $0x1608] ss:$16 sps:$4 sm:$0xff]   ;;  %v16379_v41 = vld [vmem:[#allocation3 + $0x1624] ss:$16 sps:$4 sm:$0xff]  }
 0x2bf   :  { %11307 = vmatprep.subr.bf16.mxu0 %v16287_v32  ;;  %12455 = vmatprep.subr.bf16.mxu1 %v16290_v42  ;;  %v16382_v32 = vld [vmem:[#allocation3 + $0x162c] ss:$16 sps:$4 sm:$0xff]   ;;  %v13268_v42 = vcombine.high %v18244_v38, %v18244_v38 }
 0x2c2   :  { %11308 = vmatpush1.bf16.msra.mxu0 %v16285_v43  ;;  %12456 = vmatpush1.bf16.msra.mxu1 %v16288_v44  ;;  %v16377_v43 = vld [vmem:[#allocation3 + $0x1620] ss:$16 sps:$4 sm:$0xff]   ;;  %v16380_v44 = vld [vmem:[#allocation3 + $0x1628] ss:$16 sps:$4 sm:$0xff]  }
 0x2c3   :  { %11309 = vmatprep.subr.bf16.mxu0 %v16293_v45  ;;  %12457 = vmatprep.subr.bf16.mxu1 %v16296_v46  ;;  %v16388_v45 = vld [vmem:[#allocation3 + $0x164c] ss:$16 sps:$4 sm:$0xff]   ;;  %v16383_v46 = vld [vmem:[#allocation3 + $0x1640] ss:$16 sps:$4 sm:$0xff]  }
 0x2c6   :  { %11310 = vmatpush1.bf16.msra.mxu0 %v16291_v47  ;;  %12458 = vmatpush1.bf16.msra.mxu1 %v16294_v48  ;;  %v16386_v47 = vld [vmem:[#allocation3 + $0x1648] ss:$16 sps:$4 sm:$0xff]   ;;  %v16391_v48 = vld [vmem:[#allocation3 + $0x1664] ss:$16 sps:$4 sm:$0xff]  }
 0x2c7   :  { %11311 = vmatprep.subr.bf16.mxu0 %v16299_v49  ;;  %12459 = vmatprep.subr.bf16.mxu1 %v16302_v50  ;;  %v16394_v49 = vld [vmem:[#allocation3 + $0x166c] ss:$16 sps:$4 sm:$0xff]   ;;  %v16389_v50 = vld [vmem:[#allocation3 + $0x1660] ss:$16 sps:$4 sm:$0xff]  }
 0x2ca   :  { %11312 = vmatpush1.bf16.msra.mxu0 %v16297_v51  ;;  %12460 = vmatpush1.bf16.msra.mxu1 %v16300_v52  ;;  %v16392_v51 = vld [vmem:[#allocation3 + $0x1668] ss:$16 sps:$4 sm:$0xff]   ;;  %v16397_v52 = vld [vmem:[#allocation3 + $0x1684] ss:$16 sps:$4 sm:$0xff]  }
 0x2cb   :  { %11313 = vmatprep.subr.bf16.mxu0 %v16305_v53  ;;  %12461 = vmatprep.subr.bf16.mxu1 %v16308_v54  ;;  %v16400_v53 = vld [vmem:[#allocation3 + $0x168c] ss:$16 sps:$4 sm:$0xff]   ;;  %v16395_v54 = vld [vmem:[#allocation3 + $0x1680] ss:$16 sps:$4 sm:$0xff]  }
 0x2ce   :  { %11314 = vmatpush1.bf16.msra.mxu0 %v16303_v55  ;;  %12462 = vmatpush1.bf16.msra.mxu1 %v16306_v56  ;;  %v16398_v55 = vld [vmem:[#allocation3 + $0x1688] ss:$16 sps:$4 sm:$0xff]   ;;  %v16403_v56 = vld [vmem:[#allocation3 + $0x16a4] ss:$16 sps:$4 sm:$0xff]  }
 0x2cf   :  { %11315 = vmatprep.subr.bf16.mxu0 %v16311_v57  ;;  %12463 = vmatprep.subr.bf16.mxu1 %v16314_v58  ;;  %v16406_v57 = vld [vmem:[#allocation3 + $0x16ac] ss:$16 sps:$4 sm:$0xff]   ;;  %v16401_v58 = vld [vmem:[#allocation3 + $0x16a0] ss:$16 sps:$4 sm:$0xff]  }
 0x2d2   :  { %11316 = vmatpush1.bf16.msra.mxu0 %v16309_v59  ;;  %12464 = vmatpush1.bf16.msra.mxu1 %v16312_v60  ;;  %v16404_v59 = vld [vmem:[#allocation3 + $0x16a8] ss:$16 sps:$4 sm:$0xff]   ;;  %v16409_v60 = vld [vmem:[#allocation3 + $0x16c4] ss:$16 sps:$4 sm:$0xff]  }
 0x2d3   :  { %11317 = vmatprep.subr.bf16.mxu0 %v16317_v61  ;;  %12465 = vmatprep.subr.bf16.mxu1 %v16320_v62  ;;  %v16412_v61 = vld [vmem:[#allocation3 + $0x16cc] ss:$16 sps:$4 sm:$0xff]   ;;  %v16407_v62 = vld [vmem:[#allocation3 + $0x16c0] ss:$16 sps:$4 sm:$0xff]  }
 0x2d6   :  { %11318 = vmatpush1.bf16.msra.mxu0 %v16315_v63  ;;  %12466 = vmatpush1.bf16.msra.mxu1 %v16318_v0  ;;  %v16410_v63 = vld [vmem:[#allocation3 + $0x16c8] ss:$16 sps:$4 sm:$0xff]   ;;  %v16415_v0 = vld [vmem:[#allocation3 + $0x16e4] ss:$16 sps:$4 sm:$0xff]  }
 0x2d7   :  { %11319 = vmatprep.subr.bf16.mxu0 %v16323_v1  ;;  %12467 = vmatprep.subr.bf16.mxu1 %v16326_v2  ;;  %v16418_v1 = vld [vmem:[#allocation3 + $0x16ec] ss:$16 sps:$4 sm:$0xff]   ;;  %v16413_v2 = vld [vmem:[#allocation3 + $0x16e0] ss:$16 sps:$4 sm:$0xff]  }
 0x2da   :  { %11320 = vmatpush1.bf16.msra.mxu0 %v16321_v3  ;;  %12468 = vmatpush1.bf16.msra.mxu1 %v16324_v4  ;;  %v16416_v3 = vld [vmem:[#allocation3 + $0x16e8] ss:$16 sps:$4 sm:$0xff]   ;;  %v16421_v4 = vld [vmem:[#allocation3 + $0x1704] ss:$16 sps:$4 sm:$0xff]  }
 0x2db   :  { %11321 = vmatprep.subr.bf16.mxu0 %v16329_v5  ;;  %12469 = vmatprep.subr.bf16.mxu1 %v16332_v6  ;;  %v16424_v5 = vld [vmem:[#allocation3 + $0x170c] ss:$16 sps:$4 sm:$0xff]   ;;  %v16419_v6 = vld [vmem:[#allocation3 + $0x1700] ss:$16 sps:$4 sm:$0xff]  }
 0x2de   :  { %11322 = vmatpush1.bf16.msra.mxu0 %v16327_v7  ;;  %12470 = vmatpush1.bf16.msra.mxu1 %v16330_v8  ;;  %v16422_v7 = vld [vmem:[#allocation3 + $0x1708] ss:$16 sps:$4 sm:$0xff]   ;;  %v16427_v8 = vld [vmem:[#allocation3 + $0x1724] ss:$16 sps:$4 sm:$0xff]  }
 0x2df   :  { %11323 = vmatprep.subr.bf16.mxu0 %v16335_v9  ;;  %12471 = vmatprep.subr.bf16.mxu1 %v16338_v10  ;;  %v16430_v9 = vld [vmem:[#allocation3 + $0x172c] ss:$16 sps:$4 sm:$0xff]   ;;  %v16425_v10 = vld [vmem:[#allocation3 + $0x1720] ss:$16 sps:$4 sm:$0xff]  }
 0x2e2   :  { %11324 = vmatpush1.bf16.msra.mxu0 %v16333_v11  ;;  %12472 = vmatpush1.bf16.msra.mxu1 %v16336_v13  ;;  %v16428_v11 = vld [vmem:[#allocation3 + $0x1728] ss:$16 sps:$4 sm:$0xff]   ;;  %v16433_v13 = vld [vmem:[#allocation3 + $0x1744] ss:$16 sps:$4 sm:$0xff]  }
 0x2e3   :  { %11325 = vmatprep.subr.bf16.mxu0 %v16341_v14  ;;  %12473 = vmatprep.subr.bf16.mxu1 %v16344_v16  ;;  %v16436_v14 = vld [vmem:[#allocation3 + $0x174c] ss:$16 sps:$4 sm:$0xff]   ;;  %v16431_v16 = vld [vmem:[#allocation3 + $0x1740] ss:$16 sps:$4 sm:$0xff]  }
 0x2e6   :  { %11326 = vmatpush1.bf16.msra.mxu0 %v16339_v17  ;;  %12474 = vmatpush1.bf16.msra.mxu1 %v16342_v19  ;;  %v16434_v17 = vld [vmem:[#allocation3 + $0x1748] ss:$16 sps:$4 sm:$0xff]   ;;  %v16439_v19 = vld [vmem:[#allocation3 + $0x1764] ss:$16 sps:$4 sm:$0xff]  }
 0x2e7   :  { %11327 = vmatprep.subr.bf16.mxu0 %v16347_v12  ;;  %12475 = vmatprep.subr.bf16.mxu1 %v16350_v21  ;;  %v16442_v12 = vld [vmem:[#allocation3 + $0x176c] ss:$16 sps:$4 sm:$0xff]   ;;  %v16437_v21 = vld [vmem:[#allocation3 + $0x1760] ss:$16 sps:$4 sm:$0xff]  }
 0x2ea   :  { %11328 = vmatpush1.bf16.msra.mxu0 %v16345_v15  ;;  %12476 = vmatpush1.bf16.msra.mxu1 %v16348_v23  ;;  %v16440_v15 = vld [vmem:[#allocation3 + $0x1768] ss:$16 sps:$4 sm:$0xff]   ;;  %v16445_v23 = vld [vmem:[#allocation3 + $0x1784] ss:$16 sps:$4 sm:$0xff]  }
 0x2eb   :  { %11329 = vmatprep.subr.bf16.mxu0 %v16353_v24  ;;  %12477 = vmatprep.subr.bf16.mxu1 %v16356_v25  ;;  %v16448_v24 = vld [vmem:[#allocation3 + $0x178c] ss:$16 sps:$4 sm:$0xff]   ;;  %v16443_v25 = vld [vmem:[#allocation3 + $0x1780] ss:$16 sps:$4 sm:$0xff]  }
 0x2ee   :  { %11330 = vmatpush1.bf16.msra.mxu0 %v16351_v18  ;;  %12478 = vmatpush1.bf16.msra.mxu1 %v16354_v27  ;;  %v16446_v18 = vld [vmem:[#allocation3 + $0x1788] ss:$16 sps:$4 sm:$0xff]   ;;  %v16451_v27 = vld [vmem:[#allocation3 + $0x17a4] ss:$16 sps:$4 sm:$0xff]  }
 0x2ef   :  { %11331 = vmatprep.subr.bf16.mxu0 %v16359_v28  ;;  %12479 = vmatprep.subr.bf16.mxu1 %v16362_v20  ;;  %v16454_v28 = vld [vmem:[#allocation3 + $0x17ac] ss:$16 sps:$4 sm:$0xff]   ;;  %v16449_v20 = vld [vmem:[#allocation3 + $0x17a0] ss:$16 sps:$4 sm:$0xff]  }
 0x2f2   :  { %11332 = vmatpush1.bf16.msra.mxu0 %v16357_v30  ;;  %12480 = vmatpush1.bf16.msra.mxu1 %v16360_v31  ;;  %v16452_v30 = vld [vmem:[#allocation3 + $0x17a8] ss:$16 sps:$4 sm:$0xff]   ;;  %v16457_v31 = vld [vmem:[#allocation3 + $0x17c4] ss:$16 sps:$4 sm:$0xff]  }
 0x2f3   :  { %11333 = vmatprep.subr.bf16.mxu0 %v16365_v22  ;;  %12481 = vmatprep.subr.bf16.mxu1 %v16368_v33  ;;  %v16460_v22 = vld [vmem:[#allocation3 + $0x17cc] ss:$16 sps:$4 sm:$0xff]   ;;  %v16455_v33 = vld [vmem:[#allocation3 + $0x17c0] ss:$16 sps:$4 sm:$0xff]  }
 0x2f6   :  { %11334 = vmatpush1.bf16.msra.mxu0 %v16363_v34  ;;  %12482 = vmatpush1.bf16.msra.mxu1 %v16366_v26  ;;  %v16458_v34 = vld [vmem:[#allocation3 + $0x17c8] ss:$16 sps:$4 sm:$0xff]   ;;  %v16463_v26 = vld [vmem:[#allocation3 + $0x17e4] ss:$16 sps:$4 sm:$0xff]  }
 0x2f7   :  { %11344 = vmatprep.subr.bf16.mxu0 %v16373_v36  ;;  %12492 = vmatprep.subr.bf16.mxu1 %v16376_v37  ;;  %v16466_v36 = vld [vmem:[#allocation3 + $0x17ec] ss:$16 sps:$4 sm:$0xff]   ;;  %v16461_v37 = vld [vmem:[#allocation3 + $0x17e0] ss:$16 sps:$4 sm:$0xff]  }
 0x2f9   :  { %11336 = vmatmul.mubr.bf16.vlgmr.msra.gmra.mrb[0].mxu0 %v13265_v29  ;;  %12484 = vmatmul.mubr.bf16.vlgmr.msra.gmra.mrb[0].mxu1 %v13265_v29  ;;  %v16464_v29 = vld [vmem:[#allocation3 + $0x17e8] ss:$16 sps:$4 sm:$0xff]  }
 0x2fa   :  { %11345 = vmatpush1.bf16.msra.mxu0 %v16371_v39  ;;  %12493 = vmatpush1.bf16.msra.mxu1 %v16374_v40  ;;  %v16471_v39 = vld [vmem:[#allocation3 + $0x1804] ss:$16 sps:$4 sm:$0xff]   ;;  %v16474_v40 = vld [vmem:[#allocation3 + $0x180c] ss:$16 sps:$4 sm:$0xff]  }
 0x2fb   :  { %11346 = vmatprep.subr.bf16.mxu0 %v16379_v41  ;;  %12494 = vmatprep.subr.bf16.mxu1 %v16382_v32  ;;  %v18253_v41 = vld [vmem:[%s18399_s0 + $0x60] sm:$0xff]  ;;  %v13267_v32 = vcombine.low %v18244_v38, %v18244_v38 }
 0x2fc   :  { %11376 = vmatprep.mubr.bf16.mxu0 %v13268_v42  ;;  %12524 = vmatprep.mubr.bf16.mxu1 %v13268_v42  ;;  %v16469_v42 = vld [vmem:[#allocation3 + $0x1800] ss:$16 sps:$4 sm:$0xff]   ;;  %v16483_v38 = vld [vmem:[#allocation3 + $0x1844] ss:$16 sps:$4 sm:$0xff]  }
 0x2fe   :  { %11347 = vmatpush1.bf16.msra.mxu0 %v16377_v43  ;;  %12495 = vmatpush1.bf16.msra.mxu1 %v16380_v44  ;;  %v16472_v43 = vld [vmem:[#allocation3 + $0x1808] ss:$16 sps:$4 sm:$0xff]   ;;  %v16477_v44 = vld [vmem:[#allocation3 + $0x1824] ss:$16 sps:$4 sm:$0xff]  }
 0x2ff   :  { %11348 = vmatprep.subr.bf16.mxu0 %v16385_v35  ;;  %12496 = vmatprep.subr.bf16.mxu1 %v16388_v45  ;;  %v16480_v35 = vld [vmem:[#allocation3 + $0x182c] ss:$16 sps:$4 sm:$0xff]   ;;  %v13270_v45 = vcombine.high %v18253_v41, %v18253_v41 }
 0x302   :  { %11349 = vmatpush1.bf16.msra.mxu0 %v16383_v46  ;;  %12497 = vmatpush1.bf16.msra.mxu1 %v16386_v47  ;;  %v16475_v46 = vld [vmem:[#allocation3 + $0x1820] ss:$16 sps:$4 sm:$0xff]   ;;  %v16478_v47 = vld [vmem:[#allocation3 + $0x1828] ss:$16 sps:$4 sm:$0xff]  }
 0x303   :  { %11350 = vmatprep.subr.bf16.mxu0 %v16391_v48  ;;  %12498 = vmatprep.subr.bf16.mxu1 %v16394_v49  ;;  %v16486_v48 = vld [vmem:[#allocation3 + $0x184c] ss:$16 sps:$4 sm:$0xff]   ;;  %v16481_v49 = vld [vmem:[#allocation3 + $0x1840] ss:$16 sps:$4 sm:$0xff]  }
 0x306   :  { %11351 = vmatpush1.bf16.msra.mxu0 %v16389_v50  ;;  %12499 = vmatpush1.bf16.msra.mxu1 %v16392_v51  ;;  %v16484_v50 = vld [vmem:[#allocation3 + $0x1848] ss:$16 sps:$4 sm:$0xff]   ;;  %v16489_v51 = vld [vmem:[#allocation3 + $0x1864] ss:$16 sps:$4 sm:$0xff]  }
 0x307   :  { %11352 = vmatprep.subr.bf16.mxu0 %v16397_v52  ;;  %12500 = vmatprep.subr.bf16.mxu1 %v16400_v53  ;;  %v16492_v52 = vld [vmem:[#allocation3 + $0x186c] ss:$16 sps:$4 sm:$0xff]   ;;  %v16487_v53 = vld [vmem:[#allocation3 + $0x1860] ss:$16 sps:$4 sm:$0xff]  }
 0x30a   :  { %11353 = vmatpush1.bf16.msra.mxu0 %v16395_v54  ;;  %12501 = vmatpush1.bf16.msra.mxu1 %v16398_v55  ;;  %v16490_v54 = vld [vmem:[#allocation3 + $0x1868] ss:$16 sps:$4 sm:$0xff]   ;;  %v16495_v55 = vld [vmem:[#allocation3 + $0x1884] ss:$16 sps:$4 sm:$0xff]  }
 0x30b   :  { %11354 = vmatprep.subr.bf16.mxu0 %v16403_v56  ;;  %12502 = vmatprep.subr.bf16.mxu1 %v16406_v57  ;;  %v16498_v56 = vld [vmem:[#allocation3 + $0x188c] ss:$16 sps:$4 sm:$0xff]   ;;  %v16493_v57 = vld [vmem:[#allocation3 + $0x1880] ss:$16 sps:$4 sm:$0xff]  }
 0x30e   :  { %11355 = vmatpush1.bf16.msra.mxu0 %v16401_v58  ;;  %12503 = vmatpush1.bf16.msra.mxu1 %v16404_v59  ;;  %v16496_v58 = vld [vmem:[#allocation3 + $0x1888] ss:$16 sps:$4 sm:$0xff]   ;;  %v16501_v59 = vld [vmem:[#allocation3 + $0x18a4] ss:$16 sps:$4 sm:$0xff]  }
 0x30f   :  { %11356 = vmatprep.subr.bf16.mxu0 %v16409_v60  ;;  %12504 = vmatprep.subr.bf16.mxu1 %v16412_v61  ;;  %v16504_v60 = vld [vmem:[#allocation3 + $0x18ac] ss:$16 sps:$4 sm:$0xff]   ;;  %v16499_v61 = vld [vmem:[#allocation3 + $0x18a0] ss:$16 sps:$4 sm:$0xff]  }
 0x312   :  { %11357 = vmatpush1.bf16.msra.mxu0 %v16407_v62  ;;  %12505 = vmatpush1.bf16.msra.mxu1 %v16410_v63  ;;  %v16502_v62 = vld [vmem:[#allocation3 + $0x18a8] ss:$16 sps:$4 sm:$0xff]   ;;  %v16507_v63 = vld [vmem:[#allocation3 + $0x18c4] ss:$16 sps:$4 sm:$0xff]  }
 0x313   :  { %11358 = vmatprep.subr.bf16.mxu0 %v16415_v0  ;;  %12506 = vmatprep.subr.bf16.mxu1 %v16418_v1  ;;  %v16510_v0 = vld [vmem:[#allocation3 + $0x18cc] ss:$16 sps:$4 sm:$0xff]   ;;  %v16505_v1 = vld [vmem:[#allocation3 + $0x18c0] ss:$16 sps:$4 sm:$0xff]  }
 0x316   :  { %11359 = vmatpush1.bf16.msra.mxu0 %v16413_v2  ;;  %12507 = vmatpush1.bf16.msra.mxu1 %v16416_v3  ;;  %v16508_v2 = vld [vmem:[#allocation3 + $0x18c8] ss:$16 sps:$4 sm:$0xff]   ;;  %v16513_v3 = vld [vmem:[#allocation3 + $0x18e4] ss:$16 sps:$4 sm:$0xff]  }
 0x317   :  { %11360 = vmatprep.subr.bf16.mxu0 %v16421_v4  ;;  %12508 = vmatprep.subr.bf16.mxu1 %v16424_v5  ;;  %v16516_v4 = vld [vmem:[#allocation3 + $0x18ec] ss:$16 sps:$4 sm:$0xff]   ;;  %v16511_v5 = vld [vmem:[#allocation3 + $0x18e0] ss:$16 sps:$4 sm:$0xff]  }
 0x31a   :  { %11361 = vmatpush1.bf16.msra.mxu0 %v16419_v6  ;;  %12509 = vmatpush1.bf16.msra.mxu1 %v16422_v7  ;;  %v16514_v6 = vld [vmem:[#allocation3 + $0x18e8] ss:$16 sps:$4 sm:$0xff]   ;;  %v16519_v7 = vld [vmem:[#allocation3 + $0x1904] ss:$16 sps:$4 sm:$0xff]  }
 0x31b   :  { %11362 = vmatprep.subr.bf16.mxu0 %v16427_v8  ;;  %12510 = vmatprep.subr.bf16.mxu1 %v16430_v9  ;;  %v16522_v8 = vld [vmem:[#allocation3 + $0x190c] ss:$16 sps:$4 sm:$0xff]   ;;  %v16517_v9 = vld [vmem:[#allocation3 + $0x1900] ss:$16 sps:$4 sm:$0xff]  }
 0x31e   :  { %11363 = vmatpush1.bf16.msra.mxu0 %v16425_v10  ;;  %12511 = vmatpush1.bf16.msra.mxu1 %v16428_v11  ;;  %v16520_v10 = vld [vmem:[#allocation3 + $0x1908] ss:$16 sps:$4 sm:$0xff]   ;;  %v16525_v11 = vld [vmem:[#allocation3 + $0x1924] ss:$16 sps:$4 sm:$0xff]  }
 0x31f   :  { %11364 = vmatprep.subr.bf16.mxu0 %v16433_v13  ;;  %12512 = vmatprep.subr.bf16.mxu1 %v16436_v14  ;;  %v16528_v13 = vld [vmem:[#allocation3 + $0x192c] ss:$16 sps:$4 sm:$0xff]   ;;  %v16523_v14 = vld [vmem:[#allocation3 + $0x1920] ss:$16 sps:$4 sm:$0xff]  }
 0x322   :  { %11365 = vmatpush1.bf16.msra.mxu0 %v16431_v16  ;;  %12513 = vmatpush1.bf16.msra.mxu1 %v16434_v17  ;;  %v16526_v16 = vld [vmem:[#allocation3 + $0x1928] ss:$16 sps:$4 sm:$0xff]   ;;  %v16531_v17 = vld [vmem:[#allocation3 + $0x1944] ss:$16 sps:$4 sm:$0xff]  }
 0x323   :  { %11366 = vmatprep.subr.bf16.mxu0 %v16439_v19  ;;  %12514 = vmatprep.subr.bf16.mxu1 %v16442_v12  ;;  %v16534_v19 = vld [vmem:[#allocation3 + $0x194c] ss:$16 sps:$4 sm:$0xff]   ;;  %v16529_v12 = vld [vmem:[#allocation3 + $0x1940] ss:$16 sps:$4 sm:$0xff]  }
 0x326   :  { %11367 = vmatpush1.bf16.msra.mxu0 %v16437_v21  ;;  %12515 = vmatpush1.bf16.msra.mxu1 %v16440_v15  ;;  %v16532_v21 = vld [vmem:[#allocation3 + $0x1948] ss:$16 sps:$4 sm:$0xff]   ;;  %v16537_v15 = vld [vmem:[#allocation3 + $0x1964] ss:$16 sps:$4 sm:$0xff]  }
 0x327   :  { %11368 = vmatprep.subr.bf16.mxu0 %v16445_v23  ;;  %12516 = vmatprep.subr.bf16.mxu1 %v16448_v24  ;;  %v16540_v23 = vld [vmem:[#allocation3 + $0x196c] ss:$16 sps:$4 sm:$0xff]   ;;  %v16535_v24 = vld [vmem:[#allocation3 + $0x1960] ss:$16 sps:$4 sm:$0xff]  }
 0x32a   :  { %11369 = vmatpush1.bf16.msra.mxu0 %v16443_v25  ;;  %12517 = vmatpush1.bf16.msra.mxu1 %v16446_v18  ;;  %v16538_v25 = vld [vmem:[#allocation3 + $0x1968] ss:$16 sps:$4 sm:$0xff]   ;;  %v16543_v18 = vld [vmem:[#allocation3 + $0x1984] ss:$16 sps:$4 sm:$0xff]  }
 0x32b   :  { %11370 = vmatprep.subr.bf16.mxu0 %v16451_v27  ;;  %12518 = vmatprep.subr.bf16.mxu1 %v16454_v28  ;;  %v16546_v27 = vld [vmem:[#allocation3 + $0x198c] ss:$16 sps:$4 sm:$0xff]   ;;  %v16541_v28 = vld [vmem:[#allocation3 + $0x1980] ss:$16 sps:$4 sm:$0xff]  }
 0x32e   :  { %11371 = vmatpush1.bf16.msra.mxu0 %v16449_v20  ;;  %12519 = vmatpush1.bf16.msra.mxu1 %v16452_v30  ;;  %v16544_v20 = vld [vmem:[#allocation3 + $0x1988] ss:$16 sps:$4 sm:$0xff]   ;;  %v16549_v30 = vld [vmem:[#allocation3 + $0x19a4] ss:$16 sps:$4 sm:$0xff]  }
 0x32f   :  { %11372 = vmatprep.subr.bf16.mxu0 %v16457_v31  ;;  %12520 = vmatprep.subr.bf16.mxu1 %v16460_v22  ;;  %v16552_v31 = vld [vmem:[#allocation3 + $0x19ac] ss:$16 sps:$4 sm:$0xff]   ;;  %v16547_v22 = vld [vmem:[#allocation3 + $0x19a0] ss:$16 sps:$4 sm:$0xff]  }
 0x332   :  { %11373 = vmatpush1.bf16.msra.mxu0 %v16455_v33  ;;  %12521 = vmatpush1.bf16.msra.mxu1 %v16458_v34  ;;  %v16550_v33 = vld [vmem:[#allocation3 + $0x19a8] ss:$16 sps:$4 sm:$0xff]   ;;  %v16555_v34 = vld [vmem:[#allocation3 + $0x19c4] ss:$16 sps:$4 sm:$0xff]  }
 0x333   :  { %11374 = vmatprep.subr.bf16.mxu0 %v16463_v26  ;;  %12522 = vmatprep.subr.bf16.mxu1 %v16466_v36  ;;  %v16558_v26 = vld [vmem:[#allocation3 + $0x19cc] ss:$16 sps:$4 sm:$0xff]   ;;  %v16553_v36 = vld [vmem:[#allocation3 + $0x19c0] ss:$16 sps:$4 sm:$0xff]  }
 0x336   :  { %11375 = vmatpush1.bf16.msra.mxu0 %v16461_v37  ;;  %12523 = vmatpush1.bf16.msra.mxu1 %v16464_v29  ;;  %v16556_v37 = vld [vmem:[#allocation3 + $0x19c8] ss:$16 sps:$4 sm:$0xff]   ;;  %v16561_v29 = vld [vmem:[#allocation3 + $0x19e4] ss:$16 sps:$4 sm:$0xff]  }
 0x337   :  { %11385 = vmatprep.subr.bf16.mxu0 %v16471_v39  ;;  %12533 = vmatprep.subr.bf16.mxu1 %v16474_v40  ;;  %v16564_v39 = vld [vmem:[#allocation3 + $0x19ec] ss:$16 sps:$4 sm:$0xff]   ;;  %v16559_v40 = vld [vmem:[#allocation3 + $0x19e0] ss:$16 sps:$4 sm:$0xff]  }
 0x339   :  { %11377 = vmatmul.mubr.bf16.vlgmr.msra.gmra.mrb[0].mxu0 %v13267_v32  ;;  %12525 = vmatmul.mubr.bf16.vlgmr.msra.gmra.mrb[0].mxu1 %v13267_v32  ;;  %v16562_v32 = vld [vmem:[#allocation3 + $0x19e8] ss:$16 sps:$4 sm:$0xff]  }
 0x33a   :  { %11386 = vmatpush1.bf16.msra.mxu0 %v16469_v42  ;;  %12534 = vmatpush1.bf16.msra.mxu1 %v16472_v43  ;;  %v16569_v42 = vld [vmem:[#allocation3 + $0x1a04] ss:$16 sps:$4 sm:$0xff]   ;;  %v16572_v43 = vld [vmem:[#allocation3 + $0x1a0c] ss:$16 sps:$4 sm:$0xff]  }
 0x33b   :  { %11387 = vmatprep.subr.bf16.mxu0 %v16477_v44  ;;  %12535 = vmatprep.subr.bf16.mxu1 %v16480_v35  ;;  %v18262_v44 = vld [vmem:[%s18399_s0 + $0x68] sm:$0xff]  ;;  %v13269_v35 = vcombine.low %v18253_v41, %v18253_v41 }
 0x33c   :  { %11417 = vmatprep.mubr.bf16.mxu0 %v13270_v45  ;;  %12565 = vmatprep.mubr.bf16.mxu1 %v13270_v45  ;;  %v16567_v45 = vld [vmem:[#allocation3 + $0x1a00] ss:$16 sps:$4 sm:$0xff]   ;;  %v16581_v41 = vld [vmem:[#allocation3 + $0x1a44] ss:$16 sps:$4 sm:$0xff]  }
 0x33e   :  { %11388 = vmatpush1.bf16.msra.mxu0 %v16475_v46  ;;  %12536 = vmatpush1.bf16.msra.mxu1 %v16478_v47  ;;  %v16570_v46 = vld [vmem:[#allocation3 + $0x1a08] ss:$16 sps:$4 sm:$0xff]   ;;  %v16575_v47 = vld [vmem:[#allocation3 + $0x1a24] ss:$16 sps:$4 sm:$0xff]  }
 0x33f   :  { %11389 = vmatprep.subr.bf16.mxu0 %v16483_v38  ;;  %12537 = vmatprep.subr.bf16.mxu1 %v16486_v48  ;;  %v16578_v38 = vld [vmem:[#allocation3 + $0x1a2c] ss:$16 sps:$4 sm:$0xff]   ;;  %v13272_v48 = vcombine.high %v18262_v44, %v18262_v44 }
 0x342   :  { %11390 = vmatpush1.bf16.msra.mxu0 %v16481_v49  ;;  %12538 = vmatpush1.bf16.msra.mxu1 %v16484_v50  ;;  %v16573_v49 = vld [vmem:[#allocation3 + $0x1a20] ss:$16 sps:$4 sm:$0xff]   ;;  %v16576_v50 = vld [vmem:[#allocation3 + $0x1a28] ss:$16 sps:$4 sm:$0xff]  }
 0x343   :  { %11391 = vmatprep.subr.bf16.mxu0 %v16489_v51  ;;  %12539 = vmatprep.subr.bf16.mxu1 %v16492_v52  ;;  %v16584_v51 = vld [vmem:[#allocation3 + $0x1a4c] ss:$16 sps:$4 sm:$0xff]   ;;  %v16579_v52 = vld [vmem:[#allocation3 + $0x1a40] ss:$16 sps:$4 sm:$0xff]  }
 0x346   :  { %11392 = vmatpush1.bf16.msra.mxu0 %v16487_v53  ;;  %12540 = vmatpush1.bf16.msra.mxu1 %v16490_v54  ;;  %v16582_v53 = vld [vmem:[#allocation3 + $0x1a48] ss:$16 sps:$4 sm:$0xff]   ;;  %v16587_v54 = vld [vmem:[#allocation3 + $0x1a64] ss:$16 sps:$4 sm:$0xff]  }
 0x347   :  { %11393 = vmatprep.subr.bf16.mxu0 %v16495_v55  ;;  %12541 = vmatprep.subr.bf16.mxu1 %v16498_v56  ;;  %v16590_v55 = vld [vmem:[#allocation3 + $0x1a6c] ss:$16 sps:$4 sm:$0xff]   ;;  %v16585_v56 = vld [vmem:[#allocation3 + $0x1a60] ss:$16 sps:$4 sm:$0xff]  }
 0x34a   :  { %11394 = vmatpush1.bf16.msra.mxu0 %v16493_v57  ;;  %12542 = vmatpush1.bf16.msra.mxu1 %v16496_v58  ;;  %v16588_v57 = vld [vmem:[#allocation3 + $0x1a68] ss:$16 sps:$4 sm:$0xff]   ;;  %v16593_v58 = vld [vmem:[#allocation3 + $0x1a84] ss:$16 sps:$4 sm:$0xff]  }
 0x34b   :  { %11395 = vmatprep.subr.bf16.mxu0 %v16501_v59  ;;  %12543 = vmatprep.subr.bf16.mxu1 %v16504_v60  ;;  %v16596_v59 = vld [vmem:[#allocation3 + $0x1a8c] ss:$16 sps:$4 sm:$0xff]   ;;  %v16591_v60 = vld [vmem:[#allocation3 + $0x1a80] ss:$16 sps:$4 sm:$0xff]  }
 0x34e   :  { %11396 = vmatpush1.bf16.msra.mxu0 %v16499_v61  ;;  %12544 = vmatpush1.bf16.msra.mxu1 %v16502_v62  ;;  %v16594_v61 = vld [vmem:[#allocation3 + $0x1a88] ss:$16 sps:$4 sm:$0xff]   ;;  %v16599_v62 = vld [vmem:[#allocation3 + $0x1aa4] ss:$16 sps:$4 sm:$0xff]  }
 0x34f   :  { %11397 = vmatprep.subr.bf16.mxu0 %v16507_v63  ;;  %12545 = vmatprep.subr.bf16.mxu1 %v16510_v0  ;;  %v16602_v63 = vld [vmem:[#allocation3 + $0x1aac] ss:$16 sps:$4 sm:$0xff]   ;;  %v16597_v0 = vld [vmem:[#allocation3 + $0x1aa0] ss:$16 sps:$4 sm:$0xff]  }
 0x352   :  { %11398 = vmatpush1.bf16.msra.mxu0 %v16505_v1  ;;  %12546 = vmatpush1.bf16.msra.mxu1 %v16508_v2  ;;  %v16600_v1 = vld [vmem:[#allocation3 + $0x1aa8] ss:$16 sps:$4 sm:$0xff]   ;;  %v16605_v2 = vld [vmem:[#allocation3 + $0x1ac4] ss:$16 sps:$4 sm:$0xff]  }
 0x353   :  { %11399 = vmatprep.subr.bf16.mxu0 %v16513_v3  ;;  %12547 = vmatprep.subr.bf16.mxu1 %v16516_v4  ;;  %v16608_v3 = vld [vmem:[#allocation3 + $0x1acc] ss:$16 sps:$4 sm:$0xff]   ;;  %v16603_v4 = vld [vmem:[#allocation3 + $0x1ac0] ss:$16 sps:$4 sm:$0xff]  }
 0x356   :  { %11400 = vmatpush1.bf16.msra.mxu0 %v16511_v5  ;;  %12548 = vmatpush1.bf16.msra.mxu1 %v16514_v6  ;;  %v16606_v5 = vld [vmem:[#allocation3 + $0x1ac8] ss:$16 sps:$4 sm:$0xff]   ;;  %v16611_v6 = vld [vmem:[#allocation3 + $0x1ae4] ss:$16 sps:$4 sm:$0xff]  }
 0x357   :  { %11401 = vmatprep.subr.bf16.mxu0 %v16519_v7  ;;  %12549 = vmatprep.subr.bf16.mxu1 %v16522_v8  ;;  %v16614_v7 = vld [vmem:[#allocation3 + $0x1aec] ss:$16 sps:$4 sm:$0xff]   ;;  %v16609_v8 = vld [vmem:[#allocation3 + $0x1ae0] ss:$16 sps:$4 sm:$0xff]  }
 0x35a   :  { %11402 = vmatpush1.bf16.msra.mxu0 %v16517_v9  ;;  %12550 = vmatpush1.bf16.msra.mxu1 %v16520_v10  ;;  %v16612_v9 = vld [vmem:[#allocation3 + $0x1ae8] ss:$16 sps:$4 sm:$0xff]   ;;  %v16617_v10 = vld [vmem:[#allocation3 + $0x1b04] ss:$16 sps:$4 sm:$0xff]  }
 0x35b   :  { %11403 = vmatprep.subr.bf16.mxu0 %v16525_v11  ;;  %12551 = vmatprep.subr.bf16.mxu1 %v16528_v13  ;;  %v16620_v11 = vld [vmem:[#allocation3 + $0x1b0c] ss:$16 sps:$4 sm:$0xff]   ;;  %v16615_v13 = vld [vmem:[#allocation3 + $0x1b00] ss:$16 sps:$4 sm:$0xff]  }
 0x35e   :  { %11404 = vmatpush1.bf16.msra.mxu0 %v16523_v14  ;;  %12552 = vmatpush1.bf16.msra.mxu1 %v16526_v16  ;;  %v16618_v14 = vld [vmem:[#allocation3 + $0x1b08] ss:$16 sps:$4 sm:$0xff]   ;;  %v16623_v16 = vld [vmem:[#allocation3 + $0x1b24] ss:$16 sps:$4 sm:$0xff]  }
 0x35f   :  { %11405 = vmatprep.subr.bf16.mxu0 %v16531_v17  ;;  %12553 = vmatprep.subr.bf16.mxu1 %v16534_v19  ;;  %v16626_v17 = vld [vmem:[#allocation3 + $0x1b2c] ss:$16 sps:$4 sm:$0xff]   ;;  %v16621_v19 = vld [vmem:[#allocation3 + $0x1b20] ss:$16 sps:$4 sm:$0xff]  }
 0x362   :  { %11406 = vmatpush1.bf16.msra.mxu0 %v16529_v12  ;;  %12554 = vmatpush1.bf16.msra.mxu1 %v16532_v21  ;;  %v16624_v12 = vld [vmem:[#allocation3 + $0x1b28] ss:$16 sps:$4 sm:$0xff]   ;;  %v16629_v21 = vld [vmem:[#allocation3 + $0x1b44] ss:$16 sps:$4 sm:$0xff]  }
 0x363   :  { %11407 = vmatprep.subr.bf16.mxu0 %v16537_v15  ;;  %12555 = vmatprep.subr.bf16.mxu1 %v16540_v23  ;;  %v16632_v15 = vld [vmem:[#allocation3 + $0x1b4c] ss:$16 sps:$4 sm:$0xff]   ;;  %v16627_v23 = vld [vmem:[#allocation3 + $0x1b40] ss:$16 sps:$4 sm:$0xff]  }
 0x366   :  { %11408 = vmatpush1.bf16.msra.mxu0 %v16535_v24  ;;  %12556 = vmatpush1.bf16.msra.mxu1 %v16538_v25  ;;  %v16630_v24 = vld [vmem:[#allocation3 + $0x1b48] ss:$16 sps:$4 sm:$0xff]   ;;  %v16635_v25 = vld [vmem:[#allocation3 + $0x1b64] ss:$16 sps:$4 sm:$0xff]  }
 0x367   :  { %11409 = vmatprep.subr.bf16.mxu0 %v16543_v18  ;;  %12557 = vmatprep.subr.bf16.mxu1 %v16546_v27  ;;  %v16638_v18 = vld [vmem:[#allocation3 + $0x1b6c] ss:$16 sps:$4 sm:$0xff]   ;;  %v16633_v27 = vld [vmem:[#allocation3 + $0x1b60] ss:$16 sps:$4 sm:$0xff]  }
 0x36a   :  { %11410 = vmatpush1.bf16.msra.mxu0 %v16541_v28  ;;  %12558 = vmatpush1.bf16.msra.mxu1 %v16544_v20  ;;  %v16636_v28 = vld [vmem:[#allocation3 + $0x1b68] ss:$16 sps:$4 sm:$0xff]   ;;  %v16641_v20 = vld [vmem:[#allocation3 + $0x1b84] ss:$16 sps:$4 sm:$0xff]  }
 0x36b   :  { %11411 = vmatprep.subr.bf16.mxu0 %v16549_v30  ;;  %12559 = vmatprep.subr.bf16.mxu1 %v16552_v31  ;;  %v16644_v30 = vld [vmem:[#allocation3 + $0x1b8c] ss:$16 sps:$4 sm:$0xff]   ;;  %v16639_v31 = vld [vmem:[#allocation3 + $0x1b80] ss:$16 sps:$4 sm:$0xff]  }
 0x36e   :  { %11412 = vmatpush1.bf16.msra.mxu0 %v16547_v22  ;;  %12560 = vmatpush1.bf16.msra.mxu1 %v16550_v33  ;;  %v16642_v22 = vld [vmem:[#allocation3 + $0x1b88] ss:$16 sps:$4 sm:$0xff]   ;;  %v16647_v33 = vld [vmem:[#allocation3 + $0x1ba4] ss:$16 sps:$4 sm:$0xff]  }
 0x36f   :  { %11413 = vmatprep.subr.bf16.mxu0 %v16555_v34  ;;  %12561 = vmatprep.subr.bf16.mxu1 %v16558_v26  ;;  %v16650_v34 = vld [vmem:[#allocation3 + $0x1bac] ss:$16 sps:$4 sm:$0xff]   ;;  %v16645_v26 = vld [vmem:[#allocation3 + $0x1ba0] ss:$16 sps:$4 sm:$0xff]  }
 0x372   :  { %11414 = vmatpush1.bf16.msra.mxu0 %v16553_v36  ;;  %12562 = vmatpush1.bf16.msra.mxu1 %v16556_v37  ;;  %v16648_v36 = vld [vmem:[#allocation3 + $0x1ba8] ss:$16 sps:$4 sm:$0xff]   ;;  %v16653_v37 = vld [vmem:[#allocation3 + $0x1bc4] ss:$16 sps:$4 sm:$0xff]  }
 0x373   :  { %11415 = vmatprep.subr.bf16.mxu0 %v16561_v29  ;;  %12563 = vmatprep.subr.bf16.mxu1 %v16564_v39  ;;  %v16656_v29 = vld [vmem:[#allocation3 + $0x1bcc] ss:$16 sps:$4 sm:$0xff]   ;;  %v16651_v39 = vld [vmem:[#allocation3 + $0x1bc0] ss:$16 sps:$4 sm:$0xff]  }
 0x376   :  { %11416 = vmatpush1.bf16.msra.mxu0 %v16559_v40  ;;  %12564 = vmatpush1.bf16.msra.mxu1 %v16562_v32  ;;  %v16654_v40 = vld [vmem:[#allocation3 + $0x1bc8] ss:$16 sps:$4 sm:$0xff]   ;;  %v16659_v32 = vld [vmem:[#allocation3 + $0x1be4] ss:$16 sps:$4 sm:$0xff]  }
 0x377   :  { %11426 = vmatprep.subr.bf16.mxu0 %v16569_v42  ;;  %12574 = vmatprep.subr.bf16.mxu1 %v16572_v43  ;;  %v16662_v42 = vld [vmem:[#allocation3 + $0x1bec] ss:$16 sps:$4 sm:$0xff]   ;;  %v16657_v43 = vld [vmem:[#allocation3 + $0x1be0] ss:$16 sps:$4 sm:$0xff]  }
 0x379   :  { %11418 = vmatmul.mubr.bf16.vlgmr.msra.gmra.mrb[0].mxu0 %v13269_v35  ;;  %12566 = vmatmul.mubr.bf16.vlgmr.msra.gmra.mrb[0].mxu1 %v13269_v35  ;;  %v16660_v35 = vld [vmem:[#allocation3 + $0x1be8] ss:$16 sps:$4 sm:$0xff]  }
 0x37a   :  { %11427 = vmatpush1.bf16.msra.mxu0 %v16567_v45  ;;  %12575 = vmatpush1.bf16.msra.mxu1 %v16570_v46  ;;  %v16667_v45 = vld [vmem:[#allocation3 + $0x1c04] ss:$16 sps:$4 sm:$0xff]   ;;  %v16670_v46 = vld [vmem:[#allocation3 + $0x1c0c] ss:$16 sps:$4 sm:$0xff]  }
 0x37b   :  { %11428 = vmatprep.subr.bf16.mxu0 %v16575_v47  ;;  %12576 = vmatprep.subr.bf16.mxu1 %v16578_v38  ;;  %v18271_v47 = vld [vmem:[%s18399_s0 + $0x70] sm:$0xff]  ;;  %v13271_v38 = vcombine.low %v18262_v44, %v18262_v44 }
 0x37c   :  { %11458 = vmatprep.mubr.bf16.mxu0 %v13272_v48  ;;  %12606 = vmatprep.mubr.bf16.mxu1 %v13272_v48  ;;  %v16665_v48 = vld [vmem:[#allocation3 + $0x1c00] ss:$16 sps:$4 sm:$0xff]   ;;  %v16679_v44 = vld [vmem:[#allocation3 + $0x1c44] ss:$16 sps:$4 sm:$0xff]  }
 0x37e   :  { %11429 = vmatpush1.bf16.msra.mxu0 %v16573_v49  ;;  %12577 = vmatpush1.bf16.msra.mxu1 %v16576_v50  ;;  %v16668_v49 = vld [vmem:[#allocation3 + $0x1c08] ss:$16 sps:$4 sm:$0xff]   ;;  %v16673_v50 = vld [vmem:[#allocation3 + $0x1c24] ss:$16 sps:$4 sm:$0xff]  }
 0x37f   :  { %11430 = vmatprep.subr.bf16.mxu0 %v16581_v41  ;;  %12578 = vmatprep.subr.bf16.mxu1 %v16584_v51  ;;  %v16676_v41 = vld [vmem:[#allocation3 + $0x1c2c] ss:$16 sps:$4 sm:$0xff]   ;;  %v13274_v51 = vcombine.high %v18271_v47, %v18271_v47 }
 0x382   :  { %11431 = vmatpush1.bf16.msra.mxu0 %v16579_v52  ;;  %12579 = vmatpush1.bf16.msra.mxu1 %v16582_v53  ;;  %v16671_v52 = vld [vmem:[#allocation3 + $0x1c20] ss:$16 sps:$4 sm:$0xff]   ;;  %v16674_v53 = vld [vmem:[#allocation3 + $0x1c28] ss:$16 sps:$4 sm:$0xff]  }
 0x383   :  { %11432 = vmatprep.subr.bf16.mxu0 %v16587_v54  ;;  %12580 = vmatprep.subr.bf16.mxu1 %v16590_v55  ;;  %v16682_v54 = vld [vmem:[#allocation3 + $0x1c4c] ss:$16 sps:$4 sm:$0xff]   ;;  %v16677_v55 = vld [vmem:[#allocation3 + $0x1c40] ss:$16 sps:$4 sm:$0xff]  }
 0x386   :  { %11433 = vmatpush1.bf16.msra.mxu0 %v16585_v56  ;;  %12581 = vmatpush1.bf16.msra.mxu1 %v16588_v57  ;;  %v16680_v56 = vld [vmem:[#allocation3 + $0x1c48] ss:$16 sps:$4 sm:$0xff]   ;;  %v16685_v57 = vld [vmem:[#allocation3 + $0x1c64] ss:$16 sps:$4 sm:$0xff]  }
 0x387   :  { %11434 = vmatprep.subr.bf16.mxu0 %v16593_v58  ;;  %12582 = vmatprep.subr.bf16.mxu1 %v16596_v59  ;;  %v16688_v58 = vld [vmem:[#allocation3 + $0x1c6c] ss:$16 sps:$4 sm:$0xff]   ;;  %v16683_v59 = vld [vmem:[#allocation3 + $0x1c60] ss:$16 sps:$4 sm:$0xff]  }
 0x38a   :  { %11435 = vmatpush1.bf16.msra.mxu0 %v16591_v60  ;;  %12583 = vmatpush1.bf16.msra.mxu1 %v16594_v61  ;;  %v16686_v60 = vld [vmem:[#allocation3 + $0x1c68] ss:$16 sps:$4 sm:$0xff]   ;;  %v16691_v61 = vld [vmem:[#allocation3 + $0x1c84] ss:$16 sps:$4 sm:$0xff]  }
 0x38b   :  { %11436 = vmatprep.subr.bf16.mxu0 %v16599_v62  ;;  %12584 = vmatprep.subr.bf16.mxu1 %v16602_v63  ;;  %v16694_v62 = vld [vmem:[#allocation3 + $0x1c8c] ss:$16 sps:$4 sm:$0xff]   ;;  %v16689_v63 = vld [vmem:[#allocation3 + $0x1c80] ss:$16 sps:$4 sm:$0xff]  }
 0x38e   :  { %11437 = vmatpush1.bf16.msra.mxu0 %v16597_v0  ;;  %12585 = vmatpush1.bf16.msra.mxu1 %v16600_v1  ;;  %v16692_v0 = vld [vmem:[#allocation3 + $0x1c88] ss:$16 sps:$4 sm:$0xff]   ;;  %v16697_v1 = vld [vmem:[#allocation3 + $0x1ca4] ss:$16 sps:$4 sm:$0xff]  }
 0x38f   :  { %11438 = vmatprep.subr.bf16.mxu0 %v16605_v2  ;;  %12586 = vmatprep.subr.bf16.mxu1 %v16608_v3  ;;  %v16700_v2 = vld [vmem:[#allocation3 + $0x1cac] ss:$16 sps:$4 sm:$0xff]   ;;  %v16695_v3 = vld [vmem:[#allocation3 + $0x1ca0] ss:$16 sps:$4 sm:$0xff]  }
 0x392   :  { %11439 = vmatpush1.bf16.msra.mxu0 %v16603_v4  ;;  %12587 = vmatpush1.bf16.msra.mxu1 %v16606_v5  ;;  %v16698_v4 = vld [vmem:[#allocation3 + $0x1ca8] ss:$16 sps:$4 sm:$0xff]   ;;  %v16703_v5 = vld [vmem:[#allocation3 + $0x1cc4] ss:$16 sps:$4 sm:$0xff]  }
 0x393   :  { %11440 = vmatprep.subr.bf16.mxu0 %v16611_v6  ;;  %12588 = vmatprep.subr.bf16.mxu1 %v16614_v7  ;;  %v16706_v6 = vld [vmem:[#allocation3 + $0x1ccc] ss:$16 sps:$4 sm:$0xff]   ;;  %v16701_v7 = vld [vmem:[#allocation3 + $0x1cc0] ss:$16 sps:$4 sm:$0xff]  }
 0x396   :  { %11441 = vmatpush1.bf16.msra.mxu0 %v16609_v8  ;;  %12589 = vmatpush1.bf16.msra.mxu1 %v16612_v9  ;;  %v16704_v8 = vld [vmem:[#allocation3 + $0x1cc8] ss:$16 sps:$4 sm:$0xff]   ;;  %v16709_v9 = vld [vmem:[#allocation3 + $0x1ce4] ss:$16 sps:$4 sm:$0xff]  }
 0x397   :  { %11442 = vmatprep.subr.bf16.mxu0 %v16617_v10  ;;  %12590 = vmatprep.subr.bf16.mxu1 %v16620_v11  ;;  %v16712_v10 = vld [vmem:[#allocation3 + $0x1cec] ss:$16 sps:$4 sm:$0xff]   ;;  %v16707_v11 = vld [vmem:[#allocation3 + $0x1ce0] ss:$16 sps:$4 sm:$0xff]  }
 0x39a   :  { %11443 = vmatpush1.bf16.msra.mxu0 %v16615_v13  ;;  %12591 = vmatpush1.bf16.msra.mxu1 %v16618_v14  ;;  %v16710_v13 = vld [vmem:[#allocation3 + $0x1ce8] ss:$16 sps:$4 sm:$0xff]   ;;  %v16715_v14 = vld [vmem:[#allocation3 + $0x1d04] ss:$16 sps:$4 sm:$0xff]  }
 0x39b   :  { %11444 = vmatprep.subr.bf16.mxu0 %v16623_v16  ;;  %12592 = vmatprep.subr.bf16.mxu1 %v16626_v17  ;;  %v16718_v16 = vld [vmem:[#allocation3 + $0x1d0c] ss:$16 sps:$4 sm:$0xff]   ;;  %v16713_v17 = vld [vmem:[#allocation3 + $0x1d00] ss:$16 sps:$4 sm:$0xff]  }
 0x39e   :  { %11445 = vmatpush1.bf16.msra.mxu0 %v16621_v19  ;;  %12593 = vmatpush1.bf16.msra.mxu1 %v16624_v12  ;;  %v16716_v19 = vld [vmem:[#allocation3 + $0x1d08] ss:$16 sps:$4 sm:$0xff]   ;;  %v16721_v12 = vld [vmem:[#allocation3 + $0x1d24] ss:$16 sps:$4 sm:$0xff]  }
 0x39f   :  { %11446 = vmatprep.subr.bf16.mxu0 %v16629_v21  ;;  %12594 = vmatprep.subr.bf16.mxu1 %v16632_v15  ;;  %v16724_v21 = vld [vmem:[#allocation3 + $0x1d2c] ss:$16 sps:$4 sm:$0xff]   ;;  %v16719_v15 = vld [vmem:[#allocation3 + $0x1d20] ss:$16 sps:$4 sm:$0xff]  }
 0x3a2   :  { %11447 = vmatpush1.bf16.msra.mxu0 %v16627_v23  ;;  %12595 = vmatpush1.bf16.msra.mxu1 %v16630_v24  ;;  %v16722_v23 = vld [vmem:[#allocation3 + $0x1d28] ss:$16 sps:$4 sm:$0xff]   ;;  %v16727_v24 = vld [vmem:[#allocation3 + $0x1d44] ss:$16 sps:$4 sm:$0xff]  }
 0x3a3   :  { %11448 = vmatprep.subr.bf16.mxu0 %v16635_v25  ;;  %12596 = vmatprep.subr.bf16.mxu1 %v16638_v18  ;;  %v16730_v25 = vld [vmem:[#allocation3 + $0x1d4c] ss:$16 sps:$4 sm:$0xff]   ;;  %v16725_v18 = vld [vmem:[#allocation3 + $0x1d40] ss:$16 sps:$4 sm:$0xff]  }
 0x3a6   :  { %11449 = vmatpush1.bf16.msra.mxu0 %v16633_v27  ;;  %12597 = vmatpush1.bf16.msra.mxu1 %v16636_v28  ;;  %v16728_v27 = vld [vmem:[#allocation3 + $0x1d48] ss:$16 sps:$4 sm:$0xff]   ;;  %v16733_v28 = vld [vmem:[#allocation3 + $0x1d64] ss:$16 sps:$4 sm:$0xff]  }
 0x3a7   :  { %11450 = vmatprep.subr.bf16.mxu0 %v16641_v20  ;;  %12598 = vmatprep.subr.bf16.mxu1 %v16644_v30  ;;  %v16736_v20 = vld [vmem:[#allocation3 + $0x1d6c] ss:$16 sps:$4 sm:$0xff]   ;;  %v16731_v30 = vld [vmem:[#allocation3 + $0x1d60] ss:$16 sps:$4 sm:$0xff]  }
 0x3aa   :  { %11451 = vmatpush1.bf16.msra.mxu0 %v16639_v31  ;;  %12599 = vmatpush1.bf16.msra.mxu1 %v16642_v22  ;;  %v16734_v31 = vld [vmem:[#allocation3 + $0x1d68] ss:$16 sps:$4 sm:$0xff]   ;;  %v16739_v22 = vld [vmem:[#allocation3 + $0x1d84] ss:$16 sps:$4 sm:$0xff]  }
 0x3ab   :  { %11452 = vmatprep.subr.bf16.mxu0 %v16647_v33  ;;  %12600 = vmatprep.subr.bf16.mxu1 %v16650_v34  ;;  %v16742_v33 = vld [vmem:[#allocation3 + $0x1d8c] ss:$16 sps:$4 sm:$0xff]   ;;  %v16737_v34 = vld [vmem:[#allocation3 + $0x1d80] ss:$16 sps:$4 sm:$0xff]  }
 0x3ae   :  { %11453 = vmatpush1.bf16.msra.mxu0 %v16645_v26  ;;  %12601 = vmatpush1.bf16.msra.mxu1 %v16648_v36  ;;  %v16740_v26 = vld [vmem:[#allocation3 + $0x1d88] ss:$16 sps:$4 sm:$0xff]   ;;  %v16745_v36 = vld [vmem:[#allocation3 + $0x1da4] ss:$16 sps:$4 sm:$0xff]  }
 0x3af   :  { %11454 = vmatprep.subr.bf16.mxu0 %v16653_v37  ;;  %12602 = vmatprep.subr.bf16.mxu1 %v16656_v29  ;;  %v16748_v37 = vld [vmem:[#allocation3 + $0x1dac] ss:$16 sps:$4 sm:$0xff]   ;;  %v16743_v29 = vld [vmem:[#allocation3 + $0x1da0] ss:$16 sps:$4 sm:$0xff]  }
 0x3b2   :  { %11455 = vmatpush1.bf16.msra.mxu0 %v16651_v39  ;;  %12603 = vmatpush1.bf16.msra.mxu1 %v16654_v40  ;;  %v16746_v39 = vld [vmem:[#allocation3 + $0x1da8] ss:$16 sps:$4 sm:$0xff]   ;;  %v16751_v40 = vld [vmem:[#allocation3 + $0x1dc4] ss:$16 sps:$4 sm:$0xff]  }
 0x3b3   :  { %11456 = vmatprep.subr.bf16.mxu0 %v16659_v32  ;;  %12604 = vmatprep.subr.bf16.mxu1 %v16662_v42  ;;  %v16754_v32 = vld [vmem:[#allocation3 + $0x1dcc] ss:$16 sps:$4 sm:$0xff]   ;;  %v16749_v42 = vld [vmem:[#allocation3 + $0x1dc0] ss:$16 sps:$4 sm:$0xff]  }
 0x3b6   :  { %11457 = vmatpush1.bf16.msra.mxu0 %v16657_v43  ;;  %12605 = vmatpush1.bf16.msra.mxu1 %v16660_v35  ;;  %v16752_v43 = vld [vmem:[#allocation3 + $0x1dc8] ss:$16 sps:$4 sm:$0xff]   ;;  %v16757_v35 = vld [vmem:[#allocation3 + $0x1de4] ss:$16 sps:$4 sm:$0xff]  }
 0x3b7   :  { %11467 = vmatprep.subr.bf16.mxu0 %v16667_v45  ;;  %12615 = vmatprep.subr.bf16.mxu1 %v16670_v46  ;;  %v16760_v45 = vld [vmem:[#allocation3 + $0x1dec] ss:$16 sps:$4 sm:$0xff]   ;;  %v16755_v46 = vld [vmem:[#allocation3 + $0x1de0] ss:$16 sps:$4 sm:$0xff]  }
 0x3b9   :  { %11459 = vmatmul.mubr.bf16.vlgmr.msra.gmra.mrb[0].mxu0 %v13271_v38  ;;  %12607 = vmatmul.mubr.bf16.vlgmr.msra.gmra.mrb[0].mxu1 %v13271_v38  ;;  %v16758_v38 = vld [vmem:[#allocation3 + $0x1de8] ss:$16 sps:$4 sm:$0xff]  }
 0x3ba   :  { %11468 = vmatpush1.bf16.msra.mxu0 %v16665_v48  ;;  %12616 = vmatpush1.bf16.msra.mxu1 %v16668_v49  ;;  %v16765_v48 = vld [vmem:[#allocation3 + $0x1e04] ss:$16 sps:$4 sm:$0xff]   ;;  %v16768_v49 = vld [vmem:[#allocation3 + $0x1e0c] ss:$16 sps:$4 sm:$0xff]  }
 0x3bb   :  { %11469 = vmatprep.subr.bf16.mxu0 %v16673_v50  ;;  %12617 = vmatprep.subr.bf16.mxu1 %v16676_v41  ;;  %v13273_v50 = vcombine.low %v18271_v47, %v18271_v47  ;;  %v18282_v41 = vld [vmem:[%s18399_s0 + $0x78] sm:$0xff]  ;;  %v16769_v47 = vld [vmem:[#allocation3 + $0x1e20] ss:$16 sps:$4 sm:$0xff]  }
 0x3bc   :  { %11499 = vmatprep.mubr.bf16.mxu0 %v13274_v51  ;;  %12647 = vmatprep.mubr.bf16.mxu1 %v13274_v51  ;;  %v16763_v51 = vld [vmem:[#allocation3 + $0x1e00] ss:$16 sps:$4 sm:$0xff]  }
 0x3be   :  { %11470 = vmatpush1.bf16.msra.mxu0 %v16671_v52  ;;  %12618 = vmatpush1.bf16.msra.mxu1 %v16674_v53  ;;  %v16766_v52 = vld [vmem:[#allocation3 + $0x1e08] ss:$16 sps:$4 sm:$0xff]   ;;  %v16771_v53 = vld [vmem:[#allocation3 + $0x1e24] ss:$16 sps:$4 sm:$0xff]  }
 0x3bf   :  { %11471 = vmatprep.subr.bf16.mxu0 %v16679_v44  ;;  %12619 = vmatprep.subr.bf16.mxu1 %v16682_v54  ;;  %v16774_v44 = vld [vmem:[#allocation3 + $0x1e2c] ss:$16 sps:$4 sm:$0xff]   ;;  %v13276_v54 = vcombine.high %v18282_v41, %v18282_v41 }
 0x3c2   :  { %11472 = vmatpush1.bf16.msra.mxu0 %v16677_v55  ;;  %12620 = vmatpush1.bf16.msra.mxu1 %v16680_v56  ;;  %v16772_v55 = vld [vmem:[#allocation3 + $0x1e28] ss:$16 sps:$4 sm:$0xff]   ;;  %v16777_v56 = vld [vmem:[#allocation3 + $0x1e44] ss:$16 sps:$4 sm:$0xff]  }
 0x3c3   :  { %11473 = vmatprep.subr.bf16.mxu0 %v16685_v57  ;;  %12621 = vmatprep.subr.bf16.mxu1 %v16688_v58  ;;  %v16780_v57 = vld [vmem:[#allocation3 + $0x1e4c] ss:$16 sps:$4 sm:$0xff]   ;;  %v16775_v58 = vld [vmem:[#allocation3 + $0x1e40] ss:$16 sps:$4 sm:$0xff]  }
 0x3c6   :  { %11474 = vmatpush1.bf16.msra.mxu0 %v16683_v59  ;;  %12622 = vmatpush1.bf16.msra.mxu1 %v16686_v60  ;;  %v16778_v59 = vld [vmem:[#allocation3 + $0x1e48] ss:$16 sps:$4 sm:$0xff]   ;;  %v16783_v60 = vld [vmem:[#allocation3 + $0x1e64] ss:$16 sps:$4 sm:$0xff]  }
 0x3c7   :  { %11475 = vmatprep.subr.bf16.mxu0 %v16691_v61  ;;  %12623 = vmatprep.subr.bf16.mxu1 %v16694_v62  ;;  %v16786_v61 = vld [vmem:[#allocation3 + $0x1e6c] ss:$16 sps:$4 sm:$0xff]   ;;  %v16781_v62 = vld [vmem:[#allocation3 + $0x1e60] ss:$16 sps:$4 sm:$0xff]  }
 0x3ca   :  { %11476 = vmatpush1.bf16.msra.mxu0 %v16689_v63  ;;  %12624 = vmatpush1.bf16.msra.mxu1 %v16692_v0  ;;  %v16784_v63 = vld [vmem:[#allocation3 + $0x1e68] ss:$16 sps:$4 sm:$0xff]   ;;  %v16789_v0 = vld [vmem:[#allocation3 + $0x1e84] ss:$16 sps:$4 sm:$0xff]  }
 0x3cb   :  { %11477 = vmatprep.subr.bf16.mxu0 %v16697_v1  ;;  %12625 = vmatprep.subr.bf16.mxu1 %v16700_v2  ;;  %v16792_v1 = vld [vmem:[#allocation3 + $0x1e8c] ss:$16 sps:$4 sm:$0xff]   ;;  %v16787_v2 = vld [vmem:[#allocation3 + $0x1e80] ss:$16 sps:$4 sm:$0xff]  }
 0x3ce   :  { %11478 = vmatpush1.bf16.msra.mxu0 %v16695_v3  ;;  %12626 = vmatpush1.bf16.msra.mxu1 %v16698_v4  ;;  %v16790_v3 = vld [vmem:[#allocation3 + $0x1e88] ss:$16 sps:$4 sm:$0xff]   ;;  %v16795_v4 = vld [vmem:[#allocation3 + $0x1ea4] ss:$16 sps:$4 sm:$0xff]  }
 0x3cf   :  { %11479 = vmatprep.subr.bf16.mxu0 %v16703_v5  ;;  %12627 = vmatprep.subr.bf16.mxu1 %v16706_v6  ;;  %v16798_v5 = vld [vmem:[#allocation3 + $0x1eac] ss:$16 sps:$4 sm:$0xff]   ;;  %v16793_v6 = vld [vmem:[#allocation3 + $0x1ea0] ss:$16 sps:$4 sm:$0xff]  }
 0x3d2   :  { %11480 = vmatpush1.bf16.msra.mxu0 %v16701_v7  ;;  %12628 = vmatpush1.bf16.msra.mxu1 %v16704_v8  ;;  %v16796_v7 = vld [vmem:[#allocation3 + $0x1ea8] ss:$16 sps:$4 sm:$0xff]   ;;  %v16801_v8 = vld [vmem:[#allocation3 + $0x1ec4] ss:$16 sps:$4 sm:$0xff]  }
 0x3d3   :  { %11481 = vmatprep.subr.bf16.mxu0 %v16709_v9  ;;  %12629 = vmatprep.subr.bf16.mxu1 %v16712_v10  ;;  %v16804_v9 = vld [vmem:[#allocation3 + $0x1ecc] ss:$16 sps:$4 sm:$0xff]   ;;  %v16799_v10 = vld [vmem:[#allocation3 + $0x1ec0] ss:$16 sps:$4 sm:$0xff]  }
 0x3d6   :  { %11482 = vmatpush1.bf16.msra.mxu0 %v16707_v11  ;;  %12630 = vmatpush1.bf16.msra.mxu1 %v16710_v13  ;;  %v16802_v11 = vld [vmem:[#allocation3 + $0x1ec8] ss:$16 sps:$4 sm:$0xff]   ;;  %v16807_v13 = vld [vmem:[#allocation3 + $0x1ee4] ss:$16 sps:$4 sm:$0xff]  }
 0x3d7   :  { %11483 = vmatprep.subr.bf16.mxu0 %v16715_v14  ;;  %12631 = vmatprep.subr.bf16.mxu1 %v16718_v16  ;;  %v16810_v14 = vld [vmem:[#allocation3 + $0x1eec] ss:$16 sps:$4 sm:$0xff]   ;;  %v16805_v16 = vld [vmem:[#allocation3 + $0x1ee0] ss:$16 sps:$4 sm:$0xff]  }
 0x3da   :  { %11484 = vmatpush1.bf16.msra.mxu0 %v16713_v17  ;;  %12632 = vmatpush1.bf16.msra.mxu1 %v16716_v19  ;;  %v16808_v17 = vld [vmem:[#allocation3 + $0x1ee8] ss:$16 sps:$4 sm:$0xff]   ;;  %v16813_v19 = vld [vmem:[#allocation3 + $0x1f04] ss:$16 sps:$4 sm:$0xff]  }
 0x3db   :  { %11485 = vmatprep.subr.bf16.mxu0 %v16721_v12  ;;  %12633 = vmatprep.subr.bf16.mxu1 %v16724_v21  ;;  %v16816_v12 = vld [vmem:[#allocation3 + $0x1f0c] ss:$16 sps:$4 sm:$0xff]   ;;  %v16811_v21 = vld [vmem:[#allocation3 + $0x1f00] ss:$16 sps:$4 sm:$0xff]  }
 0x3de   :  { %11486 = vmatpush1.bf16.msra.mxu0 %v16719_v15  ;;  %12634 = vmatpush1.bf16.msra.mxu1 %v16722_v23  ;;  %v16814_v15 = vld [vmem:[#allocation3 + $0x1f08] ss:$16 sps:$4 sm:$0xff]   ;;  %v16819_v23 = vld [vmem:[#allocation3 + $0x1f24] ss:$16 sps:$4 sm:$0xff]  }
 0x3df   :  { %11487 = vmatprep.subr.bf16.mxu0 %v16727_v24  ;;  %12635 = vmatprep.subr.bf16.mxu1 %v16730_v25  ;;  %v16822_v24 = vld [vmem:[#allocation3 + $0x1f2c] ss:$16 sps:$4 sm:$0xff]   ;;  %v16817_v25 = vld [vmem:[#allocation3 + $0x1f20] ss:$16 sps:$4 sm:$0xff]  }
 0x3e2   :  { %11488 = vmatpush1.bf16.msra.mxu0 %v16725_v18  ;;  %12636 = vmatpush1.bf16.msra.mxu1 %v16728_v27  ;;  %v16820_v18 = vld [vmem:[#allocation3 + $0x1f28] ss:$16 sps:$4 sm:$0xff]   ;;  %v16825_v27 = vld [vmem:[#allocation3 + $0x1f44] ss:$16 sps:$4 sm:$0xff]  }
 0x3e3   :  { %11489 = vmatprep.subr.bf16.mxu0 %v16733_v28  ;;  %12637 = vmatprep.subr.bf16.mxu1 %v16736_v20  ;;  %v16828_v28 = vld [vmem:[#allocation3 + $0x1f4c] ss:$16 sps:$4 sm:$0xff]   ;;  %v16823_v20 = vld [vmem:[#allocation3 + $0x1f40] ss:$16 sps:$4 sm:$0xff]  }
 0x3e6   :  { %11490 = vmatpush1.bf16.msra.mxu0 %v16731_v30  ;;  %12638 = vmatpush1.bf16.msra.mxu1 %v16734_v31  ;;  %v16826_v30 = vld [vmem:[#allocation3 + $0x1f48] ss:$16 sps:$4 sm:$0xff]   ;;  %v16831_v31 = vld [vmem:[#allocation3 + $0x1f64] ss:$16 sps:$4 sm:$0xff]  }
 0x3e7   :  { %11491 = vmatprep.subr.bf16.mxu0 %v16739_v22  ;;  %12639 = vmatprep.subr.bf16.mxu1 %v16742_v33  ;;  %v16834_v22 = vld [vmem:[#allocation3 + $0x1f6c] ss:$16 sps:$4 sm:$0xff]   ;;  %v16829_v33 = vld [vmem:[#allocation3 + $0x1f60] ss:$16 sps:$4 sm:$0xff]  }
 0x3ea   :  { %11492 = vmatpush1.bf16.msra.mxu0 %v16737_v34  ;;  %12640 = vmatpush1.bf16.msra.mxu1 %v16740_v26  ;;  %v16832_v34 = vld [vmem:[#allocation3 + $0x1f68] ss:$16 sps:$4 sm:$0xff]   ;;  %v16837_v26 = vld [vmem:[#allocation3 + $0x1f84] ss:$16 sps:$4 sm:$0xff]  }
 0x3eb   :  { %11493 = vmatprep.subr.bf16.mxu0 %v16745_v36  ;;  %12641 = vmatprep.subr.bf16.mxu1 %v16748_v37  ;;  %v16840_v36 = vld [vmem:[#allocation3 + $0x1f8c] ss:$16 sps:$4 sm:$0xff]   ;;  %v16835_v37 = vld [vmem:[#allocation3 + $0x1f80] ss:$16 sps:$4 sm:$0xff]  }
 0x3ee   :  { %11494 = vmatpush1.bf16.msra.mxu0 %v16743_v29  ;;  %12642 = vmatpush1.bf16.msra.mxu1 %v16746_v39  ;;  %v16838_v29 = vld [vmem:[#allocation3 + $0x1f88] ss:$16 sps:$4 sm:$0xff]   ;;  %v16843_v39 = vld [vmem:[#allocation3 + $0x1fa4] ss:$16 sps:$4 sm:$0xff]  }
 0x3ef   :  { %11495 = vmatprep.subr.bf16.mxu0 %v16751_v40  ;;  %12643 = vmatprep.subr.bf16.mxu1 %v16754_v32  ;;  %v16846_v40 = vld [vmem:[#allocation3 + $0x1fac] ss:$16 sps:$4 sm:$0xff]   ;;  %v16841_v32 = vld [vmem:[#allocation3 + $0x1fa0] ss:$16 sps:$4 sm:$0xff]  }
 0x3f2   :  { %11496 = vmatpush1.bf16.msra.mxu0 %v16749_v42  ;;  %12644 = vmatpush1.bf16.msra.mxu1 %v16752_v43  ;;  %v16844_v42 = vld [vmem:[#allocation3 + $0x1fa8] ss:$16 sps:$4 sm:$0xff]   ;;  %v16849_v43 = vld [vmem:[#allocation3 + $0x1fc4] ss:$16 sps:$4 sm:$0xff]  }
 0x3f3   :  { %11497 = vmatprep.subr.bf16.mxu0 %v16757_v35  ;;  %12645 = vmatprep.subr.bf16.mxu1 %v16760_v45  ;;  %v16852_v35 = vld [vmem:[#allocation3 + $0x1fcc] ss:$16 sps:$4 sm:$0xff]   ;;  %v16847_v45 = vld [vmem:[#allocation3 + $0x1fc0] ss:$16 sps:$4 sm:$0xff]  }
 0x3f6   :  { %11498 = vmatpush1.bf16.msra.mxu0 %v16755_v46  ;;  %12646 = vmatpush1.bf16.msra.mxu1 %v16758_v38  ;;  %v16850_v46 = vld [vmem:[#allocation3 + $0x1fc8] ss:$16 sps:$4 sm:$0xff]   ;;  %v16855_v38 = vld [vmem:[#allocation3 + $0x1fe4] ss:$16 sps:$4 sm:$0xff]  }
 0x3f7   :  { %11508 = vmatprep.subr.bf16.mxu0 %v16765_v48  ;;  %12656 = vmatprep.subr.bf16.mxu1 %v16768_v49  ;;  %v16858_v48 = vld [vmem:[#allocation3 + $0x1fec] ss:$16 sps:$4 sm:$0xff]   ;;  %v16853_v49 = vld [vmem:[#allocation3 + $0x1fe0] ss:$16 sps:$4 sm:$0xff]  }
 0x3f9   :  { %11500 = vmatmul.mubr.bf16.vlgmr.msra.gmra.mrb[0].mxu0 %v13273_v50  ;;  %12648 = vmatmul.mubr.bf16.vlgmr.msra.gmra.mrb[0].mxu1 %v13273_v50  ;;  %v16856_v50 = vld [vmem:[#allocation3 + $0x1fe8] ss:$16 sps:$4 sm:$0xff]  }
 0x3fa   :  { %11509 = vmatpush1.bf16.msra.mxu0 %v16763_v51  ;;  %12657 = vmatpush1.bf16.msra.mxu1 %v16766_v52  ;;  %v16863_v51 = vld [vmem:[#allocation3 + $0x2004] ss:$16 sps:$4 sm:$0xff]   ;;  %v16866_v52 = vld [vmem:[#allocation3 + $0x200c] ss:$16 sps:$4 sm:$0xff]  }
 0x3fb   :  { %11510 = vmatprep.subr.bf16.mxu0 %v16771_v53  ;;  %12658 = vmatprep.subr.bf16.mxu1 %v16774_v44  ;;  %v13275_v53 = vcombine.low %v18282_v41, %v18282_v41  ;;  %v18291_v44 = vld [vmem:[%s18399_s0 + $0x80] sm:$0xff] }
 0x3fc   :  { %11540 = vmatprep.mubr.bf16.mxu0 %v13276_v54  ;;  %12688 = vmatprep.mubr.bf16.mxu1 %v13276_v54  ;;  %v16861_v54 = vld [vmem:[#allocation3 + $0x2000] ss:$16 sps:$4 sm:$0xff]  }
 0x3fd   :  { %v16867_v41 = vld [vmem:[#allocation3 + $0x2020] ss:$16 sps:$4 sm:$0xff]  }
 0x3fe   :  { %11511 = vmatpush1.bf16.msra.mxu0 %v16769_v47  ;;  %12659 = vmatpush1.bf16.msra.mxu1 %v16772_v55  ;;  %v16864_v47 = vld [vmem:[#allocation3 + $0x2008] ss:$16 sps:$4 sm:$0xff]   ;;  %v16869_v55 = vld [vmem:[#allocation3 + $0x2024] ss:$16 sps:$4 sm:$0xff]  }
 0x3ff   :  { %11512 = vmatprep.subr.bf16.mxu0 %v16777_v56  ;;  %12660 = vmatprep.subr.bf16.mxu1 %v16780_v57  ;;  %v16872_v56 = vld [vmem:[#allocation3 + $0x202c] ss:$16 sps:$4 sm:$0xff]   ;;  %v13278_v57 = vcombine.high %v18291_v44, %v18291_v44 }
 0x402   :  { %11513 = vmatpush1.bf16.msra.mxu0 %v16775_v58  ;;  %12661 = vmatpush1.bf16.msra.mxu1 %v16778_v59  ;;  %v16870_v58 = vld [vmem:[#allocation3 + $0x2028] ss:$16 sps:$4 sm:$0xff]   ;;  %v16875_v59 = vld [vmem:[#allocation3 + $0x2044] ss:$16 sps:$4 sm:$0xff]  }
 0x403   :  { %11514 = vmatprep.subr.bf16.mxu0 %v16783_v60  ;;  %12662 = vmatprep.subr.bf16.mxu1 %v16786_v61  ;;  %v16878_v60 = vld [vmem:[#allocation3 + $0x204c] ss:$16 sps:$4 sm:$0xff]   ;;  %v16873_v61 = vld [vmem:[#allocation3 + $0x2040] ss:$16 sps:$4 sm:$0xff]  }
 0x406   :  { %11515 = vmatpush1.bf16.msra.mxu0 %v16781_v62  ;;  %12663 = vmatpush1.bf16.msra.mxu1 %v16784_v63  ;;  %v16876_v62 = vld [vmem:[#allocation3 + $0x2048] ss:$16 sps:$4 sm:$0xff]   ;;  %v16881_v63 = vld [vmem:[#allocation3 + $0x2064] ss:$16 sps:$4 sm:$0xff]  }
 0x407   :  { %11516 = vmatprep.subr.bf16.mxu0 %v16789_v0  ;;  %12664 = vmatprep.subr.bf16.mxu1 %v16792_v1  ;;  %v16884_v0 = vld [vmem:[#allocation3 + $0x206c] ss:$16 sps:$4 sm:$0xff]   ;;  %v16879_v1 = vld [vmem:[#allocation3 + $0x2060] ss:$16 sps:$4 sm:$0xff]  }
 0x40a   :  { %11517 = vmatpush1.bf16.msra.mxu0 %v16787_v2  ;;  %12665 = vmatpush1.bf16.msra.mxu1 %v16790_v3  ;;  %v16882_v2 = vld [vmem:[#allocation3 + $0x2068] ss:$16 sps:$4 sm:$0xff]   ;;  %v16887_v3 = vld [vmem:[#allocation3 + $0x2084] ss:$16 sps:$4 sm:$0xff]  }
 0x40b   :  { %11518 = vmatprep.subr.bf16.mxu0 %v16795_v4  ;;  %12666 = vmatprep.subr.bf16.mxu1 %v16798_v5  ;;  %v16890_v4 = vld [vmem:[#allocation3 + $0x208c] ss:$16 sps:$4 sm:$0xff]   ;;  %v16885_v5 = vld [vmem:[#allocation3 + $0x2080] ss:$16 sps:$4 sm:$0xff]  }
 0x40e   :  { %11519 = vmatpush1.bf16.msra.mxu0 %v16793_v6  ;;  %12667 = vmatpush1.bf16.msra.mxu1 %v16796_v7  ;;  %v16888_v6 = vld [vmem:[#allocation3 + $0x2088] ss:$16 sps:$4 sm:$0xff]   ;;  %v16893_v7 = vld [vmem:[#allocation3 + $0x20a4] ss:$16 sps:$4 sm:$0xff]  }
 0x40f   :  { %11520 = vmatprep.subr.bf16.mxu0 %v16801_v8  ;;  %12668 = vmatprep.subr.bf16.mxu1 %v16804_v9  ;;  %v16896_v8 = vld [vmem:[#allocation3 + $0x20ac] ss:$16 sps:$4 sm:$0xff]   ;;  %v16891_v9 = vld [vmem:[#allocation3 + $0x20a0] ss:$16 sps:$4 sm:$0xff]  }
 0x412   :  { %11521 = vmatpush1.bf16.msra.mxu0 %v16799_v10  ;;  %12669 = vmatpush1.bf16.msra.mxu1 %v16802_v11  ;;  %v16894_v10 = vld [vmem:[#allocation3 + $0x20a8] ss:$16 sps:$4 sm:$0xff]   ;;  %v16899_v11 = vld [vmem:[#allocation3 + $0x20c4] ss:$16 sps:$4 sm:$0xff]  }
 0x413   :  { %11522 = vmatprep.subr.bf16.mxu0 %v16807_v13  ;;  %12670 = vmatprep.subr.bf16.mxu1 %v16810_v14  ;;  %v16902_v13 = vld [vmem:[#allocation3 + $0x20cc] ss:$16 sps:$4 sm:$0xff]   ;;  %v16897_v14 = vld [vmem:[#allocation3 + $0x20c0] ss:$16 sps:$4 sm:$0xff]  }
 0x416   :  { %11523 = vmatpush1.bf16.msra.mxu0 %v16805_v16  ;;  %12671 = vmatpush1.bf16.msra.mxu1 %v16808_v17  ;;  %v16900_v16 = vld [vmem:[#allocation3 + $0x20c8] ss:$16 sps:$4 sm:$0xff]   ;;  %v16905_v17 = vld [vmem:[#allocation3 + $0x20e4] ss:$16 sps:$4 sm:$0xff]  }
 0x417   :  { %11524 = vmatprep.subr.bf16.mxu0 %v16813_v19  ;;  %12672 = vmatprep.subr.bf16.mxu1 %v16816_v12  ;;  %v16908_v19 = vld [vmem:[#allocation3 + $0x20ec] ss:$16 sps:$4 sm:$0xff]   ;;  %v16903_v12 = vld [vmem:[#allocation3 + $0x20e0] ss:$16 sps:$4 sm:$0xff]  }
 0x41a   :  { %11525 = vmatpush1.bf16.msra.mxu0 %v16811_v21  ;;  %12673 = vmatpush1.bf16.msra.mxu1 %v16814_v15  ;;  %v16906_v21 = vld [vmem:[#allocation3 + $0x20e8] ss:$16 sps:$4 sm:$0xff]   ;;  %v16911_v15 = vld [vmem:[#allocation3 + $0x2104] ss:$16 sps:$4 sm:$0xff]  }
 0x41b   :  { %11526 = vmatprep.subr.bf16.mxu0 %v16819_v23  ;;  %12674 = vmatprep.subr.bf16.mxu1 %v16822_v24  ;;  %v16914_v23 = vld [vmem:[#allocation3 + $0x210c] ss:$16 sps:$4 sm:$0xff]   ;;  %v16909_v24 = vld [vmem:[#allocation3 + $0x2100] ss:$16 sps:$4 sm:$0xff]  }
 0x41e   :  { %11527 = vmatpush1.bf16.msra.mxu0 %v16817_v25  ;;  %12675 = vmatpush1.bf16.msra.mxu1 %v16820_v18  ;;  %v16912_v25 = vld [vmem:[#allocation3 + $0x2108] ss:$16 sps:$4 sm:$0xff]   ;;  %v16917_v18 = vld [vmem:[#allocation3 + $0x2124] ss:$16 sps:$4 sm:$0xff]  }
 0x41f   :  { %11528 = vmatprep.subr.bf16.mxu0 %v16825_v27  ;;  %12676 = vmatprep.subr.bf16.mxu1 %v16828_v28  ;;  %v16920_v27 = vld [vmem:[#allocation3 + $0x212c] ss:$16 sps:$4 sm:$0xff]   ;;  %v16915_v28 = vld [vmem:[#allocation3 + $0x2120] ss:$16 sps:$4 sm:$0xff]  }
 0x422   :  { %11529 = vmatpush1.bf16.msra.mxu0 %v16823_v20  ;;  %12677 = vmatpush1.bf16.msra.mxu1 %v16826_v30  ;;  %v16918_v20 = vld [vmem:[#allocation3 + $0x2128] ss:$16 sps:$4 sm:$0xff]   ;;  %v16923_v30 = vld [vmem:[#allocation3 + $0x2144] ss:$16 sps:$4 sm:$0xff]  }
 0x423   :  { %11530 = vmatprep.subr.bf16.mxu0 %v16831_v31  ;;  %12678 = vmatprep.subr.bf16.mxu1 %v16834_v22  ;;  %v16926_v31 = vld [vmem:[#allocation3 + $0x214c] ss:$16 sps:$4 sm:$0xff]   ;;  %v16921_v22 = vld [vmem:[#allocation3 + $0x2140] ss:$16 sps:$4 sm:$0xff]  }
 0x426   :  { %11531 = vmatpush1.bf16.msra.mxu0 %v16829_v33  ;;  %12679 = vmatpush1.bf16.msra.mxu1 %v16832_v34  ;;  %v16924_v33 = vld [vmem:[#allocation3 + $0x2148] ss:$16 sps:$4 sm:$0xff]   ;;  %v16929_v34 = vld [vmem:[#allocation3 + $0x2164] ss:$16 sps:$4 sm:$0xff]  }
 0x427   :  { %11532 = vmatprep.subr.bf16.mxu0 %v16837_v26  ;;  %12680 = vmatprep.subr.bf16.mxu1 %v16840_v36  ;;  %v16932_v26 = vld [vmem:[#allocation3 + $0x216c] ss:$16 sps:$4 sm:$0xff]   ;;  %v16927_v36 = vld [vmem:[#allocation3 + $0x2160] ss:$16 sps:$4 sm:$0xff]  }
 0x42a   :  { %11533 = vmatpush1.bf16.msra.mxu0 %v16835_v37  ;;  %12681 = vmatpush1.bf16.msra.mxu1 %v16838_v29  ;;  %v16930_v37 = vld [vmem:[#allocation3 + $0x2168] ss:$16 sps:$4 sm:$0xff]   ;;  %v16935_v29 = vld [vmem:[#allocation3 + $0x2184] ss:$16 sps:$4 sm:$0xff]  }
 0x42b   :  { %11534 = vmatprep.subr.bf16.mxu0 %v16843_v39  ;;  %12682 = vmatprep.subr.bf16.mxu1 %v16846_v40  ;;  %v16938_v39 = vld [vmem:[#allocation3 + $0x218c] ss:$16 sps:$4 sm:$0xff]   ;;  %v16933_v40 = vld [vmem:[#allocation3 + $0x2180] ss:$16 sps:$4 sm:$0xff]  }
 0x42e   :  { %11535 = vmatpush1.bf16.msra.mxu0 %v16841_v32  ;;  %12683 = vmatpush1.bf16.msra.mxu1 %v16844_v42  ;;  %v16936_v32 = vld [vmem:[#allocation3 + $0x2188] ss:$16 sps:$4 sm:$0xff]   ;;  %v16941_v42 = vld [vmem:[#allocation3 + $0x21a4] ss:$16 sps:$4 sm:$0xff]  }
 0x42f   :  { %11536 = vmatprep.subr.bf16.mxu0 %v16849_v43  ;;  %12684 = vmatprep.subr.bf16.mxu1 %v16852_v35  ;;  %v16944_v43 = vld [vmem:[#allocation3 + $0x21ac] ss:$16 sps:$4 sm:$0xff]   ;;  %v16939_v35 = vld [vmem:[#allocation3 + $0x21a0] ss:$16 sps:$4 sm:$0xff]  }
 0x432   :  { %11537 = vmatpush1.bf16.msra.mxu0 %v16847_v45  ;;  %12685 = vmatpush1.bf16.msra.mxu1 %v16850_v46  ;;  %v16942_v45 = vld [vmem:[#allocation3 + $0x21a8] ss:$16 sps:$4 sm:$0xff]   ;;  %v16947_v46 = vld [vmem:[#allocation3 + $0x21c4] ss:$16 sps:$4 sm:$0xff]  }
 0x433   :  { %11538 = vmatprep.subr.bf16.mxu0 %v16855_v38  ;;  %12686 = vmatprep.subr.bf16.mxu1 %v16858_v48  ;;  %v16950_v38 = vld [vmem:[#allocation3 + $0x21cc] ss:$16 sps:$4 sm:$0xff]   ;;  %v16945_v48 = vld [vmem:[#allocation3 + $0x21c0] ss:$16 sps:$4 sm:$0xff]  }
 0x436   :  { %11539 = vmatpush1.bf16.msra.mxu0 %v16853_v49  ;;  %12687 = vmatpush1.bf16.msra.mxu1 %v16856_v50  ;;  %v16948_v49 = vld [vmem:[#allocation3 + $0x21c8] ss:$16 sps:$4 sm:$0xff]   ;;  %v16953_v50 = vld [vmem:[#allocation3 + $0x21e4] ss:$16 sps:$4 sm:$0xff]  }
 0x437   :  { %11549 = vmatprep.subr.bf16.mxu0 %v16863_v51  ;;  %12697 = vmatprep.subr.bf16.mxu1 %v16866_v52  ;;  %v16956_v51 = vld [vmem:[#allocation3 + $0x21ec] ss:$16 sps:$4 sm:$0xff]   ;;  %v16951_v52 = vld [vmem:[#allocation3 + $0x21e0] ss:$16 sps:$4 sm:$0xff]  }
 0x439   :  { %11541 = vmatmul.mubr.bf16.vlgmr.msra.gmra.mrb[0].mxu0 %v13275_v53  ;;  %12689 = vmatmul.mubr.bf16.vlgmr.msra.gmra.mrb[0].mxu1 %v13275_v53  ;;  %v16954_v53 = vld [vmem:[#allocation3 + $0x21e8] ss:$16 sps:$4 sm:$0xff]  }
 0x43a   :  { %11550 = vmatpush1.bf16.msra.mxu0 %v16861_v54  ;;  %12698 = vmatpush1.bf16.msra.mxu1 %v16864_v47  ;;  %v16961_v54 = vld [vmem:[#allocation3 + $0x2204] ss:$16 sps:$4 sm:$0xff]   ;;  %v16964_v47 = vld [vmem:[#allocation3 + $0x220c] ss:$16 sps:$4 sm:$0xff]  }
 0x43b   :  { %11551 = vmatprep.subr.bf16.mxu0 %v16869_v55  ;;  %12699 = vmatprep.subr.bf16.mxu1 %v16872_v56  ;;  %v13277_v55 = vcombine.low %v18291_v44, %v18291_v44  ;;  %v18300_v56 = vld [vmem:[%s18399_s0 + $0x88] sm:$0xff]  ;;  %v16965_v44 = vld [vmem:[#allocation3 + $0x2220] ss:$16 sps:$4 sm:$0xff]  }
 0x43c   :  { %11581 = vmatprep.mubr.bf16.mxu0 %v13278_v57  ;;  %12729 = vmatprep.mubr.bf16.mxu1 %v13278_v57  ;;  %v16959_v57 = vld [vmem:[#allocation3 + $0x2200] ss:$16 sps:$4 sm:$0xff]  }
 0x43e   :  { %11552 = vmatpush1.bf16.msra.mxu0 %v16867_v41  ;;  %12700 = vmatpush1.bf16.msra.mxu1 %v16870_v58  ;;  %v16962_v41 = vld [vmem:[#allocation3 + $0x2208] ss:$16 sps:$4 sm:$0xff]   ;;  %v16967_v58 = vld [vmem:[#allocation3 + $0x2224] ss:$16 sps:$4 sm:$0xff]  }
 0x43f   :  { %11553 = vmatprep.subr.bf16.mxu0 %v16875_v59  ;;  %12701 = vmatprep.subr.bf16.mxu1 %v16878_v60  ;;  %v16970_v59 = vld [vmem:[#allocation3 + $0x222c] ss:$16 sps:$4 sm:$0xff]   ;;  %v13280_v60 = vcombine.high %v18300_v56, %v18300_v56 }
 0x442   :  { %11554 = vmatpush1.bf16.msra.mxu0 %v16873_v61  ;;  %12702 = vmatpush1.bf16.msra.mxu1 %v16876_v62  ;;  %v16968_v61 = vld [vmem:[#allocation3 + $0x2228] ss:$16 sps:$4 sm:$0xff]   ;;  %v16973_v62 = vld [vmem:[#allocation3 + $0x2244] ss:$16 sps:$4 sm:$0xff]  }
 0x443   :  { %11555 = vmatprep.subr.bf16.mxu0 %v16881_v63  ;;  %12703 = vmatprep.subr.bf16.mxu1 %v16884_v0  ;;  %v16976_v63 = vld [vmem:[#allocation3 + $0x224c] ss:$16 sps:$4 sm:$0xff]   ;;  %v16971_v0 = vld [vmem:[#allocation3 + $0x2240] ss:$16 sps:$4 sm:$0xff]  }
 0x446   :  { %11556 = vmatpush1.bf16.msra.mxu0 %v16879_v1  ;;  %12704 = vmatpush1.bf16.msra.mxu1 %v16882_v2  ;;  %v16974_v1 = vld [vmem:[#allocation3 + $0x2248] ss:$16 sps:$4 sm:$0xff]   ;;  %v16979_v2 = vld [vmem:[#allocation3 + $0x2264] ss:$16 sps:$4 sm:$0xff]  }
 0x447   :  { %11557 = vmatprep.subr.bf16.mxu0 %v16887_v3  ;;  %12705 = vmatprep.subr.bf16.mxu1 %v16890_v4  ;;  %v16982_v3 = vld [vmem:[#allocation3 + $0x226c] ss:$16 sps:$4 sm:$0xff]   ;;  %v16977_v4 = vld [vmem:[#allocation3 + $0x2260] ss:$16 sps:$4 sm:$0xff]  }
 0x44a   :  { %11558 = vmatpush1.bf16.msra.mxu0 %v16885_v5  ;;  %12706 = vmatpush1.bf16.msra.mxu1 %v16888_v6  ;;  %v16980_v5 = vld [vmem:[#allocation3 + $0x2268] ss:$16 sps:$4 sm:$0xff]   ;;  %v16985_v6 = vld [vmem:[#allocation3 + $0x2284] ss:$16 sps:$4 sm:$0xff]  }
 0x44b   :  { %11559 = vmatprep.subr.bf16.mxu0 %v16893_v7  ;;  %12707 = vmatprep.subr.bf16.mxu1 %v16896_v8  ;;  %v16988_v7 = vld [vmem:[#allocation3 + $0x228c] ss:$16 sps:$4 sm:$0xff]   ;;  %v16983_v8 = vld [vmem:[#allocation3 + $0x2280] ss:$16 sps:$4 sm:$0xff]  }
 0x44e   :  { %11560 = vmatpush1.bf16.msra.mxu0 %v16891_v9  ;;  %12708 = vmatpush1.bf16.msra.mxu1 %v16894_v10  ;;  %v16986_v9 = vld [vmem:[#allocation3 + $0x2288] ss:$16 sps:$4 sm:$0xff]   ;;  %v16991_v10 = vld [vmem:[#allocation3 + $0x22a4] ss:$16 sps:$4 sm:$0xff]  }
 0x44f   :  { %11561 = vmatprep.subr.bf16.mxu0 %v16899_v11  ;;  %12709 = vmatprep.subr.bf16.mxu1 %v16902_v13  ;;  %v16994_v11 = vld [vmem:[#allocation3 + $0x22ac] ss:$16 sps:$4 sm:$0xff]   ;;  %v16989_v13 = vld [vmem:[#allocation3 + $0x22a0] ss:$16 sps:$4 sm:$0xff]  }
 0x452   :  { %11562 = vmatpush1.bf16.msra.mxu0 %v16897_v14  ;;  %12710 = vmatpush1.bf16.msra.mxu1 %v16900_v16  ;;  %v16992_v14 = vld [vmem:[#allocation3 + $0x22a8] ss:$16 sps:$4 sm:$0xff]   ;;  %v16997_v16 = vld [vmem:[#allocation3 + $0x22c4] ss:$16 sps:$4 sm:$0xff]  }
 0x453   :  { %11563 = vmatprep.subr.bf16.mxu0 %v16905_v17  ;;  %12711 = vmatprep.subr.bf16.mxu1 %v16908_v19  ;;  %v17000_v17 = vld [vmem:[#allocation3 + $0x22cc] ss:$16 sps:$4 sm:$0xff]   ;;  %v16995_v19 = vld [vmem:[#allocation3 + $0x22c0] ss:$16 sps:$4 sm:$0xff]  }
 0x456   :  { %11564 = vmatpush1.bf16.msra.mxu0 %v16903_v12  ;;  %12712 = vmatpush1.bf16.msra.mxu1 %v16906_v21  ;;  %v16998_v12 = vld [vmem:[#allocation3 + $0x22c8] ss:$16 sps:$4 sm:$0xff]   ;;  %v17003_v21 = vld [vmem:[#allocation3 + $0x22e4] ss:$16 sps:$4 sm:$0xff]  }
 0x457   :  { %11565 = vmatprep.subr.bf16.mxu0 %v16911_v15  ;;  %12713 = vmatprep.subr.bf16.mxu1 %v16914_v23  ;;  %v17006_v15 = vld [vmem:[#allocation3 + $0x22ec] ss:$16 sps:$4 sm:$0xff]   ;;  %v17001_v23 = vld [vmem:[#allocation3 + $0x22e0] ss:$16 sps:$4 sm:$0xff]  }
 0x45a   :  { %11566 = vmatpush1.bf16.msra.mxu0 %v16909_v24  ;;  %12714 = vmatpush1.bf16.msra.mxu1 %v16912_v25  ;;  %v17004_v24 = vld [vmem:[#allocation3 + $0x22e8] ss:$16 sps:$4 sm:$0xff]   ;;  %v17009_v25 = vld [vmem:[#allocation3 + $0x2304] ss:$16 sps:$4 sm:$0xff]  }
 0x45b   :  { %11567 = vmatprep.subr.bf16.mxu0 %v16917_v18  ;;  %12715 = vmatprep.subr.bf16.mxu1 %v16920_v27  ;;  %v17012_v18 = vld [vmem:[#allocation3 + $0x230c] ss:$16 sps:$4 sm:$0xff]   ;;  %v17007_v27 = vld [vmem:[#allocation3 + $0x2300] ss:$16 sps:$4 sm:$0xff]  }
 0x45e   :  { %11568 = vmatpush1.bf16.msra.mxu0 %v16915_v28  ;;  %12716 = vmatpush1.bf16.msra.mxu1 %v16918_v20  ;;  %v17010_v28 = vld [vmem:[#allocation3 + $0x2308] ss:$16 sps:$4 sm:$0xff]   ;;  %v17015_v20 = vld [vmem:[#allocation3 + $0x2324] ss:$16 sps:$4 sm:$0xff]  }
 0x45f   :  { %11569 = vmatprep.subr.bf16.mxu0 %v16923_v30  ;;  %12717 = vmatprep.subr.bf16.mxu1 %v16926_v31  ;;  %v17018_v30 = vld [vmem:[#allocation3 + $0x232c] ss:$16 sps:$4 sm:$0xff]   ;;  %v17013_v31 = vld [vmem:[#allocation3 + $0x2320] ss:$16 sps:$4 sm:$0xff]  }
 0x462   :  { %11570 = vmatpush1.bf16.msra.mxu0 %v16921_v22  ;;  %12718 = vmatpush1.bf16.msra.mxu1 %v16924_v33  ;;  %v17016_v22 = vld [vmem:[#allocation3 + $0x2328] ss:$16 sps:$4 sm:$0xff]   ;;  %v17021_v33 = vld [vmem:[#allocation3 + $0x2344] ss:$16 sps:$4 sm:$0xff]  }
 0x463   :  { %11571 = vmatprep.subr.bf16.mxu0 %v16929_v34  ;;  %12719 = vmatprep.subr.bf16.mxu1 %v16932_v26  ;;  %v17024_v34 = vld [vmem:[#allocation3 + $0x234c] ss:$16 sps:$4 sm:$0xff]   ;;  %v17019_v26 = vld [vmem:[#allocation3 + $0x2340] ss:$16 sps:$4 sm:$0xff]  }
 0x466   :  { %11572 = vmatpush1.bf16.msra.mxu0 %v16927_v36  ;;  %12720 = vmatpush1.bf16.msra.mxu1 %v16930_v37  ;;  %v17022_v36 = vld [vmem:[#allocation3 + $0x2348] ss:$16 sps:$4 sm:$0xff]   ;;  %v17027_v37 = vld [vmem:[#allocation3 + $0x2364] ss:$16 sps:$4 sm:$0xff]  }
 0x467   :  { %11573 = vmatprep.subr.bf16.mxu0 %v16935_v29  ;;  %12721 = vmatprep.subr.bf16.mxu1 %v16938_v39  ;;  %v17030_v29 = vld [vmem:[#allocation3 + $0x236c] ss:$16 sps:$4 sm:$0xff]   ;;  %v17025_v39 = vld [vmem:[#allocation3 + $0x2360] ss:$16 sps:$4 sm:$0xff]  }
 0x46a   :  { %11574 = vmatpush1.bf16.msra.mxu0 %v16933_v40  ;;  %12722 = vmatpush1.bf16.msra.mxu1 %v16936_v32  ;;  %v17028_v40 = vld [vmem:[#allocation3 + $0x2368] ss:$16 sps:$4 sm:$0xff]   ;;  %v17033_v32 = vld [vmem:[#allocation3 + $0x2384] ss:$16 sps:$4 sm:$0xff]  }
 0x46b   :  { %11575 = vmatprep.subr.bf16.mxu0 %v16941_v42  ;;  %12723 = vmatprep.subr.bf16.mxu1 %v16944_v43  ;;  %v17036_v42 = vld [vmem:[#allocation3 + $0x238c] ss:$16 sps:$4 sm:$0xff]   ;;  %v17031_v43 = vld [vmem:[#allocation3 + $0x2380] ss:$16 sps:$4 sm:$0xff]  }
 0x46e   :  { %11576 = vmatpush1.bf16.msra.mxu0 %v16939_v35  ;;  %12724 = vmatpush1.bf16.msra.mxu1 %v16942_v45  ;;  %v17034_v35 = vld [vmem:[#allocation3 + $0x2388] ss:$16 sps:$4 sm:$0xff]   ;;  %v17039_v45 = vld [vmem:[#allocation3 + $0x23a4] ss:$16 sps:$4 sm:$0xff]  }
 0x46f   :  { %11577 = vmatprep.subr.bf16.mxu0 %v16947_v46  ;;  %12725 = vmatprep.subr.bf16.mxu1 %v16950_v38  ;;  %v17042_v46 = vld [vmem:[#allocation3 + $0x23ac] ss:$16 sps:$4 sm:$0xff]   ;;  %v17037_v38 = vld [vmem:[#allocation3 + $0x23a0] ss:$16 sps:$4 sm:$0xff]  }
 0x472   :  { %11578 = vmatpush1.bf16.msra.mxu0 %v16945_v48  ;;  %12726 = vmatpush1.bf16.msra.mxu1 %v16948_v49  ;;  %v17040_v48 = vld [vmem:[#allocation3 + $0x23a8] ss:$16 sps:$4 sm:$0xff]   ;;  %v17045_v49 = vld [vmem:[#allocation3 + $0x23c4] ss:$16 sps:$4 sm:$0xff]  }
 0x473   :  { %11579 = vmatprep.subr.bf16.mxu0 %v16953_v50  ;;  %12727 = vmatprep.subr.bf16.mxu1 %v16956_v51  ;;  %v17048_v50 = vld [vmem:[#allocation3 + $0x23cc] ss:$16 sps:$4 sm:$0xff]   ;;  %v17043_v51 = vld [vmem:[#allocation3 + $0x23c0] ss:$16 sps:$4 sm:$0xff]  }
 0x476   :  { %11580 = vmatpush1.bf16.msra.mxu0 %v16951_v52  ;;  %12728 = vmatpush1.bf16.msra.mxu1 %v16954_v53  ;;  %v17046_v52 = vld [vmem:[#allocation3 + $0x23c8] ss:$16 sps:$4 sm:$0xff]   ;;  %v17051_v53 = vld [vmem:[#allocation3 + $0x23e4] ss:$16 sps:$4 sm:$0xff]  }
 0x477   :  { %11590 = vmatprep.subr.bf16.mxu0 %v16961_v54  ;;  %12738 = vmatprep.subr.bf16.mxu1 %v16964_v47  ;;  %v17054_v54 = vld [vmem:[#allocation3 + $0x23ec] ss:$16 sps:$4 sm:$0xff]   ;;  %v17049_v47 = vld [vmem:[#allocation3 + $0x23e0] ss:$16 sps:$4 sm:$0xff]  }
 0x479   :  { %11582 = vmatmul.mubr.bf16.vlgmr.msra.gmra.mrb[0].mxu0 %v13277_v55  ;;  %12730 = vmatmul.mubr.bf16.vlgmr.msra.gmra.mrb[0].mxu1 %v13277_v55  ;;  %v17052_v55 = vld [vmem:[#allocation3 + $0x23e8] ss:$16 sps:$4 sm:$0xff]  }
 0x47a   :  { %11591 = vmatpush1.bf16.msra.mxu0 %v16959_v57  ;;  %12739 = vmatpush1.bf16.msra.mxu1 %v16962_v41  ;;  %v17059_v57 = vld [vmem:[#allocation3 + $0x2404] ss:$16 sps:$4 sm:$0xff]   ;;  %v17062_v41 = vld [vmem:[#allocation3 + $0x240c] ss:$16 sps:$4 sm:$0xff]  }
 0x47b   :  { %11592 = vmatprep.subr.bf16.mxu0 %v16967_v58  ;;  %12740 = vmatprep.subr.bf16.mxu1 %v16970_v59  ;;  %v13279_v58 = vcombine.low %v18300_v56, %v18300_v56  ;;  %v18309_v59 = vld [vmem:[%s18399_s0 + $0x90] sm:$0xff] }
 0x47c   :  { %11622 = vmatprep.mubr.bf16.mxu0 %v13280_v60  ;;  %12770 = vmatprep.mubr.bf16.mxu1 %v13280_v60  ;;  %v17057_v60 = vld [vmem:[#allocation3 + $0x2400] ss:$16 sps:$4 sm:$0xff]  }
 0x47d   :  { %v17063_v56 = vld [vmem:[#allocation3 + $0x2420] ss:$16 sps:$4 sm:$0xff]  }
 0x47e   :  { %11593 = vmatpush1.bf16.msra.mxu0 %v16965_v44  ;;  %12741 = vmatpush1.bf16.msra.mxu1 %v16968_v61  ;;  %v17060_v44 = vld [vmem:[#allocation3 + $0x2408] ss:$16 sps:$4 sm:$0xff]   ;;  %v17065_v61 = vld [vmem:[#allocation3 + $0x2424] ss:$16 sps:$4 sm:$0xff]  }
 0x47f   :  { %11594 = vmatprep.subr.bf16.mxu0 %v16973_v62  ;;  %12742 = vmatprep.subr.bf16.mxu1 %v16976_v63  ;;  %v17068_v62 = vld [vmem:[#allocation3 + $0x242c] ss:$16 sps:$4 sm:$0xff]   ;;  %v13282_v63 = vcombine.high %v18309_v59, %v18309_v59 }
 0x482   :  { %11595 = vmatpush1.bf16.msra.mxu0 %v16971_v0  ;;  %12743 = vmatpush1.bf16.msra.mxu1 %v16974_v1  ;;  %v17066_v0 = vld [vmem:[#allocation3 + $0x2428] ss:$16 sps:$4 sm:$0xff]   ;;  %v17071_v1 = vld [vmem:[#allocation3 + $0x2444] ss:$16 sps:$4 sm:$0xff]  }
 0x483   :  { %11596 = vmatprep.subr.bf16.mxu0 %v16979_v2  ;;  %12744 = vmatprep.subr.bf16.mxu1 %v16982_v3  ;;  %v17074_v2 = vld [vmem:[#allocation3 + $0x244c] ss:$16 sps:$4 sm:$0xff]   ;;  %v17069_v3 = vld [vmem:[#allocation3 + $0x2440] ss:$16 sps:$4 sm:$0xff]  }
 0x486   :  { %11597 = vmatpush1.bf16.msra.mxu0 %v16977_v4  ;;  %12745 = vmatpush1.bf16.msra.mxu1 %v16980_v5  ;;  %v17072_v4 = vld [vmem:[#allocation3 + $0x2448] ss:$16 sps:$4 sm:$0xff]   ;;  %v17077_v5 = vld [vmem:[#allocation3 + $0x2464] ss:$16 sps:$4 sm:$0xff]  }
 0x487   :  { %11598 = vmatprep.subr.bf16.mxu0 %v16985_v6  ;;  %12746 = vmatprep.subr.bf16.mxu1 %v16988_v7  ;;  %v17080_v6 = vld [vmem:[#allocation3 + $0x246c] ss:$16 sps:$4 sm:$0xff]   ;;  %v17075_v7 = vld [vmem:[#allocation3 + $0x2460] ss:$16 sps:$4 sm:$0xff]  }
 0x48a   :  { %11599 = vmatpush1.bf16.msra.mxu0 %v16983_v8  ;;  %12747 = vmatpush1.bf16.msra.mxu1 %v16986_v9  ;;  %v17078_v8 = vld [vmem:[#allocation3 + $0x2468] ss:$16 sps:$4 sm:$0xff]   ;;  %v17083_v9 = vld [vmem:[#allocation3 + $0x2484] ss:$16 sps:$4 sm:$0xff]  }
 0x48b   :  { %11600 = vmatprep.subr.bf16.mxu0 %v16991_v10  ;;  %12748 = vmatprep.subr.bf16.mxu1 %v16994_v11  ;;  %v17086_v10 = vld [vmem:[#allocation3 + $0x248c] ss:$16 sps:$4 sm:$0xff]   ;;  %v17081_v11 = vld [vmem:[#allocation3 + $0x2480] ss:$16 sps:$4 sm:$0xff]  }
 0x48e   :  { %11601 = vmatpush1.bf16.msra.mxu0 %v16989_v13  ;;  %12749 = vmatpush1.bf16.msra.mxu1 %v16992_v14  ;;  %v17084_v13 = vld [vmem:[#allocation3 + $0x2488] ss:$16 sps:$4 sm:$0xff]   ;;  %v17089_v14 = vld [vmem:[#allocation3 + $0x24a4] ss:$16 sps:$4 sm:$0xff]  }
 0x48f   :  { %11602 = vmatprep.subr.bf16.mxu0 %v16997_v16  ;;  %12750 = vmatprep.subr.bf16.mxu1 %v17000_v17  ;;  %v17092_v16 = vld [vmem:[#allocation3 + $0x24ac] ss:$16 sps:$4 sm:$0xff]   ;;  %v17087_v17 = vld [vmem:[#allocation3 + $0x24a0] ss:$16 sps:$4 sm:$0xff]  }
 0x492   :  { %11603 = vmatpush1.bf16.msra.mxu0 %v16995_v19  ;;  %12751 = vmatpush1.bf16.msra.mxu1 %v16998_v12  ;;  %v17090_v19 = vld [vmem:[#allocation3 + $0x24a8] ss:$16 sps:$4 sm:$0xff]   ;;  %v17095_v12 = vld [vmem:[#allocation3 + $0x24c4] ss:$16 sps:$4 sm:$0xff]  }
 0x493   :  { %11604 = vmatprep.subr.bf16.mxu0 %v17003_v21  ;;  %12752 = vmatprep.subr.bf16.mxu1 %v17006_v15  ;;  %v17098_v21 = vld [vmem:[#allocation3 + $0x24cc] ss:$16 sps:$4 sm:$0xff]   ;;  %v17093_v15 = vld [vmem:[#allocation3 + $0x24c0] ss:$16 sps:$4 sm:$0xff]  }
 0x496   :  { %11605 = vmatpush1.bf16.msra.mxu0 %v17001_v23  ;;  %12753 = vmatpush1.bf16.msra.mxu1 %v17004_v24  ;;  %v17096_v23 = vld [vmem:[#allocation3 + $0x24c8] ss:$16 sps:$4 sm:$0xff]   ;;  %v17101_v24 = vld [vmem:[#allocation3 + $0x24e4] ss:$16 sps:$4 sm:$0xff]  }
 0x497   :  { %11606 = vmatprep.subr.bf16.mxu0 %v17009_v25  ;;  %12754 = vmatprep.subr.bf16.mxu1 %v17012_v18  ;;  %v17104_v25 = vld [vmem:[#allocation3 + $0x24ec] ss:$16 sps:$4 sm:$0xff]   ;;  %v17099_v18 = vld [vmem:[#allocation3 + $0x24e0] ss:$16 sps:$4 sm:$0xff]  }
 0x49a   :  { %11607 = vmatpush1.bf16.msra.mxu0 %v17007_v27  ;;  %12755 = vmatpush1.bf16.msra.mxu1 %v17010_v28  ;;  %v17102_v27 = vld [vmem:[#allocation3 + $0x24e8] ss:$16 sps:$4 sm:$0xff]   ;;  %v17107_v28 = vld [vmem:[#allocation3 + $0x2504] ss:$16 sps:$4 sm:$0xff]  }
 0x49b   :  { %11608 = vmatprep.subr.bf16.mxu0 %v17015_v20  ;;  %12756 = vmatprep.subr.bf16.mxu1 %v17018_v30  ;;  %v17110_v20 = vld [vmem:[#allocation3 + $0x250c] ss:$16 sps:$4 sm:$0xff]   ;;  %v17105_v30 = vld [vmem:[#allocation3 + $0x2500] ss:$16 sps:$4 sm:$0xff]  }
 0x49e   :  { %11609 = vmatpush1.bf16.msra.mxu0 %v17013_v31  ;;  %12757 = vmatpush1.bf16.msra.mxu1 %v17016_v22  ;;  %v17108_v31 = vld [vmem:[#allocation3 + $0x2508] ss:$16 sps:$4 sm:$0xff]   ;;  %v17113_v22 = vld [vmem:[#allocation3 + $0x2524] ss:$16 sps:$4 sm:$0xff]  }
 0x49f   :  { %11610 = vmatprep.subr.bf16.mxu0 %v17021_v33  ;;  %12758 = vmatprep.subr.bf16.mxu1 %v17024_v34  ;;  %v17116_v33 = vld [vmem:[#allocation3 + $0x252c] ss:$16 sps:$4 sm:$0xff]   ;;  %v17111_v34 = vld [vmem:[#allocation3 + $0x2520] ss:$16 sps:$4 sm:$0xff]  }
 0x4a2   :  { %11611 = vmatpush1.bf16.msra.mxu0 %v17019_v26  ;;  %12759 = vmatpush1.bf16.msra.mxu1 %v17022_v36  ;;  %v17114_v26 = vld [vmem:[#allocation3 + $0x2528] ss:$16 sps:$4 sm:$0xff]   ;;  %v17119_v36 = vld [vmem:[#allocation3 + $0x2544] ss:$16 sps:$4 sm:$0xff]  }
 0x4a3   :  { %11612 = vmatprep.subr.bf16.mxu0 %v17027_v37  ;;  %12760 = vmatprep.subr.bf16.mxu1 %v17030_v29  ;;  %v17122_v37 = vld [vmem:[#allocation3 + $0x254c] ss:$16 sps:$4 sm:$0xff]   ;;  %v17117_v29 = vld [vmem:[#allocation3 + $0x2540] ss:$16 sps:$4 sm:$0xff]  }
 0x4a6   :  { %11613 = vmatpush1.bf16.msra.mxu0 %v17025_v39  ;;  %12761 = vmatpush1.bf16.msra.mxu1 %v17028_v40  ;;  %v17120_v39 = vld [vmem:[#allocation3 + $0x2548] ss:$16 sps:$4 sm:$0xff]   ;;  %v17125_v40 = vld [vmem:[#allocation3 + $0x2564] ss:$16 sps:$4 sm:$0xff]  }
 0x4a7   :  { %11614 = vmatprep.subr.bf16.mxu0 %v17033_v32  ;;  %12762 = vmatprep.subr.bf16.mxu1 %v17036_v42  ;;  %v17128_v32 = vld [vmem:[#allocation3 + $0x256c] ss:$16 sps:$4 sm:$0xff]   ;;  %v17123_v42 = vld [vmem:[#allocation3 + $0x2560] ss:$16 sps:$4 sm:$0xff]  }
 0x4aa   :  { %11615 = vmatpush1.bf16.msra.mxu0 %v17031_v43  ;;  %12763 = vmatpush1.bf16.msra.mxu1 %v17034_v35  ;;  %v17126_v43 = vld [vmem:[#allocation3 + $0x2568] ss:$16 sps:$4 sm:$0xff]   ;;  %v17131_v35 = vld [vmem:[#allocation3 + $0x2584] ss:$16 sps:$4 sm:$0xff]  }
 0x4ab   :  { %11616 = vmatprep.subr.bf16.mxu0 %v17039_v45  ;;  %12764 = vmatprep.subr.bf16.mxu1 %v17042_v46  ;;  %v17134_v45 = vld [vmem:[#allocation3 + $0x258c] ss:$16 sps:$4 sm:$0xff]   ;;  %v17129_v46 = vld [vmem:[#allocation3 + $0x2580] ss:$16 sps:$4 sm:$0xff]  }
 0x4ae   :  { %11617 = vmatpush1.bf16.msra.mxu0 %v17037_v38  ;;  %12765 = vmatpush1.bf16.msra.mxu1 %v17040_v48  ;;  %v17132_v38 = vld [vmem:[#allocation3 + $0x2588] ss:$16 sps:$4 sm:$0xff]   ;;  %v17137_v48 = vld [vmem:[#allocation3 + $0x25a4] ss:$16 sps:$4 sm:$0xff]  }
 0x4af   :  { %11618 = vmatprep.subr.bf16.mxu0 %v17045_v49  ;;  %12766 = vmatprep.subr.bf16.mxu1 %v17048_v50  ;;  %v17140_v49 = vld [vmem:[#allocation3 + $0x25ac] ss:$16 sps:$4 sm:$0xff]   ;;  %v17135_v50 = vld [vmem:[#allocation3 + $0x25a0] ss:$16 sps:$4 sm:$0xff]  }
 0x4b2   :  { %11619 = vmatpush1.bf16.msra.mxu0 %v17043_v51  ;;  %12767 = vmatpush1.bf16.msra.mxu1 %v17046_v52  ;;  %v17138_v51 = vld [vmem:[#allocation3 + $0x25a8] ss:$16 sps:$4 sm:$0xff]   ;;  %v17143_v52 = vld [vmem:[#allocation3 + $0x25c4] ss:$16 sps:$4 sm:$0xff]  }
 0x4b3   :  { %11620 = vmatprep.subr.bf16.mxu0 %v17051_v53  ;;  %12768 = vmatprep.subr.bf16.mxu1 %v17054_v54  ;;  %v17146_v53 = vld [vmem:[#allocation3 + $0x25cc] ss:$16 sps:$4 sm:$0xff]   ;;  %v17141_v54 = vld [vmem:[#allocation3 + $0x25c0] ss:$16 sps:$4 sm:$0xff]  }
 0x4b6   :  { %11621 = vmatpush1.bf16.msra.mxu0 %v17049_v47  ;;  %12769 = vmatpush1.bf16.msra.mxu1 %v17052_v55  ;;  %v17144_v47 = vld [vmem:[#allocation3 + $0x25c8] ss:$16 sps:$4 sm:$0xff]   ;;  %v17149_v55 = vld [vmem:[#allocation3 + $0x25e4] ss:$16 sps:$4 sm:$0xff]  }
 0x4b7   :  { %11631 = vmatprep.subr.bf16.mxu0 %v17059_v57  ;;  %12779 = vmatprep.subr.bf16.mxu1 %v17062_v41  ;;  %v17152_v57 = vld [vmem:[#allocation3 + $0x25ec] ss:$16 sps:$4 sm:$0xff]   ;;  %v17147_v41 = vld [vmem:[#allocation3 + $0x25e0] ss:$16 sps:$4 sm:$0xff]  }
 0x4b9   :  { %11623 = vmatmul.mubr.bf16.vlgmr.msra.gmra.mrb[0].mxu0 %v13279_v58  ;;  %12771 = vmatmul.mubr.bf16.vlgmr.msra.gmra.mrb[0].mxu1 %v13279_v58  ;;  %v17150_v58 = vld [vmem:[#allocation3 + $0x25e8] ss:$16 sps:$4 sm:$0xff]  }
 0x4ba   :  { %11632 = vmatpush1.bf16.msra.mxu0 %v17057_v60  ;;  %12780 = vmatpush1.bf16.msra.mxu1 %v17060_v44  ;;  %v17157_v60 = vld [vmem:[#allocation3 + $0x2604] ss:$16 sps:$4 sm:$0xff]   ;;  %v17160_v44 = vld [vmem:[#allocation3 + $0x260c] ss:$16 sps:$4 sm:$0xff]  }
 0x4bb   :  { %11633 = vmatprep.subr.bf16.mxu0 %v17065_v61  ;;  %12781 = vmatprep.subr.bf16.mxu1 %v17068_v62  ;;  %v13281_v61 = vcombine.low %v18309_v59, %v18309_v59  ;;  %v18318_v62 = vld [vmem:[%s18399_s0 + $0x98] sm:$0xff]  ;;  %v17161_v59 = vld [vmem:[#allocation3 + $0x2620] ss:$16 sps:$4 sm:$0xff]  }
 0x4bc   :  { %11663 = vmatprep.mubr.bf16.mxu0 %v13282_v63  ;;  %12811 = vmatprep.mubr.bf16.mxu1 %v13282_v63  ;;  %v17155_v63 = vld [vmem:[#allocation3 + $0x2600] ss:$16 sps:$4 sm:$0xff]  }
 0x4be   :  { %11634 = vmatpush1.bf16.msra.mxu0 %v17063_v56  ;;  %12782 = vmatpush1.bf16.msra.mxu1 %v17066_v0  ;;  %v17158_v56 = vld [vmem:[#allocation3 + $0x2608] ss:$16 sps:$4 sm:$0xff]   ;;  %v17163_v0 = vld [vmem:[#allocation3 + $0x2624] ss:$16 sps:$4 sm:$0xff]  }
 0x4bf   :  { %11635 = vmatprep.subr.bf16.mxu0 %v17071_v1  ;;  %12783 = vmatprep.subr.bf16.mxu1 %v17074_v2  ;;  %v17166_v1 = vld [vmem:[#allocation3 + $0x262c] ss:$16 sps:$4 sm:$0xff]   ;;  %v13284_v2 = vcombine.high %v18318_v62, %v18318_v62 }
 0x4c2   :  { %11636 = vmatpush1.bf16.msra.mxu0 %v17069_v3  ;;  %12784 = vmatpush1.bf16.msra.mxu1 %v17072_v4  ;;  %v17164_v3 = vld [vmem:[#allocation3 + $0x2628] ss:$16 sps:$4 sm:$0xff]   ;;  %v17169_v4 = vld [vmem:[#allocation3 + $0x2644] ss:$16 sps:$4 sm:$0xff]  }
 0x4c3   :  { %11637 = vmatprep.subr.bf16.mxu0 %v17077_v5  ;;  %12785 = vmatprep.subr.bf16.mxu1 %v17080_v6  ;;  %v17172_v5 = vld [vmem:[#allocation3 + $0x264c] ss:$16 sps:$4 sm:$0xff]   ;;  %v17167_v6 = vld [vmem:[#allocation3 + $0x2640] ss:$16 sps:$4 sm:$0xff]  }
 0x4c6   :  { %11638 = vmatpush1.bf16.msra.mxu0 %v17075_v7  ;;  %12786 = vmatpush1.bf16.msra.mxu1 %v17078_v8  ;;  %v17170_v7 = vld [vmem:[#allocation3 + $0x2648] ss:$16 sps:$4 sm:$0xff]   ;;  %v17175_v8 = vld [vmem:[#allocation3 + $0x2664] ss:$16 sps:$4 sm:$0xff]  }
 0x4c7   :  { %11639 = vmatprep.subr.bf16.mxu0 %v17083_v9  ;;  %12787 = vmatprep.subr.bf16.mxu1 %v17086_v10  ;;  %v17178_v9 = vld [vmem:[#allocation3 + $0x266c] ss:$16 sps:$4 sm:$0xff]   ;;  %v17173_v10 = vld [vmem:[#allocation3 + $0x2660] ss:$16 sps:$4 sm:$0xff]  }
 0x4ca   :  { %11640 = vmatpush1.bf16.msra.mxu0 %v17081_v11  ;;  %12788 = vmatpush1.bf16.msra.mxu1 %v17084_v13  ;;  %v17176_v11 = vld [vmem:[#allocation3 + $0x2668] ss:$16 sps:$4 sm:$0xff]   ;;  %v17181_v13 = vld [vmem:[#allocation3 + $0x2684] ss:$16 sps:$4 sm:$0xff]  }
 0x4cb   :  { %11641 = vmatprep.subr.bf16.mxu0 %v17089_v14  ;;  %12789 = vmatprep.subr.bf16.mxu1 %v17092_v16  ;;  %v17184_v14 = vld [vmem:[#allocation3 + $0x268c] ss:$16 sps:$4 sm:$0xff]   ;;  %v17179_v16 = vld [vmem:[#allocation3 + $0x2680] ss:$16 sps:$4 sm:$0xff]  }
 0x4ce   :  { %11642 = vmatpush1.bf16.msra.mxu0 %v17087_v17  ;;  %12790 = vmatpush1.bf16.msra.mxu1 %v17090_v19  ;;  %v17182_v17 = vld [vmem:[#allocation3 + $0x2688] ss:$16 sps:$4 sm:$0xff]   ;;  %v17187_v19 = vld [vmem:[#allocation3 + $0x26a4] ss:$16 sps:$4 sm:$0xff]  }
 0x4cf   :  { %11643 = vmatprep.subr.bf16.mxu0 %v17095_v12  ;;  %12791 = vmatprep.subr.bf16.mxu1 %v17098_v21  ;;  %v17190_v12 = vld [vmem:[#allocation3 + $0x26ac] ss:$16 sps:$4 sm:$0xff]   ;;  %v17185_v21 = vld [vmem:[#allocation3 + $0x26a0] ss:$16 sps:$4 sm:$0xff]  }
 0x4d2   :  { %11644 = vmatpush1.bf16.msra.mxu0 %v17093_v15  ;;  %12792 = vmatpush1.bf16.msra.mxu1 %v17096_v23  ;;  %v17188_v15 = vld [vmem:[#allocation3 + $0x26a8] ss:$16 sps:$4 sm:$0xff]   ;;  %v17193_v23 = vld [vmem:[#allocation3 + $0x26c4] ss:$16 sps:$4 sm:$0xff]  }
 0x4d3   :  { %11645 = vmatprep.subr.bf16.mxu0 %v17101_v24  ;;  %12793 = vmatprep.subr.bf16.mxu1 %v17104_v25  ;;  %v17196_v24 = vld [vmem:[#allocation3 + $0x26cc] ss:$16 sps:$4 sm:$0xff]   ;;  %v17191_v25 = vld [vmem:[#allocation3 + $0x26c0] ss:$16 sps:$4 sm:$0xff]  }
 0x4d6   :  { %11646 = vmatpush1.bf16.msra.mxu0 %v17099_v18  ;;  %12794 = vmatpush1.bf16.msra.mxu1 %v17102_v27  ;;  %v17194_v18 = vld [vmem:[#allocation3 + $0x26c8] ss:$16 sps:$4 sm:$0xff]   ;;  %v17199_v27 = vld [vmem:[#allocation3 + $0x26e4] ss:$16 sps:$4 sm:$0xff]  }
 0x4d7   :  { %11647 = vmatprep.subr.bf16.mxu0 %v17107_v28  ;;  %12795 = vmatprep.subr.bf16.mxu1 %v17110_v20  ;;  %v17202_v28 = vld [vmem:[#allocation3 + $0x26ec] ss:$16 sps:$4 sm:$0xff]   ;;  %v17197_v20 = vld [vmem:[#allocation3 + $0x26e0] ss:$16 sps:$4 sm:$0xff]  }
 0x4da   :  { %11648 = vmatpush1.bf16.msra.mxu0 %v17105_v30  ;;  %12796 = vmatpush1.bf16.msra.mxu1 %v17108_v31  ;;  %v17200_v30 = vld [vmem:[#allocation3 + $0x26e8] ss:$16 sps:$4 sm:$0xff]   ;;  %v17205_v31 = vld [vmem:[#allocation3 + $0x2704] ss:$16 sps:$4 sm:$0xff]  }
 0x4db   :  { %11649 = vmatprep.subr.bf16.mxu0 %v17113_v22  ;;  %12797 = vmatprep.subr.bf16.mxu1 %v17116_v33  ;;  %v17208_v22 = vld [vmem:[#allocation3 + $0x270c] ss:$16 sps:$4 sm:$0xff]   ;;  %v17203_v33 = vld [vmem:[#allocation3 + $0x2700] ss:$16 sps:$4 sm:$0xff]  }
 0x4de   :  { %11650 = vmatpush1.bf16.msra.mxu0 %v17111_v34  ;;  %12798 = vmatpush1.bf16.msra.mxu1 %v17114_v26  ;;  %v17206_v34 = vld [vmem:[#allocation3 + $0x2708] ss:$16 sps:$4 sm:$0xff]   ;;  %v17211_v26 = vld [vmem:[#allocation3 + $0x2724] ss:$16 sps:$4 sm:$0xff]  }
 0x4df   :  { %11651 = vmatprep.subr.bf16.mxu0 %v17119_v36  ;;  %12799 = vmatprep.subr.bf16.mxu1 %v17122_v37  ;;  %v17214_v36 = vld [vmem:[#allocation3 + $0x272c] ss:$16 sps:$4 sm:$0xff]   ;;  %v17209_v37 = vld [vmem:[#allocation3 + $0x2720] ss:$16 sps:$4 sm:$0xff]  }
 0x4e2   :  { %11652 = vmatpush1.bf16.msra.mxu0 %v17117_v29  ;;  %12800 = vmatpush1.bf16.msra.mxu1 %v17120_v39  ;;  %v17212_v29 = vld [vmem:[#allocation3 + $0x2728] ss:$16 sps:$4 sm:$0xff]   ;;  %v17217_v39 = vld [vmem:[#allocation3 + $0x2744] ss:$16 sps:$4 sm:$0xff]  }
 0x4e3   :  { %11653 = vmatprep.subr.bf16.mxu0 %v17125_v40  ;;  %12801 = vmatprep.subr.bf16.mxu1 %v17128_v32  ;;  %v17220_v40 = vld [vmem:[#allocation3 + $0x274c] ss:$16 sps:$4 sm:$0xff]   ;;  %v17215_v32 = vld [vmem:[#allocation3 + $0x2740] ss:$16 sps:$4 sm:$0xff]  }
 0x4e6   :  { %11654 = vmatpush1.bf16.msra.mxu0 %v17123_v42  ;;  %12802 = vmatpush1.bf16.msra.mxu1 %v17126_v43  ;;  %v17218_v42 = vld [vmem:[#allocation3 + $0x2748] ss:$16 sps:$4 sm:$0xff]   ;;  %v17223_v43 = vld [vmem:[#allocation3 + $0x2764] ss:$16 sps:$4 sm:$0xff]  }
 0x4e7   :  { %11655 = vmatprep.subr.bf16.mxu0 %v17131_v35  ;;  %12803 = vmatprep.subr.bf16.mxu1 %v17134_v45  ;;  %v17226_v35 = vld [vmem:[#allocation3 + $0x276c] ss:$16 sps:$4 sm:$0xff]   ;;  %v17221_v45 = vld [vmem:[#allocation3 + $0x2760] ss:$16 sps:$4 sm:$0xff]  }
 0x4ea   :  { %11656 = vmatpush1.bf16.msra.mxu0 %v17129_v46  ;;  %12804 = vmatpush1.bf16.msra.mxu1 %v17132_v38  ;;  %v17224_v46 = vld [vmem:[#allocation3 + $0x2768] ss:$16 sps:$4 sm:$0xff]   ;;  %v17229_v38 = vld [vmem:[#allocation3 + $0x2784] ss:$16 sps:$4 sm:$0xff]  }
 0x4eb   :  { %11657 = vmatprep.subr.bf16.mxu0 %v17137_v48  ;;  %12805 = vmatprep.subr.bf16.mxu1 %v17140_v49  ;;  %v17232_v48 = vld [vmem:[#allocation3 + $0x278c] ss:$16 sps:$4 sm:$0xff]   ;;  %v17227_v49 = vld [vmem:[#allocation3 + $0x2780] ss:$16 sps:$4 sm:$0xff]  }
 0x4ee   :  { %11658 = vmatpush1.bf16.msra.mxu0 %v17135_v50  ;;  %12806 = vmatpush1.bf16.msra.mxu1 %v17138_v51  ;;  %v17230_v50 = vld [vmem:[#allocation3 + $0x2788] ss:$16 sps:$4 sm:$0xff]   ;;  %v17235_v51 = vld [vmem:[#allocation3 + $0x27a4] ss:$16 sps:$4 sm:$0xff]  }
 0x4ef   :  { %11659 = vmatprep.subr.bf16.mxu0 %v17143_v52  ;;  %12807 = vmatprep.subr.bf16.mxu1 %v17146_v53  ;;  %v17238_v52 = vld [vmem:[#allocation3 + $0x27ac] ss:$16 sps:$4 sm:$0xff]   ;;  %v17233_v53 = vld [vmem:[#allocation3 + $0x27a0] ss:$16 sps:$4 sm:$0xff]  }
 0x4f2   :  { %11660 = vmatpush1.bf16.msra.mxu0 %v17141_v54  ;;  %12808 = vmatpush1.bf16.msra.mxu1 %v17144_v47  ;;  %v17236_v54 = vld [vmem:[#allocation3 + $0x27a8] ss:$16 sps:$4 sm:$0xff]   ;;  %v17241_v47 = vld [vmem:[#allocation3 + $0x27c4] ss:$16 sps:$4 sm:$0xff]  }
 0x4f3   :  { %11661 = vmatprep.subr.bf16.mxu0 %v17149_v55  ;;  %12809 = vmatprep.subr.bf16.mxu1 %v17152_v57  ;;  %v17244_v55 = vld [vmem:[#allocation3 + $0x27cc] ss:$16 sps:$4 sm:$0xff]   ;;  %v17239_v57 = vld [vmem:[#allocation3 + $0x27c0] ss:$16 sps:$4 sm:$0xff]  }
 0x4f6   :  { %11662 = vmatpush1.bf16.msra.mxu0 %v17147_v41  ;;  %12810 = vmatpush1.bf16.msra.mxu1 %v17150_v58  ;;  %v17242_v41 = vld [vmem:[#allocation3 + $0x27c8] ss:$16 sps:$4 sm:$0xff]   ;;  %v17247_v58 = vld [vmem:[#allocation3 + $0x27e4] ss:$16 sps:$4 sm:$0xff]  }
 0x4f7   :  { %11672 = vmatprep.subr.bf16.mxu0 %v17157_v60  ;;  %12820 = vmatprep.subr.bf16.mxu1 %v17160_v44  ;;  %v17250_v60 = vld [vmem:[#allocation3 + $0x27ec] ss:$16 sps:$4 sm:$0xff]   ;;  %v17245_v44 = vld [vmem:[#allocation3 + $0x27e0] ss:$16 sps:$4 sm:$0xff]  }
 0x4f9   :  { %11664 = vmatmul.mubr.bf16.vlgmr.msra.gmra.mrb[0].mxu0 %v13281_v61  ;;  %12812 = vmatmul.mubr.bf16.vlgmr.msra.gmra.mrb[0].mxu1 %v13281_v61  ;;  %v17248_v61 = vld [vmem:[#allocation3 + $0x27e8] ss:$16 sps:$4 sm:$0xff]  }
 0x4fa   :  { %11673 = vmatpush1.bf16.msra.mxu0 %v17155_v63  ;;  %12821 = vmatpush1.bf16.msra.mxu1 %v17158_v56  ;;  %v17255_v63 = vld [vmem:[#allocation3 + $0x2804] ss:$16 sps:$4 sm:$0xff]   ;;  %v17258_v56 = vld [vmem:[#allocation3 + $0x280c] ss:$16 sps:$4 sm:$0xff]  }
 0x4fb   :  { %11674 = vmatprep.subr.bf16.mxu0 %v17163_v0  ;;  %12822 = vmatprep.subr.bf16.mxu1 %v17166_v1  ;;  %v13283_v0 = vcombine.low %v18318_v62, %v18318_v62  ;;  %v18327_v1 = vld [vmem:[%s18399_s0 + $0xa0] sm:$0xff] }
 0x4fc   :  { %11704 = vmatprep.mubr.bf16.mxu0 %v13284_v2  ;;  %12852 = vmatprep.mubr.bf16.mxu1 %v13284_v2  ;;  %v17253_v2 = vld [vmem:[#allocation3 + $0x2800] ss:$16 sps:$4 sm:$0xff]  }
 0x4fd   :  { %v17259_v62 = vld [vmem:[#allocation3 + $0x2820] ss:$16 sps:$4 sm:$0xff]  }
 0x4fe   :  { %11675 = vmatpush1.bf16.msra.mxu0 %v17161_v59  ;;  %12823 = vmatpush1.bf16.msra.mxu1 %v17164_v3  ;;  %v17256_v59 = vld [vmem:[#allocation3 + $0x2808] ss:$16 sps:$4 sm:$0xff]   ;;  %v17261_v3 = vld [vmem:[#allocation3 + $0x2824] ss:$16 sps:$4 sm:$0xff]  }
 0x4ff   :  { %11676 = vmatprep.subr.bf16.mxu0 %v17169_v4  ;;  %12824 = vmatprep.subr.bf16.mxu1 %v17172_v5  ;;  %v17264_v4 = vld [vmem:[#allocation3 + $0x282c] ss:$16 sps:$4 sm:$0xff]   ;;  %v13286_v5 = vcombine.high %v18327_v1, %v18327_v1 }
 0x502   :  { %11677 = vmatpush1.bf16.msra.mxu0 %v17167_v6  ;;  %12825 = vmatpush1.bf16.msra.mxu1 %v17170_v7  ;;  %v17262_v6 = vld [vmem:[#allocation3 + $0x2828] ss:$16 sps:$4 sm:$0xff]   ;;  %v17267_v7 = vld [vmem:[#allocation3 + $0x2844] ss:$16 sps:$4 sm:$0xff]  }
 0x503   :  { %11678 = vmatprep.subr.bf16.mxu0 %v17175_v8  ;;  %12826 = vmatprep.subr.bf16.mxu1 %v17178_v9  ;;  %v17270_v8 = vld [vmem:[#allocation3 + $0x284c] ss:$16 sps:$4 sm:$0xff]   ;;  %v17265_v9 = vld [vmem:[#allocation3 + $0x2840] ss:$16 sps:$4 sm:$0xff]  }
 0x506   :  { %11679 = vmatpush1.bf16.msra.mxu0 %v17173_v10  ;;  %12827 = vmatpush1.bf16.msra.mxu1 %v17176_v11  ;;  %v17268_v10 = vld [vmem:[#allocation3 + $0x2848] ss:$16 sps:$4 sm:$0xff]   ;;  %v17273_v11 = vld [vmem:[#allocation3 + $0x2864] ss:$16 sps:$4 sm:$0xff]  }
 0x507   :  { %11680 = vmatprep.subr.bf16.mxu0 %v17181_v13  ;;  %12828 = vmatprep.subr.bf16.mxu1 %v17184_v14  ;;  %v17276_v13 = vld [vmem:[#allocation3 + $0x286c] ss:$16 sps:$4 sm:$0xff]   ;;  %v17271_v14 = vld [vmem:[#allocation3 + $0x2860] ss:$16 sps:$4 sm:$0xff]  }
 0x50a   :  { %11681 = vmatpush1.bf16.msra.mxu0 %v17179_v16  ;;  %12829 = vmatpush1.bf16.msra.mxu1 %v17182_v17  ;;  %v17274_v16 = vld [vmem:[#allocation3 + $0x2868] ss:$16 sps:$4 sm:$0xff]   ;;  %v17279_v17 = vld [vmem:[#allocation3 + $0x2884] ss:$16 sps:$4 sm:$0xff]  }
 0x50b   :  { %11682 = vmatprep.subr.bf16.mxu0 %v17187_v19  ;;  %12830 = vmatprep.subr.bf16.mxu1 %v17190_v12  ;;  %v17282_v19 = vld [vmem:[#allocation3 + $0x288c] ss:$16 sps:$4 sm:$0xff]   ;;  %v17277_v12 = vld [vmem:[#allocation3 + $0x2880] ss:$16 sps:$4 sm:$0xff]  }
 0x50e   :  { %11683 = vmatpush1.bf16.msra.mxu0 %v17185_v21  ;;  %12831 = vmatpush1.bf16.msra.mxu1 %v17188_v15  ;;  %v17280_v21 = vld [vmem:[#allocation3 + $0x2888] ss:$16 sps:$4 sm:$0xff]   ;;  %v17285_v15 = vld [vmem:[#allocation3 + $0x28a4] ss:$16 sps:$4 sm:$0xff]  }
 0x50f   :  { %11684 = vmatprep.subr.bf16.mxu0 %v17193_v23  ;;  %12832 = vmatprep.subr.bf16.mxu1 %v17196_v24  ;;  %v17288_v23 = vld [vmem:[#allocation3 + $0x28ac] ss:$16 sps:$4 sm:$0xff]   ;;  %v17283_v24 = vld [vmem:[#allocation3 + $0x28a0] ss:$16 sps:$4 sm:$0xff]  }
 0x512   :  { %11685 = vmatpush1.bf16.msra.mxu0 %v17191_v25  ;;  %12833 = vmatpush1.bf16.msra.mxu1 %v17194_v18  ;;  %v17286_v25 = vld [vmem:[#allocation3 + $0x28a8] ss:$16 sps:$4 sm:$0xff]   ;;  %v17291_v18 = vld [vmem:[#allocation3 + $0x28c4] ss:$16 sps:$4 sm:$0xff]  }
 0x513   :  { %11686 = vmatprep.subr.bf16.mxu0 %v17199_v27  ;;  %12834 = vmatprep.subr.bf16.mxu1 %v17202_v28  ;;  %v17294_v27 = vld [vmem:[#allocation3 + $0x28cc] ss:$16 sps:$4 sm:$0xff]   ;;  %v17289_v28 = vld [vmem:[#allocation3 + $0x28c0] ss:$16 sps:$4 sm:$0xff]  }
 0x516   :  { %11687 = vmatpush1.bf16.msra.mxu0 %v17197_v20  ;;  %12835 = vmatpush1.bf16.msra.mxu1 %v17200_v30  ;;  %v17292_v20 = vld [vmem:[#allocation3 + $0x28c8] ss:$16 sps:$4 sm:$0xff]   ;;  %v17297_v30 = vld [vmem:[#allocation3 + $0x28e4] ss:$16 sps:$4 sm:$0xff]  }
 0x517   :  { %11688 = vmatprep.subr.bf16.mxu0 %v17205_v31  ;;  %12836 = vmatprep.subr.bf16.mxu1 %v17208_v22  ;;  %v17300_v31 = vld [vmem:[#allocation3 + $0x28ec] ss:$16 sps:$4 sm:$0xff]   ;;  %v17295_v22 = vld [vmem:[#allocation3 + $0x28e0] ss:$16 sps:$4 sm:$0xff]  }
 0x51a   :  { %11689 = vmatpush1.bf16.msra.mxu0 %v17203_v33  ;;  %12837 = vmatpush1.bf16.msra.mxu1 %v17206_v34  ;;  %v17298_v33 = vld [vmem:[#allocation3 + $0x28e8] ss:$16 sps:$4 sm:$0xff]   ;;  %v17303_v34 = vld [vmem:[#allocation3 + $0x2904] ss:$16 sps:$4 sm:$0xff]  }
 0x51b   :  { %11690 = vmatprep.subr.bf16.mxu0 %v17211_v26  ;;  %12838 = vmatprep.subr.bf16.mxu1 %v17214_v36  ;;  %v17306_v26 = vld [vmem:[#allocation3 + $0x290c] ss:$16 sps:$4 sm:$0xff]   ;;  %v17301_v36 = vld [vmem:[#allocation3 + $0x2900] ss:$16 sps:$4 sm:$0xff]  }
 0x51e   :  { %11691 = vmatpush1.bf16.msra.mxu0 %v17209_v37  ;;  %12839 = vmatpush1.bf16.msra.mxu1 %v17212_v29  ;;  %v17304_v37 = vld [vmem:[#allocation3 + $0x2908] ss:$16 sps:$4 sm:$0xff]   ;;  %v17309_v29 = vld [vmem:[#allocation3 + $0x2924] ss:$16 sps:$4 sm:$0xff]  }
 0x51f   :  { %11692 = vmatprep.subr.bf16.mxu0 %v17217_v39  ;;  %12840 = vmatprep.subr.bf16.mxu1 %v17220_v40  ;;  %v17312_v39 = vld [vmem:[#allocation3 + $0x292c] ss:$16 sps:$4 sm:$0xff]   ;;  %v17307_v40 = vld [vmem:[#allocation3 + $0x2920] ss:$16 sps:$4 sm:$0xff]  }
 0x522   :  { %11693 = vmatpush1.bf16.msra.mxu0 %v17215_v32  ;;  %12841 = vmatpush1.bf16.msra.mxu1 %v17218_v42  ;;  %v17310_v32 = vld [vmem:[#allocation3 + $0x2928] ss:$16 sps:$4 sm:$0xff]   ;;  %v17315_v42 = vld [vmem:[#allocation3 + $0x2944] ss:$16 sps:$4 sm:$0xff]  }
 0x523   :  { %11694 = vmatprep.subr.bf16.mxu0 %v17223_v43  ;;  %12842 = vmatprep.subr.bf16.mxu1 %v17226_v35  ;;  %v17318_v43 = vld [vmem:[#allocation3 + $0x294c] ss:$16 sps:$4 sm:$0xff]   ;;  %v17313_v35 = vld [vmem:[#allocation3 + $0x2940] ss:$16 sps:$4 sm:$0xff]  }
 0x526   :  { %11695 = vmatpush1.bf16.msra.mxu0 %v17221_v45  ;;  %12843 = vmatpush1.bf16.msra.mxu1 %v17224_v46  ;;  %v17316_v45 = vld [vmem:[#allocation3 + $0x2948] ss:$16 sps:$4 sm:$0xff]   ;;  %v17321_v46 = vld [vmem:[#allocation3 + $0x2964] ss:$16 sps:$4 sm:$0xff]  }
 0x527   :  { %11696 = vmatprep.subr.bf16.mxu0 %v17229_v38  ;;  %12844 = vmatprep.subr.bf16.mxu1 %v17232_v48  ;;  %v17324_v38 = vld [vmem:[#allocation3 + $0x296c] ss:$16 sps:$4 sm:$0xff]   ;;  %v17319_v48 = vld [vmem:[#allocation3 + $0x2960] ss:$16 sps:$4 sm:$0xff]  }
 0x52a   :  { %11697 = vmatpush1.bf16.msra.mxu0 %v17227_v49  ;;  %12845 = vmatpush1.bf16.msra.mxu1 %v17230_v50  ;;  %v17322_v49 = vld [vmem:[#allocation3 + $0x2968] ss:$16 sps:$4 sm:$0xff]   ;;  %v17327_v50 = vld [vmem:[#allocation3 + $0x2984] ss:$16 sps:$4 sm:$0xff]  }
 0x52b   :  { %11698 = vmatprep.subr.bf16.mxu0 %v17235_v51  ;;  %12846 = vmatprep.subr.bf16.mxu1 %v17238_v52  ;;  %v17330_v51 = vld [vmem:[#allocation3 + $0x298c] ss:$16 sps:$4 sm:$0xff]   ;;  %v17325_v52 = vld [vmem:[#allocation3 + $0x2980] ss:$16 sps:$4 sm:$0xff]  }
 0x52e   :  { %11699 = vmatpush1.bf16.msra.mxu0 %v17233_v53  ;;  %12847 = vmatpush1.bf16.msra.mxu1 %v17236_v54  ;;  %v17328_v53 = vld [vmem:[#allocation3 + $0x2988] ss:$16 sps:$4 sm:$0xff]   ;;  %v17333_v54 = vld [vmem:[#allocation3 + $0x29a4] ss:$16 sps:$4 sm:$0xff]  }
 0x52f   :  { %11700 = vmatprep.subr.bf16.mxu0 %v17241_v47  ;;  %12848 = vmatprep.subr.bf16.mxu1 %v17244_v55  ;;  %v17336_v47 = vld [vmem:[#allocation3 + $0x29ac] ss:$16 sps:$4 sm:$0xff]   ;;  %v17331_v55 = vld [vmem:[#allocation3 + $0x29a0] ss:$16 sps:$4 sm:$0xff]  }
 0x532   :  { %11701 = vmatpush1.bf16.msra.mxu0 %v17239_v57  ;;  %12849 = vmatpush1.bf16.msra.mxu1 %v17242_v41  ;;  %v17334_v57 = vld [vmem:[#allocation3 + $0x29a8] ss:$16 sps:$4 sm:$0xff]   ;;  %v17339_v41 = vld [vmem:[#allocation3 + $0x29c4] ss:$16 sps:$4 sm:$0xff]  }
 0x533   :  { %11702 = vmatprep.subr.bf16.mxu0 %v17247_v58  ;;  %12850 = vmatprep.subr.bf16.mxu1 %v17250_v60  ;;  %v17342_v58 = vld [vmem:[#allocation3 + $0x29cc] ss:$16 sps:$4 sm:$0xff]   ;;  %v17337_v60 = vld [vmem:[#allocation3 + $0x29c0] ss:$16 sps:$4 sm:$0xff]  }
 0x536   :  { %11703 = vmatpush1.bf16.msra.mxu0 %v17245_v44  ;;  %12851 = vmatpush1.bf16.msra.mxu1 %v17248_v61  ;;  %v17340_v44 = vld [vmem:[#allocation3 + $0x29c8] ss:$16 sps:$4 sm:$0xff]   ;;  %v17345_v61 = vld [vmem:[#allocation3 + $0x29e4] ss:$16 sps:$4 sm:$0xff]  }
 0x537   :  { %11713 = vmatprep.subr.bf16.mxu0 %v17255_v63  ;;  %12861 = vmatprep.subr.bf16.mxu1 %v17258_v56  ;;  %v17348_v63 = vld [vmem:[#allocation3 + $0x29ec] ss:$16 sps:$4 sm:$0xff]   ;;  %v17343_v56 = vld [vmem:[#allocation3 + $0x29e0] ss:$16 sps:$4 sm:$0xff]  }
 0x539   :  { %11705 = vmatmul.mubr.bf16.vlgmr.msra.gmra.mrb[0].mxu0 %v13283_v0  ;;  %12853 = vmatmul.mubr.bf16.vlgmr.msra.gmra.mrb[0].mxu1 %v13283_v0  ;;  %v17346_v0 = vld [vmem:[#allocation3 + $0x29e8] ss:$16 sps:$4 sm:$0xff]  }
 0x53a   :  { %11714 = vmatpush1.bf16.msra.mxu0 %v17253_v2  ;;  %12862 = vmatpush1.bf16.msra.mxu1 %v17256_v59  ;;  %v17353_v2 = vld [vmem:[#allocation3 + $0x2a04] ss:$16 sps:$4 sm:$0xff]   ;;  %v17356_v59 = vld [vmem:[#allocation3 + $0x2a0c] ss:$16 sps:$4 sm:$0xff]  }
 0x53b   :  { %11715 = vmatprep.subr.bf16.mxu0 %v17261_v3  ;;  %12863 = vmatprep.subr.bf16.mxu1 %v17264_v4  ;;  %v13285_v3 = vcombine.low %v18327_v1, %v18327_v1  ;;  %v18336_v4 = vld [vmem:[%s18399_s0 + $0xa8] sm:$0xff]  ;;  %v17357_v1 = vld [vmem:[#allocation3 + $0x2a20] ss:$16 sps:$4 sm:$0xff]  }
 0x53c   :  { %11745 = vmatprep.mubr.bf16.mxu0 %v13286_v5  ;;  %12893 = vmatprep.mubr.bf16.mxu1 %v13286_v5  ;;  %v17351_v5 = vld [vmem:[#allocation3 + $0x2a00] ss:$16 sps:$4 sm:$0xff]  }
 0x53e   :  { %11716 = vmatpush1.bf16.msra.mxu0 %v17259_v62  ;;  %12864 = vmatpush1.bf16.msra.mxu1 %v17262_v6  ;;  %v17354_v62 = vld [vmem:[#allocation3 + $0x2a08] ss:$16 sps:$4 sm:$0xff]   ;;  %v17359_v6 = vld [vmem:[#allocation3 + $0x2a24] ss:$16 sps:$4 sm:$0xff]  }
 0x53f   :  { %11717 = vmatprep.subr.bf16.mxu0 %v17267_v7  ;;  %12865 = vmatprep.subr.bf16.mxu1 %v17270_v8  ;;  %v17362_v7 = vld [vmem:[#allocation3 + $0x2a2c] ss:$16 sps:$4 sm:$0xff]   ;;  %v13288_v8 = vcombine.high %v18336_v4, %v18336_v4 }
 0x542   :  { %11718 = vmatpush1.bf16.msra.mxu0 %v17265_v9  ;;  %12866 = vmatpush1.bf16.msra.mxu1 %v17268_v10  ;;  %v17360_v9 = vld [vmem:[#allocation3 + $0x2a28] ss:$16 sps:$4 sm:$0xff]   ;;  %v17365_v10 = vld [vmem:[#allocation3 + $0x2a44] ss:$16 sps:$4 sm:$0xff]  }
 0x543   :  { %11719 = vmatprep.subr.bf16.mxu0 %v17273_v11  ;;  %12867 = vmatprep.subr.bf16.mxu1 %v17276_v13  ;;  %v17368_v11 = vld [vmem:[#allocation3 + $0x2a4c] ss:$16 sps:$4 sm:$0xff]   ;;  %v17363_v13 = vld [vmem:[#allocation3 + $0x2a40] ss:$16 sps:$4 sm:$0xff]  }
 0x546   :  { %11720 = vmatpush1.bf16.msra.mxu0 %v17271_v14  ;;  %12868 = vmatpush1.bf16.msra.mxu1 %v17274_v16  ;;  %v17366_v14 = vld [vmem:[#allocation3 + $0x2a48] ss:$16 sps:$4 sm:$0xff]   ;;  %v17371_v16 = vld [vmem:[#allocation3 + $0x2a64] ss:$16 sps:$4 sm:$0xff]  }
 0x547   :  { %11721 = vmatprep.subr.bf16.mxu0 %v17279_v17  ;;  %12869 = vmatprep.subr.bf16.mxu1 %v17282_v19  ;;  %v17374_v17 = vld [vmem:[#allocation3 + $0x2a6c] ss:$16 sps:$4 sm:$0xff]   ;;  %v17369_v19 = vld [vmem:[#allocation3 + $0x2a60] ss:$16 sps:$4 sm:$0xff]  }
 0x54a   :  { %11722 = vmatpush1.bf16.msra.mxu0 %v17277_v12  ;;  %12870 = vmatpush1.bf16.msra.mxu1 %v17280_v21  ;;  %v17372_v12 = vld [vmem:[#allocation3 + $0x2a68] ss:$16 sps:$4 sm:$0xff]   ;;  %v17377_v21 = vld [vmem:[#allocation3 + $0x2a84] ss:$16 sps:$4 sm:$0xff]  }
 0x54b   :  { %11723 = vmatprep.subr.bf16.mxu0 %v17285_v15  ;;  %12871 = vmatprep.subr.bf16.mxu1 %v17288_v23  ;;  %v17380_v15 = vld [vmem:[#allocation3 + $0x2a8c] ss:$16 sps:$4 sm:$0xff]   ;;  %v17375_v23 = vld [vmem:[#allocation3 + $0x2a80] ss:$16 sps:$4 sm:$0xff]  }
 0x54e   :  { %11724 = vmatpush1.bf16.msra.mxu0 %v17283_v24  ;;  %12872 = vmatpush1.bf16.msra.mxu1 %v17286_v25  ;;  %v17378_v24 = vld [vmem:[#allocation3 + $0x2a88] ss:$16 sps:$4 sm:$0xff]   ;;  %v17383_v25 = vld [vmem:[#allocation3 + $0x2aa4] ss:$16 sps:$4 sm:$0xff]  }
 0x54f   :  { %11725 = vmatprep.subr.bf16.mxu0 %v17291_v18  ;;  %12873 = vmatprep.subr.bf16.mxu1 %v17294_v27  ;;  %v17386_v18 = vld [vmem:[#allocation3 + $0x2aac] ss:$16 sps:$4 sm:$0xff]   ;;  %v17381_v27 = vld [vmem:[#allocation3 + $0x2aa0] ss:$16 sps:$4 sm:$0xff]  }
 0x552   :  { %11726 = vmatpush1.bf16.msra.mxu0 %v17289_v28  ;;  %12874 = vmatpush1.bf16.msra.mxu1 %v17292_v20  ;;  %v17384_v28 = vld [vmem:[#allocation3 + $0x2aa8] ss:$16 sps:$4 sm:$0xff]   ;;  %v17389_v20 = vld [vmem:[#allocation3 + $0x2ac4] ss:$16 sps:$4 sm:$0xff]  }
 0x553   :  { %11727 = vmatprep.subr.bf16.mxu0 %v17297_v30  ;;  %12875 = vmatprep.subr.bf16.mxu1 %v17300_v31  ;;  %v17392_v30 = vld [vmem:[#allocation3 + $0x2acc] ss:$16 sps:$4 sm:$0xff]   ;;  %v17387_v31 = vld [vmem:[#allocation3 + $0x2ac0] ss:$16 sps:$4 sm:$0xff]  }
 0x556   :  { %11728 = vmatpush1.bf16.msra.mxu0 %v17295_v22  ;;  %12876 = vmatpush1.bf16.msra.mxu1 %v17298_v33  ;;  %v17390_v22 = vld [vmem:[#allocation3 + $0x2ac8] ss:$16 sps:$4 sm:$0xff]   ;;  %v17395_v33 = vld [vmem:[#allocation3 + $0x2ae4] ss:$16 sps:$4 sm:$0xff]  }
 0x557   :  { %11729 = vmatprep.subr.bf16.mxu0 %v17303_v34  ;;  %12877 = vmatprep.subr.bf16.mxu1 %v17306_v26  ;;  %v17398_v34 = vld [vmem:[#allocation3 + $0x2aec] ss:$16 sps:$4 sm:$0xff]   ;;  %v17393_v26 = vld [vmem:[#allocation3 + $0x2ae0] ss:$16 sps:$4 sm:$0xff]  }
 0x55a   :  { %11730 = vmatpush1.bf16.msra.mxu0 %v17301_v36  ;;  %12878 = vmatpush1.bf16.msra.mxu1 %v17304_v37  ;;  %v17396_v36 = vld [vmem:[#allocation3 + $0x2ae8] ss:$16 sps:$4 sm:$0xff]   ;;  %v17401_v37 = vld [vmem:[#allocation3 + $0x2b04] ss:$16 sps:$4 sm:$0xff]  }
 0x55b   :  { %11731 = vmatprep.subr.bf16.mxu0 %v17309_v29  ;;  %12879 = vmatprep.subr.bf16.mxu1 %v17312_v39  ;;  %v17404_v29 = vld [vmem:[#allocation3 + $0x2b0c] ss:$16 sps:$4 sm:$0xff]   ;;  %v17399_v39 = vld [vmem:[#allocation3 + $0x2b00] ss:$16 sps:$4 sm:$0xff]  }
 0x55e   :  { %11732 = vmatpush1.bf16.msra.mxu0 %v17307_v40  ;;  %12880 = vmatpush1.bf16.msra.mxu1 %v17310_v32  ;;  %v17402_v40 = vld [vmem:[#allocation3 + $0x2b08] ss:$16 sps:$4 sm:$0xff]   ;;  %v17407_v32 = vld [vmem:[#allocation3 + $0x2b24] ss:$16 sps:$4 sm:$0xff]  }
 0x55f   :  { %11733 = vmatprep.subr.bf16.mxu0 %v17315_v42  ;;  %12881 = vmatprep.subr.bf16.mxu1 %v17318_v43  ;;  %v17410_v42 = vld [vmem:[#allocation3 + $0x2b2c] ss:$16 sps:$4 sm:$0xff]   ;;  %v17405_v43 = vld [vmem:[#allocation3 + $0x2b20] ss:$16 sps:$4 sm:$0xff]  }
 0x562   :  { %11734 = vmatpush1.bf16.msra.mxu0 %v17313_v35  ;;  %12882 = vmatpush1.bf16.msra.mxu1 %v17316_v45  ;;  %v17408_v35 = vld [vmem:[#allocation3 + $0x2b28] ss:$16 sps:$4 sm:$0xff]   ;;  %v17413_v45 = vld [vmem:[#allocation3 + $0x2b44] ss:$16 sps:$4 sm:$0xff]  }
 0x563   :  { %11735 = vmatprep.subr.bf16.mxu0 %v17321_v46  ;;  %12883 = vmatprep.subr.bf16.mxu1 %v17324_v38  ;;  %v17416_v46 = vld [vmem:[#allocation3 + $0x2b4c] ss:$16 sps:$4 sm:$0xff]   ;;  %v17411_v38 = vld [vmem:[#allocation3 + $0x2b40] ss:$16 sps:$4 sm:$0xff]  }
 0x566   :  { %11736 = vmatpush1.bf16.msra.mxu0 %v17319_v48  ;;  %12884 = vmatpush1.bf16.msra.mxu1 %v17322_v49  ;;  %v17414_v48 = vld [vmem:[#allocation3 + $0x2b48] ss:$16 sps:$4 sm:$0xff]   ;;  %v17419_v49 = vld [vmem:[#allocation3 + $0x2b64] ss:$16 sps:$4 sm:$0xff]  }
 0x567   :  { %11737 = vmatprep.subr.bf16.mxu0 %v17327_v50  ;;  %12885 = vmatprep.subr.bf16.mxu1 %v17330_v51  ;;  %v17422_v50 = vld [vmem:[#allocation3 + $0x2b6c] ss:$16 sps:$4 sm:$0xff]   ;;  %v17417_v51 = vld [vmem:[#allocation3 + $0x2b60] ss:$16 sps:$4 sm:$0xff]  }
 0x56a   :  { %11738 = vmatpush1.bf16.msra.mxu0 %v17325_v52  ;;  %12886 = vmatpush1.bf16.msra.mxu1 %v17328_v53  ;;  %v17420_v52 = vld [vmem:[#allocation3 + $0x2b68] ss:$16 sps:$4 sm:$0xff]   ;;  %v17425_v53 = vld [vmem:[#allocation3 + $0x2b84] ss:$16 sps:$4 sm:$0xff]  }
 0x56b   :  { %11739 = vmatprep.subr.bf16.mxu0 %v17333_v54  ;;  %12887 = vmatprep.subr.bf16.mxu1 %v17336_v47  ;;  %v17428_v54 = vld [vmem:[#allocation3 + $0x2b8c] ss:$16 sps:$4 sm:$0xff]   ;;  %v17423_v47 = vld [vmem:[#allocation3 + $0x2b80] ss:$16 sps:$4 sm:$0xff]  }
 0x56e   :  { %11740 = vmatpush1.bf16.msra.mxu0 %v17331_v55  ;;  %12888 = vmatpush1.bf16.msra.mxu1 %v17334_v57  ;;  %v17426_v55 = vld [vmem:[#allocation3 + $0x2b88] ss:$16 sps:$4 sm:$0xff]   ;;  %v17431_v57 = vld [vmem:[#allocation3 + $0x2ba4] ss:$16 sps:$4 sm:$0xff]  }
 0x56f   :  { %11741 = vmatprep.subr.bf16.mxu0 %v17339_v41  ;;  %12889 = vmatprep.subr.bf16.mxu1 %v17342_v58  ;;  %v17434_v41 = vld [vmem:[#allocation3 + $0x2bac] ss:$16 sps:$4 sm:$0xff]   ;;  %v17429_v58 = vld [vmem:[#allocation3 + $0x2ba0] ss:$16 sps:$4 sm:$0xff]  }
 0x572   :  { %11742 = vmatpush1.bf16.msra.mxu0 %v17337_v60  ;;  %12890 = vmatpush1.bf16.msra.mxu1 %v17340_v44  ;;  %v17432_v60 = vld [vmem:[#allocation3 + $0x2ba8] ss:$16 sps:$4 sm:$0xff]   ;;  %v17437_v44 = vld [vmem:[#allocation3 + $0x2bc4] ss:$16 sps:$4 sm:$0xff]  }
 0x573   :  { %11743 = vmatprep.subr.bf16.mxu0 %v17345_v61  ;;  %12891 = vmatprep.subr.bf16.mxu1 %v17348_v63  ;;  %v17440_v61 = vld [vmem:[#allocation3 + $0x2bcc] ss:$16 sps:$4 sm:$0xff]   ;;  %v17435_v63 = vld [vmem:[#allocation3 + $0x2bc0] ss:$16 sps:$4 sm:$0xff]  }
 0x576   :  { %11744 = vmatpush1.bf16.msra.mxu0 %v17343_v56  ;;  %12892 = vmatpush1.bf16.msra.mxu1 %v17346_v0  ;;  %v17438_v56 = vld [vmem:[#allocation3 + $0x2bc8] ss:$16 sps:$4 sm:$0xff]   ;;  %v17443_v0 = vld [vmem:[#allocation3 + $0x2be4] ss:$16 sps:$4 sm:$0xff]  }
 0x577   :  { %11754 = vmatprep.subr.bf16.mxu0 %v17353_v2  ;;  %12902 = vmatprep.subr.bf16.mxu1 %v17356_v59  ;;  %v17446_v2 = vld [vmem:[#allocation3 + $0x2bec] ss:$16 sps:$4 sm:$0xff]   ;;  %v17441_v59 = vld [vmem:[#allocation3 + $0x2be0] ss:$16 sps:$4 sm:$0xff]  }
 0x579   :  { %11746 = vmatmul.mubr.bf16.vlgmr.msra.gmra.mrb[0].mxu0 %v13285_v3  ;;  %12894 = vmatmul.mubr.bf16.vlgmr.msra.gmra.mrb[0].mxu1 %v13285_v3  ;;  %v17444_v3 = vld [vmem:[#allocation3 + $0x2be8] ss:$16 sps:$4 sm:$0xff]  }
 0x57a   :  { %11755 = vmatpush1.bf16.msra.mxu0 %v17351_v5  ;;  %12903 = vmatpush1.bf16.msra.mxu1 %v17354_v62  ;;  %v17451_v5 = vld [vmem:[#allocation3 + $0x2c04] ss:$16 sps:$4 sm:$0xff]   ;;  %v17454_v62 = vld [vmem:[#allocation3 + $0x2c0c] ss:$16 sps:$4 sm:$0xff]  }
 0x57b   :  { %11756 = vmatprep.subr.bf16.mxu0 %v17359_v6  ;;  %12904 = vmatprep.subr.bf16.mxu1 %v17362_v7  ;;  %v13287_v6 = vcombine.low %v18336_v4, %v18336_v4  ;;  %v18345_v7 = vld [vmem:[%s18399_s0 + $0xb0] sm:$0xff] }
 0x57c   :  { %11786 = vmatprep.mubr.bf16.mxu0 %v13288_v8  ;;  %12934 = vmatprep.mubr.bf16.mxu1 %v13288_v8  ;;  %v17449_v8 = vld [vmem:[#allocation3 + $0x2c00] ss:$16 sps:$4 sm:$0xff]  }
 0x57d   :  { %v17455_v4 = vld [vmem:[#allocation3 + $0x2c20] ss:$16 sps:$4 sm:$0xff]  }
 0x57e   :  { %11757 = vmatpush1.bf16.msra.mxu0 %v17357_v1  ;;  %12905 = vmatpush1.bf16.msra.mxu1 %v17360_v9  ;;  %v17452_v1 = vld [vmem:[#allocation3 + $0x2c08] ss:$16 sps:$4 sm:$0xff]   ;;  %v17457_v9 = vld [vmem:[#allocation3 + $0x2c24] ss:$16 sps:$4 sm:$0xff]  }
 0x57f   :  { %11758 = vmatprep.subr.bf16.mxu0 %v17365_v10  ;;  %12906 = vmatprep.subr.bf16.mxu1 %v17368_v11  ;;  %v17460_v10 = vld [vmem:[#allocation3 + $0x2c2c] ss:$16 sps:$4 sm:$0xff]   ;;  %v13290_v11 = vcombine.high %v18345_v7, %v18345_v7 }
 0x582   :  { %11759 = vmatpush1.bf16.msra.mxu0 %v17363_v13  ;;  %12907 = vmatpush1.bf16.msra.mxu1 %v17366_v14  ;;  %v17458_v13 = vld [vmem:[#allocation3 + $0x2c28] ss:$16 sps:$4 sm:$0xff]   ;;  %v17463_v14 = vld [vmem:[#allocation3 + $0x2c44] ss:$16 sps:$4 sm:$0xff]  }
 0x583   :  { %11760 = vmatprep.subr.bf16.mxu0 %v17371_v16  ;;  %12908 = vmatprep.subr.bf16.mxu1 %v17374_v17  ;;  %v17466_v16 = vld [vmem:[#allocation3 + $0x2c4c] ss:$16 sps:$4 sm:$0xff]   ;;  %v17461_v17 = vld [vmem:[#allocation3 + $0x2c40] ss:$16 sps:$4 sm:$0xff]  }
 0x586   :  { %11761 = vmatpush1.bf16.msra.mxu0 %v17369_v19  ;;  %12909 = vmatpush1.bf16.msra.mxu1 %v17372_v12  ;;  %v17464_v19 = vld [vmem:[#allocation3 + $0x2c48] ss:$16 sps:$4 sm:$0xff]   ;;  %v17469_v12 = vld [vmem:[#allocation3 + $0x2c64] ss:$16 sps:$4 sm:$0xff]  }
 0x587   :  { %11762 = vmatprep.subr.bf16.mxu0 %v17377_v21  ;;  %12910 = vmatprep.subr.bf16.mxu1 %v17380_v15  ;;  %v17472_v21 = vld [vmem:[#allocation3 + $0x2c6c] ss:$16 sps:$4 sm:$0xff]   ;;  %v17467_v15 = vld [vmem:[#allocation3 + $0x2c60] ss:$16 sps:$4 sm:$0xff]  }
 0x58a   :  { %11763 = vmatpush1.bf16.msra.mxu0 %v17375_v23  ;;  %12911 = vmatpush1.bf16.msra.mxu1 %v17378_v24  ;;  %v17470_v23 = vld [vmem:[#allocation3 + $0x2c68] ss:$16 sps:$4 sm:$0xff]   ;;  %v17475_v24 = vld [vmem:[#allocation3 + $0x2c84] ss:$16 sps:$4 sm:$0xff]  }
 0x58b   :  { %11764 = vmatprep.subr.bf16.mxu0 %v17383_v25  ;;  %12912 = vmatprep.subr.bf16.mxu1 %v17386_v18  ;;  %v17478_v25 = vld [vmem:[#allocation3 + $0x2c8c] ss:$16 sps:$4 sm:$0xff]   ;;  %v17473_v18 = vld [vmem:[#allocation3 + $0x2c80] ss:$16 sps:$4 sm:$0xff]  }
 0x58e   :  { %11765 = vmatpush1.bf16.msra.mxu0 %v17381_v27  ;;  %12913 = vmatpush1.bf16.msra.mxu1 %v17384_v28  ;;  %v17476_v27 = vld [vmem:[#allocation3 + $0x2c88] ss:$16 sps:$4 sm:$0xff]   ;;  %v17481_v28 = vld [vmem:[#allocation3 + $0x2ca4] ss:$16 sps:$4 sm:$0xff]  }
 0x58f   :  { %11766 = vmatprep.subr.bf16.mxu0 %v17389_v20  ;;  %12914 = vmatprep.subr.bf16.mxu1 %v17392_v30  ;;  %v17484_v20 = vld [vmem:[#allocation3 + $0x2cac] ss:$16 sps:$4 sm:$0xff]   ;;  %v17479_v30 = vld [vmem:[#allocation3 + $0x2ca0] ss:$16 sps:$4 sm:$0xff]  }
 0x592   :  { %11767 = vmatpush1.bf16.msra.mxu0 %v17387_v31  ;;  %12915 = vmatpush1.bf16.msra.mxu1 %v17390_v22  ;;  %v17482_v31 = vld [vmem:[#allocation3 + $0x2ca8] ss:$16 sps:$4 sm:$0xff]   ;;  %v17487_v22 = vld [vmem:[#allocation3 + $0x2cc4] ss:$16 sps:$4 sm:$0xff]  }
 0x593   :  { %11768 = vmatprep.subr.bf16.mxu0 %v17395_v33  ;;  %12916 = vmatprep.subr.bf16.mxu1 %v17398_v34  ;;  %v17490_v33 = vld [vmem:[#allocation3 + $0x2ccc] ss:$16 sps:$4 sm:$0xff]   ;;  %v17485_v34 = vld [vmem:[#allocation3 + $0x2cc0] ss:$16 sps:$4 sm:$0xff]  }
 0x596   :  { %11769 = vmatpush1.bf16.msra.mxu0 %v17393_v26  ;;  %12917 = vmatpush1.bf16.msra.mxu1 %v17396_v36  ;;  %v17488_v26 = vld [vmem:[#allocation3 + $0x2cc8] ss:$16 sps:$4 sm:$0xff]   ;;  %v17493_v36 = vld [vmem:[#allocation3 + $0x2ce4] ss:$16 sps:$4 sm:$0xff]  }
 0x597   :  { %11770 = vmatprep.subr.bf16.mxu0 %v17401_v37  ;;  %12918 = vmatprep.subr.bf16.mxu1 %v17404_v29  ;;  %v17496_v37 = vld [vmem:[#allocation3 + $0x2cec] ss:$16 sps:$4 sm:$0xff]   ;;  %v17491_v29 = vld [vmem:[#allocation3 + $0x2ce0] ss:$16 sps:$4 sm:$0xff]  }
 0x59a   :  { %11771 = vmatpush1.bf16.msra.mxu0 %v17399_v39  ;;  %12919 = vmatpush1.bf16.msra.mxu1 %v17402_v40  ;;  %v17494_v39 = vld [vmem:[#allocation3 + $0x2ce8] ss:$16 sps:$4 sm:$0xff]   ;;  %v17499_v40 = vld [vmem:[#allocation3 + $0x2d04] ss:$16 sps:$4 sm:$0xff]  }
 0x59b   :  { %11772 = vmatprep.subr.bf16.mxu0 %v17407_v32  ;;  %12920 = vmatprep.subr.bf16.mxu1 %v17410_v42  ;;  %v17502_v32 = vld [vmem:[#allocation3 + $0x2d0c] ss:$16 sps:$4 sm:$0xff]   ;;  %v17497_v42 = vld [vmem:[#allocation3 + $0x2d00] ss:$16 sps:$4 sm:$0xff]  }
 0x59e   :  { %11773 = vmatpush1.bf16.msra.mxu0 %v17405_v43  ;;  %12921 = vmatpush1.bf16.msra.mxu1 %v17408_v35  ;;  %v17500_v43 = vld [vmem:[#allocation3 + $0x2d08] ss:$16 sps:$4 sm:$0xff]   ;;  %v17505_v35 = vld [vmem:[#allocation3 + $0x2d24] ss:$16 sps:$4 sm:$0xff]  }
 0x59f   :  { %11774 = vmatprep.subr.bf16.mxu0 %v17413_v45  ;;  %12922 = vmatprep.subr.bf16.mxu1 %v17416_v46  ;;  %v17508_v45 = vld [vmem:[#allocation3 + $0x2d2c] ss:$16 sps:$4 sm:$0xff]   ;;  %v17503_v46 = vld [vmem:[#allocation3 + $0x2d20] ss:$16 sps:$4 sm:$0xff]  }
 0x5a2   :  { %11775 = vmatpush1.bf16.msra.mxu0 %v17411_v38  ;;  %12923 = vmatpush1.bf16.msra.mxu1 %v17414_v48  ;;  %v17506_v38 = vld [vmem:[#allocation3 + $0x2d28] ss:$16 sps:$4 sm:$0xff]   ;;  %v17511_v48 = vld [vmem:[#allocation3 + $0x2d44] ss:$16 sps:$4 sm:$0xff]  }
 0x5a3   :  { %11776 = vmatprep.subr.bf16.mxu0 %v17419_v49  ;;  %12924 = vmatprep.subr.bf16.mxu1 %v17422_v50  ;;  %v17514_v49 = vld [vmem:[#allocation3 + $0x2d4c] ss:$16 sps:$4 sm:$0xff]   ;;  %v17509_v50 = vld [vmem:[#allocation3 + $0x2d40] ss:$16 sps:$4 sm:$0xff]  }
 0x5a6   :  { %11777 = vmatpush1.bf16.msra.mxu0 %v17417_v51  ;;  %12925 = vmatpush1.bf16.msra.mxu1 %v17420_v52  ;;  %v17512_v51 = vld [vmem:[#allocation3 + $0x2d48] ss:$16 sps:$4 sm:$0xff]   ;;  %v17517_v52 = vld [vmem:[#allocation3 + $0x2d64] ss:$16 sps:$4 sm:$0xff]  }
 0x5a7   :  { %11778 = vmatprep.subr.bf16.mxu0 %v17425_v53  ;;  %12926 = vmatprep.subr.bf16.mxu1 %v17428_v54  ;;  %v17520_v53 = vld [vmem:[#allocation3 + $0x2d6c] ss:$16 sps:$4 sm:$0xff]   ;;  %v17515_v54 = vld [vmem:[#allocation3 + $0x2d60] ss:$16 sps:$4 sm:$0xff]  }
 0x5aa   :  { %11779 = vmatpush1.bf16.msra.mxu0 %v17423_v47  ;;  %12927 = vmatpush1.bf16.msra.mxu1 %v17426_v55  ;;  %v17518_v47 = vld [vmem:[#allocation3 + $0x2d68] ss:$16 sps:$4 sm:$0xff]   ;;  %v17523_v55 = vld [vmem:[#allocation3 + $0x2d84] ss:$16 sps:$4 sm:$0xff]  }
 0x5ab   :  { %11780 = vmatprep.subr.bf16.mxu0 %v17431_v57  ;;  %12928 = vmatprep.subr.bf16.mxu1 %v17434_v41  ;;  %v17526_v57 = vld [vmem:[#allocation3 + $0x2d8c] ss:$16 sps:$4 sm:$0xff]   ;;  %v17521_v41 = vld [vmem:[#allocation3 + $0x2d80] ss:$16 sps:$4 sm:$0xff]  }
 0x5ae   :  { %11781 = vmatpush1.bf16.msra.mxu0 %v17429_v58  ;;  %12929 = vmatpush1.bf16.msra.mxu1 %v17432_v60  ;;  %v17524_v58 = vld [vmem:[#allocation3 + $0x2d88] ss:$16 sps:$4 sm:$0xff]   ;;  %v17529_v60 = vld [vmem:[#allocation3 + $0x2da4] ss:$16 sps:$4 sm:$0xff]  }
 0x5af   :  { %11782 = vmatprep.subr.bf16.mxu0 %v17437_v44  ;;  %12930 = vmatprep.subr.bf16.mxu1 %v17440_v61  ;;  %v17532_v44 = vld [vmem:[#allocation3 + $0x2dac] ss:$16 sps:$4 sm:$0xff]   ;;  %v17527_v61 = vld [vmem:[#allocation3 + $0x2da0] ss:$16 sps:$4 sm:$0xff]  }
 0x5b2   :  { %11783 = vmatpush1.bf16.msra.mxu0 %v17435_v63  ;;  %12931 = vmatpush1.bf16.msra.mxu1 %v17438_v56  ;;  %v17530_v63 = vld [vmem:[#allocation3 + $0x2da8] ss:$16 sps:$4 sm:$0xff]   ;;  %v17535_v56 = vld [vmem:[#allocation3 + $0x2dc4] ss:$16 sps:$4 sm:$0xff]  }
 0x5b3   :  { %11784 = vmatprep.subr.bf16.mxu0 %v17443_v0  ;;  %12932 = vmatprep.subr.bf16.mxu1 %v17446_v2  ;;  %v17538_v0 = vld [vmem:[#allocation3 + $0x2dcc] ss:$16 sps:$4 sm:$0xff]   ;;  %v17533_v2 = vld [vmem:[#allocation3 + $0x2dc0] ss:$16 sps:$4 sm:$0xff]  }
 0x5b6   :  { %11785 = vmatpush1.bf16.msra.mxu0 %v17441_v59  ;;  %12933 = vmatpush1.bf16.msra.mxu1 %v17444_v3  ;;  %v17536_v59 = vld [vmem:[#allocation3 + $0x2dc8] ss:$16 sps:$4 sm:$0xff]   ;;  %v17541_v3 = vld [vmem:[#allocation3 + $0x2de4] ss:$16 sps:$4 sm:$0xff]  }
 0x5b7   :  { %11795 = vmatprep.subr.bf16.mxu0 %v17451_v5  ;;  %12943 = vmatprep.subr.bf16.mxu1 %v17454_v62  ;;  %v17544_v5 = vld [vmem:[#allocation3 + $0x2dec] ss:$16 sps:$4 sm:$0xff]   ;;  %v17539_v62 = vld [vmem:[#allocation3 + $0x2de0] ss:$16 sps:$4 sm:$0xff]  }
 0x5b9   :  { %11787 = vmatmul.mubr.bf16.vlgmr.msra.gmra.mrb[0].mxu0 %v13287_v6  ;;  %12935 = vmatmul.mubr.bf16.vlgmr.msra.gmra.mrb[0].mxu1 %v13287_v6  ;;  %v17542_v6 = vld [vmem:[#allocation3 + $0x2de8] ss:$16 sps:$4 sm:$0xff]  }
 0x5ba   :  { %11796 = vmatpush1.bf16.msra.mxu0 %v17449_v8  ;;  %12944 = vmatpush1.bf16.msra.mxu1 %v17452_v1  ;;  %v17549_v8 = vld [vmem:[#allocation3 + $0x2e04] ss:$16 sps:$4 sm:$0xff]   ;;  %v17552_v1 = vld [vmem:[#allocation3 + $0x2e0c] ss:$16 sps:$4 sm:$0xff]  }
 0x5bb   :  { %11797 = vmatprep.subr.bf16.mxu0 %v17457_v9  ;;  %12945 = vmatprep.subr.bf16.mxu1 %v17460_v10  ;;  %v13289_v9 = vcombine.low %v18345_v7, %v18345_v7  ;;  %v18354_v10 = vld [vmem:[%s18399_s0 + $0xb8] sm:$0xff]  ;;  %v17553_v7 = vld [vmem:[#allocation3 + $0x2e20] ss:$16 sps:$4 sm:$0xff]  }
 0x5bc   :  { %11827 = vmatprep.mubr.bf16.mxu0 %v13290_v11  ;;  %12975 = vmatprep.mubr.bf16.mxu1 %v13290_v11  ;;  %v17547_v11 = vld [vmem:[#allocation3 + $0x2e00] ss:$16 sps:$4 sm:$0xff]  }
 0x5be   :  { %11798 = vmatpush1.bf16.msra.mxu0 %v17455_v4  ;;  %12946 = vmatpush1.bf16.msra.mxu1 %v17458_v13  ;;  %v17550_v4 = vld [vmem:[#allocation3 + $0x2e08] ss:$16 sps:$4 sm:$0xff]   ;;  %v17555_v13 = vld [vmem:[#allocation3 + $0x2e24] ss:$16 sps:$4 sm:$0xff]  }
 0x5bf   :  { %11799 = vmatprep.subr.bf16.mxu0 %v17463_v14  ;;  %12947 = vmatprep.subr.bf16.mxu1 %v17466_v16  ;;  %v17558_v14 = vld [vmem:[#allocation3 + $0x2e2c] ss:$16 sps:$4 sm:$0xff]   ;;  %v13292_v16 = vcombine.high %v18354_v10, %v18354_v10 }
 0x5c2   :  { %11800 = vmatpush1.bf16.msra.mxu0 %v17461_v17  ;;  %12948 = vmatpush1.bf16.msra.mxu1 %v17464_v19  ;;  %v17556_v17 = vld [vmem:[#allocation3 + $0x2e28] ss:$16 sps:$4 sm:$0xff]   ;;  %v17561_v19 = vld [vmem:[#allocation3 + $0x2e44] ss:$16 sps:$4 sm:$0xff]  }
 0x5c3   :  { %11801 = vmatprep.subr.bf16.mxu0 %v17469_v12  ;;  %12949 = vmatprep.subr.bf16.mxu1 %v17472_v21  ;;  %v17564_v12 = vld [vmem:[#allocation3 + $0x2e4c] ss:$16 sps:$4 sm:$0xff]   ;;  %v17559_v21 = vld [vmem:[#allocation3 + $0x2e40] ss:$16 sps:$4 sm:$0xff]  }
 0x5c6   :  { %11802 = vmatpush1.bf16.msra.mxu0 %v17467_v15  ;;  %12950 = vmatpush1.bf16.msra.mxu1 %v17470_v23  ;;  %v17562_v15 = vld [vmem:[#allocation3 + $0x2e48] ss:$16 sps:$4 sm:$0xff]   ;;  %v17567_v23 = vld [vmem:[#allocation3 + $0x2e64] ss:$16 sps:$4 sm:$0xff]  }
 0x5c7   :  { %11803 = vmatprep.subr.bf16.mxu0 %v17475_v24  ;;  %12951 = vmatprep.subr.bf16.mxu1 %v17478_v25  ;;  %v17570_v24 = vld [vmem:[#allocation3 + $0x2e6c] ss:$16 sps:$4 sm:$0xff]   ;;  %v17565_v25 = vld [vmem:[#allocation3 + $0x2e60] ss:$16 sps:$4 sm:$0xff]  }
 0x5ca   :  { %11804 = vmatpush1.bf16.msra.mxu0 %v17473_v18  ;;  %12952 = vmatpush1.bf16.msra.mxu1 %v17476_v27  ;;  %v17568_v18 = vld [vmem:[#allocation3 + $0x2e68] ss:$16 sps:$4 sm:$0xff]   ;;  %v17573_v27 = vld [vmem:[#allocation3 + $0x2e84] ss:$16 sps:$4 sm:$0xff]  }
 0x5cb   :  { %11805 = vmatprep.subr.bf16.mxu0 %v17481_v28  ;;  %12953 = vmatprep.subr.bf16.mxu1 %v17484_v20  ;;  %v17576_v28 = vld [vmem:[#allocation3 + $0x2e8c] ss:$16 sps:$4 sm:$0xff]   ;;  %v17571_v20 = vld [vmem:[#allocation3 + $0x2e80] ss:$16 sps:$4 sm:$0xff]  }
 0x5ce   :  { %11806 = vmatpush1.bf16.msra.mxu0 %v17479_v30  ;;  %12954 = vmatpush1.bf16.msra.mxu1 %v17482_v31  ;;  %v17574_v30 = vld [vmem:[#allocation3 + $0x2e88] ss:$16 sps:$4 sm:$0xff]   ;;  %v17579_v31 = vld [vmem:[#allocation3 + $0x2ea4] ss:$16 sps:$4 sm:$0xff]  }
 0x5cf   :  { %11807 = vmatprep.subr.bf16.mxu0 %v17487_v22  ;;  %12955 = vmatprep.subr.bf16.mxu1 %v17490_v33  ;;  %v17582_v22 = vld [vmem:[#allocation3 + $0x2eac] ss:$16 sps:$4 sm:$0xff]   ;;  %v17577_v33 = vld [vmem:[#allocation3 + $0x2ea0] ss:$16 sps:$4 sm:$0xff]  }
 0x5d2   :  { %11808 = vmatpush1.bf16.msra.mxu0 %v17485_v34  ;;  %12956 = vmatpush1.bf16.msra.mxu1 %v17488_v26  ;;  %v17580_v34 = vld [vmem:[#allocation3 + $0x2ea8] ss:$16 sps:$4 sm:$0xff]   ;;  %v17585_v26 = vld [vmem:[#allocation3 + $0x2ec4] ss:$16 sps:$4 sm:$0xff]  }
 0x5d3   :  { %11809 = vmatprep.subr.bf16.mxu0 %v17493_v36  ;;  %12957 = vmatprep.subr.bf16.mxu1 %v17496_v37  ;;  %v17588_v36 = vld [vmem:[#allocation3 + $0x2ecc] ss:$16 sps:$4 sm:$0xff]   ;;  %v17583_v37 = vld [vmem:[#allocation3 + $0x2ec0] ss:$16 sps:$4 sm:$0xff]  }
 0x5d6   :  { %11810 = vmatpush1.bf16.msra.mxu0 %v17491_v29  ;;  %12958 = vmatpush1.bf16.msra.mxu1 %v17494_v39  ;;  %v17586_v29 = vld [vmem:[#allocation3 + $0x2ec8] ss:$16 sps:$4 sm:$0xff]   ;;  %v17591_v39 = vld [vmem:[#allocation3 + $0x2ee4] ss:$16 sps:$4 sm:$0xff]  }
 0x5d7   :  { %11811 = vmatprep.subr.bf16.mxu0 %v17499_v40  ;;  %12959 = vmatprep.subr.bf16.mxu1 %v17502_v32  ;;  %v17594_v40 = vld [vmem:[#allocation3 + $0x2eec] ss:$16 sps:$4 sm:$0xff]   ;;  %v17589_v32 = vld [vmem:[#allocation3 + $0x2ee0] ss:$16 sps:$4 sm:$0xff]  }
 0x5da   :  { %11812 = vmatpush1.bf16.msra.mxu0 %v17497_v42  ;;  %12960 = vmatpush1.bf16.msra.mxu1 %v17500_v43  ;;  %v17592_v42 = vld [vmem:[#allocation3 + $0x2ee8] ss:$16 sps:$4 sm:$0xff]   ;;  %v17597_v43 = vld [vmem:[#allocation3 + $0x2f04] ss:$16 sps:$4 sm:$0xff]  }
 0x5db   :  { %11813 = vmatprep.subr.bf16.mxu0 %v17505_v35  ;;  %12961 = vmatprep.subr.bf16.mxu1 %v17508_v45  ;;  %v17600_v35 = vld [vmem:[#allocation3 + $0x2f0c] ss:$16 sps:$4 sm:$0xff]   ;;  %v17595_v45 = vld [vmem:[#allocation3 + $0x2f00] ss:$16 sps:$4 sm:$0xff]  }
 0x5de   :  { %11814 = vmatpush1.bf16.msra.mxu0 %v17503_v46  ;;  %12962 = vmatpush1.bf16.msra.mxu1 %v17506_v38  ;;  %v17598_v46 = vld [vmem:[#allocation3 + $0x2f08] ss:$16 sps:$4 sm:$0xff]   ;;  %v17603_v38 = vld [vmem:[#allocation3 + $0x2f24] ss:$16 sps:$4 sm:$0xff]  }
 0x5df   :  { %11815 = vmatprep.subr.bf16.mxu0 %v17511_v48  ;;  %12963 = vmatprep.subr.bf16.mxu1 %v17514_v49  ;;  %v17606_v48 = vld [vmem:[#allocation3 + $0x2f2c] ss:$16 sps:$4 sm:$0xff]   ;;  %v17601_v49 = vld [vmem:[#allocation3 + $0x2f20] ss:$16 sps:$4 sm:$0xff]  }
 0x5e2   :  { %11816 = vmatpush1.bf16.msra.mxu0 %v17509_v50  ;;  %12964 = vmatpush1.bf16.msra.mxu1 %v17512_v51  ;;  %v17604_v50 = vld [vmem:[#allocation3 + $0x2f28] ss:$16 sps:$4 sm:$0xff]   ;;  %v17609_v51 = vld [vmem:[#allocation3 + $0x2f44] ss:$16 sps:$4 sm:$0xff]  }
 0x5e3   :  { %11817 = vmatprep.subr.bf16.mxu0 %v17517_v52  ;;  %12965 = vmatprep.subr.bf16.mxu1 %v17520_v53  ;;  %v17612_v52 = vld [vmem:[#allocation3 + $0x2f4c] ss:$16 sps:$4 sm:$0xff]   ;;  %v17607_v53 = vld [vmem:[#allocation3 + $0x2f40] ss:$16 sps:$4 sm:$0xff]  }
 0x5e6   :  { %11818 = vmatpush1.bf16.msra.mxu0 %v17515_v54  ;;  %12966 = vmatpush1.bf16.msra.mxu1 %v17518_v47  ;;  %v17610_v54 = vld [vmem:[#allocation3 + $0x2f48] ss:$16 sps:$4 sm:$0xff]   ;;  %v17615_v47 = vld [vmem:[#allocation3 + $0x2f64] ss:$16 sps:$4 sm:$0xff]  }
 0x5e7   :  { %11819 = vmatprep.subr.bf16.mxu0 %v17523_v55  ;;  %12967 = vmatprep.subr.bf16.mxu1 %v17526_v57  ;;  %v17618_v55 = vld [vmem:[#allocation3 + $0x2f6c] ss:$16 sps:$4 sm:$0xff]   ;;  %v17613_v57 = vld [vmem:[#allocation3 + $0x2f60] ss:$16 sps:$4 sm:$0xff]  }
 0x5ea   :  { %11820 = vmatpush1.bf16.msra.mxu0 %v17521_v41  ;;  %12968 = vmatpush1.bf16.msra.mxu1 %v17524_v58  ;;  %v17616_v41 = vld [vmem:[#allocation3 + $0x2f68] ss:$16 sps:$4 sm:$0xff]   ;;  %v17621_v58 = vld [vmem:[#allocation3 + $0x2f84] ss:$16 sps:$4 sm:$0xff]  }
 0x5eb   :  { %11821 = vmatprep.subr.bf16.mxu0 %v17529_v60  ;;  %12969 = vmatprep.subr.bf16.mxu1 %v17532_v44  ;;  %v17624_v60 = vld [vmem:[#allocation3 + $0x2f8c] ss:$16 sps:$4 sm:$0xff]   ;;  %v17619_v44 = vld [vmem:[#allocation3 + $0x2f80] ss:$16 sps:$4 sm:$0xff]  }
 0x5ee   :  { %11822 = vmatpush1.bf16.msra.mxu0 %v17527_v61  ;;  %12970 = vmatpush1.bf16.msra.mxu1 %v17530_v63  ;;  %v17622_v61 = vld [vmem:[#allocation3 + $0x2f88] ss:$16 sps:$4 sm:$0xff]   ;;  %v17627_v63 = vld [vmem:[#allocation3 + $0x2fa4] ss:$16 sps:$4 sm:$0xff]  }
 0x5ef   :  { %11823 = vmatprep.subr.bf16.mxu0 %v17535_v56  ;;  %12971 = vmatprep.subr.bf16.mxu1 %v17538_v0  ;;  %v17630_v56 = vld [vmem:[#allocation3 + $0x2fac] ss:$16 sps:$4 sm:$0xff]   ;;  %v17625_v0 = vld [vmem:[#allocation3 + $0x2fa0] ss:$16 sps:$4 sm:$0xff]  }
 0x5f2   :  { %11824 = vmatpush1.bf16.msra.mxu0 %v17533_v2  ;;  %12972 = vmatpush1.bf16.msra.mxu1 %v17536_v59  ;;  %v17628_v2 = vld [vmem:[#allocation3 + $0x2fa8] ss:$16 sps:$4 sm:$0xff]   ;;  %v17633_v59 = vld [vmem:[#allocation3 + $0x2fc4] ss:$16 sps:$4 sm:$0xff]  }
 0x5f3   :  { %11825 = vmatprep.subr.bf16.mxu0 %v17541_v3  ;;  %12973 = vmatprep.subr.bf16.mxu1 %v17544_v5  ;;  %v17636_v3 = vld [vmem:[#allocation3 + $0x2fcc] ss:$16 sps:$4 sm:$0xff]   ;;  %v17631_v5 = vld [vmem:[#allocation3 + $0x2fc0] ss:$16 sps:$4 sm:$0xff]  }
 0x5f6   :  { %11826 = vmatpush1.bf16.msra.mxu0 %v17539_v62  ;;  %12974 = vmatpush1.bf16.msra.mxu1 %v17542_v6  ;;  %v17634_v62 = vld [vmem:[#allocation3 + $0x2fc8] ss:$16 sps:$4 sm:$0xff]   ;;  %v17639_v6 = vld [vmem:[#allocation3 + $0x2fe4] ss:$16 sps:$4 sm:$0xff]  }
 0x5f7   :  { %11836 = vmatprep.subr.bf16.mxu0 %v17549_v8  ;;  %12984 = vmatprep.subr.bf16.mxu1 %v17552_v1  ;;  %v17642_v8 = vld [vmem:[#allocation3 + $0x2fec] ss:$16 sps:$4 sm:$0xff]   ;;  %v17637_v1 = vld [vmem:[#allocation3 + $0x2fe0] ss:$16 sps:$4 sm:$0xff]  }
 0x5f9   :  { %11828 = vmatmul.mubr.bf16.vlgmr.msra.gmra.mrb[0].mxu0 %v13289_v9  ;;  %12976 = vmatmul.mubr.bf16.vlgmr.msra.gmra.mrb[0].mxu1 %v13289_v9  ;;  %v17640_v9 = vld [vmem:[#allocation3 + $0x2fe8] ss:$16 sps:$4 sm:$0xff]  }
 0x5fa   :  { %11837 = vmatpush1.bf16.msra.mxu0 %v17547_v11  ;;  %12985 = vmatpush1.bf16.msra.mxu1 %v17550_v4  ;;  %v17647_v11 = vld [vmem:[#allocation3 + $0x3004] ss:$16 sps:$4 sm:$0xff]   ;;  %v17650_v4 = vld [vmem:[#allocation3 + $0x300c] ss:$16 sps:$4 sm:$0xff]  }
 0x5fb   :  { %11838 = vmatprep.subr.bf16.mxu0 %v17555_v13  ;;  %12986 = vmatprep.subr.bf16.mxu1 %v17558_v14  ;;  %v13291_v13 = vcombine.low %v18354_v10, %v18354_v10  ;;  %v18363_v14 = vld [vmem:[%s18399_s0 + $0xc0] sm:$0xff] }
 0x5fc   :  { %11868 = vmatprep.mubr.bf16.mxu0 %v13292_v16  ;;  %13016 = vmatprep.mubr.bf16.mxu1 %v13292_v16  ;;  %v17645_v16 = vld [vmem:[#allocation3 + $0x3000] ss:$16 sps:$4 sm:$0xff]  }
 0x5fd   :  { %v17651_v10 = vld [vmem:[#allocation3 + $0x3020] ss:$16 sps:$4 sm:$0xff]  }
 0x5fe   :  { %11839 = vmatpush1.bf16.msra.mxu0 %v17553_v7  ;;  %12987 = vmatpush1.bf16.msra.mxu1 %v17556_v17  ;;  %v17648_v7 = vld [vmem:[#allocation3 + $0x3008] ss:$16 sps:$4 sm:$0xff]   ;;  %v17653_v17 = vld [vmem:[#allocation3 + $0x3024] ss:$16 sps:$4 sm:$0xff]  }
 0x5ff   :  { %11840 = vmatprep.subr.bf16.mxu0 %v17561_v19  ;;  %12988 = vmatprep.subr.bf16.mxu1 %v17564_v12  ;;  %v17656_v19 = vld [vmem:[#allocation3 + $0x302c] ss:$16 sps:$4 sm:$0xff]   ;;  %v13294_v12 = vcombine.high %v18363_v14, %v18363_v14 }
 0x602   :  { %11841 = vmatpush1.bf16.msra.mxu0 %v17559_v21  ;;  %12989 = vmatpush1.bf16.msra.mxu1 %v17562_v15  ;;  %v17654_v21 = vld [vmem:[#allocation3 + $0x3028] ss:$16 sps:$4 sm:$0xff]   ;;  %v17659_v15 = vld [vmem:[#allocation3 + $0x3044] ss:$16 sps:$4 sm:$0xff]  }
 0x603   :  { %11842 = vmatprep.subr.bf16.mxu0 %v17567_v23  ;;  %12990 = vmatprep.subr.bf16.mxu1 %v17570_v24  ;;  %v17662_v23 = vld [vmem:[#allocation3 + $0x304c] ss:$16 sps:$4 sm:$0xff]   ;;  %v17657_v24 = vld [vmem:[#allocation3 + $0x3040] ss:$16 sps:$4 sm:$0xff]  }
 0x606   :  { %11843 = vmatpush1.bf16.msra.mxu0 %v17565_v25  ;;  %12991 = vmatpush1.bf16.msra.mxu1 %v17568_v18  ;;  %v17660_v25 = vld [vmem:[#allocation3 + $0x3048] ss:$16 sps:$4 sm:$0xff]   ;;  %v17665_v18 = vld [vmem:[#allocation3 + $0x3064] ss:$16 sps:$4 sm:$0xff]  }
 0x607   :  { %11844 = vmatprep.subr.bf16.mxu0 %v17573_v27  ;;  %12992 = vmatprep.subr.bf16.mxu1 %v17576_v28  ;;  %v17668_v27 = vld [vmem:[#allocation3 + $0x306c] ss:$16 sps:$4 sm:$0xff]   ;;  %v17663_v28 = vld [vmem:[#allocation3 + $0x3060] ss:$16 sps:$4 sm:$0xff]  }
 0x60a   :  { %11845 = vmatpush1.bf16.msra.mxu0 %v17571_v20  ;;  %12993 = vmatpush1.bf16.msra.mxu1 %v17574_v30  ;;  %v17666_v20 = vld [vmem:[#allocation3 + $0x3068] ss:$16 sps:$4 sm:$0xff]   ;;  %v17671_v30 = vld [vmem:[#allocation3 + $0x3084] ss:$16 sps:$4 sm:$0xff]  }
 0x60b   :  { %11846 = vmatprep.subr.bf16.mxu0 %v17579_v31  ;;  %12994 = vmatprep.subr.bf16.mxu1 %v17582_v22  ;;  %v17674_v31 = vld [vmem:[#allocation3 + $0x308c] ss:$16 sps:$4 sm:$0xff]   ;;  %v17669_v22 = vld [vmem:[#allocation3 + $0x3080] ss:$16 sps:$4 sm:$0xff]  }
 0x60e   :  { %11847 = vmatpush1.bf16.msra.mxu0 %v17577_v33  ;;  %12995 = vmatpush1.bf16.msra.mxu1 %v17580_v34  ;;  %v17672_v33 = vld [vmem:[#allocation3 + $0x3088] ss:$16 sps:$4 sm:$0xff]   ;;  %v17677_v34 = vld [vmem:[#allocation3 + $0x30a4] ss:$16 sps:$4 sm:$0xff]  }
 0x60f   :  { %11848 = vmatprep.subr.bf16.mxu0 %v17585_v26  ;;  %12996 = vmatprep.subr.bf16.mxu1 %v17588_v36  ;;  %v17680_v26 = vld [vmem:[#allocation3 + $0x30ac] ss:$16 sps:$4 sm:$0xff]   ;;  %v17675_v36 = vld [vmem:[#allocation3 + $0x30a0] ss:$16 sps:$4 sm:$0xff]  }
 0x612   :  { %11849 = vmatpush1.bf16.msra.mxu0 %v17583_v37  ;;  %12997 = vmatpush1.bf16.msra.mxu1 %v17586_v29  ;;  %v17678_v37 = vld [vmem:[#allocation3 + $0x30a8] ss:$16 sps:$4 sm:$0xff]   ;;  %v17683_v29 = vld [vmem:[#allocation3 + $0x30c4] ss:$16 sps:$4 sm:$0xff]  }
 0x613   :  { %11850 = vmatprep.subr.bf16.mxu0 %v17591_v39  ;;  %12998 = vmatprep.subr.bf16.mxu1 %v17594_v40  ;;  %v17686_v39 = vld [vmem:[#allocation3 + $0x30cc] ss:$16 sps:$4 sm:$0xff]   ;;  %v17681_v40 = vld [vmem:[#allocation3 + $0x30c0] ss:$16 sps:$4 sm:$0xff]  }
 0x616   :  { %11851 = vmatpush1.bf16.msra.mxu0 %v17589_v32  ;;  %12999 = vmatpush1.bf16.msra.mxu1 %v17592_v42  ;;  %v17684_v32 = vld [vmem:[#allocation3 + $0x30c8] ss:$16 sps:$4 sm:$0xff]   ;;  %v17689_v42 = vld [vmem:[#allocation3 + $0x30e4] ss:$16 sps:$4 sm:$0xff]  }
 0x617   :  { %11852 = vmatprep.subr.bf16.mxu0 %v17597_v43  ;;  %13000 = vmatprep.subr.bf16.mxu1 %v17600_v35  ;;  %v17692_v43 = vld [vmem:[#allocation3 + $0x30ec] ss:$16 sps:$4 sm:$0xff]   ;;  %v17687_v35 = vld [vmem:[#allocation3 + $0x30e0] ss:$16 sps:$4 sm:$0xff]  }
 0x61a   :  { %11853 = vmatpush1.bf16.msra.mxu0 %v17595_v45  ;;  %13001 = vmatpush1.bf16.msra.mxu1 %v17598_v46  ;;  %v17690_v45 = vld [vmem:[#allocation3 + $0x30e8] ss:$16 sps:$4 sm:$0xff]   ;;  %v17695_v46 = vld [vmem:[#allocation3 + $0x3104] ss:$16 sps:$4 sm:$0xff]  }
 0x61b   :  { %11854 = vmatprep.subr.bf16.mxu0 %v17603_v38  ;;  %13002 = vmatprep.subr.bf16.mxu1 %v17606_v48  ;;  %v17698_v38 = vld [vmem:[#allocation3 + $0x310c] ss:$16 sps:$4 sm:$0xff]   ;;  %v17693_v48 = vld [vmem:[#allocation3 + $0x3100] ss:$16 sps:$4 sm:$0xff]  }
 0x61e   :  { %11855 = vmatpush1.bf16.msra.mxu0 %v17601_v49  ;;  %13003 = vmatpush1.bf16.msra.mxu1 %v17604_v50  ;;  %v17696_v49 = vld [vmem:[#allocation3 + $0x3108] ss:$16 sps:$4 sm:$0xff]   ;;  %v17701_v50 = vld [vmem:[#allocation3 + $0x3124] ss:$16 sps:$4 sm:$0xff]  }
 0x61f   :  { %11856 = vmatprep.subr.bf16.mxu0 %v17609_v51  ;;  %13004 = vmatprep.subr.bf16.mxu1 %v17612_v52  ;;  %v17704_v51 = vld [vmem:[#allocation3 + $0x312c] ss:$16 sps:$4 sm:$0xff]   ;;  %v17699_v52 = vld [vmem:[#allocation3 + $0x3120] ss:$16 sps:$4 sm:$0xff]  }
 0x622   :  { %11857 = vmatpush1.bf16.msra.mxu0 %v17607_v53  ;;  %13005 = vmatpush1.bf16.msra.mxu1 %v17610_v54  ;;  %v17702_v53 = vld [vmem:[#allocation3 + $0x3128] ss:$16 sps:$4 sm:$0xff]   ;;  %v17707_v54 = vld [vmem:[#allocation3 + $0x3144] ss:$16 sps:$4 sm:$0xff]  }
 0x623   :  { %11858 = vmatprep.subr.bf16.mxu0 %v17615_v47  ;;  %13006 = vmatprep.subr.bf16.mxu1 %v17618_v55  ;;  %v17710_v47 = vld [vmem:[#allocation3 + $0x314c] ss:$16 sps:$4 sm:$0xff]   ;;  %v17705_v55 = vld [vmem:[#allocation3 + $0x3140] ss:$16 sps:$4 sm:$0xff]  }
 0x626   :  { %11859 = vmatpush1.bf16.msra.mxu0 %v17613_v57  ;;  %13007 = vmatpush1.bf16.msra.mxu1 %v17616_v41  ;;  %v17708_v57 = vld [vmem:[#allocation3 + $0x3148] ss:$16 sps:$4 sm:$0xff]   ;;  %v17713_v41 = vld [vmem:[#allocation3 + $0x3164] ss:$16 sps:$4 sm:$0xff]  }
 0x627   :  { %11860 = vmatprep.subr.bf16.mxu0 %v17621_v58  ;;  %13008 = vmatprep.subr.bf16.mxu1 %v17624_v60  ;;  %v17716_v58 = vld [vmem:[#allocation3 + $0x316c] ss:$16 sps:$4 sm:$0xff]   ;;  %v17711_v60 = vld [vmem:[#allocation3 + $0x3160] ss:$16 sps:$4 sm:$0xff]  }
 0x62a   :  { %11861 = vmatpush1.bf16.msra.mxu0 %v17619_v44  ;;  %13009 = vmatpush1.bf16.msra.mxu1 %v17622_v61  ;;  %v17714_v44 = vld [vmem:[#allocation3 + $0x3168] ss:$16 sps:$4 sm:$0xff]   ;;  %v17719_v61 = vld [vmem:[#allocation3 + $0x3184] ss:$16 sps:$4 sm:$0xff]  }
 0x62b   :  { %11862 = vmatprep.subr.bf16.mxu0 %v17627_v63  ;;  %13010 = vmatprep.subr.bf16.mxu1 %v17630_v56  ;;  %v17722_v63 = vld [vmem:[#allocation3 + $0x318c] ss:$16 sps:$4 sm:$0xff]   ;;  %v17717_v56 = vld [vmem:[#allocation3 + $0x3180] ss:$16 sps:$4 sm:$0xff]  }
 0x62e   :  { %11863 = vmatpush1.bf16.msra.mxu0 %v17625_v0  ;;  %13011 = vmatpush1.bf16.msra.mxu1 %v17628_v2  ;;  %v17720_v0 = vld [vmem:[#allocation3 + $0x3188] ss:$16 sps:$4 sm:$0xff]   ;;  %v17725_v2 = vld [vmem:[#allocation3 + $0x31a4] ss:$16 sps:$4 sm:$0xff]  }
 0x62f   :  { %11864 = vmatprep.subr.bf16.mxu0 %v17633_v59  ;;  %13012 = vmatprep.subr.bf16.mxu1 %v17636_v3  ;;  %v17728_v59 = vld [vmem:[#allocation3 + $0x31ac] ss:$16 sps:$4 sm:$0xff]   ;;  %v17723_v3 = vld [vmem:[#allocation3 + $0x31a0] ss:$16 sps:$4 sm:$0xff]  }
 0x632   :  { %11865 = vmatpush1.bf16.msra.mxu0 %v17631_v5  ;;  %13013 = vmatpush1.bf16.msra.mxu1 %v17634_v62  ;;  %v17726_v5 = vld [vmem:[#allocation3 + $0x31a8] ss:$16 sps:$4 sm:$0xff]   ;;  %v17731_v62 = vld [vmem:[#allocation3 + $0x31c4] ss:$16 sps:$4 sm:$0xff]  }
 0x633   :  { %11866 = vmatprep.subr.bf16.mxu0 %v17639_v6  ;;  %13014 = vmatprep.subr.bf16.mxu1 %v17642_v8  ;;  %v17734_v6 = vld [vmem:[#allocation3 + $0x31cc] ss:$16 sps:$4 sm:$0xff]   ;;  %v17729_v8 = vld [vmem:[#allocation3 + $0x31c0] ss:$16 sps:$4 sm:$0xff]  }
 0x636   :  { %11867 = vmatpush1.bf16.msra.mxu0 %v17637_v1  ;;  %13015 = vmatpush1.bf16.msra.mxu1 %v17640_v9  ;;  %v17732_v1 = vld [vmem:[#allocation3 + $0x31c8] ss:$16 sps:$4 sm:$0xff]   ;;  %v17737_v9 = vld [vmem:[#allocation3 + $0x31e4] ss:$16 sps:$4 sm:$0xff]  }
 0x637   :  { %11877 = vmatprep.subr.bf16.mxu0 %v17647_v11  ;;  %13025 = vmatprep.subr.bf16.mxu1 %v17650_v4  ;;  %v17740_v11 = vld [vmem:[#allocation3 + $0x31ec] ss:$16 sps:$4 sm:$0xff]   ;;  %v17735_v4 = vld [vmem:[#allocation3 + $0x31e0] ss:$16 sps:$4 sm:$0xff]  }
 0x639   :  { %11869 = vmatmul.mubr.bf16.vlgmr.msra.gmra.mrb[0].mxu0 %v13291_v13  ;;  %13017 = vmatmul.mubr.bf16.vlgmr.msra.gmra.mrb[0].mxu1 %v13291_v13  ;;  %v17738_v13 = vld [vmem:[#allocation3 + $0x31e8] ss:$16 sps:$4 sm:$0xff]  }
 0x63a   :  { %11878 = vmatpush1.bf16.msra.mxu0 %v17645_v16  ;;  %13026 = vmatpush1.bf16.msra.mxu1 %v17648_v7  ;;  %v17745_v16 = vld [vmem:[#allocation3 + $0x3204] ss:$16 sps:$4 sm:$0xff]   ;;  %v17748_v7 = vld [vmem:[#allocation3 + $0x320c] ss:$16 sps:$4 sm:$0xff]  }
 0x63b   :  { %11879 = vmatprep.subr.bf16.mxu0 %v17653_v17  ;;  %13027 = vmatprep.subr.bf16.mxu1 %v17656_v19  ;;  %v13293_v17 = vcombine.low %v18363_v14, %v18363_v14  ;;  %v18372_v19 = vld [vmem:[%s18399_s0 + $0xc8] sm:$0xff]  ;;  %v17749_v14 = vld [vmem:[#allocation3 + $0x3220] ss:$16 sps:$4 sm:$0xff]  }
 0x63c   :  { %11909 = vmatprep.mubr.bf16.mxu0 %v13294_v12  ;;  %13057 = vmatprep.mubr.bf16.mxu1 %v13294_v12  ;;  %v17743_v12 = vld [vmem:[#allocation3 + $0x3200] ss:$16 sps:$4 sm:$0xff]  }
 0x63e   :  { %11880 = vmatpush1.bf16.msra.mxu0 %v17651_v10  ;;  %13028 = vmatpush1.bf16.msra.mxu1 %v17654_v21  ;;  %v17746_v10 = vld [vmem:[#allocation3 + $0x3208] ss:$16 sps:$4 sm:$0xff]   ;;  %v17751_v21 = vld [vmem:[#allocation3 + $0x3224] ss:$16 sps:$4 sm:$0xff]  }
 0x63f   :  { %11881 = vmatprep.subr.bf16.mxu0 %v17659_v15  ;;  %13029 = vmatprep.subr.bf16.mxu1 %v17662_v23  ;;  %v17754_v15 = vld [vmem:[#allocation3 + $0x322c] ss:$16 sps:$4 sm:$0xff]   ;;  %v13296_v23 = vcombine.high %v18372_v19, %v18372_v19 }
 0x642   :  { %11882 = vmatpush1.bf16.msra.mxu0 %v17657_v24  ;;  %13030 = vmatpush1.bf16.msra.mxu1 %v17660_v25  ;;  %v17752_v24 = vld [vmem:[#allocation3 + $0x3228] ss:$16 sps:$4 sm:$0xff]   ;;  %v17757_v25 = vld [vmem:[#allocation3 + $0x3244] ss:$16 sps:$4 sm:$0xff]  }
 0x643   :  { %11883 = vmatprep.subr.bf16.mxu0 %v17665_v18  ;;  %13031 = vmatprep.subr.bf16.mxu1 %v17668_v27  ;;  %v17760_v18 = vld [vmem:[#allocation3 + $0x324c] ss:$16 sps:$4 sm:$0xff]   ;;  %v17755_v27 = vld [vmem:[#allocation3 + $0x3240] ss:$16 sps:$4 sm:$0xff]  }
 0x646   :  { %11884 = vmatpush1.bf16.msra.mxu0 %v17663_v28  ;;  %13032 = vmatpush1.bf16.msra.mxu1 %v17666_v20  ;;  %v17758_v28 = vld [vmem:[#allocation3 + $0x3248] ss:$16 sps:$4 sm:$0xff]   ;;  %v17763_v20 = vld [vmem:[#allocation3 + $0x3264] ss:$16 sps:$4 sm:$0xff]  }
 0x647   :  { %11885 = vmatprep.subr.bf16.mxu0 %v17671_v30  ;;  %13033 = vmatprep.subr.bf16.mxu1 %v17674_v31  ;;  %v17766_v30 = vld [vmem:[#allocation3 + $0x326c] ss:$16 sps:$4 sm:$0xff]   ;;  %v17761_v31 = vld [vmem:[#allocation3 + $0x3260] ss:$16 sps:$4 sm:$0xff]  }
 0x64a   :  { %11886 = vmatpush1.bf16.msra.mxu0 %v17669_v22  ;;  %13034 = vmatpush1.bf16.msra.mxu1 %v17672_v33  ;;  %v17764_v22 = vld [vmem:[#allocation3 + $0x3268] ss:$16 sps:$4 sm:$0xff]   ;;  %v17769_v33 = vld [vmem:[#allocation3 + $0x3284] ss:$16 sps:$4 sm:$0xff]  }
 0x64b   :  { %11887 = vmatprep.subr.bf16.mxu0 %v17677_v34  ;;  %13035 = vmatprep.subr.bf16.mxu1 %v17680_v26  ;;  %v17772_v34 = vld [vmem:[#allocation3 + $0x328c] ss:$16 sps:$4 sm:$0xff]   ;;  %v17767_v26 = vld [vmem:[#allocation3 + $0x3280] ss:$16 sps:$4 sm:$0xff]  }
 0x64e   :  { %11888 = vmatpush1.bf16.msra.mxu0 %v17675_v36  ;;  %13036 = vmatpush1.bf16.msra.mxu1 %v17678_v37  ;;  %v17770_v36 = vld [vmem:[#allocation3 + $0x3288] ss:$16 sps:$4 sm:$0xff]   ;;  %v17775_v37 = vld [vmem:[#allocation3 + $0x32a4] ss:$16 sps:$4 sm:$0xff]  }
 0x64f   :  { %11889 = vmatprep.subr.bf16.mxu0 %v17683_v29  ;;  %13037 = vmatprep.subr.bf16.mxu1 %v17686_v39  ;;  %v17778_v29 = vld [vmem:[#allocation3 + $0x32ac] ss:$16 sps:$4 sm:$0xff]   ;;  %v17773_v39 = vld [vmem:[#allocation3 + $0x32a0] ss:$16 sps:$4 sm:$0xff]  }
 0x652   :  { %11890 = vmatpush1.bf16.msra.mxu0 %v17681_v40  ;;  %13038 = vmatpush1.bf16.msra.mxu1 %v17684_v32  ;;  %v17776_v40 = vld [vmem:[#allocation3 + $0x32a8] ss:$16 sps:$4 sm:$0xff]   ;;  %v17781_v32 = vld [vmem:[#allocation3 + $0x32c4] ss:$16 sps:$4 sm:$0xff]  }
 0x653   :  { %11891 = vmatprep.subr.bf16.mxu0 %v17689_v42  ;;  %13039 = vmatprep.subr.bf16.mxu1 %v17692_v43  ;;  %v17784_v42 = vld [vmem:[#allocation3 + $0x32cc] ss:$16 sps:$4 sm:$0xff]   ;;  %v17779_v43 = vld [vmem:[#allocation3 + $0x32c0] ss:$16 sps:$4 sm:$0xff]  }
 0x656   :  { %11892 = vmatpush1.bf16.msra.mxu0 %v17687_v35  ;;  %13040 = vmatpush1.bf16.msra.mxu1 %v17690_v45  ;;  %v17782_v35 = vld [vmem:[#allocation3 + $0x32c8] ss:$16 sps:$4 sm:$0xff]   ;;  %v17787_v45 = vld [vmem:[#allocation3 + $0x32e4] ss:$16 sps:$4 sm:$0xff]  }
 0x657   :  { %11893 = vmatprep.subr.bf16.mxu0 %v17695_v46  ;;  %13041 = vmatprep.subr.bf16.mxu1 %v17698_v38  ;;  %v17790_v46 = vld [vmem:[#allocation3 + $0x32ec] ss:$16 sps:$4 sm:$0xff]   ;;  %v17785_v38 = vld [vmem:[#allocation3 + $0x32e0] ss:$16 sps:$4 sm:$0xff]  }
 0x65a   :  { %11894 = vmatpush1.bf16.msra.mxu0 %v17693_v48  ;;  %13042 = vmatpush1.bf16.msra.mxu1 %v17696_v49  ;;  %v17788_v48 = vld [vmem:[#allocation3 + $0x32e8] ss:$16 sps:$4 sm:$0xff]   ;;  %v17793_v49 = vld [vmem:[#allocation3 + $0x3304] ss:$16 sps:$4 sm:$0xff]  }
 0x65b   :  { %11895 = vmatprep.subr.bf16.mxu0 %v17701_v50  ;;  %13043 = vmatprep.subr.bf16.mxu1 %v17704_v51  ;;  %v17796_v50 = vld [vmem:[#allocation3 + $0x330c] ss:$16 sps:$4 sm:$0xff]   ;;  %v17791_v51 = vld [vmem:[#allocation3 + $0x3300] ss:$16 sps:$4 sm:$0xff]  }
 0x65e   :  { %11896 = vmatpush1.bf16.msra.mxu0 %v17699_v52  ;;  %13044 = vmatpush1.bf16.msra.mxu1 %v17702_v53  ;;  %v17794_v52 = vld [vmem:[#allocation3 + $0x3308] ss:$16 sps:$4 sm:$0xff]   ;;  %v17799_v53 = vld [vmem:[#allocation3 + $0x3324] ss:$16 sps:$4 sm:$0xff]  }
 0x65f   :  { %11897 = vmatprep.subr.bf16.mxu0 %v17707_v54  ;;  %13045 = vmatprep.subr.bf16.mxu1 %v17710_v47  ;;  %v17802_v54 = vld [vmem:[#allocation3 + $0x332c] ss:$16 sps:$4 sm:$0xff]   ;;  %v17797_v47 = vld [vmem:[#allocation3 + $0x3320] ss:$16 sps:$4 sm:$0xff]  }
 0x662   :  { %11898 = vmatpush1.bf16.msra.mxu0 %v17705_v55  ;;  %13046 = vmatpush1.bf16.msra.mxu1 %v17708_v57  ;;  %v17800_v55 = vld [vmem:[#allocation3 + $0x3328] ss:$16 sps:$4 sm:$0xff]   ;;  %v17805_v57 = vld [vmem:[#allocation3 + $0x3344] ss:$16 sps:$4 sm:$0xff]  }
 0x663   :  { %11899 = vmatprep.subr.bf16.mxu0 %v17713_v41  ;;  %13047 = vmatprep.subr.bf16.mxu1 %v17716_v58  ;;  %v17808_v41 = vld [vmem:[#allocation3 + $0x334c] ss:$16 sps:$4 sm:$0xff]   ;;  %v17803_v58 = vld [vmem:[#allocation3 + $0x3340] ss:$16 sps:$4 sm:$0xff]  }
 0x666   :  { %11900 = vmatpush1.bf16.msra.mxu0 %v17711_v60  ;;  %13048 = vmatpush1.bf16.msra.mxu1 %v17714_v44  ;;  %v17806_v60 = vld [vmem:[#allocation3 + $0x3348] ss:$16 sps:$4 sm:$0xff]   ;;  %v17811_v44 = vld [vmem:[#allocation3 + $0x3364] ss:$16 sps:$4 sm:$0xff]  }
 0x667   :  { %11901 = vmatprep.subr.bf16.mxu0 %v17719_v61  ;;  %13049 = vmatprep.subr.bf16.mxu1 %v17722_v63  ;;  %v17814_v61 = vld [vmem:[#allocation3 + $0x336c] ss:$16 sps:$4 sm:$0xff]   ;;  %v17809_v63 = vld [vmem:[#allocation3 + $0x3360] ss:$16 sps:$4 sm:$0xff]  }
 0x66a   :  { %11902 = vmatpush1.bf16.msra.mxu0 %v17717_v56  ;;  %13050 = vmatpush1.bf16.msra.mxu1 %v17720_v0  ;;  %v17812_v56 = vld [vmem:[#allocation3 + $0x3368] ss:$16 sps:$4 sm:$0xff]   ;;  %v17817_v0 = vld [vmem:[#allocation3 + $0x3384] ss:$16 sps:$4 sm:$0xff]  }
 0x66b   :  { %11903 = vmatprep.subr.bf16.mxu0 %v17725_v2  ;;  %13051 = vmatprep.subr.bf16.mxu1 %v17728_v59  ;;  %v17820_v2 = vld [vmem:[#allocation3 + $0x338c] ss:$16 sps:$4 sm:$0xff]   ;;  %v17815_v59 = vld [vmem:[#allocation3 + $0x3380] ss:$16 sps:$4 sm:$0xff]  }
 0x66e   :  { %11904 = vmatpush1.bf16.msra.mxu0 %v17723_v3  ;;  %13052 = vmatpush1.bf16.msra.mxu1 %v17726_v5  ;;  %v17818_v3 = vld [vmem:[#allocation3 + $0x3388] ss:$16 sps:$4 sm:$0xff]   ;;  %v17823_v5 = vld [vmem:[#allocation3 + $0x33a4] ss:$16 sps:$4 sm:$0xff]  }
 0x66f   :  { %11905 = vmatprep.subr.bf16.mxu0 %v17731_v62  ;;  %13053 = vmatprep.subr.bf16.mxu1 %v17734_v6  ;;  %v17826_v62 = vld [vmem:[#allocation3 + $0x33ac] ss:$16 sps:$4 sm:$0xff]   ;;  %v17821_v6 = vld [vmem:[#allocation3 + $0x33a0] ss:$16 sps:$4 sm:$0xff]  }
 0x672   :  { %11906 = vmatpush1.bf16.msra.mxu0 %v17729_v8  ;;  %13054 = vmatpush1.bf16.msra.mxu1 %v17732_v1  ;;  %v17824_v8 = vld [vmem:[#allocation3 + $0x33a8] ss:$16 sps:$4 sm:$0xff]   ;;  %v17829_v1 = vld [vmem:[#allocation3 + $0x33c4] ss:$16 sps:$4 sm:$0xff]  }
 0x673   :  { %11907 = vmatprep.subr.bf16.mxu0 %v17737_v9  ;;  %13055 = vmatprep.subr.bf16.mxu1 %v17740_v11  ;;  %v17832_v9 = vld [vmem:[#allocation3 + $0x33cc] ss:$16 sps:$4 sm:$0xff]   ;;  %v17827_v11 = vld [vmem:[#allocation3 + $0x33c0] ss:$16 sps:$4 sm:$0xff]  }
 0x676   :  { %11908 = vmatpush1.bf16.msra.mxu0 %v17735_v4  ;;  %13056 = vmatpush1.bf16.msra.mxu1 %v17738_v13  ;;  %v17830_v4 = vld [vmem:[#allocation3 + $0x33c8] ss:$16 sps:$4 sm:$0xff]   ;;  %v17835_v13 = vld [vmem:[#allocation3 + $0x33e4] ss:$16 sps:$4 sm:$0xff]  }
 0x677   :  { %11918 = vmatprep.subr.bf16.mxu0 %v17745_v16  ;;  %13066 = vmatprep.subr.bf16.mxu1 %v17748_v7  ;;  %v17838_v16 = vld [vmem:[#allocation3 + $0x33ec] ss:$16 sps:$4 sm:$0xff]   ;;  %v17833_v7 = vld [vmem:[#allocation3 + $0x33e0] ss:$16 sps:$4 sm:$0xff]  }
 0x679   :  { %11910 = vmatmul.mubr.bf16.vlgmr.msra.gmra.mrb[0].mxu0 %v13293_v17  ;;  %13058 = vmatmul.mubr.bf16.vlgmr.msra.gmra.mrb[0].mxu1 %v13293_v17  ;;  %v17836_v17 = vld [vmem:[#allocation3 + $0x33e8] ss:$16 sps:$4 sm:$0xff]  }
 0x67a   :  { %11919 = vmatpush1.bf16.msra.mxu0 %v17743_v12  ;;  %13067 = vmatpush1.bf16.msra.mxu1 %v17746_v10  ;;  %v17843_v12 = vld [vmem:[#allocation3 + $0x3404] ss:$16 sps:$4 sm:$0xff]   ;;  %v17846_v10 = vld [vmem:[#allocation3 + $0x340c] ss:$16 sps:$4 sm:$0xff]  }
 0x67b   :  { %11920 = vmatprep.subr.bf16.mxu0 %v17751_v21  ;;  %13068 = vmatprep.subr.bf16.mxu1 %v17754_v15  ;;  %v13295_v21 = vcombine.low %v18372_v19, %v18372_v19  ;;  %v18381_v15 = vld [vmem:[%s18399_s0 + $0xd0] sm:$0xff] }
 0x67c   :  { %11950 = vmatprep.mubr.bf16.mxu0 %v13296_v23  ;;  %13098 = vmatprep.mubr.bf16.mxu1 %v13296_v23  ;;  %v17841_v23 = vld [vmem:[#allocation3 + $0x3400] ss:$16 sps:$4 sm:$0xff]  }
 0x67d   :  { %v17847_v19 = vld [vmem:[#allocation3 + $0x3420] ss:$16 sps:$4 sm:$0xff]  }
 0x67e   :  { %11921 = vmatpush1.bf16.msra.mxu0 %v17749_v14  ;;  %13069 = vmatpush1.bf16.msra.mxu1 %v17752_v24  ;;  %v17844_v14 = vld [vmem:[#allocation3 + $0x3408] ss:$16 sps:$4 sm:$0xff]   ;;  %v17849_v24 = vld [vmem:[#allocation3 + $0x3424] ss:$16 sps:$4 sm:$0xff]  }
 0x67f   :  { %11922 = vmatprep.subr.bf16.mxu0 %v17757_v25  ;;  %13070 = vmatprep.subr.bf16.mxu1 %v17760_v18  ;;  %v17852_v25 = vld [vmem:[#allocation3 + $0x342c] ss:$16 sps:$4 sm:$0xff]   ;;  %v13298_v18 = vcombine.high %v18381_v15, %v18381_v15 }
 0x682   :  { %11923 = vmatpush1.bf16.msra.mxu0 %v17755_v27  ;;  %13071 = vmatpush1.bf16.msra.mxu1 %v17758_v28  ;;  %v17850_v27 = vld [vmem:[#allocation3 + $0x3428] ss:$16 sps:$4 sm:$0xff]   ;;  %v17855_v28 = vld [vmem:[#allocation3 + $0x3444] ss:$16 sps:$4 sm:$0xff]  }
 0x683   :  { %11924 = vmatprep.subr.bf16.mxu0 %v17763_v20  ;;  %13072 = vmatprep.subr.bf16.mxu1 %v17766_v30  ;;  %v17858_v20 = vld [vmem:[#allocation3 + $0x344c] ss:$16 sps:$4 sm:$0xff]   ;;  %v17853_v30 = vld [vmem:[#allocation3 + $0x3440] ss:$16 sps:$4 sm:$0xff]  }
 0x686   :  { %11925 = vmatpush1.bf16.msra.mxu0 %v17761_v31  ;;  %13073 = vmatpush1.bf16.msra.mxu1 %v17764_v22  ;;  %v17856_v31 = vld [vmem:[#allocation3 + $0x3448] ss:$16 sps:$4 sm:$0xff]   ;;  %v17861_v22 = vld [vmem:[#allocation3 + $0x3464] ss:$16 sps:$4 sm:$0xff]  }
 0x687   :  { %11926 = vmatprep.subr.bf16.mxu0 %v17769_v33  ;;  %13074 = vmatprep.subr.bf16.mxu1 %v17772_v34  ;;  %v17864_v33 = vld [vmem:[#allocation3 + $0x346c] ss:$16 sps:$4 sm:$0xff]   ;;  %v17859_v34 = vld [vmem:[#allocation3 + $0x3460] ss:$16 sps:$4 sm:$0xff]  }
 0x68a   :  { %11927 = vmatpush1.bf16.msra.mxu0 %v17767_v26  ;;  %13075 = vmatpush1.bf16.msra.mxu1 %v17770_v36  ;;  %v17862_v26 = vld [vmem:[#allocation3 + $0x3468] ss:$16 sps:$4 sm:$0xff]   ;;  %v17867_v36 = vld [vmem:[#allocation3 + $0x3484] ss:$16 sps:$4 sm:$0xff]  }
 0x68b   :  { %11928 = vmatprep.subr.bf16.mxu0 %v17775_v37  ;;  %13076 = vmatprep.subr.bf16.mxu1 %v17778_v29  ;;  %v17870_v37 = vld [vmem:[#allocation3 + $0x348c] ss:$16 sps:$4 sm:$0xff]   ;;  %v17865_v29 = vld [vmem:[#allocation3 + $0x3480] ss:$16 sps:$4 sm:$0xff]  }
 0x68e   :  { %11929 = vmatpush1.bf16.msra.mxu0 %v17773_v39  ;;  %13077 = vmatpush1.bf16.msra.mxu1 %v17776_v40  ;;  %v17868_v39 = vld [vmem:[#allocation3 + $0x3488] ss:$16 sps:$4 sm:$0xff]   ;;  %v17873_v40 = vld [vmem:[#allocation3 + $0x34a4] ss:$16 sps:$4 sm:$0xff]  }
 0x68f   :  { %11930 = vmatprep.subr.bf16.mxu0 %v17781_v32  ;;  %13078 = vmatprep.subr.bf16.mxu1 %v17784_v42  ;;  %v17876_v32 = vld [vmem:[#allocation3 + $0x34ac] ss:$16 sps:$4 sm:$0xff]   ;;  %v17871_v42 = vld [vmem:[#allocation3 + $0x34a0] ss:$16 sps:$4 sm:$0xff]  }
 0x692   :  { %11931 = vmatpush1.bf16.msra.mxu0 %v17779_v43  ;;  %13079 = vmatpush1.bf16.msra.mxu1 %v17782_v35  ;;  %v17874_v43 = vld [vmem:[#allocation3 + $0x34a8] ss:$16 sps:$4 sm:$0xff]   ;;  %v17879_v35 = vld [vmem:[#allocation3 + $0x34c4] ss:$16 sps:$4 sm:$0xff]  }
 0x693   :  { %11932 = vmatprep.subr.bf16.mxu0 %v17787_v45  ;;  %13080 = vmatprep.subr.bf16.mxu1 %v17790_v46  ;;  %v17882_v45 = vld [vmem:[#allocation3 + $0x34cc] ss:$16 sps:$4 sm:$0xff]   ;;  %v17877_v46 = vld [vmem:[#allocation3 + $0x34c0] ss:$16 sps:$4 sm:$0xff]  }
 0x696   :  { %11933 = vmatpush1.bf16.msra.mxu0 %v17785_v38  ;;  %13081 = vmatpush1.bf16.msra.mxu1 %v17788_v48  ;;  %v17880_v38 = vld [vmem:[#allocation3 + $0x34c8] ss:$16 sps:$4 sm:$0xff]   ;;  %v17885_v48 = vld [vmem:[#allocation3 + $0x34e4] ss:$16 sps:$4 sm:$0xff]  }
 0x697   :  { %11934 = vmatprep.subr.bf16.mxu0 %v17793_v49  ;;  %13082 = vmatprep.subr.bf16.mxu1 %v17796_v50  ;;  %v17888_v49 = vld [vmem:[#allocation3 + $0x34ec] ss:$16 sps:$4 sm:$0xff]   ;;  %v17883_v50 = vld [vmem:[#allocation3 + $0x34e0] ss:$16 sps:$4 sm:$0xff]  }
 0x69a   :  { %11935 = vmatpush1.bf16.msra.mxu0 %v17791_v51  ;;  %13083 = vmatpush1.bf16.msra.mxu1 %v17794_v52  ;;  %v17886_v51 = vld [vmem:[#allocation3 + $0x34e8] ss:$16 sps:$4 sm:$0xff]   ;;  %v17891_v52 = vld [vmem:[#allocation3 + $0x3504] ss:$16 sps:$4 sm:$0xff]  }
 0x69b   :  { %11936 = vmatprep.subr.bf16.mxu0 %v17799_v53  ;;  %13084 = vmatprep.subr.bf16.mxu1 %v17802_v54  ;;  %v17894_v53 = vld [vmem:[#allocation3 + $0x350c] ss:$16 sps:$4 sm:$0xff]   ;;  %v17889_v54 = vld [vmem:[#allocation3 + $0x3500] ss:$16 sps:$4 sm:$0xff]  }
 0x69e   :  { %11937 = vmatpush1.bf16.msra.mxu0 %v17797_v47  ;;  %13085 = vmatpush1.bf16.msra.mxu1 %v17800_v55  ;;  %v17892_v47 = vld [vmem:[#allocation3 + $0x3508] ss:$16 sps:$4 sm:$0xff]   ;;  %v17897_v55 = vld [vmem:[#allocation3 + $0x3524] ss:$16 sps:$4 sm:$0xff]  }
 0x69f   :  { %11938 = vmatprep.subr.bf16.mxu0 %v17805_v57  ;;  %13086 = vmatprep.subr.bf16.mxu1 %v17808_v41  ;;  %v17900_v57 = vld [vmem:[#allocation3 + $0x352c] ss:$16 sps:$4 sm:$0xff]   ;;  %v17895_v41 = vld [vmem:[#allocation3 + $0x3520] ss:$16 sps:$4 sm:$0xff]  }
 0x6a2   :  { %11939 = vmatpush1.bf16.msra.mxu0 %v17803_v58  ;;  %13087 = vmatpush1.bf16.msra.mxu1 %v17806_v60  ;;  %v17898_v58 = vld [vmem:[#allocation3 + $0x3528] ss:$16 sps:$4 sm:$0xff]   ;;  %v17903_v60 = vld [vmem:[#allocation3 + $0x3544] ss:$16 sps:$4 sm:$0xff]  }
 0x6a3   :  { %11940 = vmatprep.subr.bf16.mxu0 %v17811_v44  ;;  %13088 = vmatprep.subr.bf16.mxu1 %v17814_v61  ;;  %v17906_v44 = vld [vmem:[#allocation3 + $0x354c] ss:$16 sps:$4 sm:$0xff]   ;;  %v17901_v61 = vld [vmem:[#allocation3 + $0x3540] ss:$16 sps:$4 sm:$0xff]  }
 0x6a6   :  { %11941 = vmatpush1.bf16.msra.mxu0 %v17809_v63  ;;  %13089 = vmatpush1.bf16.msra.mxu1 %v17812_v56  ;;  %v17904_v63 = vld [vmem:[#allocation3 + $0x3548] ss:$16 sps:$4 sm:$0xff]   ;;  %v17909_v56 = vld [vmem:[#allocation3 + $0x3564] ss:$16 sps:$4 sm:$0xff]  }
 0x6a7   :  { %11942 = vmatprep.subr.bf16.mxu0 %v17817_v0  ;;  %13090 = vmatprep.subr.bf16.mxu1 %v17820_v2  ;;  %v17912_v0 = vld [vmem:[#allocation3 + $0x356c] ss:$16 sps:$4 sm:$0xff]   ;;  %v17907_v2 = vld [vmem:[#allocation3 + $0x3560] ss:$16 sps:$4 sm:$0xff]  }
 0x6aa   :  { %11943 = vmatpush1.bf16.msra.mxu0 %v17815_v59  ;;  %13091 = vmatpush1.bf16.msra.mxu1 %v17818_v3  ;;  %v17910_v59 = vld [vmem:[#allocation3 + $0x3568] ss:$16 sps:$4 sm:$0xff]   ;;  %v17915_v3 = vld [vmem:[#allocation3 + $0x3584] ss:$16 sps:$4 sm:$0xff]  }
 0x6ab   :  { %11944 = vmatprep.subr.bf16.mxu0 %v17823_v5  ;;  %13092 = vmatprep.subr.bf16.mxu1 %v17826_v62  ;;  %v17918_v5 = vld [vmem:[#allocation3 + $0x358c] ss:$16 sps:$4 sm:$0xff]   ;;  %v17913_v62 = vld [vmem:[#allocation3 + $0x3580] ss:$16 sps:$4 sm:$0xff]  }
 0x6ae   :  { %11945 = vmatpush1.bf16.msra.mxu0 %v17821_v6  ;;  %13093 = vmatpush1.bf16.msra.mxu1 %v17824_v8  ;;  %v17916_v6 = vld [vmem:[#allocation3 + $0x3588] ss:$16 sps:$4 sm:$0xff]   ;;  %v17921_v8 = vld [vmem:[#allocation3 + $0x35a4] ss:$16 sps:$4 sm:$0xff]  }
 0x6af   :  { %11946 = vmatprep.subr.bf16.mxu0 %v17829_v1  ;;  %13094 = vmatprep.subr.bf16.mxu1 %v17832_v9  ;;  %v17924_v1 = vld [vmem:[#allocation3 + $0x35ac] ss:$16 sps:$4 sm:$0xff]   ;;  %v17919_v9 = vld [vmem:[#allocation3 + $0x35a0] ss:$16 sps:$4 sm:$0xff]  }
 0x6b2   :  { %11947 = vmatpush1.bf16.msra.mxu0 %v17827_v11  ;;  %13095 = vmatpush1.bf16.msra.mxu1 %v17830_v4  ;;  %v17922_v11 = vld [vmem:[#allocation3 + $0x35a8] ss:$16 sps:$4 sm:$0xff]   ;;  %v17927_v4 = vld [vmem:[#allocation3 + $0x35c4] ss:$16 sps:$4 sm:$0xff]  }
 0x6b3   :  { %11948 = vmatprep.subr.bf16.mxu0 %v17835_v13  ;;  %13096 = vmatprep.subr.bf16.mxu1 %v17838_v16  ;;  %v17930_v13 = vld [vmem:[#allocation3 + $0x35cc] ss:$16 sps:$4 sm:$0xff]   ;;  %v17925_v16 = vld [vmem:[#allocation3 + $0x35c0] ss:$16 sps:$4 sm:$0xff]  }
 0x6b6   :  { %11949 = vmatpush1.bf16.msra.mxu0 %v17833_v7  ;;  %13097 = vmatpush1.bf16.msra.mxu1 %v17836_v17  ;;  %v17928_v7 = vld [vmem:[#allocation3 + $0x35c8] ss:$16 sps:$4 sm:$0xff]   ;;  %v17933_v17 = vld [vmem:[#allocation3 + $0x35e4] ss:$16 sps:$4 sm:$0xff]  }
 0x6b7   :  { %11959 = vmatprep.subr.bf16.mxu0 %v17843_v12  ;;  %13107 = vmatprep.subr.bf16.mxu1 %v17846_v10  ;;  %v17936_v12 = vld [vmem:[#allocation3 + $0x35ec] ss:$16 sps:$4 sm:$0xff]   ;;  %v17931_v10 = vld [vmem:[#allocation3 + $0x35e0] ss:$16 sps:$4 sm:$0xff]  }
 0x6b9   :  { %11951 = vmatmul.mubr.bf16.vlgmr.msra.gmra.mrb[0].mxu0 %v13295_v21  ;;  %13099 = vmatmul.mubr.bf16.vlgmr.msra.gmra.mrb[0].mxu1 %v13295_v21  ;;  %v17934_v21 = vld [vmem:[#allocation3 + $0x35e8] ss:$16 sps:$4 sm:$0xff]  }
 0x6ba   :  { %11960 = vmatpush1.bf16.msra.mxu0 %v17841_v23  ;;  %13108 = vmatpush1.bf16.msra.mxu1 %v17844_v14  ;;  %v17941_v23 = vld [vmem:[#allocation3 + $0x3604] ss:$16 sps:$4 sm:$0xff]   ;;  %v17944_v14 = vld [vmem:[#allocation3 + $0x360c] ss:$16 sps:$4 sm:$0xff]  }
 0x6bb   :  { %11961 = vmatprep.subr.bf16.mxu0 %v17849_v24  ;;  %13109 = vmatprep.subr.bf16.mxu1 %v17852_v25  ;;  %v13297_v24 = vcombine.low %v18381_v15, %v18381_v15  ;;  %v18390_v25 = vld [vmem:[%s18399_s0 + $0xd8] sm:$0xff]  ;;  %v17945_v15 = vld [vmem:[#allocation3 + $0x3620] ss:$16 sps:$4 sm:$0xff]  }
 0x6bc   :  { %11991 = vmatprep.mubr.bf16.mxu0 %v13298_v18  ;;  %13139 = vmatprep.mubr.bf16.mxu1 %v13298_v18  ;;  %v17939_v18 = vld [vmem:[#allocation3 + $0x3600] ss:$16 sps:$4 sm:$0xff]  }
 0x6be   :  { %11962 = vmatpush1.bf16.msra.mxu0 %v17847_v19  ;;  %13110 = vmatpush1.bf16.msra.mxu1 %v17850_v27  ;;  %v17942_v19 = vld [vmem:[#allocation3 + $0x3608] ss:$16 sps:$4 sm:$0xff]   ;;  %v17947_v27 = vld [vmem:[#allocation3 + $0x3624] ss:$16 sps:$4 sm:$0xff]  }
 0x6bf   :  { %11963 = vmatprep.subr.bf16.mxu0 %v17855_v28  ;;  %13111 = vmatprep.subr.bf16.mxu1 %v17858_v20  ;;  %v17950_v28 = vld [vmem:[#allocation3 + $0x362c] ss:$16 sps:$4 sm:$0xff]   ;;  %v13300_v20 = vcombine.high %v18390_v25, %v18390_v25 }
 0x6c2   :  { %11964 = vmatpush1.bf16.msra.mxu0 %v17853_v30  ;;  %13112 = vmatpush1.bf16.msra.mxu1 %v17856_v31  ;;  %v17948_v30 = vld [vmem:[#allocation3 + $0x3628] ss:$16 sps:$4 sm:$0xff]   ;;  %v17953_v31 = vld [vmem:[#allocation3 + $0x3644] ss:$16 sps:$4 sm:$0xff]  }
 0x6c3   :  { %11965 = vmatprep.subr.bf16.mxu0 %v17861_v22  ;;  %13113 = vmatprep.subr.bf16.mxu1 %v17864_v33  ;;  %v17956_v22 = vld [vmem:[#allocation3 + $0x364c] ss:$16 sps:$4 sm:$0xff]   ;;  %v17951_v33 = vld [vmem:[#allocation3 + $0x3640] ss:$16 sps:$4 sm:$0xff]  }
 0x6c6   :  { %11966 = vmatpush1.bf16.msra.mxu0 %v17859_v34  ;;  %13114 = vmatpush1.bf16.msra.mxu1 %v17862_v26  ;;  %v17954_v34 = vld [vmem:[#allocation3 + $0x3648] ss:$16 sps:$4 sm:$0xff]   ;;  %v17959_v26 = vld [vmem:[#allocation3 + $0x3664] ss:$16 sps:$4 sm:$0xff]  }
 0x6c7   :  { %11967 = vmatprep.subr.bf16.mxu0 %v17867_v36  ;;  %13115 = vmatprep.subr.bf16.mxu1 %v17870_v37  ;;  %v17962_v36 = vld [vmem:[#allocation3 + $0x366c] ss:$16 sps:$4 sm:$0xff]   ;;  %v17957_v37 = vld [vmem:[#allocation3 + $0x3660] ss:$16 sps:$4 sm:$0xff]  }
 0x6ca   :  { %11968 = vmatpush1.bf16.msra.mxu0 %v17865_v29  ;;  %13116 = vmatpush1.bf16.msra.mxu1 %v17868_v39  ;;  %v17960_v29 = vld [vmem:[#allocation3 + $0x3668] ss:$16 sps:$4 sm:$0xff]   ;;  %v17965_v39 = vld [vmem:[#allocation3 + $0x3684] ss:$16 sps:$4 sm:$0xff]  }
 0x6cb   :  { %11969 = vmatprep.subr.bf16.mxu0 %v17873_v40  ;;  %13117 = vmatprep.subr.bf16.mxu1 %v17876_v32  ;;  %v17968_v40 = vld [vmem:[#allocation3 + $0x368c] ss:$16 sps:$4 sm:$0xff]   ;;  %v17963_v32 = vld [vmem:[#allocation3 + $0x3680] ss:$16 sps:$4 sm:$0xff]  }
 0x6ce   :  { %11970 = vmatpush1.bf16.msra.mxu0 %v17871_v42  ;;  %13118 = vmatpush1.bf16.msra.mxu1 %v17874_v43  ;;  %v17966_v42 = vld [vmem:[#allocation3 + $0x3688] ss:$16 sps:$4 sm:$0xff]   ;;  %v17971_v43 = vld [vmem:[#allocation3 + $0x36a4] ss:$16 sps:$4 sm:$0xff]  }
 0x6cf   :  { %11971 = vmatprep.subr.bf16.mxu0 %v17879_v35  ;;  %13119 = vmatprep.subr.bf16.mxu1 %v17882_v45  ;;  %v17974_v35 = vld [vmem:[#allocation3 + $0x36ac] ss:$16 sps:$4 sm:$0xff]   ;;  %v17969_v45 = vld [vmem:[#allocation3 + $0x36a0] ss:$16 sps:$4 sm:$0xff]  }
 0x6d2   :  { %11972 = vmatpush1.bf16.msra.mxu0 %v17877_v46  ;;  %13120 = vmatpush1.bf16.msra.mxu1 %v17880_v38  ;;  %v17972_v46 = vld [vmem:[#allocation3 + $0x36a8] ss:$16 sps:$4 sm:$0xff]   ;;  %v17977_v38 = vld [vmem:[#allocation3 + $0x36c4] ss:$16 sps:$4 sm:$0xff]  }
 0x6d3   :  { %11973 = vmatprep.subr.bf16.mxu0 %v17885_v48  ;;  %13121 = vmatprep.subr.bf16.mxu1 %v17888_v49  ;;  %v17980_v48 = vld [vmem:[#allocation3 + $0x36cc] ss:$16 sps:$4 sm:$0xff]   ;;  %v17975_v49 = vld [vmem:[#allocation3 + $0x36c0] ss:$16 sps:$4 sm:$0xff]  }
 0x6d6   :  { %11974 = vmatpush1.bf16.msra.mxu0 %v17883_v50  ;;  %13122 = vmatpush1.bf16.msra.mxu1 %v17886_v51  ;;  %v17978_v50 = vld [vmem:[#allocation3 + $0x36c8] ss:$16 sps:$4 sm:$0xff]   ;;  %v17983_v51 = vld [vmem:[#allocation3 + $0x36e4] ss:$16 sps:$4 sm:$0xff]  }
 0x6d7   :  { %11975 = vmatprep.subr.bf16.mxu0 %v17891_v52  ;;  %13123 = vmatprep.subr.bf16.mxu1 %v17894_v53  ;;  %v17986_v52 = vld [vmem:[#allocation3 + $0x36ec] ss:$16 sps:$4 sm:$0xff]   ;;  %v17981_v53 = vld [vmem:[#allocation3 + $0x36e0] ss:$16 sps:$4 sm:$0xff]  }
 0x6da   :  { %11976 = vmatpush1.bf16.msra.mxu0 %v17889_v54  ;;  %13124 = vmatpush1.bf16.msra.mxu1 %v17892_v47  ;;  %v17984_v54 = vld [vmem:[#allocation3 + $0x36e8] ss:$16 sps:$4 sm:$0xff]   ;;  %v17989_v47 = vld [vmem:[#allocation3 + $0x3704] ss:$16 sps:$4 sm:$0xff]  }
 0x6db   :  { %11977 = vmatprep.subr.bf16.mxu0 %v17897_v55  ;;  %13125 = vmatprep.subr.bf16.mxu1 %v17900_v57  ;;  %v17992_v55 = vld [vmem:[#allocation3 + $0x370c] ss:$16 sps:$4 sm:$0xff]   ;;  %v17987_v57 = vld [vmem:[#allocation3 + $0x3700] ss:$16 sps:$4 sm:$0xff]  }
 0x6de   :  { %11978 = vmatpush1.bf16.msra.mxu0 %v17895_v41  ;;  %13126 = vmatpush1.bf16.msra.mxu1 %v17898_v58  ;;  %v17990_v41 = vld [vmem:[#allocation3 + $0x3708] ss:$16 sps:$4 sm:$0xff]   ;;  %v13299_v58 = vcombine.low %v18390_v25, %v18390_v25 }
 0x6df   :  { %11979 = vmatprep.subr.bf16.mxu0 %v17903_v60  ;;  %13127 = vmatprep.subr.bf16.mxu1 %v17906_v44  ;;  %v1854_v60 = vlaneseq }
 0x6e1   :  { %v1855_v44 = vshrl.u32 %v1854_v60, 7 }
 0x6e2   :  { %11980 = vmatpush1.bf16.msra.mxu0 %v17901_v61  ;;  %13128 = vmatpush1.bf16.msra.mxu1 %v17904_v63 }
 0x6e3   :  { %11981 = vmatprep.subr.bf16.mxu0 %v17909_v56  ;;  %13129 = vmatprep.subr.bf16.mxu1 %v17912_v0  ;;  %v1856_v61 = vsub.s32 0, %v1855_v44  ;;  %v1864_v63 = vsub.s32 2, %v1855_v44  ;;  %v1852_v56 = vld [vmem:[#allocation5] sm:$0xf]  ;;  %v1860_v0 = vsub.s32 1, %v1855_v44 }
 0x6e6   :  { %11982 = vmatpush1.bf16.msra.mxu0 %v17907_v2  ;;  %13130 = vmatpush1.bf16.msra.mxu1 %v17910_v59  ;;  %v1868_v2 = vsub.s32 3, %v1855_v44  ;;  %v1857_v59 = vrot.slane %v1852_v56, %v1856_v61 }
 0x6e7   :  { %11983 = vmatprep.subr.bf16.mxu0 %v17915_v3  ;;  %13131 = vmatprep.subr.bf16.mxu1 %v17918_v5  ;;  %v1865_v3 = vrot.slane %v1852_v56, %v1864_v63  ;;  %v13193_v5 = vld [vmem:[#allocation7] sm:$0xf] }
 0x6ea   :  { %11984 = vmatpush1.bf16.msra.mxu0 %v17913_v62  ;;  %13132 = vmatpush1.bf16.msra.mxu1 %v17916_v6  ;;  %v1861_v62 = vrot.slane %v1852_v56, %v1860_v0  ;;  %v1869_v6 = vrot.slane %v1852_v56, %v1868_v2 }
 0x6eb   :  { %11985 = vmatprep.subr.bf16.mxu0 %v17921_v8  ;;  %13133 = vmatprep.subr.bf16.mxu1 %v17924_v1 }
 0x6ee   :  { %11986 = vmatpush1.bf16.msra.mxu0 %v17919_v9  ;;  %13134 = vmatpush1.bf16.msra.mxu1 %v17922_v11  ;;  %v13198_v11 = vrot.slane %v13193_v5, %v1856_v61 }
 0x6ef   :  { %11987 = vmatprep.subr.bf16.mxu0 %v17927_v4  ;;  %13135 = vmatprep.subr.bf16.mxu1 %v17930_v13 }
 0x6f2   :  { %11988 = vmatpush1.bf16.msra.mxu0 %v17925_v16  ;;  %13136 = vmatpush1.bf16.msra.mxu1 %v17928_v7 }
 0x6f3   :  { %11989 = vmatprep.subr.bf16.mxu0 %v17933_v17  ;;  %13137 = vmatprep.subr.bf16.mxu1 %v17936_v12  ;;  %v13202_v17 = vrot.slane %v13193_v5, %v1860_v0 }
 0x6f6   :  { %11990 = vmatpush1.bf16.msra.mxu0 %v17931_v10  ;;  %13138 = vmatpush1.bf16.msra.mxu1 %v17934_v21 }
 0x6f7   :  { %12000 = vmatprep.subr.bf16.mxu0 %v17941_v23  ;;  %13148 = vmatprep.subr.bf16.mxu1 %v17944_v14 }
 0x6f9   :  { %11992 = vmatmul.mubr.bf16.vlgmr.msra.gmra.mrb[0].mxu0 %v13297_v24  ;;  %13140 = vmatmul.mubr.bf16.vlgmr.msra.gmra.mrb[0].mxu1 %v13297_v24 }
 0x6fa   :  { %12001 = vmatpush1.bf16.msra.mxu0 %v17939_v18  ;;  %13149 = vmatpush1.bf16.msra.mxu1 %v17942_v19  ;;  %v13206_v18 = vrot.slane %v13193_v5, %v1864_v63 }
 0x6fb   :  { %12002 = vmatprep.subr.bf16.mxu0 %v17947_v27  ;;  %13150 = vmatprep.subr.bf16.mxu1 %v17950_v28 }
 0x6fc   :  { %15065 = vmatprep.mubr.msk.bf16.mxu0 %vm10889_vm0, %v13300_v20  ;;  %15066 = vmatprep.mubr.msk.bf16.mxu1 %vm10889_vm0, %v13300_v20 }
 0x6fe   :  { %12003 = vmatpush1.bf16.msra.mxu0 %v17945_v15  ;;  %13151 = vmatpush1.bf16.msra.mxu1 %v17948_v30  ;;  %v13210_v15 = vrot.slane %v13193_v5, %v1868_v2 }
 0x6ff   :  { %12004 = vmatprep.subr.bf16.mxu0 %v17953_v31  ;;  %13152 = vmatprep.subr.bf16.mxu1 %v17956_v22 }
 0x702   :  { %12005 = vmatpush1.bf16.msra.mxu0 %v17951_v33  ;;  %13153 = vmatpush1.bf16.msra.mxu1 %v17954_v34 }
 0x703   :  { %12006 = vmatprep.subr.bf16.mxu0 %v17959_v26  ;;  %13154 = vmatprep.subr.bf16.mxu1 %v17962_v36  ;;  %v15067_v26 = vld [vmem:[#allocation2] ss:$0 sm:$0xff] }
 0x706   :  { %12007 = vmatpush1.bf16.msra.mxu0 %v17957_v37  ;;  %13155 = vmatpush1.bf16.msra.mxu1 %v17960_v29 }
 0x707   :  { %12008 = vmatprep.subr.bf16.mxu0 %v17965_v39  ;;  %13156 = vmatprep.subr.bf16.mxu1 %v17968_v40 }
 0x70a   :  { %12009 = vmatpush1.bf16.msra.mxu0 %v17963_v32  ;;  %13157 = vmatpush1.bf16.msra.mxu1 %v17966_v42 }
 0x70b   :  { %12010 = vmatprep.subr.bf16.mxu0 %v17971_v43  ;;  %13158 = vmatprep.subr.bf16.mxu1 %v17974_v35 }
 0x70e   :  { %12011 = vmatpush1.bf16.msra.mxu0 %v17969_v45  ;;  %13159 = vmatpush1.bf16.msra.mxu1 %v17972_v46 }
 0x70f   :  { %12012 = vmatprep.subr.bf16.mxu0 %v17977_v38  ;;  %13160 = vmatprep.subr.bf16.mxu1 %v17980_v48 }
 0x712   :  { %12013 = vmatpush1.bf16.msra.mxu0 %v17975_v49  ;;  %13161 = vmatpush1.bf16.msra.mxu1 %v17978_v50 }
 0x713   :  { %12014 = vmatprep.subr.bf16.mxu0 %v17983_v51  ;;  %13162 = vmatprep.subr.bf16.mxu1 %v17986_v52 }
 0x716   :  { %12015 = vmatpush1.bf16.msra.mxu0 %v17981_v53  ;;  %13163 = vmatpush1.bf16.msra.mxu1 %v17984_v54 }
 0x717   :  { %12016 = vmatprep.subr.bf16.mxu0 %v17989_v47  ;;  %13164 = vmatprep.subr.bf16.mxu1 %v17992_v55 }
 0x71a   :  { %12017 = vmatpush1.bf16.msra.mxu0 %v17987_v57  ;;  %13165 = vmatpush1.bf16.msra.mxu1 %v17990_v41 }
 0x71d   :  { %12033 = vmatmul.mubr.bf16.vlgmr.msra.gmra.mrb[0].mxu0 %v13299_v58  ;;  %13181 = vmatmul.mubr.bf16.vlgmr.msra.gmra.mrb[0].mxu1 %v13299_v58 }
 0x7f0   :  { %v12034_v8 = vpop.f32.mrb[0].mxu0  ;;  %v13182_v1 = vpop.f32.mrb[0].mxu1 }
 0x7f1   :  { %v15068_v9 = vadd.f32 %v12034_v8, %v1857_v59  ;;  %v15070_v4 = vadd.f32 %v13182_v1, %v1865_v3  ;;  %v12036_v13 = vpop.f32.mrb[1].mxu0  ;;  %v13184_v16 = vpop.f32.mrb[1].mxu1 }
 0x7f2   :  { %v15069_v7 = vadd.f32 %v12036_v13, %v1861_v62  ;;  %v15071_v12 = vadd.f32 %v13184_v16, %v1869_v6  ;;  %v12038_v10 = vpop.f32.mrb[2].mxu0  ;;  %v13186_v21 = vpop.f32.mrb[2].mxu1 }
 0x7f3   :  { %v13189_v23 = vmax.f32 %v15068_v9, 0.0  ;;  %v12039_v14 = vpop.f32.mrb[3].mxu0  ;;  %v13187_v24 = vpop.f32.mrb[3].mxu1  ;;  %v13191_v25 = vmax.f32 %v15070_v4, 0.0 }
 0x7f4   :  { %v13190_v19 = vmax.f32 %v15069_v7, 0.0  ;;  %v13192_v20 = vmax.f32 %v15071_v12, 0.0 }
 0x7f5   :  { %v13215_v27 = vmul.f32 %v13198_v11, %v13189_v23  ;;  %v13217_v30 = vmul.f32 %v13206_v18, %v13191_v25 }
 0x7f6   :  { %v13216_v28 = vmul.f32 %v13202_v17, %v13190_v19  ;;  %v13218_v22 = vmul.f32 %v13210_v15, %v13192_v20 }
 0x7f8   :  { %v13219_v31 = vadd.f32 %v13216_v28, %v13215_v27 }
 0x7fa   :  { %v13220_v33 = vadd.f32 %v13219_v31, %v13217_v30 }
 0x7fc   :  { %v13221_v34 = vadd.f32 %v13220_v33, %v13218_v22 }
 0x7fe   :  { %13222 = vadd.xlane.f32.xlu0 %v13221_v34 }
 0x88b   :  { %v13223_v36 = vpop.xlane.xlu0 %13222 }
 0x88c   :  { %v13231_v37 = vadd.f32 %v15067_v26, %v13223_v36 }
 0x88e   :  { %v13232_v29 = vsub.f32 0.0, %v13231_v37 }
 0x890   :  { %v13233_v39 = vmul.f32 1.442695, %v13232_v29 }
 0x892   :  { %17995 = vpow2.f32 %v13233_v39 }
 0x89c   :  { %v17996_v40 = vpop.eup %17995 }
 0x89d   :  { %v13235_v32 = vadd.f32 1.0, %v17996_v40 }
 0x89f   :  { %17997 = vrcp.f32 %v13235_v32 }
 0x8a9   :  { %v17998_v42 = vpop.eup %17997 }
 0x8aa   :  { %13238 = vst.msk [vmem:[%s18404_s5] sm:$0xff] %vm13237_vm1, %v17998_v42 }
 0x8ab   :  { %13243 = vsyncpa [#allocation4], 1 }
 0x8ac   :  { %13244 = vsyncpa [#allocation6], 1 }

</bundles_post_ra>
